<compile_context>
chip_gen: v7x
topology: tpu7x:2x2x1
jax: 0.10.0
libtpu: 0.0.40
codegen_flags: <defaults>
</compile_context>

<pallas_src>
import functools
import math

import jax
import jax.numpy as jnp
from jax.experimental import pallas as pl
from jax.experimental.pallas import tpu as pltpu


# ------------------------- hyper-parameters (the `args` object) ----------------------
class Args:
    user = 24          # small row counts (multiples of 8 for clean sublane tiling)
    item = 16
    latdim = 128       # lane-dense feature dims (full 128-lane vregs)
    hyperNum = 128
    gnn_layer = 2
    leaky = 0.5
    temp = 0.5
    droprate = 0.0


args = Args()


# --------------------------------- small helpers --------------------------------------
def _full_spec(shape):
    # one grid step, one block == the full array (so no (8,128) divisibility needed)
    return pl.BlockSpec(shape, lambda i: (0,) * len(shape))


def _lrelu(x, leaky):
    return jnp.maximum(leaky * x, x)


def _dotT(a, b):
    """a.T @ b without materializing the transpose (contract axis 0 of both)."""
    return jax.lax.dot_general(a, b, (((0,), (0,)), ((), ())),
                               preferred_element_type=jnp.float32)


# ------------------------------- fused GNN kernel --------------------------------------
def _gnn_kernel(adj_ref, ue_ref, ie_ref, uh_ref, ih_ref, ufc_ref, ifc_ref,
                usum_ref, isum_ref, gu_ref, gi_ref, hu_ref, hi_ref,
                *, leaky, n_layers):
    """All gnn_layer iterations of HCCF.forward, resident in VMEM.

    adj: [user, item]; ue/ie: [user|item, D]; uh/ih: [D, H];
    ufc/ifc: [3*L, H, H] stacked per-layer FC weights.
    Outputs: summed ulat/ilat and per-layer gnn/hyper latents (stacked over layers).
    """
    adj = adj_ref[...]
    ue = ue_ref[...]
    ie = ie_ref[...]
    uuHyper = jnp.dot(ue, uh_ref[...], preferred_element_type=jnp.float32)  # [user, H]
    iiHyper = jnp.dot(ie, ih_ref[...], preferred_element_type=jnp.float32)  # [item, H]

    def hyper_prop(lats, adj_h, fc_ref, base):
        # transpose(FC(x.T)) == LeakyRelu(W.T @ x) -> transposed contraction in-kernel.
        lat1 = _lrelu(_dotT(adj_h, lats), leaky)                       # [H, D]
        lat2 = _lrelu(_dotT(fc_ref[base + 0], lat1), leaky) + lat1
        lat3 = _lrelu(_dotT(fc_ref[base + 1], lat2), leaky) + lat2
        lat4 = _lrelu(_dotT(fc_ref[base + 2], lat3), leaky) + lat3
        return _lrelu(jnp.dot(adj_h, lat4, preferred_element_type=jnp.float32), leaky)

    u_prev, i_prev = ue, ie
    usum, isum = ue, ie
    for l in range(n_layers):                                          # static unroll
        ulat = _lrelu(jnp.dot(adj, i_prev, preferred_element_type=jnp.float32), leaky)
        ilat = _lrelu(_dotT(adj, u_prev), leaky)                       # adj.T @ u_prev
        hyperU = hyper_prop(u_prev, uuHyper, ufc_ref, 3 * l)
        hyperI = hyper_prop(i_prev, iiHyper, ifc_ref, 3 * l)

        gu_ref[l] = ulat
        gi_ref[l] = ilat
        hu_ref[l] = hyperU
        hi_ref[l] = hyperI

        u_new = ulat + hyperU + u_prev
        i_new = ilat + hyperI + i_prev
        usum = usum + u_new
        isum = isum + i_new
        u_prev, i_prev = u_new, i_new

    usum_ref[...] = usum
    isum_ref[...] = isum


def gnn_pallas(adj, ue, ie, uh, ih, ufc, ifc, n_layers):
    user, item = adj.shape
    D = ue.shape[1]
    out_shape = (
        jax.ShapeDtypeStruct((user, D), jnp.float32),            # ulat (summed)
        jax.ShapeDtypeStruct((item, D), jnp.float32),            # ilat (summed)
        jax.ShapeDtypeStruct((n_layers, user, D), jnp.float32),  # gnnULats
        jax.ShapeDtypeStruct((n_layers, item, D), jnp.float32),  # gnnILats
        jax.ShapeDtypeStruct((n_layers, user, D), jnp.float32),  # hyperULats
        jax.ShapeDtypeStruct((n_layers, item, D), jnp.float32),  # hyperILats
    )
    ins = (adj, ue, ie, uh, ih, ufc, ifc)
    return pl.pallas_call(
        functools.partial(_gnn_kernel, leaky=args.leaky, n_layers=n_layers),
        grid=(1,),
        in_specs=[_full_spec(x.shape) for x in ins],
        out_specs=tuple(_full_spec(s.shape) for s in out_shape),
        out_shape=out_shape,
        compiler_params=pltpu.CompilerParams(dimension_semantics=("arbitrary",)),
    )(*ins)


# ------------------------- fused preds + SSL + regularizer kernel ----------------------
def _tail_kernel(pu_ref, pi_ref, hu_ref, gu_ref, hi_ref, gi_ref, wt_ref,
                 ue_ref, ie_ref, uh_ref, ih_ref,
                 preds_ref, ssl_ref, reg_ref, *, temp, n_layers):
    """preds row-dot + all per-layer SSL losses + L2 regularizer in one kernel."""
    preds_ref[...] = jnp.sum(pu_ref[...] * pi_ref[...], axis=1, keepdims=True)

    def l2norm(x):
        # torch.nn.functional.normalize(p=2, dim=1, eps=1e-12)
        nrm = jnp.sqrt(jnp.sum(x * x, axis=1, keepdims=True))
        return x / jnp.maximum(nrm, 1e-12)

    def calc_ssl(hyper, gnn):
        pos = jnp.exp(jnp.sum(hyper * gnn, axis=1, keepdims=True) / temp)   # (n, 1)
        sim = jax.lax.dot_general(gnn, hyper, (((1,), (1,)), ((), ())),
                                  preferred_element_type=jnp.float32)       # g @ h.T
        neg = jnp.sum(jnp.exp(sim / temp), axis=1, keepdims=True)           # (n, 1)
        per = -jnp.log(pos / (neg + 1e-8) + 1e-8)
        return jnp.sum(per, axis=(0, 1), keepdims=True)

    ssl = jnp.zeros((1, 1), jnp.float32)
    for l in range(n_layers):                                          # static unroll
        W = wt_ref[l]
        hU = jnp.dot(l2norm(hu_ref[l]), W, preferred_element_type=jnp.float32)
        gU = l2norm(gu_ref[l])
        hI = jnp.dot(l2norm(hi_ref[l]), W, preferred_element_type=jnp.float32)
        gI = l2norm(gi_ref[l])
        ssl = ssl + calc_ssl(hU, gU) + calc_ssl(hI, gI)
    ssl_ref[...] = ssl

    def sumsq(x):
        return jnp.sum(x * x, axis=(0, 1), keepdims=True)

    reg_ref[...] = (sumsq(ue_ref[...]) + sumsq(ie_ref[...])
                    + sumsq(uh_ref[...]) + sumsq(ih_ref[...]))


def tail_pallas(pckU, pckI, hu_g, gu_g, hi_g, gi_g, wt, ue, ie, uh, ih, n_layers):
    batch = pckU.shape[0]
    out_shape = (
        jax.ShapeDtypeStruct((batch, 1), jnp.float32),   # preds
        jax.ShapeDtypeStruct((1, 1), jnp.float32),       # sslloss
        jax.ShapeDtypeStruct((1, 1), jnp.float32),       # reg
    )
    ins = (pckU, pckI, hu_g, gu_g, hi_g, gi_g, wt, ue, ie, uh, ih)
    return pl.pallas_call(
        functools.partial(_tail_kernel, temp=args.temp, n_layers=n_layers),
        grid=(1,),
        in_specs=[_full_spec(x.shape) for x in ins],
        out_specs=tuple(_full_spec(s.shape) for s in out_shape),
        out_shape=out_shape,
        compiler_params=pltpu.CompilerParams(dimension_semantics=("arbitrary",)),
    )(*ins)


# ------------------------------------ forward ------------------------------------------
def hccf_forward(params, adj, uids, iids, uniq_uids, uniq_iids):
    L = args.gnn_layer
    # Stack per-layer weights once (cheap XLA concat under jit).
    ufc = jnp.stack([params["layers"][l][k]
                     for l in range(L) for k in ("u_fc1", "u_fc2", "u_fc3")])
    ifc = jnp.stack([params["layers"][l][k]
                     for l in range(L) for k in ("i_fc1", "i_fc2", "i_fc3")])
    wt = jnp.stack([params["layers"][l]["w_trans"] for l in range(L)])

    ulat, ilat, gU, gI, hU, hI = gnn_pallas(
        adj, params["uEmbed0"], params["iEmbed0"],
        params["uhyper"], params["ihyper"], ufc, ifc, L)

    # Gathers stay in XLA (fused under jit); everything else is inside the two kernels.
    pckU = jnp.take(ulat, uids, axis=0)
    pckI = jnp.take(ilat, iids, axis=0)
    hu_g = jnp.take(hU, uniq_uids, axis=1)
    gu_g = jnp.take(gU, uniq_uids, axis=1)
    hi_g = jnp.take(hI, uniq_iids, axis=1)
    gi_g = jnp.take(gI, uniq_iids, axis=1)

    preds, ssl, reg = tail_pallas(pckU, pckI, hu_g, gu_g, hi_g, gi_g, wt,
                                  params["uEmbed0"], params["iEmbed0"],
                                  params["uhyper"], params["ihyper"], L)
    return preds[:, 0], ssl[0, 0], reg[0, 0]


# ------------------------------- pure-JAX reference ------------------------------------
def hccf_forward_ref(params, adj, uids, iids, uniq_uids, uniq_iids):
    leaky, temp = args.leaky, args.temp

    def lrelu(x):
        return jnp.maximum(leaky * x, x)

    def l2norm(x):
        nrm = jnp.sqrt(jnp.sum(x * x, axis=1, keepdims=True))
        return x / jnp.maximum(nrm, 1e-12)

    def calc_ssl(h, g):
        pos = jnp.exp(jnp.sum(h * g, axis=1) / temp)
        neg = jnp.sum(jnp.exp(g @ h.T / temp), axis=1)
        return jnp.sum(-jnp.log(pos / (neg + 1e-8) + 1e-8))

    def hyper(lats, ah, w1, w2, w3):
        lat1 = lrelu(ah.T @ lats)
        lat2 = lrelu(w1.T @ lat1) + lat1
        lat3 = lrelu(w2.T @ lat2) + lat2
        lat4 = lrelu(w3.T @ lat3) + lat3
        return lrelu(ah @ lat4)

    ue, ie = params["uEmbed0"], params["iEmbed0"]
    uh, ih = params["uhyper"], params["ihyper"]
    uuHyper, iiHyper = ue @ uh, ie @ ih
    ulats, ilats = [ue], [ie]
    gU, gI, hU, hI = [], [], [], []
    for l in range(args.gnn_layer):
        lyr = params["layers"][l]
        ulat = lrelu(adj @ ilats[-1])
        ilat = lrelu(adj.T @ ulats[-1])
        hu = hyper(ulats[-1], uuHyper, lyr["u_fc1"], lyr["u_fc2"], lyr["u_fc3"])
        hi_ = hyper(ilats[-1], iiHyper, lyr["i_fc1"], lyr["i_fc2"], lyr["i_fc3"])
        gU.append(ulat); gI.append(ilat); hU.append(hu); hI.append(hi_)
        ulats.append(ulat + hu + ulats[-1])
        ilats.append(ilat + hi_ + ilats[-1])
    ulat, ilat = sum(ulats), sum(ilats)
    preds = jnp.sum(ulat[uids] * ilat[iids], axis=-1)
    ssl = jnp.float32(0.0)
    for l in range(args.gnn_layer):
        W = params["layers"][l]["w_trans"]
        ssl = ssl + calc_ssl(l2norm(hU[l][uniq_uids]) @ W, l2norm(gU[l][uniq_uids]))
        ssl = ssl + calc_ssl(l2norm(hI[l][uniq_iids]) @ W, l2norm(gI[l][uniq_iids]))
    reg = sum(jnp.sum(x * x) for x in (ue, ie, uh, ih))
    return preds, ssl, reg


# ------------------------------- deterministic init -----------------------------------
def xavier_normal(key, shape):
    fan_in, fan_out = shape
    std = math.sqrt(2.0 / (fan_in + fan_out))
    return (std * jax.random.normal(key, shape, dtype=jnp.float32)).astype(jnp.float32)


def init_params(key):
    keys = jax.random.split(key, 4 + 7 * args.gnn_layer)
    params = {
        "uEmbed0": xavier_normal(keys[0], (args.user, args.latdim)),
        "iEmbed0": xavier_normal(keys[1], (args.item, args.latdim)),
        "uhyper": xavier_normal(keys[2], (args.latdim, args.hyperNum)),
        "ihyper": xavier_normal(keys[3], (args.latdim, args.hyperNum)),
        "layers": [],
    }
    k = 4
    for _ in range(args.gnn_layer):
        params["layers"].append({
            "u_fc1": xavier_normal(keys[k + 0], (args.hyperNum, args.hyperNum)),
            "u_fc2": xavier_normal(keys[k + 1], (args.hyperNum, args.hyperNum)),
            "u_fc3": xavier_normal(keys[k + 2], (args.hyperNum, args.hyperNum)),
            "i_fc1": xavier_normal(keys[k + 3], (args.hyperNum, args.hyperNum)),
            "i_fc2": xavier_normal(keys[k + 4], (args.hyperNum, args.hyperNum)),
            "i_fc3": xavier_normal(keys[k + 5], (args.hyperNum, args.hyperNum)),
            "w_trans": xavier_normal(keys[k + 6], (args.latdim, args.latdim)),
        })
        k += 7
    return params


# --------------------------------------- main ------------------------------------------
if __name__ == "__main__":
    root = jax.random.PRNGKey(0)
    k_par, k_adj, k_u, k_i = jax.random.split(root, 4)

    params = init_params(k_par)

    # Dense stand-in for the (normalized) sparse user-item adjacency.
    mask = (jax.random.uniform(k_adj, (args.user, args.item)) < 0.3).astype(jnp.float32)
    adj = mask / jnp.float32(args.item)        # [user, item]

    batch = 16
    uids = jax.random.randint(k_u, (batch,), 0, args.user, dtype=jnp.int32)
    iids = jax.random.randint(k_i, (batch,), 0, args.item, dtype=jnp.int32)
    # unique ids computed on host (outside jit) so shapes are static at trace time
    uniq_uids = jnp.unique(uids)
    uniq_iids = jnp.unique(iids)

    forward = jax.jit(hccf_forward)
    preds, sslloss, reg = forward(params, adj, uids, iids, uniq_uids, uniq_iids)
    jax.block_until_ready((preds, sslloss, reg))

    # correctness vs. a pure-JAX reference of the PyTorch module
    preds_r, ssl_r, reg_r = hccf_forward_ref(params, adj, uids, iids,
                                             uniq_uids, uniq_iids)
    assert preds.shape == (batch,)
    assert sslloss.shape == () and reg.shape == ()
    assert bool(jnp.all(jnp.isfinite(preds)))
    assert bool(jnp.isfinite(sslloss)) and bool(jnp.isfinite(reg))
    assert bool(jnp.allclose(preds, preds_r, rtol=5e-2, atol=5e-2))
    assert bool(jnp.allclose(sslloss, ssl_r, rtol=5e-2, atol=5e-2))
    assert bool(jnp.allclose(reg, reg_r, rtol=5e-2, atol=5e-2))

    print("KERNEL_OK")
</pallas_src>

<mosaic_0001>
module attributes {stable_mosaic.version = 11 : i64} {
  func.func @_gnn_kernel(%arg0: i32, %arg1: memref<24x16xf32, #tpu.memory_space<vmem>>, %arg2: memref<24x128xf32, #tpu.memory_space<vmem>>, %arg3: memref<16x128xf32, #tpu.memory_space<vmem>>, %arg4: memref<128x128xf32, #tpu.memory_space<vmem>>, %arg5: memref<128x128xf32, #tpu.memory_space<vmem>>, %arg6: memref<6x128x128xf32, #tpu.memory_space<vmem>>, %arg7: memref<6x128x128xf32, #tpu.memory_space<vmem>>, %arg8: memref<24x128xf32, #tpu.memory_space<vmem>>, %arg9: memref<16x128xf32, #tpu.memory_space<vmem>>, %arg10: memref<2x24x128xf32, #tpu.memory_space<vmem>>, %arg11: memref<2x16x128xf32, #tpu.memory_space<vmem>>, %arg12: memref<2x24x128xf32, #tpu.memory_space<vmem>>, %arg13: memref<2x16x128xf32, #tpu.memory_space<vmem>>) attributes {dimension_semantics = [#tpu.dimension_semantics<arbitrary>], iteration_bounds = array<i64: 1>, scalar_prefetch = 0 : i64, scratch_operands = 0 : i64, tpu.core_type = #tpu.core_type<tc>, window_params = [{pipeline_mode = #tpu.pipeline_mode<synchronous>, transform_indices = @transform_0, window_bounds = array<i64: 24, 16>}, {pipeline_mode = #tpu.pipeline_mode<synchronous>, transform_indices = @transform_1, window_bounds = array<i64: 24, 128>}, {pipeline_mode = #tpu.pipeline_mode<synchronous>, transform_indices = @transform_2, window_bounds = array<i64: 16, 128>}, {pipeline_mode = #tpu.pipeline_mode<synchronous>, transform_indices = @transform_3, window_bounds = array<i64: 128, 128>}, {pipeline_mode = #tpu.pipeline_mode<synchronous>, transform_indices = @transform_4, window_bounds = array<i64: 128, 128>}, {pipeline_mode = #tpu.pipeline_mode<synchronous>, transform_indices = @transform_5, window_bounds = array<i64: 6, 128, 128>}, {pipeline_mode = #tpu.pipeline_mode<synchronous>, transform_indices = @transform_6, window_bounds = array<i64: 6, 128, 128>}, {pipeline_mode = #tpu.pipeline_mode<synchronous>, transform_indices = @transform_7, window_bounds = array<i64: 24, 128>}, {pipeline_mode = #tpu.pipeline_mode<synchronous>, transform_indices = @transform_8, window_bounds = array<i64: 16, 128>}, {pipeline_mode = #tpu.pipeline_mode<synchronous>, transform_indices = @transform_9, window_bounds = array<i64: 2, 24, 128>}, {pipeline_mode = #tpu.pipeline_mode<synchronous>, transform_indices = @transform_10, window_bounds = array<i64: 2, 16, 128>}, {pipeline_mode = #tpu.pipeline_mode<synchronous>, transform_indices = @transform_11, window_bounds = array<i64: 2, 24, 128>}, {pipeline_mode = #tpu.pipeline_mode<synchronous>, transform_indices = @transform_12, window_bounds = array<i64: 2, 16, 128>}]} {
    %c0 = arith.constant 0 : index
    %c0_0 = arith.constant 0 : index
    %0 = vector.load %arg1[%c0, %c0_0] : memref<24x16xf32, #tpu.memory_space<vmem>>, vector<24x16xf32>
    %c0_1 = arith.constant 0 : index
    %c0_2 = arith.constant 0 : index
    %1 = vector.load %arg2[%c0_1, %c0_2] : memref<24x128xf32, #tpu.memory_space<vmem>>, vector<24x128xf32>
    %c0_3 = arith.constant 0 : index
    %c0_4 = arith.constant 0 : index
    %2 = vector.load %arg3[%c0_3, %c0_4] : memref<16x128xf32, #tpu.memory_space<vmem>>, vector<16x128xf32>
    %c0_5 = arith.constant 0 : index
    %c0_6 = arith.constant 0 : index
    %3 = vector.load %arg4[%c0_5, %c0_6] : memref<128x128xf32, #tpu.memory_space<vmem>>, vector<128x128xf32>
    %cst = arith.constant dense<0.000000e+00> : vector<24x128xf32>
    %4 = tpu.matmul %1, %3, %cst {dimension_numbers = #tpu.dot_dimension_numbers<[1], [0], [0], [1], [0, 0, 1, 1], [], []>} : vector<24x128xf32>, vector<128x128xf32>, vector<24x128xf32> -> vector<24x128xf32>
    %c0_7 = arith.constant 0 : index
    %c0_8 = arith.constant 0 : index
    %5 = vector.load %arg5[%c0_7, %c0_8] : memref<128x128xf32, #tpu.memory_space<vmem>>, vector<128x128xf32>
    %cst_9 = arith.constant dense<0.000000e+00> : vector<16x128xf32>
    %6 = tpu.matmul %2, %5, %cst_9 {dimension_numbers = #tpu.dot_dimension_numbers<[1], [0], [0], [1], [0, 0, 1, 1], [], []>} : vector<16x128xf32>, vector<128x128xf32>, vector<16x128xf32> -> vector<16x128xf32>
    %cst_10 = arith.constant dense<0.000000e+00> : vector<24x128xf32>
    %7 = tpu.matmul %0, %2, %cst_10 {dimension_numbers = #tpu.dot_dimension_numbers<[1], [0], [0], [1], [0, 0, 1, 1], [], []>} : vector<24x16xf32>, vector<16x128xf32>, vector<24x128xf32> -> vector<24x128xf32>
    %cst_11 = arith.constant 5.000000e-01 : f32
    %8 = vector.broadcast %cst_11 : f32 to vector<24x128xf32>
    %9 = arith.mulf %8, %7 : vector<24x128xf32>
    %10 = arith.maximumf %9, %7 : vector<24x128xf32>
    %cst_12 = arith.constant dense<0.000000e+00> : vector<16x128xf32>
    %11 = tpu.matmul %0, %1, %cst_12 {dimension_numbers = #tpu.dot_dimension_numbers<[0], [0], [1], [1], [0, 1, 1, 1], [], []>} : vector<24x16xf32>, vector<24x128xf32>, vector<16x128xf32> -> vector<16x128xf32>
    %cst_13 = arith.constant 5.000000e-01 : f32
    %12 = vector.broadcast %cst_13 : f32 to vector<16x128xf32>
    %13 = arith.mulf %12, %11 : vector<16x128xf32>
    %14 = arith.maximumf %13, %11 : vector<16x128xf32>
    %cst_14 = arith.constant dense<0.000000e+00> : vector<128x128xf32>
    %15 = tpu.matmul %4, %1, %cst_14 {dimension_numbers = #tpu.dot_dimension_numbers<[0], [0], [1], [1], [0, 1, 1, 1], [], []>} : vector<24x128xf32>, vector<24x128xf32>, vector<128x128xf32> -> vector<128x128xf32>
    %cst_15 = arith.constant 5.000000e-01 : f32
    %16 = vector.broadcast %cst_15 : f32 to vector<128x128xf32>
    %17 = arith.mulf %16, %15 : vector<128x128xf32>
    %18 = arith.maximumf %17, %15 : vector<128x128xf32>
    %c0_16 = arith.constant 0 : index
    %c0_17 = arith.constant 0 : index
    %c0_18 = arith.constant 0 : index
    %19 = vector.load %arg6[%c0_16, %c0_17, %c0_18] : memref<6x128x128xf32, #tpu.memory_space<vmem>>, vector<1x128x128xf32>
    %20 = vector.shape_cast %19 : vector<1x128x128xf32> to vector<128x128xf32>
    %cst_19 = arith.constant dense<0.000000e+00> : vector<128x128xf32>
    %21 = tpu.matmul %20, %18, %cst_19 {dimension_numbers = #tpu.dot_dimension_numbers<[0], [0], [1], [1], [0, 1, 1, 1], [], []>} : vector<128x128xf32>, vector<128x128xf32>, vector<128x128xf32> -> vector<128x128xf32>
    %cst_20 = arith.constant 5.000000e-01 : f32
    %22 = vector.broadcast %cst_20 : f32 to vector<128x128xf32>
    %23 = arith.mulf %22, %21 : vector<128x128xf32>
    %24 = arith.maximumf %23, %21 : vector<128x128xf32>
    %25 = arith.addf %24, %18 : vector<128x128xf32>
    %c1 = arith.constant 1 : index
    %c0_21 = arith.constant 0 : index
    %c0_22 = arith.constant 0 : index
    %26 = vector.load %arg6[%c1, %c0_21, %c0_22] : memref<6x128x128xf32, #tpu.memory_space<vmem>>, vector<1x128x128xf32>
    %27 = vector.shape_cast %26 : vector<1x128x128xf32> to vector<128x128xf32>
    %cst_23 = arith.constant dense<0.000000e+00> : vector<128x128xf32>
    %28 = tpu.matmul %27, %25, %cst_23 {dimension_numbers = #tpu.dot_dimension_numbers<[0], [0], [1], [1], [0, 1, 1, 1], [], []>} : vector<128x128xf32>, vector<128x128xf32>, vector<128x128xf32> -> vector<128x128xf32>
    %cst_24 = arith.constant 5.000000e-01 : f32
    %29 = vector.broadcast %cst_24 : f32 to vector<128x128xf32>
    %30 = arith.mulf %29, %28 : vector<128x128xf32>
    %31 = arith.maximumf %30, %28 : vector<128x128xf32>
    %32 = arith.addf %31, %25 : vector<128x128xf32>
    %c2 = arith.constant 2 : index
    %c0_25 = arith.constant 0 : index
    %c0_26 = arith.constant 0 : index
    %33 = vector.load %arg6[%c2, %c0_25, %c0_26] : memref<6x128x128xf32, #tpu.memory_space<vmem>>, vector<1x128x128xf32>
    %34 = vector.shape_cast %33 : vector<1x128x128xf32> to vector<128x128xf32>
    %cst_27 = arith.constant dense<0.000000e+00> : vector<128x128xf32>
    %35 = tpu.matmul %34, %32, %cst_27 {dimension_numbers = #tpu.dot_dimension_numbers<[0], [0], [1], [1], [0, 1, 1, 1], [], []>} : vector<128x128xf32>, vector<128x128xf32>, vector<128x128xf32> -> vector<128x128xf32>
    %cst_28 = arith.constant 5.000000e-01 : f32
    %36 = vector.broadcast %cst_28 : f32 to vector<128x128xf32>
    %37 = arith.mulf %36, %35 : vector<128x128xf32>
    %38 = arith.maximumf %37, %35 : vector<128x128xf32>
    %39 = arith.addf %38, %32 : vector<128x128xf32>
    %cst_29 = arith.constant dense<0.000000e+00> : vector<24x128xf32>
    %40 = tpu.matmul %4, %39, %cst_29 {dimension_numbers = #tpu.dot_dimension_numbers<[1], [0], [0], [1], [0, 0, 1, 1], [], []>} : vector<24x128xf32>, vector<128x128xf32>, vector<24x128xf32> -> vector<24x128xf32>
    %cst_30 = arith.constant 5.000000e-01 : f32
    %41 = vector.broadcast %cst_30 : f32 to vector<24x128xf32>
    %42 = arith.mulf %41, %40 : vector<24x128xf32>
    %43 = arith.maximumf %42, %40 : vector<24x128xf32>
    %cst_31 = arith.constant dense<0.000000e+00> : vector<128x128xf32>
    %44 = tpu.matmul %6, %2, %cst_31 {dimension_numbers = #tpu.dot_dimension_numbers<[0], [0], [1], [1], [0, 1, 1, 1], [], []>} : vector<16x128xf32>, vector<16x128xf32>, vector<128x128xf32> -> vector<128x128xf32>
    %cst_32 = arith.constant 5.000000e-01 : f32
    %45 = vector.broadcast %cst_32 : f32 to vector<128x128xf32>
    %46 = arith.mulf %45, %44 : vector<128x128xf32>
    %47 = arith.maximumf %46, %44 : vector<128x128xf32>
    %c0_33 = arith.constant 0 : index
    %c0_34 = arith.constant 0 : index
    %c0_35 = arith.constant 0 : index
    %48 = vector.load %arg7[%c0_33, %c0_34, %c0_35] : memref<6x128x128xf32, #tpu.memory_space<vmem>>, vector<1x128x128xf32>
    %49 = vector.shape_cast %48 : vector<1x128x128xf32> to vector<128x128xf32>
    %cst_36 = arith.constant dense<0.000000e+00> : vector<128x128xf32>
    %50 = tpu.matmul %49, %47, %cst_36 {dimension_numbers = #tpu.dot_dimension_numbers<[0], [0], [1], [1], [0, 1, 1, 1], [], []>} : vector<128x128xf32>, vector<128x128xf32>, vector<128x128xf32> -> vector<128x128xf32>
    %cst_37 = arith.constant 5.000000e-01 : f32
    %51 = vector.broadcast %cst_37 : f32 to vector<128x128xf32>
    %52 = arith.mulf %51, %50 : vector<128x128xf32>
    %53 = arith.maximumf %52, %50 : vector<128x128xf32>
    %54 = arith.addf %53, %47 : vector<128x128xf32>
    %c1_38 = arith.constant 1 : index
    %c0_39 = arith.constant 0 : index
    %c0_40 = arith.constant 0 : index
    %55 = vector.load %arg7[%c1_38, %c0_39, %c0_40] : memref<6x128x128xf32, #tpu.memory_space<vmem>>, vector<1x128x128xf32>
    %56 = vector.shape_cast %55 : vector<1x128x128xf32> to vector<128x128xf32>
    %cst_41 = arith.constant dense<0.000000e+00> : vector<128x128xf32>
    %57 = tpu.matmul %56, %54, %cst_41 {dimension_numbers = #tpu.dot_dimension_numbers<[0], [0], [1], [1], [0, 1, 1, 1], [], []>} : vector<128x128xf32>, vector<128x128xf32>, vector<128x128xf32> -> vector<128x128xf32>
    %cst_42 = arith.constant 5.000000e-01 : f32
    %58 = vector.broadcast %cst_42 : f32 to vector<128x128xf32>
    %59 = arith.mulf %58, %57 : vector<128x128xf32>
    %60 = arith.maximumf %59, %57 : vector<128x128xf32>
    %61 = arith.addf %60, %54 : vector<128x128xf32>
    %c2_43 = arith.constant 2 : index
    %c0_44 = arith.constant 0 : index
    %c0_45 = arith.constant 0 : index
    %62 = vector.load %arg7[%c2_43, %c0_44, %c0_45] : memref<6x128x128xf32, #tpu.memory_space<vmem>>, vector<1x128x128xf32>
    %63 = vector.shape_cast %62 : vector<1x128x128xf32> to vector<128x128xf32>
    %cst_46 = arith.constant dense<0.000000e+00> : vector<128x128xf32>
    %64 = tpu.matmul %63, %61, %cst_46 {dimension_numbers = #tpu.dot_dimension_numbers<[0], [0], [1], [1], [0, 1, 1, 1], [], []>} : vector<128x128xf32>, vector<128x128xf32>, vector<128x128xf32> -> vector<128x128xf32>
    %cst_47 = arith.constant 5.000000e-01 : f32
    %65 = vector.broadcast %cst_47 : f32 to vector<128x128xf32>
    %66 = arith.mulf %65, %64 : vector<128x128xf32>
    %67 = arith.maximumf %66, %64 : vector<128x128xf32>
    %68 = arith.addf %67, %61 : vector<128x128xf32>
    %cst_48 = arith.constant dense<0.000000e+00> : vector<16x128xf32>
    %69 = tpu.matmul %6, %68, %cst_48 {dimension_numbers = #tpu.dot_dimension_numbers<[1], [0], [0], [1], [0, 0, 1, 1], [], []>} : vector<16x128xf32>, vector<128x128xf32>, vector<16x128xf32> -> vector<16x128xf32>
    %cst_49 = arith.constant 5.000000e-01 : f32
    %70 = vector.broadcast %cst_49 : f32 to vector<16x128xf32>
    %71 = arith.mulf %70, %69 : vector<16x128xf32>
    %72 = arith.maximumf %71, %69 : vector<16x128xf32>
    %c0_50 = arith.constant 0 : index
    %c0_51 = arith.constant 0 : index
    %c0_52 = arith.constant 0 : index
    %73 = vector.load %arg10[%c0_50, %c0_51, %c0_52] : memref<2x24x128xf32, #tpu.memory_space<vmem>>, vector<1x24x128xf32>
    %74 = vector.shape_cast %73 : vector<1x24x128xf32> to vector<24x128xf32>
    %75 = vector.shape_cast %10 : vector<24x128xf32> to vector<1x24x128xf32>
    tpu.vector_store %arg10[%c0_50, %c0_51, %c0_52], %75 {strides = array<i32>} : memref<2x24x128xf32, #tpu.memory_space<vmem>>, vector<1x24x128xf32>,
    %c0_53 = arith.constant 0 : index
    %c0_54 = arith.constant 0 : index
    %c0_55 = arith.constant 0 : index
    %76 = vector.load %arg11[%c0_53, %c0_54, %c0_55] : memref<2x16x128xf32, #tpu.memory_space<vmem>>, vector<1x16x128xf32>
    %77 = vector.shape_cast %76 : vector<1x16x128xf32> to vector<16x128xf32>
    %78 = vector.shape_cast %14 : vector<16x128xf32> to vector<1x16x128xf32>
    tpu.vector_store %arg11[%c0_53, %c0_54, %c0_55], %78 {strides = array<i32>} : memref<2x16x128xf32, #tpu.memory_space<vmem>>, vector<1x16x128xf32>,
    %c0_56 = arith.constant 0 : index
    %c0_57 = arith.constant 0 : index
    %c0_58 = arith.constant 0 : index
    %79 = vector.load %arg12[%c0_56, %c0_57, %c0_58] : memref<2x24x128xf32, #tpu.memory_space<vmem>>, vector<1x24x128xf32>
    %80 = vector.shape_cast %79 : vector<1x24x128xf32> to vector<24x128xf32>
    %81 = vector.shape_cast %43 : vector<24x128xf32> to vector<1x24x128xf32>
    tpu.vector_store %arg12[%c0_56, %c0_57, %c0_58], %81 {strides = array<i32>} : memref<2x24x128xf32, #tpu.memory_space<vmem>>, vector<1x24x128xf32>,
    %c0_59 = arith.constant 0 : index
    %c0_60 = arith.constant 0 : index
    %c0_61 = arith.constant 0 : index
    %82 = vector.load %arg13[%c0_59, %c0_60, %c0_61] : memref<2x16x128xf32, #tpu.memory_space<vmem>>, vector<1x16x128xf32>
    %83 = vector.shape_cast %82 : vector<1x16x128xf32> to vector<16x128xf32>
    %84 = vector.shape_cast %72 : vector<16x128xf32> to vector<1x16x128xf32>
    tpu.vector_store %arg13[%c0_59, %c0_60, %c0_61], %84 {strides = array<i32>} : memref<2x16x128xf32, #tpu.memory_space<vmem>>, vector<1x16x128xf32>,
    %85 = arith.addf %10, %43 : vector<24x128xf32>
    %86 = arith.addf %85, %1 : vector<24x128xf32>
    %87 = arith.addf %14, %72 : vector<16x128xf32>
    %88 = arith.addf %87, %2 : vector<16x128xf32>
    %89 = arith.addf %1, %86 : vector<24x128xf32>
    %90 = arith.addf %2, %88 : vector<16x128xf32>
    %cst_62 = arith.constant dense<0.000000e+00> : vector<24x128xf32>
    %91 = tpu.matmul %0, %88, %cst_62 {dimension_numbers = #tpu.dot_dimension_numbers<[1], [0], [0], [1], [0, 0, 1, 1], [], []>} : vector<24x16xf32>, vector<16x128xf32>, vector<24x128xf32> -> vector<24x128xf32>
    %cst_63 = arith.constant 5.000000e-01 : f32
    %92 = vector.broadcast %cst_63 : f32 to vector<24x128xf32>
    %93 = arith.mulf %92, %91 : vector<24x128xf32>
    %94 = arith.maximumf %93, %91 : vector<24x128xf32>
    %cst_64 = arith.constant dense<0.000000e+00> : vector<16x128xf32>
    %95 = tpu.matmul %0, %86, %cst_64 {dimension_numbers = #tpu.dot_dimension_numbers<[0], [0], [1], [1], [0, 1, 1, 1], [], []>} : vector<24x16xf32>, vector<24x128xf32>, vector<16x128xf32> -> vector<16x128xf32>
    %cst_65 = arith.constant 5.000000e-01 : f32
    %96 = vector.broadcast %cst_65 : f32 to vector<16x128xf32>
    %97 = arith.mulf %96, %95 : vector<16x128xf32>
    %98 = arith.maximumf %97, %95 : vector<16x128xf32>
    %cst_66 = arith.constant dense<0.000000e+00> : vector<128x128xf32>
    %99 = tpu.matmul %4, %86, %cst_66 {dimension_numbers = #tpu.dot_dimension_numbers<[0], [0], [1], [1], [0, 1, 1, 1], [], []>} : vector<24x128xf32>, vector<24x128xf32>, vector<128x128xf32> -> vector<128x128xf32>
    %cst_67 = arith.constant 5.000000e-01 : f32
    %100 = vector.broadcast %cst_67 : f32 to vector<128x128xf32>
    %101 = arith.mulf %100, %99 : vector<128x128xf32>
    %102 = arith.maximumf %101, %99 : vector<128x128xf32>
    %c3 = arith.constant 3 : index
    %c0_68 = arith.constant 0 : index
    %c0_69 = arith.constant 0 : index
    %103 = vector.load %arg6[%c3, %c0_68, %c0_69] : memref<6x128x128xf32, #tpu.memory_space<vmem>>, vector<1x128x128xf32>
    %104 = vector.shape_cast %103 : vector<1x128x128xf32> to vector<128x128xf32>
    %cst_70 = arith.constant dense<0.000000e+00> : vector<128x128xf32>
    %105 = tpu.matmul %104, %102, %cst_70 {dimension_numbers = #tpu.dot_dimension_numbers<[0], [0], [1], [1], [0, 1, 1, 1], [], []>} : vector<128x128xf32>, vector<128x128xf32>, vector<128x128xf32> -> vector<128x128xf32>
    %cst_71 = arith.constant 5.000000e-01 : f32
    %106 = vector.broadcast %cst_71 : f32 to vector<128x128xf32>
    %107 = arith.mulf %106, %105 : vector<128x128xf32>
    %108 = arith.maximumf %107, %105 : vector<128x128xf32>
    %109 = arith.addf %108, %102 : vector<128x128xf32>
    %c4 = arith.constant 4 : index
    %c0_72 = arith.constant 0 : index
    %c0_73 = arith.constant 0 : index
    %110 = vector.load %arg6[%c4, %c0_72, %c0_73] : memref<6x128x128xf32, #tpu.memory_space<vmem>>, vector<1x128x128xf32>
    %111 = vector.shape_cast %110 : vector<1x128x128xf32> to vector<128x128xf32>
    %cst_74 = arith.constant dense<0.000000e+00> : vector<128x128xf32>
    %112 = tpu.matmul %111, %109, %cst_74 {dimension_numbers = #tpu.dot_dimension_numbers<[0], [0], [1], [1], [0, 1, 1, 1], [], []>} : vector<128x128xf32>, vector<128x128xf32>, vector<128x128xf32> -> vector<128x128xf32>
    %cst_75 = arith.constant 5.000000e-01 : f32
    %113 = vector.broadcast %cst_75 : f32 to vector<128x128xf32>
    %114 = arith.mulf %113, %112 : vector<128x128xf32>
    %115 = arith.maximumf %114, %112 : vector<128x128xf32>
    %116 = arith.addf %115, %109 : vector<128x128xf32>
    %c5 = arith.constant 5 : index
    %c0_76 = arith.constant 0 : index
    %c0_77 = arith.constant 0 : index
    %117 = vector.load %arg6[%c5, %c0_76, %c0_77] : memref<6x128x128xf32, #tpu.memory_space<vmem>>, vector<1x128x128xf32>
    %118 = vector.shape_cast %117 : vector<1x128x128xf32> to vector<128x128xf32>
    %cst_78 = arith.constant dense<0.000000e+00> : vector<128x128xf32>
    %119 = tpu.matmul %118, %116, %cst_78 {dimension_numbers = #tpu.dot_dimension_numbers<[0], [0], [1], [1], [0, 1, 1, 1], [], []>} : vector<128x128xf32>, vector<128x128xf32>, vector<128x128xf32> -> vector<128x128xf32>
    %cst_79 = arith.constant 5.000000e-01 : f32
    %120 = vector.broadcast %cst_79 : f32 to vector<128x128xf32>
    %121 = arith.mulf %120, %119 : vector<128x128xf32>
    %122 = arith.maximumf %121, %119 : vector<128x128xf32>
    %123 = arith.addf %122, %116 : vector<128x128xf32>
    %cst_80 = arith.constant dense<0.000000e+00> : vector<24x128xf32>
    %124 = tpu.matmul %4, %123, %cst_80 {dimension_numbers = #tpu.dot_dimension_numbers<[1], [0], [0], [1], [0, 0, 1, 1], [], []>} : vector<24x128xf32>, vector<128x128xf32>, vector<24x128xf32> -> vector<24x128xf32>
    %cst_81 = arith.constant 5.000000e-01 : f32
    %125 = vector.broadcast %cst_81 : f32 to vector<24x128xf32>
    %126 = arith.mulf %125, %124 : vector<24x128xf32>
    %127 = arith.maximumf %126, %124 : vector<24x128xf32>
    %cst_82 = arith.constant dense<0.000000e+00> : vector<128x128xf32>
    %128 = tpu.matmul %6, %88, %cst_82 {dimension_numbers = #tpu.dot_dimension_numbers<[0], [0], [1], [1], [0, 1, 1, 1], [], []>} : vector<16x128xf32>, vector<16x128xf32>, vector<128x128xf32> -> vector<128x128xf32>
    %cst_83 = arith.constant 5.000000e-01 : f32
    %129 = vector.broadcast %cst_83 : f32 to vector<128x128xf32>
    %130 = arith.mulf %129, %128 : vector<128x128xf32>
    %131 = arith.maximumf %130, %128 : vector<128x128xf32>
    %c3_84 = arith.constant 3 : index
    %c0_85 = arith.constant 0 : index
    %c0_86 = arith.constant 0 : index
    %132 = vector.load %arg7[%c3_84, %c0_85, %c0_86] : memref<6x128x128xf32, #tpu.memory_space<vmem>>, vector<1x128x128xf32>
    %133 = vector.shape_cast %132 : vector<1x128x128xf32> to vector<128x128xf32>
    %cst_87 = arith.constant dense<0.000000e+00> : vector<128x128xf32>
    %134 = tpu.matmul %133, %131, %cst_87 {dimension_numbers = #tpu.dot_dimension_numbers<[0], [0], [1], [1], [0, 1, 1, 1], [], []>} : vector<128x128xf32>, vector<128x128xf32>, vector<128x128xf32> -> vector<128x128xf32>
    %cst_88 = arith.constant 5.000000e-01 : f32
    %135 = vector.broadcast %cst_88 : f32 to vector<128x128xf32>
    %136 = arith.mulf %135, %134 : vector<128x128xf32>
    %137 = arith.maximumf %136, %134 : vector<128x128xf32>
    %138 = arith.addf %137, %131 : vector<128x128xf32>
    %c4_89 = arith.constant 4 : index
    %c0_90 = arith.constant 0 : index
    %c0_91 = arith.constant 0 : index
    %139 = vector.load %arg7[%c4_89, %c0_90, %c0_91] : memref<6x128x128xf32, #tpu.memory_space<vmem>>, vector<1x128x128xf32>
    %140 = vector.shape_cast %139 : vector<1x128x128xf32> to vector<128x128xf32>
    %cst_92 = arith.constant dense<0.000000e+00> : vector<128x128xf32>
    %141 = tpu.matmul %140, %138, %cst_92 {dimension_numbers = #tpu.dot_dimension_numbers<[0], [0], [1], [1], [0, 1, 1, 1], [], []>} : vector<128x128xf32>, vector<128x128xf32>, vector<128x128xf32> -> vector<128x128xf32>
    %cst_93 = arith.constant 5.000000e-01 : f32
    %142 = vector.broadcast %cst_93 : f32 to vector<128x128xf32>
    %143 = arith.mulf %142, %141 : vector<128x128xf32>
    %144 = arith.maximumf %143, %141 : vector<128x128xf32>
    %145 = arith.addf %144, %138 : vector<128x128xf32>
    %c5_94 = arith.constant 5 : index
    %c0_95 = arith.constant 0 : index
    %c0_96 = arith.constant 0 : index
    %146 = vector.load %arg7[%c5_94, %c0_95, %c0_96] : memref<6x128x128xf32, #tpu.memory_space<vmem>>, vector<1x128x128xf32>
    %147 = vector.shape_cast %146 : vector<1x128x128xf32> to vector<128x128xf32>
    %cst_97 = arith.constant dense<0.000000e+00> : vector<128x128xf32>
    %148 = tpu.matmul %147, %145, %cst_97 {dimension_numbers = #tpu.dot_dimension_numbers<[0], [0], [1], [1], [0, 1, 1, 1], [], []>} : vector<128x128xf32>, vector<128x128xf32>, vector<128x128xf32> -> vector<128x128xf32>
    %cst_98 = arith.constant 5.000000e-01 : f32
    %149 = vector.broadcast %cst_98 : f32 to vector<128x128xf32>
    %150 = arith.mulf %149, %148 : vector<128x128xf32>
    %151 = arith.maximumf %150, %148 : vector<128x128xf32>
    %152 = arith.addf %151, %145 : vector<128x128xf32>
    %cst_99 = arith.constant dense<0.000000e+00> : vector<16x128xf32>
    %153 = tpu.matmul %6, %152, %cst_99 {dimension_numbers = #tpu.dot_dimension_numbers<[1], [0], [0], [1], [0, 0, 1, 1], [], []>} : vector<16x128xf32>, vector<128x128xf32>, vector<16x128xf32> -> vector<16x128xf32>
    %cst_100 = arith.constant 5.000000e-01 : f32
    %154 = vector.broadcast %cst_100 : f32 to vector<16x128xf32>
    %155 = arith.mulf %154, %153 : vector<16x128xf32>
    %156 = arith.maximumf %155, %153 : vector<16x128xf32>
    %c1_101 = arith.constant 1 : index
    %c0_102 = arith.constant 0 : index
    %c0_103 = arith.constant 0 : index
    %157 = vector.load %arg10[%c1_101, %c0_102, %c0_103] : memref<2x24x128xf32, #tpu.memory_space<vmem>>, vector<1x24x128xf32>
    %158 = vector.shape_cast %157 : vector<1x24x128xf32> to vector<24x128xf32>
    %159 = vector.shape_cast %94 : vector<24x128xf32> to vector<1x24x128xf32>
    tpu.vector_store %arg10[%c1_101, %c0_102, %c0_103], %159 {strides = array<i32>} : memref<2x24x128xf32, #tpu.memory_space<vmem>>, vector<1x24x128xf32>,
    %c1_104 = arith.constant 1 : index
    %c0_105 = arith.constant 0 : index
    %c0_106 = arith.constant 0 : index
    %160 = vector.load %arg11[%c1_104, %c0_105, %c0_106] : memref<2x16x128xf32, #tpu.memory_space<vmem>>, vector<1x16x128xf32>
    %161 = vector.shape_cast %160 : vector<1x16x128xf32> to vector<16x128xf32>
    %162 = vector.shape_cast %98 : vector<16x128xf32> to vector<1x16x128xf32>
    tpu.vector_store %arg11[%c1_104, %c0_105, %c0_106], %162 {strides = array<i32>} : memref<2x16x128xf32, #tpu.memory_space<vmem>>, vector<1x16x128xf32>,
    %c1_107 = arith.constant 1 : index
    %c0_108 = arith.constant 0 : index
    %c0_109 = arith.constant 0 : index
    %163 = vector.load %arg12[%c1_107, %c0_108, %c0_109] : memref<2x24x128xf32, #tpu.memory_space<vmem>>, vector<1x24x128xf32>
    %164 = vector.shape_cast %163 : vector<1x24x128xf32> to vector<24x128xf32>
    %165 = vector.shape_cast %127 : vector<24x128xf32> to vector<1x24x128xf32>
    tpu.vector_store %arg12[%c1_107, %c0_108, %c0_109], %165 {strides = array<i32>} : memref<2x24x128xf32, #tpu.memory_space<vmem>>, vector<1x24x128xf32>,
    %c1_110 = arith.constant 1 : index
    %c0_111 = arith.constant 0 : index
    %c0_112 = arith.constant 0 : index
    %166 = vector.load %arg13[%c1_110, %c0_111, %c0_112] : memref<2x16x128xf32, #tpu.memory_space<vmem>>, vector<1x16x128xf32>
    %167 = vector.shape_cast %166 : vector<1x16x128xf32> to vector<16x128xf32>
    %168 = vector.shape_cast %156 : vector<16x128xf32> to vector<1x16x128xf32>
    tpu.vector_store %arg13[%c1_110, %c0_111, %c0_112], %168 {strides = array<i32>} : memref<2x16x128xf32, #tpu.memory_space<vmem>>, vector<1x16x128xf32>,
    %169 = arith.addf %94, %127 : vector<24x128xf32>
    %170 = arith.addf %169, %86 : vector<24x128xf32>
    %171 = arith.addf %98, %156 : vector<16x128xf32>
    %172 = arith.addf %171, %88 : vector<16x128xf32>
    %173 = arith.addf %89, %170 : vector<24x128xf32>
    %174 = arith.addf %90, %172 : vector<16x128xf32>
    %c0_113 = arith.constant 0 : index
    %c0_114 = arith.constant 0 : index
    %175 = vector.load %arg8[%c0_113, %c0_114] : memref<24x128xf32, #tpu.memory_space<vmem>>, vector<24x128xf32>
    tpu.vector_store %arg8[%c0_113, %c0_114], %173 {strides = array<i32>} : memref<24x128xf32, #tpu.memory_space<vmem>>, vector<24x128xf32>,
    %c0_115 = arith.constant 0 : index
    %c0_116 = arith.constant 0 : index
    %176 = vector.load %arg9[%c0_115, %c0_116] : memref<16x128xf32, #tpu.memory_space<vmem>>, vector<16x128xf32>
    tpu.vector_store %arg9[%c0_115, %c0_116], %174 {strides = array<i32>} : memref<16x128xf32, #tpu.memory_space<vmem>>, vector<16x128xf32>,
    return
  }
  func.func @transform_0(%arg0: i32) -> (i32, i32) {
    %c0_i32 = arith.constant 0 : i32
    %c0_i32_0 = arith.constant 0 : i32
    %c0_i32_1 = arith.constant 0 : i32
    return %c0_i32, %c0_i32_0 : i32, i32
  }
  func.func @transform_1(%arg0: i32) -> (i32, i32) {
    %c0_i32 = arith.constant 0 : i32
    %c0_i32_0 = arith.constant 0 : i32
    %c0_i32_1 = arith.constant 0 : i32
    return %c0_i32, %c0_i32_0 : i32, i32
  }
  func.func @transform_2(%arg0: i32) -> (i32, i32) {
    %c0_i32 = arith.constant 0 : i32
    %c0_i32_0 = arith.constant 0 : i32
    %c0_i32_1 = arith.constant 0 : i32
    return %c0_i32, %c0_i32_0 : i32, i32
  }
  func.func @transform_3(%arg0: i32) -> (i32, i32) {
    %c0_i32 = arith.constant 0 : i32
    %c0_i32_0 = arith.constant 0 : i32
    %c0_i32_1 = arith.constant 0 : i32
    return %c0_i32, %c0_i32_0 : i32, i32
  }
  func.func @transform_4(%arg0: i32) -> (i32, i32) {
    %c0_i32 = arith.constant 0 : i32
    %c0_i32_0 = arith.constant 0 : i32
    %c0_i32_1 = arith.constant 0 : i32
    return %c0_i32, %c0_i32_0 : i32, i32
  }
  func.func @transform_5(%arg0: i32) -> (i32, i32, i32) {
    %c0_i32 = arith.constant 0 : i32
    %c0_i32_0 = arith.constant 0 : i32
    %c0_i32_1 = arith.constant 0 : i32
    %c0_i32_2 = arith.constant 0 : i32
    return %c0_i32, %c0_i32_0, %c0_i32_1 : i32, i32, i32
  }
  func.func @transform_6(%arg0: i32) -> (i32, i32, i32) {
    %c0_i32 = arith.constant 0 : i32
    %c0_i32_0 = arith.constant 0 : i32
    %c0_i32_1 = arith.constant 0 : i32
    %c0_i32_2 = arith.constant 0 : i32
    return %c0_i32, %c0_i32_0, %c0_i32_1 : i32, i32, i32
  }
  func.func @transform_7(%arg0: i32) -> (i32, i32) {
    %c0_i32 = arith.constant 0 : i32
    %c0_i32_0 = arith.constant 0 : i32
    %c0_i32_1 = arith.constant 0 : i32
    return %c0_i32, %c0_i32_0 : i32, i32
  }
  func.func @transform_8(%arg0: i32) -> (i32, i32) {
    %c0_i32 = arith.constant 0 : i32
    %c0_i32_0 = arith.constant 0 : i32
    %c0_i32_1 = arith.constant 0 : i32
    return %c0_i32, %c0_i32_0 : i32, i32
  }
  func.func @transform_9(%arg0: i32) -> (i32, i32, i32) {
    %c0_i32 = arith.constant 0 : i32
    %c0_i32_0 = arith.constant 0 : i32
    %c0_i32_1 = arith.constant 0 : i32
    %c0_i32_2 = arith.constant 0 : i32
    return %c0_i32, %c0_i32_0, %c0_i32_1 : i32, i32, i32
  }
  func.func @transform_10(%arg0: i32) -> (i32, i32, i32) {
    %c0_i32 = arith.constant 0 : i32
    %c0_i32_0 = arith.constant 0 : i32
    %c0_i32_1 = arith.constant 0 : i32
    %c0_i32_2 = arith.constant 0 : i32
    return %c0_i32, %c0_i32_0, %c0_i32_1 : i32, i32, i32
  }
  func.func @transform_11(%arg0: i32) -> (i32, i32, i32) {
    %c0_i32 = arith.constant 0 : i32
    %c0_i32_0 = arith.constant 0 : i32
    %c0_i32_1 = arith.constant 0 : i32
    %c0_i32_2 = arith.constant 0 : i32
    return %c0_i32, %c0_i32_0, %c0_i32_1 : i32, i32, i32
  }
  func.func @transform_12(%arg0: i32) -> (i32, i32, i32) {
    %c0_i32 = arith.constant 0 : i32
    %c0_i32_0 = arith.constant 0 : i32
    %c0_i32_1 = arith.constant 0 : i32
    %c0_i32_2 = arith.constant 0 : i32
    return %c0_i32, %c0_i32_0, %c0_i32_1 : i32, i32, i32
  }
}

module attributes {stable_mosaic.version = 11 : i64} {
  func.func @_tail_kernel(%arg0: i32, %arg1: memref<16x128xf32, #tpu.memory_space<vmem>>, %arg2: memref<16x128xf32, #tpu.memory_space<vmem>>, %arg3: memref<2x13x128xf32, #tpu.memory_space<vmem>>, %arg4: memref<2x13x128xf32, #tpu.memory_space<vmem>>, %arg5: memref<2x13x128xf32, #tpu.memory_space<vmem>>, %arg6: memref<2x13x128xf32, #tpu.memory_space<vmem>>, %arg7: memref<2x128x128xf32, #tpu.memory_space<vmem>>, %arg8: memref<24x128xf32, #tpu.memory_space<vmem>>, %arg9: memref<16x128xf32, #tpu.memory_space<vmem>>, %arg10: memref<128x128xf32, #tpu.memory_space<vmem>>, %arg11: memref<128x128xf32, #tpu.memory_space<vmem>>, %arg12: memref<16x1xf32, #tpu.memory_space<vmem>>, %arg13: memref<1x1xf32, #tpu.memory_space<vmem>>, %arg14: memref<1x1xf32, #tpu.memory_space<vmem>>) attributes {dimension_semantics = [#tpu.dimension_semantics<arbitrary>], iteration_bounds = array<i64: 1>, scalar_prefetch = 0 : i64, scratch_operands = 0 : i64, tpu.core_type = #tpu.core_type<tc>, window_params = [{pipeline_mode = #tpu.pipeline_mode<synchronous>, transform_indices = @transform_0, window_bounds = array<i64: 16, 128>}, {pipeline_mode = #tpu.pipeline_mode<synchronous>, transform_indices = @transform_1, window_bounds = array<i64: 16, 128>}, {pipeline_mode = #tpu.pipeline_mode<synchronous>, transform_indices = @transform_2, window_bounds = array<i64: 2, 13, 128>}, {pipeline_mode = #tpu.pipeline_mode<synchronous>, transform_indices = @transform_3, window_bounds = array<i64: 2, 13, 128>}, {pipeline_mode = #tpu.pipeline_mode<synchronous>, transform_indices = @transform_4, window_bounds = array<i64: 2, 13, 128>}, {pipeline_mode = #tpu.pipeline_mode<synchronous>, transform_indices = @transform_5, window_bounds = array<i64: 2, 13, 128>}, {pipeline_mode = #tpu.pipeline_mode<synchronous>, transform_indices = @transform_6, window_bounds = array<i64: 2, 128, 128>}, {pipeline_mode = #tpu.pipeline_mode<synchronous>, transform_indices = @transform_7, window_bounds = array<i64: 24, 128>}, {pipeline_mode = #tpu.pipeline_mode<synchronous>, transform_indices = @transform_8, window_bounds = array<i64: 16, 128>}, {pipeline_mode = #tpu.pipeline_mode<synchronous>, transform_indices = @transform_9, window_bounds = array<i64: 128, 128>}, {pipeline_mode = #tpu.pipeline_mode<synchronous>, transform_indices = @transform_10, window_bounds = array<i64: 128, 128>}, {pipeline_mode = #tpu.pipeline_mode<synchronous>, transform_indices = @transform_11, window_bounds = array<i64: 16, 1>}, {pipeline_mode = #tpu.pipeline_mode<synchronous>, transform_indices = @transform_12, window_bounds = array<i64: 1, 1>}, {pipeline_mode = #tpu.pipeline_mode<synchronous>, transform_indices = @transform_13, window_bounds = array<i64: 1, 1>}]} {
    %c0 = arith.constant 0 : index
    %c0_0 = arith.constant 0 : index
    %0 = vector.load %arg1[%c0, %c0_0] : memref<16x128xf32, #tpu.memory_space<vmem>>, vector<16x128xf32>
    %c0_1 = arith.constant 0 : index
    %c0_2 = arith.constant 0 : index
    %1 = vector.load %arg2[%c0_1, %c0_2] : memref<16x128xf32, #tpu.memory_space<vmem>>, vector<16x128xf32>
    %2 = arith.mulf %0, %1 : vector<16x128xf32>
    %cst = arith.constant dense<0.000000e+00> : vector<16xf32>
    %3 = vector.multi_reduction <add>, %2, %cst [1] : vector<16x128xf32> to vector<16xf32>
    %4 = vector.shape_cast %3 : vector<16xf32> to vector<16x1xf32>
    %c0_3 = arith.constant 0 : index
    %c0_4 = arith.constant 0 : index
    %5 = vector.load %arg12[%c0_3, %c0_4] : memref<16x1xf32, #tpu.memory_space<vmem>>, vector<16x1xf32>
    tpu.vector_store %arg12[%c0_3, %c0_4], %4 {strides = array<i32>} : memref<16x1xf32, #tpu.memory_space<vmem>>, vector<16x1xf32>,
    %cst_5 = arith.constant 0.000000e+00 : f32
    %6 = vector.broadcast %cst_5 : f32 to vector<1x1xf32>
    %c0_6 = arith.constant 0 : index
    %c0_7 = arith.constant 0 : index
    %c0_8 = arith.constant 0 : index
    %7 = vector.load %arg7[%c0_6, %c0_7, %c0_8] : memref<2x128x128xf32, #tpu.memory_space<vmem>>, vector<1x128x128xf32>
    %8 = vector.shape_cast %7 : vector<1x128x128xf32> to vector<128x128xf32>
    %c0_9 = arith.constant 0 : index
    %c0_10 = arith.constant 0 : index
    %c0_11 = arith.constant 0 : index
    %9 = vector.load %arg3[%c0_9, %c0_10, %c0_11] : memref<2x13x128xf32, #tpu.memory_space<vmem>>, vector<1x13x128xf32>
    %10 = vector.shape_cast %9 : vector<1x13x128xf32> to vector<13x128xf32>
    %11 = arith.mulf %10, %10 : vector<13x128xf32>
    %cst_12 = arith.constant dense<0.000000e+00> : vector<13xf32>
    %12 = vector.multi_reduction <add>, %11, %cst_12 [1] : vector<13x128xf32> to vector<13xf32>
    %13 = vector.shape_cast %12 : vector<13xf32> to vector<13x1xf32>
    %14 = math.sqrt %13 : vector<13x1xf32>
    %cst_13 = arith.constant 9.99999996E-13 : f32
    %15 = vector.broadcast %cst_13 : f32 to vector<13x1xf32>
    %16 = arith.maximumf %14, %15 : vector<13x1xf32>
    %17 = vector.broadcast %16 : vector<13x1xf32> to vector<13x128xf32>
    %18 = arith.divf %10, %17 : vector<13x128xf32>
    %cst_14 = arith.constant dense<0.000000e+00> : vector<13x128xf32>
    %19 = tpu.matmul %18, %8, %cst_14 {dimension_numbers = #tpu.dot_dimension_numbers<[1], [0], [0], [1], [0, 0, 1, 1], [], []>} : vector<13x128xf32>, vector<128x128xf32>, vector<13x128xf32> -> vector<13x128xf32>
    %c0_15 = arith.constant 0 : index
    %c0_16 = arith.constant 0 : index
    %c0_17 = arith.constant 0 : index
    %20 = vector.load %arg4[%c0_15, %c0_16, %c0_17] : memref<2x13x128xf32, #tpu.memory_space<vmem>>, vector<1x13x128xf32>
    %21 = vector.shape_cast %20 : vector<1x13x128xf32> to vector<13x128xf32>
    %22 = arith.mulf %21, %21 : vector<13x128xf32>
    %cst_18 = arith.constant dense<0.000000e+00> : vector<13xf32>
    %23 = vector.multi_reduction <add>, %22, %cst_18 [1] : vector<13x128xf32> to vector<13xf32>
    %24 = vector.shape_cast %23 : vector<13xf32> to vector<13x1xf32>
    %25 = math.sqrt %24 : vector<13x1xf32>
    %cst_19 = arith.constant 9.99999996E-13 : f32
    %26 = vector.broadcast %cst_19 : f32 to vector<13x1xf32>
    %27 = arith.maximumf %25, %26 : vector<13x1xf32>
    %28 = vector.broadcast %27 : vector<13x1xf32> to vector<13x128xf32>
    %29 = arith.divf %21, %28 : vector<13x128xf32>
    %c0_20 = arith.constant 0 : index
    %c0_21 = arith.constant 0 : index
    %c0_22 = arith.constant 0 : index
    %30 = vector.load %arg5[%c0_20, %c0_21, %c0_22] : memref<2x13x128xf32, #tpu.memory_space<vmem>>, vector<1x13x128xf32>
    %31 = vector.shape_cast %30 : vector<1x13x128xf32> to vector<13x128xf32>
    %32 = arith.mulf %31, %31 : vector<13x128xf32>
    %cst_23 = arith.constant dense<0.000000e+00> : vector<13xf32>
    %33 = vector.multi_reduction <add>, %32, %cst_23 [1] : vector<13x128xf32> to vector<13xf32>
    %34 = vector.shape_cast %33 : vector<13xf32> to vector<13x1xf32>
    %35 = math.sqrt %34 : vector<13x1xf32>
    %cst_24 = arith.constant 9.99999996E-13 : f32
    %36 = vector.broadcast %cst_24 : f32 to vector<13x1xf32>
    %37 = arith.maximumf %35, %36 : vector<13x1xf32>
    %38 = vector.broadcast %37 : vector<13x1xf32> to vector<13x128xf32>
    %39 = arith.divf %31, %38 : vector<13x128xf32>
    %cst_25 = arith.constant dense<0.000000e+00> : vector<13x128xf32>
    %40 = tpu.matmul %39, %8, %cst_25 {dimension_numbers = #tpu.dot_dimension_numbers<[1], [0], [0], [1], [0, 0, 1, 1], [], []>} : vector<13x128xf32>, vector<128x128xf32>, vector<13x128xf32> -> vector<13x128xf32>
    %c0_26 = arith.constant 0 : index
    %c0_27 = arith.constant 0 : index
    %c0_28 = arith.constant 0 : index
    %41 = vector.load %arg6[%c0_26, %c0_27, %c0_28] : memref<2x13x128xf32, #tpu.memory_space<vmem>>, vector<1x13x128xf32>
    %42 = vector.shape_cast %41 : vector<1x13x128xf32> to vector<13x128xf32>
    %43 = arith.mulf %42, %42 : vector<13x128xf32>
    %cst_29 = arith.constant dense<0.000000e+00> : vector<13xf32>
    %44 = vector.multi_reduction <add>, %43, %cst_29 [1] : vector<13x128xf32> to vector<13xf32>
    %45 = vector.shape_cast %44 : vector<13xf32> to vector<13x1xf32>
    %46 = math.sqrt %45 : vector<13x1xf32>
    %cst_30 = arith.constant 9.99999996E-13 : f32
    %47 = vector.broadcast %cst_30 : f32 to vector<13x1xf32>
    %48 = arith.maximumf %46, %47 : vector<13x1xf32>
    %49 = vector.broadcast %48 : vector<13x1xf32> to vector<13x128xf32>
    %50 = arith.divf %42, %49 : vector<13x128xf32>
    %51 = arith.mulf %19, %29 : vector<13x128xf32>
    %cst_31 = arith.constant dense<0.000000e+00> : vector<13xf32>
    %52 = vector.multi_reduction <add>, %51, %cst_31 [1] : vector<13x128xf32> to vector<13xf32>
    %53 = vector.shape_cast %52 : vector<13xf32> to vector<13x1xf32>
    %cst_32 = arith.constant 5.000000e-01 : f32
    %54 = vector.broadcast %cst_32 : f32 to vector<13x1xf32>
    %55 = arith.divf %53, %54 : vector<13x1xf32>
    %56 = math.exp %55 : vector<13x1xf32>
    %cst_33 = arith.constant dense<0.000000e+00> : vector<13x13xf32>
    %57 = tpu.matmul %29, %19, %cst_33 {dimension_numbers = #tpu.dot_dimension_numbers<[1], [1], [0], [0], [0, 0, 1, 0], [], []>} : vector<13x128xf32>, vector<13x128xf32>, vector<13x13xf32> -> vector<13x13xf32>
    %cst_34 = arith.constant 5.000000e-01 : f32
    %58 = vector.broadcast %cst_34 : f32 to vector<13x13xf32>
    %59 = arith.divf %57, %58 : vector<13x13xf32>
    %60 = math.exp %59 : vector<13x13xf32>
    %cst_35 = arith.constant dense<0.000000e+00> : vector<13xf32>
    %61 = vector.multi_reduction <add>, %60, %cst_35 [1] : vector<13x13xf32> to vector<13xf32>
    %62 = vector.shape_cast %61 : vector<13xf32> to vector<13x1xf32>
    %cst_36 = arith.constant 9.99999993E-9 : f32
    %63 = vector.broadcast %cst_36 : f32 to vector<13x1xf32>
    %64 = arith.addf %62, %63 : vector<13x1xf32>
    %65 = arith.divf %56, %64 : vector<13x1xf32>
    %cst_37 = arith.constant 9.99999993E-9 : f32
    %66 = vector.broadcast %cst_37 : f32 to vector<13x1xf32>
    %67 = arith.addf %65, %66 : vector<13x1xf32>
    %68 = math.log %67 : vector<13x1xf32>
    %cst_38 = arith.constant 0.000000e+00 : f32
    %69 = vector.broadcast %cst_38 : f32 to vector<13x1xf32>
    %70 = arith.subf %69, %68 : vector<13x1xf32>
    %71 = vector.shape_cast %70 : vector<13x1xf32> to vector<1x13x1xf32>
    %cst_39 = arith.constant dense<0.000000e+00> : vector<1xf32>
    %72 = vector.multi_reduction <add>, %71, %cst_39 [1, 2] : vector<1x13x1xf32> to vector<1xf32>
    %73 = vector.shape_cast %72 : vector<1xf32> to vector<1x1x1xf32>
    %74 = vector.extract %73[0, 0, 0] : f32 from vector<1x1x1xf32>
    %75 = vector.broadcast %74 : f32 to vector<1x1xf32>
    %76 = arith.addf %6, %75 : vector<1x1xf32>
    %77 = arith.mulf %40, %50 : vector<13x128xf32>
    %cst_40 = arith.constant dense<0.000000e+00> : vector<13xf32>
    %78 = vector.multi_reduction <add>, %77, %cst_40 [1] : vector<13x128xf32> to vector<13xf32>
    %79 = vector.shape_cast %78 : vector<13xf32> to vector<13x1xf32>
    %cst_41 = arith.constant 5.000000e-01 : f32
    %80 = vector.broadcast %cst_41 : f32 to vector<13x1xf32>
    %81 = arith.divf %79, %80 : vector<13x1xf32>
    %82 = math.exp %81 : vector<13x1xf32>
    %cst_42 = arith.constant dense<0.000000e+00> : vector<13x13xf32>
    %83 = tpu.matmul %50, %40, %cst_42 {dimension_numbers = #tpu.dot_dimension_numbers<[1], [1], [0], [0], [0, 0, 1, 0], [], []>} : vector<13x128xf32>, vector<13x128xf32>, vector<13x13xf32> -> vector<13x13xf32>
    %cst_43 = arith.constant 5.000000e-01 : f32
    %84 = vector.broadcast %cst_43 : f32 to vector<13x13xf32>
    %85 = arith.divf %83, %84 : vector<13x13xf32>
    %86 = math.exp %85 : vector<13x13xf32>
    %cst_44 = arith.constant dense<0.000000e+00> : vector<13xf32>
    %87 = vector.multi_reduction <add>, %86, %cst_44 [1] : vector<13x13xf32> to vector<13xf32>
    %88 = vector.shape_cast %87 : vector<13xf32> to vector<13x1xf32>
    %cst_45 = arith.constant 9.99999993E-9 : f32
    %89 = vector.broadcast %cst_45 : f32 to vector<13x1xf32>
    %90 = arith.addf %88, %89 : vector<13x1xf32>
    %91 = arith.divf %82, %90 : vector<13x1xf32>
    %cst_46 = arith.constant 9.99999993E-9 : f32
    %92 = vector.broadcast %cst_46 : f32 to vector<13x1xf32>
    %93 = arith.addf %91, %92 : vector<13x1xf32>
    %94 = math.log %93 : vector<13x1xf32>
    %cst_47 = arith.constant 0.000000e+00 : f32
    %95 = vector.broadcast %cst_47 : f32 to vector<13x1xf32>
    %96 = arith.subf %95, %94 : vector<13x1xf32>
    %97 = vector.shape_cast %96 : vector<13x1xf32> to vector<1x13x1xf32>
    %cst_48 = arith.constant dense<0.000000e+00> : vector<1xf32>
    %98 = vector.multi_reduction <add>, %97, %cst_48 [1, 2] : vector<1x13x1xf32> to vector<1xf32>
    %99 = vector.shape_cast %98 : vector<1xf32> to vector<1x1x1xf32>
    %100 = vector.extract %99[0, 0, 0] : f32 from vector<1x1x1xf32>
    %101 = vector.broadcast %100 : f32 to vector<1x1xf32>
    %102 = arith.addf %76, %101 : vector<1x1xf32>
    %c1 = arith.constant 1 : index
    %c0_49 = arith.constant 0 : index
    %c0_50 = arith.constant 0 : index
    %103 = vector.load %arg7[%c1, %c0_49, %c0_50] : memref<2x128x128xf32, #tpu.memory_space<vmem>>, vector<1x128x128xf32>
    %104 = vector.shape_cast %103 : vector<1x128x128xf32> to vector<128x128xf32>
    %c1_51 = arith.constant 1 : index
    %c0_52 = arith.constant 0 : index
    %c0_53 = arith.constant 0 : index
    %105 = vector.load %arg3[%c1_51, %c0_52, %c0_53] : memref<2x13x128xf32, #tpu.memory_space<vmem>>, vector<1x13x128xf32>
    %106 = vector.shape_cast %105 : vector<1x13x128xf32> to vector<13x128xf32>
    %107 = arith.mulf %106, %106 : vector<13x128xf32>
    %cst_54 = arith.constant dense<0.000000e+00> : vector<13xf32>
    %108 = vector.multi_reduction <add>, %107, %cst_54 [1] : vector<13x128xf32> to vector<13xf32>
    %109 = vector.shape_cast %108 : vector<13xf32> to vector<13x1xf32>
    %110 = math.sqrt %109 : vector<13x1xf32>
    %cst_55 = arith.constant 9.99999996E-13 : f32
    %111 = vector.broadcast %cst_55 : f32 to vector<13x1xf32>
    %112 = arith.maximumf %110, %111 : vector<13x1xf32>
    %113 = vector.broadcast %112 : vector<13x1xf32> to vector<13x128xf32>
    %114 = arith.divf %106, %113 : vector<13x128xf32>
    %cst_56 = arith.constant dense<0.000000e+00> : vector<13x128xf32>
    %115 = tpu.matmul %114, %104, %cst_56 {dimension_numbers = #tpu.dot_dimension_numbers<[1], [0], [0], [1], [0, 0, 1, 1], [], []>} : vector<13x128xf32>, vector<128x128xf32>, vector<13x128xf32> -> vector<13x128xf32>
    %c1_57 = arith.constant 1 : index
    %c0_58 = arith.constant 0 : index
    %c0_59 = arith.constant 0 : index
    %116 = vector.load %arg4[%c1_57, %c0_58, %c0_59] : memref<2x13x128xf32, #tpu.memory_space<vmem>>, vector<1x13x128xf32>
    %117 = vector.shape_cast %116 : vector<1x13x128xf32> to vector<13x128xf32>
    %118 = arith.mulf %117, %117 : vector<13x128xf32>
    %cst_60 = arith.constant dense<0.000000e+00> : vector<13xf32>
    %119 = vector.multi_reduction <add>, %118, %cst_60 [1] : vector<13x128xf32> to vector<13xf32>
    %120 = vector.shape_cast %119 : vector<13xf32> to vector<13x1xf32>
    %121 = math.sqrt %120 : vector<13x1xf32>
    %cst_61 = arith.constant 9.99999996E-13 : f32
    %122 = vector.broadcast %cst_61 : f32 to vector<13x1xf32>
    %123 = arith.maximumf %121, %122 : vector<13x1xf32>
    %124 = vector.broadcast %123 : vector<13x1xf32> to vector<13x128xf32>
    %125 = arith.divf %117, %124 : vector<13x128xf32>
    %c1_62 = arith.constant 1 : index
    %c0_63 = arith.constant 0 : index
    %c0_64 = arith.constant 0 : index
    %126 = vector.load %arg5[%c1_62, %c0_63, %c0_64] : memref<2x13x128xf32, #tpu.memory_space<vmem>>, vector<1x13x128xf32>
    %127 = vector.shape_cast %126 : vector<1x13x128xf32> to vector<13x128xf32>
    %128 = arith.mulf %127, %127 : vector<13x128xf32>
    %cst_65 = arith.constant dense<0.000000e+00> : vector<13xf32>
    %129 = vector.multi_reduction <add>, %128, %cst_65 [1] : vector<13x128xf32> to vector<13xf32>
    %130 = vector.shape_cast %129 : vector<13xf32> to vector<13x1xf32>
    %131 = math.sqrt %130 : vector<13x1xf32>
    %cst_66 = arith.constant 9.99999996E-13 : f32
    %132 = vector.broadcast %cst_66 : f32 to vector<13x1xf32>
    %133 = arith.maximumf %131, %132 : vector<13x1xf32>
    %134 = vector.broadcast %133 : vector<13x1xf32> to vector<13x128xf32>
    %135 = arith.divf %127, %134 : vector<13x128xf32>
    %cst_67 = arith.constant dense<0.000000e+00> : vector<13x128xf32>
    %136 = tpu.matmul %135, %104, %cst_67 {dimension_numbers = #tpu.dot_dimension_numbers<[1], [0], [0], [1], [0, 0, 1, 1], [], []>} : vector<13x128xf32>, vector<128x128xf32>, vector<13x128xf32> -> vector<13x128xf32>
    %c1_68 = arith.constant 1 : index
    %c0_69 = arith.constant 0 : index
    %c0_70 = arith.constant 0 : index
    %137 = vector.load %arg6[%c1_68, %c0_69, %c0_70] : memref<2x13x128xf32, #tpu.memory_space<vmem>>, vector<1x13x128xf32>
    %138 = vector.shape_cast %137 : vector<1x13x128xf32> to vector<13x128xf32>
    %139 = arith.mulf %138, %138 : vector<13x128xf32>
    %cst_71 = arith.constant dense<0.000000e+00> : vector<13xf32>
    %140 = vector.multi_reduction <add>, %139, %cst_71 [1] : vector<13x128xf32> to vector<13xf32>
    %141 = vector.shape_cast %140 : vector<13xf32> to vector<13x1xf32>
    %142 = math.sqrt %141 : vector<13x1xf32>
    %cst_72 = arith.constant 9.99999996E-13 : f32
    %143 = vector.broadcast %cst_72 : f32 to vector<13x1xf32>
    %144 = arith.maximumf %142, %143 : vector<13x1xf32>
    %145 = vector.broadcast %144 : vector<13x1xf32> to vector<13x128xf32>
    %146 = arith.divf %138, %145 : vector<13x128xf32>
    %147 = arith.mulf %115, %125 : vector<13x128xf32>
    %cst_73 = arith.constant dense<0.000000e+00> : vector<13xf32>
    %148 = vector.multi_reduction <add>, %147, %cst_73 [1] : vector<13x128xf32> to vector<13xf32>
    %149 = vector.shape_cast %148 : vector<13xf32> to vector<13x1xf32>
    %cst_74 = arith.constant 5.000000e-01 : f32
    %150 = vector.broadcast %cst_74 : f32 to vector<13x1xf32>
    %151 = arith.divf %149, %150 : vector<13x1xf32>
    %152 = math.exp %151 : vector<13x1xf32>
    %cst_75 = arith.constant dense<0.000000e+00> : vector<13x13xf32>
    %153 = tpu.matmul %125, %115, %cst_75 {dimension_numbers = #tpu.dot_dimension_numbers<[1], [1], [0], [0], [0, 0, 1, 0], [], []>} : vector<13x128xf32>, vector<13x128xf32>, vector<13x13xf32> -> vector<13x13xf32>
    %cst_76 = arith.constant 5.000000e-01 : f32
    %154 = vector.broadcast %cst_76 : f32 to vector<13x13xf32>
    %155 = arith.divf %153, %154 : vector<13x13xf32>
    %156 = math.exp %155 : vector<13x13xf32>
    %cst_77 = arith.constant dense<0.000000e+00> : vector<13xf32>
    %157 = vector.multi_reduction <add>, %156, %cst_77 [1] : vector<13x13xf32> to vector<13xf32>
    %158 = vector.shape_cast %157 : vector<13xf32> to vector<13x1xf32>
    %cst_78 = arith.constant 9.99999993E-9 : f32
    %159 = vector.broadcast %cst_78 : f32 to vector<13x1xf32>
    %160 = arith.addf %158, %159 : vector<13x1xf32>
    %161 = arith.divf %152, %160 : vector<13x1xf32>
    %cst_79 = arith.constant 9.99999993E-9 : f32
    %162 = vector.broadcast %cst_79 : f32 to vector<13x1xf32>
    %163 = arith.addf %161, %162 : vector<13x1xf32>
    %164 = math.log %163 : vector<13x1xf32>
    %cst_80 = arith.constant 0.000000e+00 : f32
    %165 = vector.broadcast %cst_80 : f32 to vector<13x1xf32>
    %166 = arith.subf %165, %164 : vector<13x1xf32>
    %167 = vector.shape_cast %166 : vector<13x1xf32> to vector<1x13x1xf32>
    %cst_81 = arith.constant dense<0.000000e+00> : vector<1xf32>
    %168 = vector.multi_reduction <add>, %167, %cst_81 [1, 2] : vector<1x13x1xf32> to vector<1xf32>
    %169 = vector.shape_cast %168 : vector<1xf32> to vector<1x1x1xf32>
    %170 = vector.extract %169[0, 0, 0] : f32 from vector<1x1x1xf32>
    %171 = vector.broadcast %170 : f32 to vector<1x1xf32>
    %172 = arith.addf %102, %171 : vector<1x1xf32>
    %173 = arith.mulf %136, %146 : vector<13x128xf32>
    %cst_82 = arith.constant dense<0.000000e+00> : vector<13xf32>
    %174 = vector.multi_reduction <add>, %173, %cst_82 [1] : vector<13x128xf32> to vector<13xf32>
    %175 = vector.shape_cast %174 : vector<13xf32> to vector<13x1xf32>
    %cst_83 = arith.constant 5.000000e-01 : f32
    %176 = vector.broadcast %cst_83 : f32 to vector<13x1xf32>
    %177 = arith.divf %175, %176 : vector<13x1xf32>
    %178 = math.exp %177 : vector<13x1xf32>
    %cst_84 = arith.constant dense<0.000000e+00> : vector<13x13xf32>
    %179 = tpu.matmul %146, %136, %cst_84 {dimension_numbers = #tpu.dot_dimension_numbers<[1], [1], [0], [0], [0, 0, 1, 0], [], []>} : vector<13x128xf32>, vector<13x128xf32>, vector<13x13xf32> -> vector<13x13xf32>
    %cst_85 = arith.constant 5.000000e-01 : f32
    %180 = vector.broadcast %cst_85 : f32 to vector<13x13xf32>
    %181 = arith.divf %179, %180 : vector<13x13xf32>
    %182 = math.exp %181 : vector<13x13xf32>
    %cst_86 = arith.constant dense<0.000000e+00> : vector<13xf32>
    %183 = vector.multi_reduction <add>, %182, %cst_86 [1] : vector<13x13xf32> to vector<13xf32>
    %184 = vector.shape_cast %183 : vector<13xf32> to vector<13x1xf32>
    %cst_87 = arith.constant 9.99999993E-9 : f32
    %185 = vector.broadcast %cst_87 : f32 to vector<13x1xf32>
    %186 = arith.addf %184, %185 : vector<13x1xf32>
    %187 = arith.divf %178, %186 : vector<13x1xf32>
    %cst_88 = arith.constant 9.99999993E-9 : f32
    %188 = vector.broadcast %cst_88 : f32 to vector<13x1xf32>
    %189 = arith.addf %187, %188 : vector<13x1xf32>
    %190 = math.log %189 : vector<13x1xf32>
    %cst_89 = arith.constant 0.000000e+00 : f32
    %191 = vector.broadcast %cst_89 : f32 to vector<13x1xf32>
    %192 = arith.subf %191, %190 : vector<13x1xf32>
    %193 = vector.shape_cast %192 : vector<13x1xf32> to vector<1x13x1xf32>
    %cst_90 = arith.constant dense<0.000000e+00> : vector<1xf32>
    %194 = vector.multi_reduction <add>, %193, %cst_90 [1, 2] : vector<1x13x1xf32> to vector<1xf32>
    %195 = vector.shape_cast %194 : vector<1xf32> to vector<1x1x1xf32>
    %196 = vector.extract %195[0, 0, 0] : f32 from vector<1x1x1xf32>
    %197 = vector.broadcast %196 : f32 to vector<1x1xf32>
    %198 = arith.addf %172, %197 : vector<1x1xf32>
    %c0_91 = arith.constant 0 : index
    %c0_92 = arith.constant 0 : index
    %199 = vector.load %arg13[%c0_91, %c0_92] : memref<1x1xf32, #tpu.memory_space<vmem>>, vector<1x1xf32>
    tpu.vector_store %arg13[%c0_91, %c0_92], %198 {strides = array<i32>} : memref<1x1xf32, #tpu.memory_space<vmem>>, vector<1x1xf32>,
    %c0_93 = arith.constant 0 : index
    %c0_94 = arith.constant 0 : index
    %200 = vector.load %arg8[%c0_93, %c0_94] : memref<24x128xf32, #tpu.memory_space<vmem>>, vector<24x128xf32>
    %201 = arith.mulf %200, %200 : vector<24x128xf32>
    %202 = vector.shape_cast %201 : vector<24x128xf32> to vector<1x24x128xf32>
    %cst_95 = arith.constant dense<0.000000e+00> : vector<1xf32>
    %203 = vector.multi_reduction <add>, %202, %cst_95 [1, 2] : vector<1x24x128xf32> to vector<1xf32>
    %204 = vector.shape_cast %203 : vector<1xf32> to vector<1x1x1xf32>
    %205 = vector.extract %204[0, 0, 0] : f32 from vector<1x1x1xf32>
    %206 = vector.broadcast %205 : f32 to vector<1x1xf32>
    %c0_96 = arith.constant 0 : index
    %c0_97 = arith.constant 0 : index
    %207 = vector.load %arg9[%c0_96, %c0_97] : memref<16x128xf32, #tpu.memory_space<vmem>>, vector<16x128xf32>
    %208 = arith.mulf %207, %207 : vector<16x128xf32>
    %209 = vector.shape_cast %208 : vector<16x128xf32> to vector<1x16x128xf32>
    %cst_98 = arith.constant dense<0.000000e+00> : vector<1xf32>
    %210 = vector.multi_reduction <add>, %209, %cst_98 [1, 2] : vector<1x16x128xf32> to vector<1xf32>
    %211 = vector.shape_cast %210 : vector<1xf32> to vector<1x1x1xf32>
    %212 = vector.extract %211[0, 0, 0] : f32 from vector<1x1x1xf32>
    %213 = vector.broadcast %212 : f32 to vector<1x1xf32>
    %214 = arith.addf %206, %213 : vector<1x1xf32>
    %c0_99 = arith.constant 0 : index
    %c0_100 = arith.constant 0 : index
    %215 = vector.load %arg10[%c0_99, %c0_100] : memref<128x128xf32, #tpu.memory_space<vmem>>, vector<128x128xf32>
    %216 = arith.mulf %215, %215 : vector<128x128xf32>
    %217 = vector.shape_cast %216 : vector<128x128xf32> to vector<1x128x128xf32>
    %cst_101 = arith.constant dense<0.000000e+00> : vector<1xf32>
    %218 = vector.multi_reduction <add>, %217, %cst_101 [1, 2] : vector<1x128x128xf32> to vector<1xf32>
    %219 = vector.shape_cast %218 : vector<1xf32> to vector<1x1x1xf32>
    %220 = vector.extract %219[0, 0, 0] : f32 from vector<1x1x1xf32>
    %221 = vector.broadcast %220 : f32 to vector<1x1xf32>
    %222 = arith.addf %214, %221 : vector<1x1xf32>
    %c0_102 = arith.constant 0 : index
    %c0_103 = arith.constant 0 : index
    %223 = vector.load %arg11[%c0_102, %c0_103] : memref<128x128xf32, #tpu.memory_space<vmem>>, vector<128x128xf32>
    %224 = arith.mulf %223, %223 : vector<128x128xf32>
    %225 = vector.shape_cast %224 : vector<128x128xf32> to vector<1x128x128xf32>
    %cst_104 = arith.constant dense<0.000000e+00> : vector<1xf32>
    %226 = vector.multi_reduction <add>, %225, %cst_104 [1, 2] : vector<1x128x128xf32> to vector<1xf32>
    %227 = vector.shape_cast %226 : vector<1xf32> to vector<1x1x1xf32>
    %228 = vector.extract %227[0, 0, 0] : f32 from vector<1x1x1xf32>
    %229 = vector.broadcast %228 : f32 to vector<1x1xf32>
    %230 = arith.addf %222, %229 : vector<1x1xf32>
    %c0_105 = arith.constant 0 : index
    %c0_106 = arith.constant 0 : index
    %231 = vector.load %arg14[%c0_105, %c0_106] : memref<1x1xf32, #tpu.memory_space<vmem>>, vector<1x1xf32>
    tpu.vector_store %arg14[%c0_105, %c0_106], %230 {strides = array<i32>} : memref<1x1xf32, #tpu.memory_space<vmem>>, vector<1x1xf32>,
    return
  }
  func.func @transform_0(%arg0: i32) -> (i32, i32) {
    %c0_i32 = arith.constant 0 : i32
    %c0_i32_0 = arith.constant 0 : i32
    %c0_i32_1 = arith.constant 0 : i32
    return %c0_i32, %c0_i32_0 : i32, i32
  }
  func.func @transform_1(%arg0: i32) -> (i32, i32) {
    %c0_i32 = arith.constant 0 : i32
    %c0_i32_0 = arith.constant 0 : i32
    %c0_i32_1 = arith.constant 0 : i32
    return %c0_i32, %c0_i32_0 : i32, i32
  }
  func.func @transform_2(%arg0: i32) -> (i32, i32, i32) {
    %c0_i32 = arith.constant 0 : i32
    %c0_i32_0 = arith.constant 0 : i32
    %c0_i32_1 = arith.constant 0 : i32
    %c0_i32_2 = arith.constant 0 : i32
    return %c0_i32, %c0_i32_0, %c0_i32_1 : i32, i32, i32
  }
  func.func @transform_3(%arg0: i32) -> (i32, i32, i32) {
    %c0_i32 = arith.constant 0 : i32
    %c0_i32_0 = arith.constant 0 : i32
    %c0_i32_1 = arith.constant 0 : i32
    %c0_i32_2 = arith.constant 0 : i32
    return %c0_i32, %c0_i32_0, %c0_i32_1 : i32, i32, i32
  }
  func.func @transform_4(%arg0: i32) -> (i32, i32, i32) {
    %c0_i32 = arith.constant 0 : i32
    %c0_i32_0 = arith.constant 0 : i32
    %c0_i32_1 = arith.constant 0 : i32
    %c0_i32_2 = arith.constant 0 : i32
    return %c0_i32, %c0_i32_0, %c0_i32_1 : i32, i32, i32
  }
  func.func @transform_5(%arg0: i32) -> (i32, i32, i32) {
    %c0_i32 = arith.constant 0 : i32
    %c0_i32_0 = arith.constant 0 : i32
    %c0_i32_1 = arith.constant 0 : i32
    %c0_i32_2 = arith.constant 0 : i32
    return %c0_i32, %c0_i32_0, %c0_i32_1 : i32, i32, i32
  }
  func.func @transform_6(%arg0: i32) -> (i32, i32, i32) {
    %c0_i32 = arith.constant 0 : i32
    %c0_i32_0 = arith.constant 0 : i32
    %c0_i32_1 = arith.constant 0 : i32
    %c0_i32_2 = arith.constant 0 : i32
    return %c0_i32, %c0_i32_0, %c0_i32_1 : i32, i32, i32
  }
  func.func @transform_7(%arg0: i32) -> (i32, i32) {
    %c0_i32 = arith.constant 0 : i32
    %c0_i32_0 = arith.constant 0 : i32
    %c0_i32_1 = arith.constant 0 : i32
    return %c0_i32, %c0_i32_0 : i32, i32
  }
  func.func @transform_8(%arg0: i32) -> (i32, i32) {
    %c0_i32 = arith.constant 0 : i32
    %c0_i32_0 = arith.constant 0 : i32
    %c0_i32_1 = arith.constant 0 : i32
    return %c0_i32, %c0_i32_0 : i32, i32
  }
  func.func @transform_9(%arg0: i32) -> (i32, i32) {
    %c0_i32 = arith.constant 0 : i32
    %c0_i32_0 = arith.constant 0 : i32
    %c0_i32_1 = arith.constant 0 : i32
    return %c0_i32, %c0_i32_0 : i32, i32
  }
  func.func @transform_10(%arg0: i32) -> (i32, i32) {
    %c0_i32 = arith.constant 0 : i32
    %c0_i32_0 = arith.constant 0 : i32
    %c0_i32_1 = arith.constant 0 : i32
    return %c0_i32, %c0_i32_0 : i32, i32
  }
  func.func @transform_11(%arg0: i32) -> (i32, i32) {
    %c0_i32 = arith.constant 0 : i32
    %c0_i32_0 = arith.constant 0 : i32
    %c0_i32_1 = arith.constant 0 : i32
    return %c0_i32, %c0_i32_0 : i32, i32
  }
  func.func @transform_12(%arg0: i32) -> (i32, i32) {
    %c0_i32 = arith.constant 0 : i32
    %c0_i32_0 = arith.constant 0 : i32
    %c0_i32_1 = arith.constant 0 : i32
    return %c0_i32, %c0_i32_0 : i32, i32
  }
  func.func @transform_13(%arg0: i32) -> (i32, i32) {
    %c0_i32 = arith.constant 0 : i32
    %c0_i32_0 = arith.constant 0 : i32
    %c0_i32_1 = arith.constant 0 : i32
    return %c0_i32, %c0_i32_0 : i32, i32
  }
}

</mosaic_0001>

<bundles_post_ra>
// kernel: hccf_forward.3
= control target key start
LH: loop header
LB: loop body
LE: loop exit
PB: predicated region body
PF: predicated region fallthrough
CT: control target
= control target key end

     0   :  { %19 = vsyncpa [#allocation3], 0  ;;  %vm78_vm0 = vcmask 1044480   ;;  %s2458_s0 = inlined_call_operand.vmem [shape: f32[16,128], index: 0, kind: input, shape index: {}]   ;;  %s2459_s1 = inlined_call_operand.vmem [shape: f32[16,128], index: 1, kind: input, shape index: {}]   ;;  %s2460_s2 = inlined_call_operand.vmem [shape: f32[2,13,128], index: 2, kind: input, shape index: {}]   ;;  %s2461_s3 = inlined_call_operand.vmem [shape: f32[2,13,128], index: 3, kind: input, shape index: {}]   ;;  %s2462_s4 = inlined_call_operand.vmem [shape: f32[2,13,128], index: 4, kind: input, shape index: {}]   ;;  %s2463_s5 = inlined_call_operand.vmem [shape: f32[2,13,128], index: 5, kind: input, shape index: {}]   ;;  %s2464_s6 = inlined_call_operand.vmem [shape: f32[2,128,128], index: 6, kind: input, shape index: {}]   ;;  %s2465_s7 = inlined_call_operand.vmem [shape: f32[24,128], index: 7, kind: input, shape index: {}]   ;;  %s2466_s8 = inlined_call_operand.vmem [shape: f32[16,128], index: 8, kind: input, shape index: {}]   ;;  %s2467_s9 = inlined_call_operand.vmem [shape: f32[128,128], index: 9, kind: input, shape index: {}]   ;;  %s2468_s10 = inlined_call_operand.vmem [shape: f32[128,128], index: 10, kind: input, shape index: {}]   ;;  %s2469_s11 = inlined_call_operand.vmem [shape: f32[16,1], index: 11, kind: output, shape index: {0}]   ;;  %s2470_s12 = inlined_call_operand.hbm [shape: f32[1,1], index: 12, kind: output, shape index: {1}]   ;;  %s2471_s13 = inlined_call_operand.hbm [shape: f32[1,1], index: 13, kind: output, shape index: {2}]  }
   0x1   :  { %v2020_v0 = vld [vmem:[%s2460_s2] sm:$0xff]  ;;  %v2025_v1 = vld [vmem:[%s2460_s2 + $0x8] sm:$0x1f] }
   0x2   :  { %v2030_v2 = vld [vmem:[%s2462_s4] sm:$0xff]  ;;  %v74_v3 = vmul.f32 %v2020_v0, %v2020_v0  ;;  %v75_v4 = vmul.f32 %v2025_v1, %v2025_v1  ;;  %v2039_v5 = vld [vmem:[%s2462_s4 + $0x8] sm:$0x1f] }
   0x3   :  { %20 = vsyncpa [#allocation5], 0  ;;  %v209_v6 = vmul.f32 %v2039_v5, %v2039_v5  ;;  %v208_v8 = vmul.f32 %v2030_v2, %v2030_v2  ;;  %v56_v10 = vld [vmem:[%s2464_s6] sm:$0xff]  ;;  %v57_v11 = vld [vmem:[%s2464_s6 + $0x8] sm:$0xff]  ;;  %s1946_s23 = smov [#allocation4]  }
   0x4   :  { %76 = vadd.xlane.f32.xlu0 %v74_v3  ;;  %v79_v7 = vsel %vm78_vm0, %v75_v4, 0.0  ;;  %v1607_v12 = vpack.c.bf16 %v57_v11, %v56_v10  ;;  %v58_v13 = vld [vmem:[%s2464_s6 + $0x10] sm:$0xff]  ;;  %v59_v14 = vld [vmem:[%s2464_s6 + $0x18] sm:$0xff]  ;;  %v60_v16 = vld [vmem:[%s2464_s6 + $0x20] sm:$0xff]  ;;  %s1313_s24 = sshll.u32 %s1946_s23, 4  ;;  %s1314_s24 = int_to_ptr.vmem [resolvable:$true] %s1313_s24 }
   0x5   :  { %80 = vadd.xlane.f32.xlu1 %v79_v7  ;;  %v212_v9 = vsel %vm78_vm0, %v209_v6, 0.0  ;;  %v1611_v15 = vpack.c.bf16 %v59_v14, %v58_v13  ;;  %v61_v17 = vld [vmem:[%s2464_s6 + $0x28] sm:$0xff]  ;;  %v62_v19 = vld [vmem:[%s2464_s6 + $0x30] sm:$0xff]  ;;  %v63_v20 = vld [vmem:[%s2464_s6 + $0x38] sm:$0xff] }
   0x6   :  { %1608 = vmatprep.subr.bf16.mxu0 %v1607_v12  ;;  %1640 = vmatprep.subr.bf16.mxu1 %v1607_v12  ;;  %v1615_v18 = vpack.c.bf16 %v61_v17, %v60_v16  ;;  %v1619_v21 = vpack.c.bf16 %v63_v20, %v62_v19  ;;  %v64_v22 = vld [vmem:[%s2464_s6 + $0x40] sm:$0xff]  ;;  %v65_v23 = vld [vmem:[%s2464_s6 + $0x48] sm:$0xff]  ;;  %v66_v25 = vld [vmem:[%s2464_s6 + $0x50] sm:$0xff] }
   0x7   :  { %1610 = vmatpush3.bf16.msra.mxu0 %v1607_v12  ;;  %1642 = vmatpush3.bf16.msra.mxu1 %v1607_v12  ;;  %v1623_v24 = vpack.c.bf16 %v65_v23, %v64_v22  ;;  %v67_v26 = vld [vmem:[%s2464_s6 + $0x58] sm:$0xff]  ;;  %v68_v28 = vld [vmem:[%s2464_s6 + $0x60] sm:$0xff]  ;;  %v69_v29 = vld [vmem:[%s2464_s6 + $0x68] sm:$0xff] }
   0x8   :  { %210 = vadd.xlane.f32.xlu0 %v208_v8  ;;  %1612 = vmatprep.subr.bf16.mxu0 %v1611_v15  ;;  %v1627_v27 = vpack.c.bf16 %v67_v26, %v66_v25  ;;  %v1631_v30 = vpack.c.bf16 %v69_v29, %v68_v28  ;;  %v70_v31 = vld [vmem:[%s2464_s6 + $0x70] sm:$0xff]  ;;  %v71_v32 = vld [vmem:[%s2464_s6 + $0x78] sm:$0xff]  ;;  %v2098_v34 = vld [vmem:[%s2461_s3] sm:$0xff] }
   0x9   :  { %213 = vadd.xlane.f32.xlu1 %v212_v9  ;;  %1644 = vmatprep.subr.bf16.mxu1 %v1611_v15  ;;  %v1635_v33 = vpack.c.bf16 %v71_v32, %v70_v31  ;;  %v2103_v35 = vld [vmem:[%s2463_s5] sm:$0xff]  ;;  %v2108_v36 = vld [vmem:[%s2461_s3 + $0x8] sm:$0x1f]  ;;  %v179_v37 = vmul.f32 %v2098_v34, %v2098_v34  ;;  %v2128_v44 = vld [vmem:[%s2460_s2 + $0x10] sm:$0xff] }
   0xa   :  { %v312_v38 = vmul.f32 %v2103_v35, %v2103_v35  ;;  %v180_v39 = vmul.f32 %v2108_v36, %v2108_v36  ;;  %v2119_v40 = vld [vmem:[%s2463_s5 + $0x8] sm:$0x1f]  ;;  %v2133_v45 = vld [vmem:[%s2462_s4 + $0x10] sm:$0xff]  ;;  %v2138_v46 = vld [vmem:[%s2460_s2 + $0x18] sm:$0x1f]  ;;  %v619_v48 = vmul.f32 %v2128_v44, %v2128_v44 }
   0xb   :  { %1614 = vmatpush3.bf16.msra.mxu0 %v1611_v15  ;;  %1646 = vmatpush3.bf16.msra.mxu1 %v1611_v15  ;;  %v313_v41 = vmul.f32 %v2119_v40, %v2119_v40  ;;  %v2143_v47 = vld [vmem:[%s2462_s4 + $0x18] sm:$0x1f]  ;;  %v754_v49 = vmul.f32 %v2133_v45, %v2133_v45  ;;  %v620_v50 = vmul.f32 %v2138_v46, %v2138_v46  ;;  %v2158_v54 = vld [vmem:[%s2463_s5 + $0x10] sm:$0xff] }
   0xc   :  { %1616 = vmatprep.subr.bf16.mxu0 %v1615_v18  ;;  %1648 = vmatprep.subr.bf16.mxu1 %v1615_v18  ;;  %v183_v42 = vsel %vm78_vm0, %v180_v39, 0.0  ;;  %v755_v51 = vmul.f32 %v2143_v47, %v2143_v47  ;;  %v2163_v55 = vld [vmem:[%s2461_s3 + $0x10] sm:$0xff]  ;;  %v859_v56 = vmul.f32 %v2158_v54, %v2158_v54  ;;  %v2172_v58 = vld [vmem:[%s2463_s5 + $0x18] sm:$0x1f] }
   0xd   :  { %181 = vadd.xlane.f32.xlu0 %v179_v37  ;;  %314 = vadd.xlane.f32.xlu1 %v312_v38  ;;  %v316_v43 = vsel %vm78_vm0, %v313_v41, 0.0  ;;  %v623_v52 = vsel %vm78_vm0, %v620_v50, 0.0  ;;  %v724_v57 = vmul.f32 %v2163_v55, %v2163_v55  ;;  %v2177_v59 = vld [vmem:[%s2461_s3 + $0x18] sm:$0x1f]  ;;  %v860_v60 = vmul.f32 %v2172_v58, %v2172_v58 }
   0xe   :  { %v758_v53 = vsel %vm78_vm0, %v755_v51, 0.0  ;;  %v725_v61 = vmul.f32 %v2177_v59, %v2177_v59 }
   0xf   :  { %1618 = vmatpush3.bf16.msra.mxu0 %v1615_v18  ;;  %1650 = vmatpush3.bf16.msra.mxu1 %v1615_v18  ;;  %v863_v62 = vsel %vm78_vm0, %v860_v60, 0.0 }
  0x10   :  { %1620 = vmatprep.subr.bf16.mxu0 %v1619_v21  ;;  %1652 = vmatprep.subr.bf16.mxu1 %v1619_v21  ;;  %v728_v63 = vsel %vm78_vm0, %v725_v61, 0.0 }
  0x11   :  { %184 = vadd.xlane.f32.xlu0 %v183_v42  ;;  %317 = vadd.xlane.f32.xlu1 %v316_v43 }
  0x13   :  { %1622 = vmatpush3.bf16.msra.mxu0 %v1619_v21  ;;  %1654 = vmatpush3.bf16.msra.mxu1 %v1619_v21 }
  0x14   :  { %1624 = vmatprep.subr.bf16.mxu0 %v1623_v24  ;;  %1656 = vmatprep.subr.bf16.mxu1 %v1623_v24 }
  0x15   :  { %621 = vadd.xlane.f32.xlu0 %v619_v48  ;;  %756 = vadd.xlane.f32.xlu1 %v754_v49 }
  0x17   :  { %1626 = vmatpush3.bf16.msra.mxu0 %v1623_v24  ;;  %1658 = vmatpush3.bf16.msra.mxu1 %v1623_v24 }
  0x18   :  { %1628 = vmatprep.subr.bf16.mxu0 %v1627_v27  ;;  %1660 = vmatprep.subr.bf16.mxu1 %v1627_v27 }
  0x19   :  { %624 = vadd.xlane.f32.xlu0 %v623_v52  ;;  %759 = vadd.xlane.f32.xlu1 %v758_v53 }
  0x1b   :  { %1630 = vmatpush3.bf16.msra.mxu0 %v1627_v27  ;;  %1662 = vmatpush3.bf16.msra.mxu1 %v1627_v27 }
  0x1c   :  { %1632 = vmatprep.subr.bf16.mxu0 %v1631_v30  ;;  %1664 = vmatprep.subr.bf16.mxu1 %v1631_v30 }
  0x1d   :  { %861 = vadd.xlane.f32.xlu1 %v859_v56  ;;  %726 = vadd.xlane.f32.xlu0 %v724_v57 }
  0x1f   :  { %1634 = vmatpush3.bf16.msra.mxu0 %v1631_v30  ;;  %1666 = vmatpush3.bf16.msra.mxu1 %v1631_v30 }
  0x20   :  { %1636 = vmatprep.subr.bf16.mxu0 %v1635_v33  ;;  %1668 = vmatprep.subr.bf16.mxu1 %v1635_v33 }
  0x21   :  { %864 = vadd.xlane.f32.xlu1 %v863_v62  ;;  %729 = vadd.xlane.f32.xlu0 %v728_v63 }
  0x23   :  { %1638 = vmatpush3.bf16.msra.mxu0 %v1635_v33  ;;  %1670 = vmatpush3.bf16.msra.mxu1 %v1635_v33 }
  0x91   :  { %v77_v3 = vpop.xlane.xlu0 %76 }
  0x92   :  { %1769 = vrsqrt.f32 %v77_v3  ;;  %v81_v4 = vpop.xlane.xlu1 %80  ;;  %vm84_vm1 = vcmp.eq.f32.partialorder %v77_v3, inf  ;;  %v87_v11 = vand.u32 2147483648, %v77_v3  ;;  %vm86_vm2 = vcmp.eq.f32.partialorder %v77_v3, 0.0 }
  0x93   :  { %1771 = vrsqrt.f32 %v81_v4  ;;  %vm91_vm3 = vcmp.eq.f32.partialorder %v81_v4, inf  ;;  %v94_v14 = vand.u32 2147483648, %v81_v4  ;;  %vm93_vm4 = vcmp.eq.f32.partialorder %v81_v4, 0.0 }
  0x95   :  { %v211_v6 = vpop.xlane.xlu0 %210 }
  0x96   :  { %1773 = vrsqrt.f32 %v211_v6  ;;  %v214_v7 = vpop.xlane.xlu1 %213  ;;  %vm217_vm5 = vcmp.eq.f32.partialorder %v211_v6, inf  ;;  %vm219_vm6 = vcmp.eq.f32.partialorder %v211_v6, 0.0  ;;  %v220_v23 = vand.u32 2147483648, %v211_v6 }
  0x97   :  { %1775 = vrsqrt.f32 %v214_v7  ;;  %vm224_vm7 = vcmp.eq.f32.partialorder %v214_v7, inf  ;;  %v227_v26 = vand.u32 2147483648, %v214_v7  ;;  %vm226_vm8 = vcmp.eq.f32.partialorder %v214_v7, 0.0 }
  0x9a   :  { %v182_v48 = vpop.xlane.xlu0 %181  ;;  %v315_v53 = vpop.xlane.xlu1 %314 }
  0x9b   :  { %vm188_vm9 = vcmp.eq.f32.partialorder %v182_v48, inf  ;;  %v191_v50 = vand.u32 2147483648, %v182_v48  ;;  %vm190_vm10 = vcmp.eq.f32.partialorder %v182_v48, 0.0  ;;  %vm321_vm11 = vcmp.eq.f32.partialorder %v315_v53, inf }
  0x9c   :  { %v1770_v8 = vpop.eup %1769  ;;  %v324_v60 = vand.u32 2147483648, %v315_v53  ;;  %vm323_vm12 = vcmp.eq.f32.partialorder %v315_v53, 0.0 }
  0x9d   :  { %v1772_v9 = vpop.eup %1771  ;;  %v83_v10 = vmul.f32 %v1770_v8, %v77_v3 }
  0x9e   :  { %v90_v12 = vmul.f32 %v1772_v9, %v81_v4 }
  0x9f   :  { %v85_v13 = vsel %vm84_vm1, %v77_v3, %v83_v10 }
  0xa0   :  { %v1774_v15 = vpop.eup %1773  ;;  %v92_v16 = vsel %vm91_vm3, %v81_v4, %v90_v12  ;;  %v88_v17 = vsel %vm86_vm2, %v87_v11, %v85_v13 }
  0xa1   :  { %v1776_v18 = vpop.eup %1775  ;;  %v95_v19 = vsel %vm93_vm4, %v94_v14, %v92_v16  ;;  %v216_v20 = vmul.f32 %v1774_v15, %v211_v6  ;;  %v96_v21 = vmax.f32 %v88_v17, 1e-12 }
  0xa2   :  { %v97_v22 = vmax.f32 %v95_v19, 1e-12  ;;  %v223_v24 = vmul.f32 %v1776_v18, %v214_v7 }
  0xa3   :  { %v218_v25 = vsel %vm217_vm5, %v211_v6, %v216_v20  ;;  %1777 = vrcp.f32 %v96_v21  ;;  %v185_v6 = vpop.xlane.xlu0 %184 }
  0xa4   :  { %1779 = vrcp.f32 %v97_v22  ;;  %v225_v27 = vsel %vm224_vm7, %v214_v7, %v223_v24  ;;  %v221_v28 = vsel %vm219_vm6, %v220_v23, %v218_v25  ;;  %vm195_vm13 = vcmp.eq.f32.partialorder %v185_v6, inf }
  0xa5   :  { %v228_v29 = vsel %vm226_vm8, %v227_v26, %v225_v27  ;;  %v229_v30 = vmax.f32 %v221_v28, 1e-12  ;;  %v198_v12 = vand.u32 2147483648, %v185_v6  ;;  %vm197_vm14 = vcmp.eq.f32.partialorder %v185_v6, 0.0 }
  0xa6   :  { %v230_v31 = vmax.f32 %v228_v29, 1e-12 }
  0xa7   :  { %1781 = vrcp.f32 %v229_v30  ;;  %v622_v7 = vpop.xlane.xlu0 %621 }
  0xa8   :  { %1783 = vrcp.f32 %v230_v31  ;;  %vm628_vm2 = vcmp.eq.f32.partialorder %v622_v7, inf  ;;  %v631_v23 = vand.u32 2147483648, %v622_v7  ;;  %vm630_vm3 = vcmp.eq.f32.partialorder %v622_v7, 0.0 }
  0xa9   :  { %1785 = vrsqrt.f32 %v182_v48 }
  0xad   :  { %v1778_v32 = vpop.eup %1777 }
  0xae   :  { %v1780_v33 = vpop.eup %1779  ;;  %v99_v37 = vmul.f32 %v1778_v32, %v2020_v0 }
  0xaf   :  { %v101_v38 = vmul.f32 %v1780_v33, %v2025_v1 }
  0xb0   :  { %1471 = vmatprep.mubr.f32.mxu0 %v99_v37 }
  0xb1   :  { %v1782_v39 = vpop.eup %1781  ;;  %1472 = vmatmul.mubr.f32.vlgmr.msra.gmra.mrb[0].mxu0 %v101_v38  ;;  %v2198_v38 = vpop.xlane.xlu0 %624 }
  0xb2   :  { %v1784_v41 = vpop.eup %1783  ;;  %v232_v42 = vmul.f32 %v1782_v39, %v2030_v2  ;;  %v1327_v39 = vld [vmem:[%s2464_s6 + $0x80] sm:$0xff]  ;;  %vm635_vm6 = vcmp.eq.f32.partialorder %v2198_v38, inf  ;;  %vm637_vm7 = vcmp.eq.f32.partialorder %v2198_v38, 0.0 }
  0xb3   :  { %v234_v43 = vmul.f32 %v1784_v41, %v2039_v5  ;;  %v1786_v49 = vpop.eup %1785  ;;  %v1328_v41 = vld [vmem:[%s2464_s6 + $0x88] sm:$0xff] }
  0xb4   :  { %1506 = vmatprep.mubr.f32.mxu1 %v232_v42  ;;  %v187_v51 = vmul.f32 %v1786_v49, %v182_v48 }
  0xb5   :  { %1507 = vmatmul.mubr.f32.vlgmr.msra.gmra.mrb[0].mxu1 %v234_v43 }
  0xb6   :  { %v189_v0 = vsel %vm188_vm9, %v182_v48, %v187_v51  ;;  %v1679_v51 = vpack.c.bf16 %v1328_v41, %v1327_v39  ;;  %v727_v41 = vpop.xlane.xlu0 %726 }
  0xb7   :  { %v192_v52 = vsel %vm190_vm10, %v191_v50, %v189_v0 }
  0xb8   :  { %v200_v1 = vmax.f32 %v192_v52, 1e-12 }
  0xba   :  { %1787 = vrcp.f32 %v200_v1 }
  0xbb   :  { %1789 = vrsqrt.f32 %v315_v53 }
  0xc4   :  { %v1788_v56 = vpop.eup %1787 }
  0xc5   :  { %v2190_v2 = vmul.f32 %v1788_v56, %v2098_v34  ;;  %v1790_v5 = vpop.eup %1789  ;;  %v318_v34 = vpop.xlane.xlu1 %317 }
  0xc6   :  { %v320_v57 = vmul.f32 %v1790_v5, %v315_v53  ;;  %vm328_vm15 = vcmp.eq.f32.partialorder %v318_v34, inf  ;;  %v331_v15 = vand.u32 2147483648, %v318_v34  ;;  %vm330_vm1 = vcmp.eq.f32.partialorder %v318_v34, 0.0 }
  0xc7   :  { %1513 = vmatprep.mubr.f32.mxu0 %v2190_v2 }
  0xc8   :  { %v322_v61 = vsel %vm321_vm11, %v315_v53, %v320_v57  ;;  %vm733_vm11 = vcmp.eq.f32.partialorder %v727_v41, inf }
  0xc9   :  { %v325_v62 = vsel %vm323_vm12, %v324_v60, %v322_v61  ;;  %v757_v11 = vpop.xlane.xlu1 %756  ;;  %v1329_v60 = vld [vmem:[%s2464_s6 + $0x90] sm:$0xff]  ;;  %v1330_v61 = vld [vmem:[%s2464_s6 + $0x98] sm:$0xff] }
  0xca   :  { %v333_v63 = vmax.f32 %v325_v62, 1e-12  ;;  %vm763_vm4 = vcmp.eq.f32.partialorder %v757_v11, inf  ;;  %v766_v27 = vand.u32 2147483648, %v757_v11  ;;  %vm765_vm5 = vcmp.eq.f32.partialorder %v757_v11, 0.0 }
  0xcc   :  { %1791 = vrcp.f32 %v333_v63  ;;  %v1683_v63 = vpack.c.bf16 %v1330_v61, %v1329_v60 }
  0xcd   :  { %1793 = vrsqrt.f32 %v185_v6  ;;  %v2209_v0 = vpop.xlane.xlu1 %759 }
  0xce   :  { %1795 = vrsqrt.f32 %v318_v34  ;;  %vm770_vm8 = vcmp.eq.f32.partialorder %v2209_v0, inf  ;;  %vm772_vm9 = vcmp.eq.f32.partialorder %v2209_v0, 0.0 }
  0xcf   :  { %1797 = vrsqrt.f32 %v622_v7 }
  0xd0   :  { %1799 = vrsqrt.f32 %v757_v11 }
  0xd1   :  { %v862_v39 = vpop.xlane.xlu1 %861 }
  0xd2   :  { %vm868_vm10 = vcmp.eq.f32.partialorder %v862_v39, inf  ;;  %vm870_vm12 = vcmp.eq.f32.partialorder %v862_v39, 0.0 }
  0xd6   :  { %v1792_v3 = vpop.eup %1791 }
  0xd7   :  { %v2194_v4 = vmul.f32 %v1792_v3, %v2103_v35  ;;  %v1794_v8 = vpop.eup %1793 }
  0xd8   :  { %v194_v9 = vmul.f32 %v1794_v8, %v185_v6  ;;  %v1796_v10 = vpop.eup %1795 }
  0xd9   :  { %1520 = vmatprep.mubr.f32.mxu1 %v2194_v4  ;;  %v327_v14 = vmul.f32 %v1796_v10, %v318_v34  ;;  %v1798_v17 = vpop.eup %1797 }
  0xda   :  { %v196_v13 = vsel %vm195_vm13, %v185_v6, %v194_v9  ;;  %v627_v20 = vmul.f32 %v1798_v17, %v622_v7  ;;  %v1800_v22 = vpop.eup %1799  ;;  %v1332_v6 = vld [vmem:[%s2464_s6 + $0xa8] sm:$0xff]  ;;  %v1334_v9 = vld [vmem:[%s2464_s6 + $0xb8] sm:$0xff]  ;;  %v773_v17 = vand.u32 2147483648, %v2209_v0  ;;  %vm735_vm13 = vcmp.eq.f32.partialorder %v727_v41, 0.0 }
  0xdb   :  { %v199_v35 = vsel %vm197_vm14, %v198_v12, %v196_v13  ;;  %v329_v16 = vsel %vm328_vm15, %v318_v34, %v327_v14  ;;  %v762_v25 = vmul.f32 %v1800_v22, %v757_v11  ;;  %v638_v12 = vand.u32 2147483648, %v2198_v38 }
  0xdc   :  { %v201_v18 = vmax.f32 %v199_v35, 1e-12  ;;  %v332_v19 = vsel %vm330_vm1, %v331_v15, %v329_v16  ;;  %v629_v24 = vsel %vm628_vm2, %v622_v7, %v627_v20  ;;  %v1336_v15 = vld [vmem:[%s2464_s6 + $0xc8] sm:$0xff]  ;;  %v1337_v20 = vld [vmem:[%s2464_s6 + $0xd0] sm:$0xff] }
  0xdd   :  { %v334_v21 = vmax.f32 %v332_v19, 1e-12  ;;  %v632_v26 = vsel %vm630_vm3, %v631_v23, %v629_v24  ;;  %v764_v29 = vsel %vm763_vm4, %v757_v11, %v762_v25  ;;  %v1339_v25 = vld [vmem:[%s2464_s6 + $0xe0] sm:$0xff]  ;;  %vm438_vm3 = vcmask 102400  }
  0xde   :  { %1801 = vrcp.f32 %v201_v18  ;;  %v640_v28 = vmax.f32 %v632_v26, 1e-12  ;;  %v767_v31 = vsel %vm765_vm5, %v766_v27, %v764_v29  ;;  %v1340_v26 = vld [vmem:[%s2464_s6 + $0xe8] sm:$0xff]  ;;  %v1341_v29 = vld [vmem:[%s2464_s6 + $0xf0] sm:$0xff]  ;;  %vm434_vm4 = vcmask 105472  }
  0xdf   :  { %1803 = vrcp.f32 %v334_v21  ;;  %v775_v37 = vmax.f32 %v767_v31, 1e-12  ;;  %v1338_v21 = vld [vmem:[%s2464_s6 + $0xd8] sm:$0xff]  ;;  %vm457_vm5 = vcmask 4096  }
  0xe0   :  { %1805 = vrcp.f32 %v640_v28  ;;  %v1699_v24 = vpack.c.bf16 %v1338_v21, %v1337_v20  ;;  %v1703_v28 = vpack.c.bf16 %v1340_v26, %v1339_v25 }
  0xe1   :  { %1807 = vrsqrt.f32 %v2198_v38 }
  0xe2   :  { %1809 = vrcp.f32 %v775_v37 }
  0xe3   :  { %1811 = vrsqrt.f32 %v2209_v0 }
  0xe8   :  { %v1802_v30 = vpop.eup %1801 }
  0xe9   :  { %v205_v32 = vmul.f32 %v1802_v30, %v2108_v36  ;;  %v1804_v33 = vpop.eup %1803  ;;  %v1342_v30 = vld [vmem:[%s2464_s6 + $0xf8] sm:$0xff] }
  0xea   :  { %v338_v49 = vmul.f32 %v1804_v33, %v2119_v40  ;;  %v1806_v5 = vpop.eup %1805  ;;  %v1707_v31 = vpack.c.bf16 %v1342_v30, %v1341_v29 }
  0xeb   :  { %v643_v62 = vmul.f32 %v1806_v5, %v2128_v44  ;;  %v1808_v3 = vpop.eup %1807  ;;  %v1333_v44 = vld [vmem:[%s2464_s6 + $0xb0] sm:$0xff] }
  0xec   :  { %v1810_v34 = vpop.eup %1809  ;;  %v634_v8 = vmul.f32 %v1808_v3, %v2198_v38  ;;  %v1691_v13 = vpack.c.bf16 %v1334_v9, %v1333_v44 }
  0xed   :  { %v778_v10 = vmul.f32 %v1810_v34, %v2133_v45  ;;  %v1812_v11 = vpop.eup %1811  ;;  %v1335_v45 = vld [vmem:[%s2464_s6 + $0xc0] sm:$0xff] }
  0xee   :  { %v636_v14 = vsel %vm635_vm6, %v2198_v38, %v634_v8  ;;  %v769_v35 = vmul.f32 %v1812_v11, %v2209_v0  ;;  %v1695_v18 = vpack.c.bf16 %v1336_v15, %v1335_v45  ;;  %vm1142_vm6 = vcmask 0  }
  0xef   :  { %v639_v16 = vsel %vm637_vm7, %v638_v12, %v636_v14 }
  0xf0   :  { %v771_v19 = vsel %vm770_vm8, %v2209_v0, %v769_v35  ;;  %v641_v22 = vmax.f32 %v639_v16, 1e-12 }
  0xf1   :  { %v774_v23 = vsel %vm772_vm9, %v773_v17, %v771_v19 }
  0xf2   :  { %1813 = vrcp.f32 %v641_v22  ;;  %v776_v27 = vmax.f32 %v774_v23, 1e-12 }
  0xf4   :  { %1815 = vrcp.f32 %v776_v27 }
  0xf5   :  { %1817 = vrsqrt.f32 %v862_v39 }
  0xf6   :  { %1819 = vrsqrt.f32 %v727_v41 }
 0x184   :  { %v1473_v42 = vpop.f32.mrb[0].mxu0 }
 0x185   :  { %v340_v43 = vmul.f32 %v1473_v42, %v205_v32  ;;  %v168_v48 = vpop.f32.mrb[1].mxu0 }
 0x186   :  { %v1671_v36 = vpack.c.bf16 %v1473_v42, %v168_v48  ;;  %v339_v50 = vmul.f32 %v2190_v2, %v168_v48 }
 0x187   :  { %v343_v52 = vsel %vm78_vm0, %v340_v43, 0.0 }
 0x188   :  { %v1508_v1 = vpop.f32.mrb[0].mxu1  ;;  %344 = vadd.xlane.f32.xlu1 %v343_v52  ;;  %1672 = vmatprep.subr.bf16.mxu0 %v1671_v36 }
 0x189   :  { %v472_v53 = vmul.f32 %v1508_v1, %v338_v49  ;;  %341 = vadd.xlane.f32.xlu0 %v339_v50  ;;  %v301_v56 = vpop.f32.mrb[1].mxu1  ;;  %1674 = vmatpush3.bf16.xpose.msra.mxu0 %v1671_v36  ;;  %v871_v36 = vand.u32 2147483648, %v862_v39 }
 0x18a   :  { %v1675_v40 = vpack.c.bf16 %v1508_v1, %v301_v56  ;;  %v471_v57 = vmul.f32 %v2194_v4, %v301_v56  ;;  %1680 = vmatprep.subr.bf16.mxu0 %v1679_v51  ;;  %v1331_v4 = vld [vmem:[%s2464_s6 + $0xa0] sm:$0xff] }
 0x18b   :  { %v475_v2 = vsel %vm78_vm0, %v472_v53, 0.0  ;;  %v1687_v7 = vpack.c.bf16 %v1332_v6, %v1331_v4 }
 0x18c   :  { %1676 = vmatprep.subr.bf16.mxu1 %v1675_v40  ;;  %476 = vadd.xlane.f32.xlu1 %v475_v2  ;;  %v865_v2 = vpop.xlane.xlu1 %864 }
 0x18d   :  { %473 = vadd.xlane.f32.xlu0 %v471_v57  ;;  %1678 = vmatpush3.bf16.xpose.msra.mxu1 %v1675_v40  ;;  %v730_v57 = vpop.xlane.xlu0 %729  ;;  %vm875_vm1 = vcmp.eq.f32.partialorder %v865_v2, inf  ;;  %v878_v14 = vand.u32 2147483648, %v865_v2  ;;  %vm877_vm2 = vcmp.eq.f32.partialorder %v865_v2, 0.0 }
 0x18e   :  { %1712 = vmatprep.subr.bf16.mxu1 %v1679_v51  ;;  %vm740_vm14 = vcmp.eq.f32.partialorder %v730_v57, inf  ;;  %v743_v9 = vand.u32 2147483648, %v730_v57  ;;  %vm742_vm15 = vcmp.eq.f32.partialorder %v730_v57, 0.0 }
 0x190   :  { %1514 = vmatmul.mubr.f32.vlgmr.msra.gmra.mrb[2].mxu0 %v205_v32  ;;  %v1814_v32 = vpop.eup %1813 }
 0x191   :  { %1682 = vmatpush3.bf16.msra.mxu0 %v1679_v51  ;;  %1555 = vmatprep.mubr.f32.mxu0 %v643_v62  ;;  %v645_v33 = vmul.f32 %v1814_v32, %v2138_v46  ;;  %v1816_v37 = vpop.eup %1815  ;;  %v736_v46 = vand.u32 2147483648, %v727_v41 }
 0x192   :  { %1684 = vmatprep.subr.bf16.mxu0 %v1683_v63  ;;  %v780_v38 = vmul.f32 %v1816_v37, %v2143_v47  ;;  %v1818_v42 = vpop.eup %1817 }
 0x193   :  { %v1820_v43 = vpop.eup %1819  ;;  %v867_v48 = vmul.f32 %v1818_v42, %v862_v39 }
 0x194   :  { %1521 = vmatmul.mubr.f32.vlgmr.msra.gmra.mrb[2].mxu1 %v338_v49  ;;  %v732_v49 = vmul.f32 %v1820_v43, %v727_v41 }
 0x195   :  { %1686 = vmatpush3.bf16.msra.mxu0 %v1683_v63  ;;  %1714 = vmatpush3.bf16.msra.mxu1 %v1679_v51  ;;  %v869_v50 = vsel %vm868_vm10, %v862_v39, %v867_v48 }
 0x196   :  { %1688 = vmatprep.subr.bf16.mxu0 %v1687_v7  ;;  %1716 = vmatprep.subr.bf16.mxu1 %v1683_v63  ;;  %v734_v51 = vsel %vm733_vm11, %v727_v41, %v732_v49  ;;  %v872_v0 = vsel %vm870_vm12, %v871_v36, %v869_v50 }
 0x197   :  { %1590 = vmatprep.mubr.f32.mxu1 %v778_v10  ;;  %v737_v52 = vsel %vm735_vm13, %v736_v46, %v734_v51  ;;  %v880_v47 = vmax.f32 %v872_v0, 1e-12 }
 0x198   :  { %v745_v1 = vmax.f32 %v737_v52, 1e-12 }
 0x199   :  { %1690 = vmatpush3.bf16.msra.mxu0 %v1687_v7  ;;  %1718 = vmatpush3.bf16.msra.mxu1 %v1683_v63  ;;  %1821 = vrcp.f32 %v880_v47 }
 0x19a   :  { %1692 = vmatprep.subr.bf16.mxu0 %v1691_v13  ;;  %1720 = vmatprep.subr.bf16.mxu1 %v1687_v7  ;;  %1823 = vrcp.f32 %v745_v1 }
 0x19b   :  { %1825 = vrsqrt.f32 %v730_v57 }
 0x19c   :  { %1827 = vrsqrt.f32 %v865_v2 }
 0x19d   :  { %1694 = vmatpush3.bf16.msra.mxu0 %v1691_v13  ;;  %1722 = vmatpush3.bf16.msra.mxu1 %v1687_v7 }
 0x19e   :  { %1696 = vmatprep.subr.bf16.mxu0 %v1695_v18  ;;  %1724 = vmatprep.subr.bf16.mxu1 %v1691_v13 }
 0x1a1   :  { %1698 = vmatpush3.bf16.msra.mxu0 %v1695_v18  ;;  %1726 = vmatpush3.bf16.msra.mxu1 %v1691_v13 }
 0x1a2   :  { %1700 = vmatprep.subr.bf16.mxu0 %v1699_v24  ;;  %1728 = vmatprep.subr.bf16.mxu1 %v1695_v18 }
 0x1a3   :  { %v1822_v53 = vpop.eup %1821 }
 0x1a4   :  { %v1824_v56 = vpop.eup %1823  ;;  %v2275_v40 = vmul.f32 %v1822_v53, %v2158_v54 }
 0x1a5   :  { %1702 = vmatpush3.bf16.msra.mxu0 %v1699_v24  ;;  %1730 = vmatpush3.bf16.msra.mxu1 %v1695_v18  ;;  %v2272_v5 = vmul.f32 %v1824_v56, %v2163_v55  ;;  %v1826_v61 = vpop.eup %1825 }
 0x1a6   :  { %1704 = vmatprep.subr.bf16.mxu0 %v1703_v28  ;;  %1732 = vmatprep.subr.bf16.mxu1 %v1699_v24  ;;  %v739_v6 = vmul.f32 %v1826_v61, %v730_v57  ;;  %v1828_v7 = vpop.eup %1827 }
 0x1a7   :  { %v874_v11 = vmul.f32 %v1828_v7, %v865_v2 }
 0x1a8   :  { %v741_v12 = vsel %vm740_vm14, %v730_v57, %v739_v6 }
 0x1a9   :  { %1706 = vmatpush3.bf16.msra.mxu0 %v1703_v28  ;;  %1734 = vmatpush3.bf16.msra.mxu1 %v1699_v24  ;;  %v744_v35 = vsel %vm742_vm15, %v743_v9, %v741_v12  ;;  %v876_v45 = vsel %vm875_vm1, %v865_v2, %v874_v11 }
 0x1aa   :  { %1708 = vmatprep.subr.bf16.mxu0 %v1707_v31  ;;  %1736 = vmatprep.subr.bf16.mxu1 %v1703_v28  ;;  %v746_v15 = vmax.f32 %v744_v35, 1e-12  ;;  %v879_v17 = vsel %vm877_vm2, %v878_v14, %v876_v45 }
 0x1ab   :  { %v881_v21 = vmax.f32 %v879_v17, 1e-12 }
 0x1ad   :  { %1710 = vmatpush3.bf16.msra.mxu0 %v1707_v31  ;;  %1738 = vmatpush3.bf16.msra.mxu1 %v1703_v28 }
 0x1ae   :  { %1740 = vmatprep.subr.bf16.mxu1 %v1707_v31 }
 0x1b0   :  { %1556 = vmatmul.mubr.f32.vlgmr.msra.gmra.mrb[4].mxu0 %v645_v33 }
 0x1b1   :  { %1742 = vmatpush3.bf16.msra.mxu1 %v1707_v31  ;;  %1597 = vmatprep.mubr.f32.mxu0 %v2272_v5 }
 0x1b4   :  { %1591 = vmatmul.mubr.f32.vlgmr.msra.gmra.mrb[4].mxu1 %v780_v38 }
 0x1b5   :  { %1604 = vmatprep.mubr.f32.mxu1 %v2275_v40 }
 0x216   :  { %v342_v49 = vpop.xlane.xlu0 %341 }
 0x217   :  { %v347_v57 = vmul.f32 2.0, %v342_v49 }
 0x21a   :  { %v474_v50 = vpop.xlane.xlu0 %473 }
 0x263   :  { %v1515_v60 = vpop.f32.mrb[2].mxu0 }
 0x264   :  { %v429_v62 = vmul.f32 2.0, %v1515_v60  ;;  %v419_v63 = vpop.f32.mrb[3].mxu0 }
 0x265   :  { %v428_v3 = vmul.f32 2.0, %v419_v63  ;;  %v349_v63 = vmul.f32 1.442695, %v347_v57 }
 0x266   :  { %v432_v4 = vmul.f32 1.442695, %v429_v62 }
 0x267   :  { %v430_v55 = vmul.f32 1.442695, %v428_v3  ;;  %v1522_v34 = vpop.f32.mrb[2].mxu1 }
 0x268   :  { %1829 = vpow2.f32 %v432_v4  ;;  %v560_v54 = vmul.f32 2.0, %v1522_v34  ;;  %v550_v8 = vpop.f32.mrb[3].mxu1 }
 0x269   :  { %1831 = vpow2.f32 %v430_v55  ;;  %v559_v44 = vmul.f32 2.0, %v550_v8 }
 0x26a   :  { %v563_v10 = vmul.f32 1.442695, %v560_v54 }
 0x26b   :  { %v561_v13 = vmul.f32 1.442695, %v559_v44 }
 0x26c   :  { %1833 = vpow2.f32 %v563_v10 }
 0x26d   :  { %1835 = vpow2.f32 %v561_v13 }
 0x26e   :  { %1837 = vrcp.f32 %v746_v15 }
 0x26f   :  { %1839 = vrcp.f32 %v881_v21 }
 0x272   :  { %v1830_v16 = vpop.eup %1829 }
 0x273   :  { %v1832_v18 = vpop.eup %1831  ;;  %v439_v19 = vsel %vm438_vm3, %v1830_v16, 0.0 }
 0x274   :  { %440 = vadd.xlane.f32.xlu1 %v439_v19  ;;  %v435_v20 = vsel %vm434_vm4, %v1832_v18, 0.0 }
 0x275   :  { %436 = vadd.xlane.f32.xlu0 %v435_v20 }
 0x276   :  { %v1834_v22 = vpop.eup %1833 }
 0x277   :  { %v1836_v23 = vpop.eup %1835  ;;  %v568_v24 = vsel %vm438_vm3, %v1834_v22, 0.0 }
 0x278   :  { %569 = vadd.xlane.f32.xlu1 %v568_v24  ;;  %v565_v25 = vsel %vm434_vm4, %v1836_v23, 0.0  ;;  %v1838_v26 = vpop.eup %1837 }
 0x279   :  { %566 = vadd.xlane.f32.xlu0 %v565_v25  ;;  %v750_v27 = vmul.f32 %v1838_v26, %v2177_v59  ;;  %v1840_v28 = vpop.eup %1839 }
 0x27a   :  { %v885_v37 = vmul.f32 %v1840_v28, %v2172_v58  ;;  %v345_v58 = vpop.xlane.xlu1 %344 }
 0x27b   :  { %v348_v0 = vmul.f32 2.0, %v345_v58 }
 0x27d   :  { %v351_v47 = vmul.f32 1.442695, %v348_v0 }
 0x27e   :  { %v477_v36 = vpop.xlane.xlu1 %476 }
 0x27f   :  { %v479_v52 = vmul.f32 2.0, %v477_v36  ;;  %1841 = vpow2.f32 %v351_v47 }
 0x281   :  { %v482_v53 = vmul.f32 1.442695, %v479_v52 }
 0x283   :  { %v1557_v29 = vpop.f32.mrb[4].mxu0  ;;  %1843 = vpow2.f32 %v482_v53  ;;  %v1144_v53 = vld [vmem:[%s2465_s7] sm:$0xff] }
 0x284   :  { %v887_v30 = vmul.f32 %v1557_v29, %v750_v27  ;;  %v712_v31 = vpop.f32.mrb[5].mxu0 }
 0x285   :  { %v1743_v32 = vpack.c.bf16 %v1557_v29, %v712_v31  ;;  %v886_v33 = vmul.f32 %v2272_v5, %v712_v31  ;;  %v478_v5 = vmul.f32 2.0, %v474_v50 }
 0x286   :  { %v890_v38 = vsel %vm78_vm0, %v887_v30, 0.0 }
 0x287   :  { %v1592_v39 = vpop.f32.mrb[4].mxu1  ;;  %891 = vadd.xlane.f32.xlu1 %v890_v38  ;;  %1744 = vmatprep.subr.bf16.mxu0 %v1743_v32  ;;  %v480_v62 = vmul.f32 1.442695, %v478_v5  ;;  %v1146_v5 = vld [vmem:[%s2465_s7 + $0x10] sm:$0xff] }
 0x288   :  { %v1015_v41 = vmul.f32 %v1592_v39, %v885_v37  ;;  %888 = vadd.xlane.f32.xlu0 %v886_v33  ;;  %v847_v42 = vpop.f32.mrb[5].mxu1  ;;  %1746 = vmatpush3.bf16.xpose.msra.mxu0 %v1743_v32 }
 0x289   :  { %v1747_v43 = vpack.c.bf16 %v1592_v39, %v847_v42  ;;  %v1014_v59 = vmul.f32 %v2275_v40, %v847_v42  ;;  %v1842_v3 = vpop.eup %1841 }
 0x28a   :  { %v1018_v48 = vsel %vm78_vm0, %v1015_v41, 0.0  ;;  %vm53_vm0 = vcmask 7168  }
 0x28b   :  { %1748 = vmatprep.subr.bf16.mxu1 %v1747_v43  ;;  %1019 = vadd.xlane.f32.xlu1 %v1018_v48 }
 0x28c   :  { %1016 = vadd.xlane.f32.xlu0 %v1014_v59  ;;  %1750 = vmatpush3.bf16.xpose.msra.mxu1 %v1747_v43 }
 0x28d   :  { %v1844_v4 = vpop.eup %1843 }
 0x28f   :  { %1598 = vmatmul.mubr.f32.vlgmr.msra.gmra.mrb[6].mxu0 %v750_v27 }
 0x293   :  { %1605 = vmatmul.mubr.f32.vlgmr.msra.gmra.mrb[6].mxu1 %v885_v37 }
 0x301   :  { %v441_v46 = vpop.xlane.xlu1 %440 }
 0x302   :  { %v437_v51 = vpop.xlane.xlu0 %436  ;;  %v443_v40 = vadd.f32 1e-08, %v441_v46 }
 0x303   :  { %v442_v61 = vadd.f32 1e-08, %v437_v51 }
 0x304   :  { %1845 = vrcp.f32 %v443_v40  ;;  %v1147_v40 = vmul.f32 %v1144_v53, %v1144_v53 }
 0x305   :  { %v570_v1 = vpop.xlane.xlu1 %569 }
 0x306   :  { %v567_v56 = vpop.xlane.xlu0 %566  ;;  %v572_v2 = vadd.f32 1e-08, %v570_v1 }
 0x307   :  { %v571_v60 = vadd.f32 1e-08, %v567_v56  ;;  %v1145_v56 = vld [vmem:[%s2465_s7 + $0x8] sm:$0xff] }
 0x308   :  { %1847 = vrcp.f32 %v572_v2  ;;  %v1148_v57 = vmul.f32 %v1145_v56, %v1145_v56  ;;  %v1149_v2 = vmul.f32 %v1146_v5, %v1146_v5  ;;  %v1186_v5 = vld [vmem:[%s2467_s9 + $0x40] sm:$0xff] }
 0x309   :  { %1849 = vrcp.f32 %v571_v60  ;;  %v1162_v60 = vld [vmem:[%s2466_s8] sm:$0xff] }
 0x30a   :  { %1851 = vrcp.f32 %v442_v61  ;;  %v1163_v61 = vld [vmem:[%s2466_s8 + $0x8] sm:$0xff] }
 0x30b   :  { %1853 = vpow2.f32 %v480_v62  ;;  %v1164_v62 = vmul.f32 %v1162_v60, %v1162_v60 }
 0x30c   :  { %1855 = vpow2.f32 %v349_v63  ;;  %v1165_v63 = vmul.f32 %v1163_v61, %v1163_v61  ;;  %v1243_v61 = vld [vmem:[%s2468_s10 + $0x38] sm:$0xff] }
 0x30e   :  { %v1846_v6 = vpop.eup %1845 }
 0x30f   :  { %v447_v54 = vmul.f32 %v1846_v6, %v1842_v3  ;;  %v1150_v3 = vadd.f32 %v1148_v57, %v1147_v40 }
 0x311   :  { %v449_v12 = vadd.f32 1e-08, %v447_v54  ;;  %v1151_v6 = vadd.f32 %v1150_v3, %v1149_v2 }
 0x312   :  { %v1848_v55 = vpop.eup %1847 }
 0x313   :  { %v1850_v34 = vpop.eup %1849  ;;  %v576_v44 = vmul.f32 %v1848_v55, %v1844_v4  ;;  %1857 = vlog2.f32 %v449_v12  ;;  %v1166_v4 = vadd.f32 %v1165_v63, %v1164_v62  ;;  %v1178_v55 = vld [vmem:[%s2467_s9] sm:$0xff]  ;;  %v1181_v12 = vld [vmem:[%s2467_s9 + $0x18] sm:$0xff]  ;;  %v1202_v63 = vmul.f32 %v1186_v5, %v1186_v5 }
 0x314   :  { %v1852_v7 = vpop.eup %1851 }
 0x315   :  { %v1854_v8 = vpop.eup %1853  ;;  %v578_v13 = vadd.f32 1e-08, %v576_v44  ;;  %v1236_v44 = vld [vmem:[%s2468_s10] sm:$0xff] }
 0x316   :  { %v1856_v9 = vpop.eup %1855  ;;  %v574_v10 = vmul.f32 %v1854_v8, %v1850_v34  ;;  %v1179_v34 = vld [vmem:[%s2467_s9 + $0x8] sm:$0xff]  ;;  %v1180_v8 = vld [vmem:[%s2467_s9 + $0x10] sm:$0xff] }
 0x317   :  { %v445_v11 = vmul.f32 %v1856_v9, %v1852_v7  ;;  %1859 = vlog2.f32 %v578_v13  ;;  %v1194_v7 = vmul.f32 %v1178_v55, %v1178_v55  ;;  %v1195_v54 = vmul.f32 %v1179_v34, %v1179_v34  ;;  %v1237_v9 = vld [vmem:[%s2468_s10 + $0x8] sm:$0xff] }
 0x318   :  { %v577_v14 = vadd.f32 1e-08, %v574_v10  ;;  %v1196_v10 = vmul.f32 %v1180_v8, %v1180_v8  ;;  %v1252_v13 = vmul.f32 %v1236_v44, %v1236_v44  ;;  %v1187_v55 = vld [vmem:[%s2467_s9 + $0x48] sm:$0xff]  ;;  %v1259_v34 = vmul.f32 %v1243_v61, %v1243_v61  ;;  %v1244_v8 = vld [vmem:[%s2468_s10 + $0x40] sm:$0xff] }
 0x319   :  { %v448_v35 = vadd.f32 1e-08, %v445_v11  ;;  %v1210_v11 = vadd.f32 %v1195_v54, %v1194_v7  ;;  %v1248_v61 = vld [vmem:[%s2468_s10 + $0x60] sm:$0xff] }
 0x31a   :  { %1861 = vlog2.f32 %v577_v14  ;;  %v1253_v14 = vmul.f32 %v1237_v9, %v1237_v9  ;;  %v1203_v9 = vmul.f32 %v1187_v55, %v1187_v55  ;;  %v1249_v55 = vld [vmem:[%s2468_s10 + $0x68] sm:$0xff] }
 0x31b   :  { %1863 = vlog2.f32 %v448_v35  ;;  %v1238_v35 = vld [vmem:[%s2468_s10 + $0x10] sm:$0xff] }
 0x31d   :  { %v1858_v24 = vpop.eup %1857 }
 0x31e   :  { %v453_v33 = vmul.f32 0.6931472, %v1858_v24  ;;  %v1183_v24 = vld [vmem:[%s2467_s9 + $0x28] sm:$0xff] }
 0x320   :  { %v455_v48 = vsub.f32 0.0, %v453_v33 }
 0x321   :  { %v1860_v26 = vpop.eup %1859 }
 0x322   :  { %v582_v31 = vmul.f32 0.6931472, %v1860_v26  ;;  %v458_v52 = vsel %vm457_vm5, %v455_v48, 0.0 }
 0x324   :  { %v1862_v28 = vpop.eup %1861  ;;  %v584_v42 = vsub.f32 0.0, %v582_v31  ;;  %v1184_v31 = vld [vmem:[%s2467_s9 + $0x30] sm:$0xff] }
 0x325   :  { %v1864_v29 = vpop.eup %1863  ;;  %v580_v30 = vmul.f32 0.6931472, %v1862_v28 }
 0x326   :  { %v451_v32 = vmul.f32 0.6931472, %v1864_v29  ;;  %v586_v46 = vsel %vm457_vm5, %v584_v42, 0.0  ;;  %v1199_v29 = vmul.f32 %v1183_v24, %v1183_v24  ;;  %v1189_v24 = vld [vmem:[%s2467_s9 + $0x58] sm:$0xff] }
 0x327   :  { %v583_v41 = vsub.f32 0.0, %v580_v30 }
 0x328   :  { %v454_v59 = vsub.f32 0.0, %v451_v32 }
 0x329   :  { %v585_v50 = vsel %vm53_vm0, %v583_v41, 0.0 }
 0x32a   :  { %v456_v0 = vsel %vm53_vm0, %v454_v59, 0.0  ;;  %v587_v47 = vadd.f32 %v586_v46, %v585_v50 }
 0x32b   :  { %v459_v1 = vadd.f32 %v458_v52, %v456_v0 }
 0x362   :  { %v1599_v45 = vpop.f32.mrb[6].mxu0 }
 0x363   :  { %v975_v15 = vmul.f32 2.0, %v1599_v45  ;;  %v965_v16 = vpop.f32.mrb[7].mxu0  ;;  %v1197_v45 = vmul.f32 %v1181_v12, %v1181_v12 }
 0x364   :  { %v974_v17 = vmul.f32 2.0, %v965_v16  ;;  %v1182_v16 = vld [vmem:[%s2467_s9 + $0x20] sm:$0xff] }
 0x365   :  { %v978_v18 = vmul.f32 1.442695, %v975_v15  ;;  %v1211_v15 = vadd.f32 %v1210_v11, %v1196_v10 }
 0x366   :  { %v976_v19 = vmul.f32 1.442695, %v974_v17  ;;  %v1606_v20 = vpop.f32.mrb[6].mxu1  ;;  %v1254_v17 = vmul.f32 %v1238_v35, %v1238_v35 }
 0x367   :  { %1865 = vpow2.f32 %v978_v18  ;;  %v1103_v21 = vmul.f32 2.0, %v1606_v20  ;;  %v1093_v22 = vpop.f32.mrb[7].mxu1  ;;  %v1268_v18 = vadd.f32 %v1253_v14, %v1252_v13  ;;  %v892_v20 = vpop.xlane.xlu1 %891  ;;  %v1188_v13 = vld [vmem:[%s2467_s9 + $0x50] sm:$0xff]  ;;  %v1260_v14 = vmul.f32 %v1244_v8, %v1244_v8 }
 0x368   :  { %1867 = vpow2.f32 %v976_v19  ;;  %v1102_v23 = vmul.f32 2.0, %v1093_v22  ;;  %v1239_v19 = vld [vmem:[%s2468_s10 + $0x18] sm:$0xff]  ;;  %v1212_v22 = vadd.f32 %v1211_v15, %v1197_v45  ;;  %v894_v28 = vmul.f32 2.0, %v892_v20 }
 0x369   :  { %v1106_v25 = vmul.f32 1.442695, %v1103_v21  ;;  %v1198_v21 = vmul.f32 %v1182_v16, %v1182_v16  ;;  %v1269_v26 = vadd.f32 %v1268_v18, %v1254_v17  ;;  %v1245_v16 = vld [vmem:[%s2468_s10 + $0x48] sm:$0xff]  ;;  %v1204_v20 = vmul.f32 %v1188_v13, %v1188_v13  ;;  %v1250_v13 = vld [vmem:[%s2468_s10 + $0x70] sm:$0xff] }
 0x36a   :  { %v1104_v27 = vmul.f32 1.442695, %v1102_v23  ;;  %v889_v23 = vpop.xlane.xlu0 %888  ;;  %v897_v42 = vmul.f32 1.442695, %v894_v28 }
 0x36b   :  { %1869 = vpow2.f32 %v1106_v25  ;;  %v1255_v25 = vmul.f32 %v1239_v19, %v1239_v19  ;;  %v1213_v30 = vadd.f32 %v1212_v22, %v1198_v21 }
 0x36c   :  { %1871 = vpow2.f32 %v1104_v27  ;;  %v1240_v27 = vld [vmem:[%s2468_s10 + $0x20] sm:$0xff] }
 0x36d   :  { %v1256_v32 = vmul.f32 %v1240_v27, %v1240_v27  ;;  %v1270_v33 = vadd.f32 %v1269_v26, %v1255_v25  ;;  %v1214_v59 = vadd.f32 %v1213_v30, %v1199_v29  ;;  %1873 = vpow2.f32 %v897_v42  ;;  %v1246_v30 = vld [vmem:[%s2468_s10 + $0x50] sm:$0xff] }
 0x36e   :  { %v1017_v41 = vpop.xlane.xlu0 %1016  ;;  %v1261_v25 = vmul.f32 %v1245_v16, %v1245_v16 }
 0x36f   :  { %v1021_v46 = vmul.f32 2.0, %v1017_v41  ;;  %v1205_v41 = vmul.f32 %v1189_v24, %v1189_v24  ;;  %v1251_v24 = vld [vmem:[%s2468_s10 + $0x78] sm:$0xff] }
 0x371   :  { %v1866_v37 = vpop.eup %1865  ;;  %v1023_v2 = vmul.f32 1.442695, %v1021_v46 }
 0x372   :  { %v1868_v38 = vpop.eup %1867  ;;  %v983_v39 = vsel %vm438_vm3, %v1866_v37, 0.0  ;;  %v893_v37 = vmul.f32 2.0, %v889_v23 }
 0x373   :  { %984 = vadd.xlane.f32.xlu1 %v983_v39  ;;  %v980_v43 = vsel %vm434_vm4, %v1868_v38, 0.0  ;;  %v1020_v38 = vpop.xlane.xlu1 %1019  ;;  %v1241_v39 = vld [vmem:[%s2468_s10 + $0x28] sm:$0xff] }
 0x374   :  { %981 = vadd.xlane.f32.xlu0 %v980_v43  ;;  %v1200_v43 = vmul.f32 %v1184_v31, %v1184_v31  ;;  %v1022_v48 = vmul.f32 2.0, %v1020_v38  ;;  %v895_v50 = vmul.f32 1.442695, %v893_v37 }
 0x375   :  { %v1870_v58 = vpop.eup %1869 }
 0x376   :  { %v1872_v49 = vpop.eup %1871  ;;  %v1111_v36 = vsel %vm438_vm3, %v1870_v58, 0.0  ;;  %v1185_v58 = vld [vmem:[%s2467_s9 + $0x38] sm:$0xff]  ;;  %1875 = vpow2.f32 %v895_v50 }
 0x377   :  { %1112 = vadd.xlane.f32.xlu1 %v1111_v36  ;;  %v1108_v51 = vsel %vm434_vm4, %v1872_v49, 0.0  ;;  %v1257_v49 = vmul.f32 %v1241_v39, %v1241_v39  ;;  %v1271_v36 = vadd.f32 %v1270_v33, %v1256_v32  ;;  %v1201_v52 = vmul.f32 %v1185_v58, %v1185_v58  ;;  %v1874_v45 = vpop.eup %1873  ;;  %v1190_v58 = vld [vmem:[%s2467_s9 + $0x60] sm:$0xff] }
 0x378   :  { %1109 = vadd.xlane.f32.xlu0 %v1108_v51  ;;  %v1242_v51 = vld [vmem:[%s2468_s10 + $0x30] sm:$0xff] }
 0x379   :  { %v1258_v40 = vmul.f32 %v1242_v51, %v1242_v51  ;;  %v1272_v57 = vadd.f32 %v1271_v36, %v1257_v49  ;;  %v1262_v49 = vmul.f32 %v1246_v30, %v1246_v30  ;;  %v1267_v30 = vmul.f32 %v1251_v24, %v1251_v24 }
 0x37b   :  { %588 = vadd.xlane.f32.xlu1 %v587_v47  ;;  %v1215_v47 = vadd.f32 %v1214_v59, %v1200_v43  ;;  %v1273_v7 = vadd.f32 %v1272_v57, %v1258_v40  ;;  %v1191_v57 = vld [vmem:[%s2467_s9 + $0x68] sm:$0xff] }
 0x37c   :  { %460 = vadd.xlane.f32.xlu0 %v459_v1  ;;  %v1025_v1 = vmul.f32 1.442695, %v1022_v48 }
 0x37d   :  { %v1216_v3 = vadd.f32 %v1215_v47, %v1201_v52  ;;  %v1274_v35 = vadd.f32 %v1273_v7, %v1259_v34 }
 0x37f   :  { %1167 = vadd.xlane.f32.xlu1 %v1166_v4  ;;  %v1217_v10 = vadd.f32 %v1216_v3, %v1202_v63  ;;  %v1275_v26 = vadd.f32 %v1274_v35, %v1260_v14  ;;  %v1192_v3 = vld [vmem:[%s2467_s9 + $0x70] sm:$0xff] }
 0x380   :  { %1152 = vadd.xlane.f32.xlu0 %v1151_v6  ;;  %v1876_v18 = vpop.eup %1875  ;;  %v1208_v7 = vmul.f32 %v1192_v3, %v1192_v3 }
 0x381   :  { %v1218_v21 = vadd.f32 %v1217_v10, %v1203_v9  ;;  %v1276_v36 = vadd.f32 %v1275_v26, %v1261_v25  ;;  %v1193_v9 = vld [vmem:[%s2467_s9 + $0x78] sm:$0xff]  ;;  %v1265_v10 = vmul.f32 %v1249_v55, %v1249_v55 }
 0x383   :  { %v1219_v42 = vadd.f32 %v1218_v21, %v1204_v20  ;;  %v1266_v20 = vmul.f32 %v1250_v13, %v1250_v13 }
 0x385   :  { %v1220_v5 = vadd.f32 %v1219_v42, %v1205_v41  ;;  %v44_v42 = vld [vmem:[%s2458_s0 + $0x8] sm:$0xff] }
 0x400   :  { %v985_v0 = vpop.xlane.xlu1 %984 }
 0x401   :  { %v987_v53 = vadd.f32 1e-08, %v985_v0  ;;  %v982_v56 = vpop.xlane.xlu0 %981  ;;  %v1247_v0 = vld [vmem:[%s2468_s10 + $0x58] sm:$0xff] }
 0x402   :  { %v986_v60 = vadd.f32 1e-08, %v982_v56  ;;  %v1206_v56 = vmul.f32 %v1190_v58, %v1190_v58 }
 0x403   :  { %1877 = vrcp.f32 %v987_v53 }
 0x404   :  { %1879 = vrcp.f32 %v986_v60  ;;  %v1113_v62 = vpop.xlane.xlu1 %1112  ;;  %v1277_v60 = vadd.f32 %v1276_v36, %v1262_v49  ;;  %v1221_v63 = vadd.f32 %v1220_v5, %v1206_v56 }
 0x405   :  { %1881 = vpow2.f32 %v1025_v1  ;;  %v1115_v4 = vadd.f32 1e-08, %v1113_v62  ;;  %v1110_v6 = vpop.xlane.xlu0 %1109  ;;  %v1207_v62 = vmul.f32 %v1191_v57, %v1191_v57 }
 0x406   :  { %1883 = vpow2.f32 %v1023_v2  ;;  %v1114_v54 = vadd.f32 1e-08, %v1110_v6  ;;  %v1263_v2 = vmul.f32 %v1247_v0, %v1247_v0 }
 0x407   :  { %1885 = vrcp.f32 %v1115_v4  ;;  %v1264_v4 = vmul.f32 %v1248_v61, %v1248_v61 }
 0x408   :  { %1887 = vrcp.f32 %v1114_v54  ;;  %v589_v44 = vpop.xlane.xlu1 %588  ;;  %v1278_v6 = vadd.f32 %v1277_v60, %v1263_v2  ;;  %v1222_v54 = vadd.f32 %v1221_v63, %v1207_v62 }
 0x409   :  { %v590_v11 = vrot.slane %v589_v44, 4  ;;  %v461_v12 = vpop.xlane.xlu0 %460 }
 0x40a   :  { %v462_v15 = vrot.slane %v461_v12, 4  ;;  %v1223_v16 = vadd.f32 %v1222_v54, %v1208_v7 }
 0x40b   :  { %v591_v17 = vadd.f32 %v590_v11, %v589_v44  ;;  %v1279_v11 = vadd.f32 %v1278_v6, %v1264_v4 }
 0x40c   :  { %v463_v19 = vadd.f32 %v462_v15, %v461_v12  ;;  %v1209_v15 = vmul.f32 %v1193_v9, %v1193_v9  ;;  %v1168_v58 = vpop.xlane.xlu1 %1167 }
 0x40d   :  { %v1878_v22 = vpop.eup %1877  ;;  %v592_v23 = vrot.slane %v591_v17, 2  ;;  %v1280_v21 = vadd.f32 %v1279_v11, %v1265_v10  ;;  %v1169_v36 = vrot.slane %v1168_v58, 4 }
 0x40e   :  { %v1880_v27 = vpop.eup %1879  ;;  %v464_v28 = vrot.slane %v463_v19, 2  ;;  %v991_v29 = vmul.f32 %v1878_v22, %v1874_v45 }
 0x40f   :  { %v1882_v31 = vpop.eup %1881  ;;  %v593_v32 = vadd.f32 %v592_v23, %v591_v17  ;;  %v989_v33 = vmul.f32 %v1880_v27, %v1876_v18 }
 0x410   :  { %v1884_v37 = vpop.eup %1883  ;;  %v465_v38 = vadd.f32 %v464_v28, %v463_v19  ;;  %v993_v39 = vadd.f32 1e-08, %v991_v29  ;;  %v1224_v29 = vadd.f32 %v1223_v16, %v1209_v15 }
 0x411   :  { %v1886_v43 = vpop.eup %1885  ;;  %v594_v59 = vrot.slane %v593_v32, 1  ;;  %v992_v48 = vadd.f32 1e-08, %v989_v33  ;;  %v43_v33 = vld [vmem:[%s2458_s0] sm:$0xff] }
 0x412   :  { %v1888_v50 = vpop.eup %1887  ;;  %v466_v46 = vrot.slane %v465_v38, 1  ;;  %1889 = vlog2.f32 %v993_v39  ;;  %v1119_v51 = vmul.f32 %v1886_v43, %v1882_v31  ;;  %v1281_v31 = vadd.f32 %v1280_v21, %v1266_v20  ;;  %v46_v43 = vld [vmem:[%s2459_s1 + $0x8] sm:$0xff] }
 0x413   :  { %v595_v52 = vadd.f32 %v594_v59, %v593_v32  ;;  %1891 = vlog2.f32 %v992_v48  ;;  %v1117_v47 = vmul.f32 %v1888_v50, %v1884_v37  ;;  %v45_v37 = vld [vmem:[%s2459_s1] sm:$0xff]  ;;  %v48_v59 = vmul.f32 %v46_v43, %v44_v42  ;;  %v1153_v48 = vpop.xlane.xlu0 %1152 }
 0x414   :  { %v467_v1 = vadd.f32 %v466_v46, %v465_v38  ;;  %v1121_v53 = vadd.f32 1e-08, %v1119_v51  ;;  %v1282_v39 = vadd.f32 %v1281_v31, %v1267_v30  ;;  %v47_v41 = vmul.f32 %v45_v37, %v43_v33 }
 0x415   :  { %v1120_v40 = vadd.f32 1e-08, %v1117_v47  ;;  %v1154_v49 = vrot.slane %v1153_v48, 4  ;;  %v1170_v46 = vadd.f32 %v1169_v36, %v1168_v58 }
 0x416   :  { %1751 = vpush %v467_v1  ;;  %1893 = vlog2.f32 %v1121_v53 }
 0x417   :  { %1753 = vpush %v595_v52  ;;  %1895 = vlog2.f32 %v1120_v40  ;;  %v1155_v50 = vadd.f32 %v1154_v49, %v1153_v48  ;;  %v1171_v1 = vrot.slane %v1170_v46, 2 }
 0x419   :  { %v1156_v47 = vrot.slane %v1155_v50, 2  ;;  %v1172_v3 = vadd.f32 %v1171_v1, %v1170_v46 }
 0x41b   :  { %v1157_v63 = vadd.f32 %v1156_v47, %v1155_v50 }
 0x41c   :  { %v1890_v34 = vpop.eup %1889 }
 0x41d   :  { %v1892_v8 = vpop.eup %1891  ;;  %v997_v44 = vmul.f32 0.6931472, %v1890_v34  ;;  %v1158_v10 = vrot.slane %v1157_v63, 1 }
 0x41e   :  { %v995_v12 = vmul.f32 0.6931472, %v1892_v8 }
 0x41f   :  { %v999_v14 = vsub.f32 0.0, %v997_v44  ;;  %v1159_v16 = vadd.f32 %v1158_v10, %v1157_v63 }
 0x420   :  { %v1894_v35 = vpop.eup %1893  ;;  %v998_v45 = vsub.f32 0.0, %v995_v12 }
 0x421   :  { %v1896_v17 = vpop.eup %1895  ;;  %v1001_v18 = vsel %vm457_vm5, %v999_v14, 0.0  ;;  %v1125_v19 = vmul.f32 0.6931472, %v1894_v35  ;;  %v1173_v14 = vrot.slane %v1172_v3, 1 }
 0x422   :  { %v1000_v22 = vsel %vm53_vm0, %v998_v45, 0.0  ;;  %v1123_v23 = vmul.f32 0.6931472, %v1896_v17 }
 0x423   :  { %v1002_v25 = vadd.f32 %v1001_v18, %v1000_v22  ;;  %v1127_v26 = vsub.f32 0.0, %v1125_v19  ;;  %v1174_v18 = vadd.f32 %v1173_v14, %v1172_v3 }
 0x424   :  { %v1126_v27 = vsub.f32 0.0, %v1123_v23 }
 0x425   :  { %1003 = vadd.xlane.f32.xlu0 %v1002_v25  ;;  %v1129_v28 = vsel %vm457_vm5, %v1127_v26, 0.0 }
 0x426   :  { %v1128_v32 = vsel %vm53_vm0, %v1126_v27, 0.0 }
 0x427   :  { %v1130_v38 = vadd.f32 %v1129_v28, %v1128_v32 }
 0x429   :  { %1131 = vadd.xlane.f32.xlu1 %v1130_v38  ;;  %1225 = vadd.xlane.f32.xlu0 %v1224_v29 }
 0x42d   :  { %1283 = vadd.xlane.f32.xlu1 %v1282_v39  ;;  %49 = vadd.xlane.f32.xlu0 %v47_v41 }
 0x431   :  { %51 = vadd.xlane.f32.xlu1 %v48_v59 }
 0x447   :  { %s1752_s18 = spop %1751 }
 0x448   :  { %s1754_s7 = spop %1753  ;;  %v469_v21 = vstv %s1752_s18 }
 0x449   :  { %v597_v22 = vstv %s1754_s7 }
 0x44a   :  { %v598_v24 = vadd.f32 %v597_v22, %v469_v21 }
 0x4b2   :  { %v1004_v51 = vpop.xlane.xlu0 %1003 }
 0x4b3   :  { %v1005_v0 = vrot.slane %v1004_v51, 4 }
 0x4b5   :  { %v1006_v52 = vadd.f32 %v1005_v0, %v1004_v51 }
 0x4b6   :  { %v1132_v53 = vpop.xlane.xlu1 %1131  ;;  %v1226_v56 = vpop.xlane.xlu0 %1225 }
 0x4b7   :  { %v1007_v5 = vrot.slane %v1006_v52, 2  ;;  %v1133_v40 = vrot.slane %v1132_v53, 4  ;;  %v1227_v57 = vrot.slane %v1226_v56, 4 }
 0x4b9   :  { %v1134_v2 = vadd.f32 %v1133_v40, %v1132_v53  ;;  %v1228_v60 = vadd.f32 %v1227_v57, %v1226_v56  ;;  %v1008_v61 = vadd.f32 %v1007_v5, %v1006_v52 }
 0x4ba   :  { %v1284_v62 = vpop.xlane.xlu1 %1283  ;;  %v50_v4 = vpop.xlane.xlu0 %49 }
 0x4bb   :  { %v1135_v6 = vrot.slane %v1134_v2, 2  ;;  %v1229_v55 = vrot.slane %v1228_v60, 2  ;;  %v1285_v34 = vrot.slane %v1284_v62, 4  ;;  %v1009_v7 = vrot.slane %v1008_v61, 1  ;;  %54 = vst.msk [vmem:[%s2469_s11] sm:$0xff] %vm53_vm0, %v50_v4 }
 0x4bd   :  { %v1286_v54 = vadd.f32 %v1285_v34, %v1284_v62  ;;  %v1010_v8 = vadd.f32 %v1009_v7, %v1008_v61  ;;  %v1136_v44 = vadd.f32 %v1135_v6, %v1134_v2  ;;  %v1230_v9 = vadd.f32 %v1229_v55, %v1228_v60 }
 0x4be   :  { %v52_v11 = vpop.xlane.xlu1 %51 }
 0x4bf   :  { %v1287_v12 = vrot.slane %v1286_v54, 2  ;;  %1755 = vpush %v1010_v8  ;;  %v1137_v13 = vrot.slane %v1136_v44, 1  ;;  %v1231_v35 = vrot.slane %v1230_v9, 1 }
 0x4c0   :  { %55 = vst.msk [vmem:[%s2469_s11 + $0x8] sm:$0xff] %vm53_vm0, %v52_v11  ;;  %s1945_s11 = smov [#allocation2]  }
 0x4c1   :  { %v1138_v45 = vadd.f32 %v1137_v13, %v1136_v44  ;;  %v1288_v15 = vadd.f32 %v1287_v12, %v1286_v54  ;;  %v1232_v17 = vadd.f32 %v1231_v35, %v1230_v9  ;;  %s1303_s5 = sshll.u32 %s1945_s11, 4  ;;  %s1304_s5 = int_to_ptr.vmem [resolvable:$true] %s1303_s5 }
 0x4c2   :  { %s1897_s25 = scalar_lea.vmem %s1304_s5, 16  ;;  %s1901_s26 = scalar_lea.vmem %s1304_s5, 32 }
 0x4c3   :  { %1757 = vpush %v1138_v45  ;;  %v1289_v19 = vrot.slane %v1288_v15, 1  ;;  %p1898_p0 = scmp.ne.s32.totalorder %s1304_s5, %s1897_s25  ;;  %p1902_p1 = scmp.lt.s32.totalorder %s1304_s5, %s1304_s5 }
 0x4c4   :  { %1759 = vpush %v1159_v16  ;;  %p1903_p2 = scmp.lt.s32.totalorder %s1901_s26, %s1897_s25 }
 0x4c5   :  { %1761 = vpush %v1174_v18  ;;  %v1290_v20 = vadd.f32 %v1289_v19, %v1288_v15 }
 0x4c6   :  { %1763 = vpush %v1232_v17  ;;  %p1904_p3 = por %p1903_p2, %p1902_p1 }
 0x4c7   :  { %1765 = vpush %v1290_v20 }
 0x4c8   :  { %p1905_p4 = pnand %p1904_p3, %p1898_p0 }
 0x4f0   :  { %s1756_s3 = spop %1755 }
 0x4f1   :  { %v1012_v23 = vstv %s1756_s3 }
 0x4f2   :  { %v1013_v25 = vadd.f32 %v1012_v23, %v598_v24 }
 0x4f4   :  { %s1758_s19 = spop %1757 }
 0x4f5   :  { %v1140_v26 = vstv %s1758_s19  ;;  %s1760_s20 = spop %1759 }
 0x4f6   :  { %v1141_v27 = vadd.f32 %v1140_v26, %v1013_v25  ;;  %v1161_v28 = vstv %s1760_s20  ;;  %s1762_s8 = spop %1761 }
 0x4f7   :  { %v1176_v29 = vstv %s1762_s8  ;;  %s1764_s21 = spop %1763 }
 0x4f8   :  { %v1177_v30 = vadd.f32 %v1176_v29, %v1161_v28  ;;  %s1766_s22 = spop %1765  ;;  %1143 = vst.msk [vmem:[#allocation2] sm:$0x1] %vm1142_vm6, %v1141_v27  ;;  %v1234_v31 = vstv %s1764_s21 }
 0x4f9   :  { %v1292_v32 = vstv %s1766_s22 }
 0x4fa   :  { %1908 = shalt.err (!%p1905_p4)
}
 0x4fb   :  { %s1909_s6 = scalar_lea.hbm %s2470_s12, 16 }
 0x4fc   :  { %p1910_p5 = scmp.ne.s32.totalorder %s2470_s12, %s1909_s6  ;;  %p1913_p6 = scmp.lt.u32.totalorder %s1909_s6, %s2470_s12 }
 0x4fe   :  { %p1915_p7 = pnand %p1913_p6, %p1910_p5 }
 0x500   :  { %1918 = shalt.err (!%p1915_p7)
}
 0x501   :  { %1306 = dma.vmem_to_hbm [thread:$0]  %s1304_s5, 16, %s2470_s12, [#allocation3]   ;;  %v1235_v33 = vadd.f32 %v1234_v31, %v1177_v30 }
 0x502   :  { %s1919_s14 = scalar_lea.vmem %s1314_s24, 16  ;;  %s1923_s15 = scalar_lea.vmem %s1314_s24, 32 }
 0x503   :  { %v1293_v37 = vadd.f32 %v1292_v32, %v1235_v33  ;;  %p1920_p8 = scmp.ne.s32.totalorder %s1314_s24, %s1919_s14  ;;  %p1924_p9 = scmp.lt.s32.totalorder %s1314_s24, %s1314_s24 }
 0x504   :  { %p1925_p10 = scmp.lt.s32.totalorder %s1923_s15, %s1919_s14 }
 0x505   :  { %1294 = vst.msk [vmem:[#allocation4] sm:$0x1] %vm1142_vm6, %v1293_v37 }
 0x506   :  { %p1926_p11 = por %p1925_p10, %p1924_p9 }
 0x508   :  { %p1927_p12 = pnand %p1926_p11, %p1920_p8 }
 0x50a   :  { %1930 = shalt.err (!%p1927_p12)
}
 0x50b   :  { %s1931_s16 = scalar_lea.hbm %s2471_s13, 16 }
 0x50c   :  { %p1932_p13 = scmp.ne.s32.totalorder %s2471_s13, %s1931_s16  ;;  %p1935_p0 = scmp.lt.u32.totalorder %s1931_s16, %s2471_s13 }
 0x50e   :  { %p1937_p1 = pnand %p1935_p0, %p1932_p13 }
 0x510   :  { %1940 = shalt.err (!%p1937_p1)
}
 0x511   :  { %1316 = dma.vmem_to_hbm [thread:$0]  %s1314_s24, 16, %s2471_s13, [#allocation5]  }
 0x512   :  { %1941 = dma.done.wait [#allocation3], 16  }
 0x513   :  { %1942 = vsyncadd [#allocation3], 4294967280 }
 0x514   :  { %1943 = dma.done.wait [#allocation5], 16  }
 0x515   :  { %1944 = vsyncadd [#allocation5], 4294967280 }
 0x516   :  { %1325 = vsyncpa [#allocation3], 1 }
 0x517   :  { %1326 = vsyncpa [#allocation5], 1 }

// kernel: hccf_forward.2
= control target key start
LH: loop header
LB: loop body
LE: loop exit
PB: predicated region body
PF: predicated region fallthrough
CT: control target
= control target key end

     0   :  { %v9541_v0 = vmov 0.0|0.0   ;;  %vm7291_vm0 = vmmov 0   ;;  %v9539_v4 = vmov 0.0   ;;  %vm227_vm1 = vcmask 130048   ;;  %s9526_s3 = inlined_call_operand.vmem [shape: f32[128,128], index: 3, kind: input, shape index: {}]   ;;  %s9527_s0 = inlined_call_operand.vmem [shape: f32[24,16], index: 0, kind: input, shape index: {}]   ;;  %s9528_s1 = inlined_call_operand.vmem [shape: f32[24,128], index: 1, kind: input, shape index: {}]   ;;  %s9529_s4 = inlined_call_operand.vmem [shape: f32[128,128], index: 4, kind: input, shape index: {}]   ;;  %s9530_s2 = inlined_call_operand.vmem [shape: f32[16,128], index: 2, kind: input, shape index: {}]   ;;  %s9531_s5 = inlined_call_operand.vmem [shape: f32[6,128,128], index: 5, kind: input, shape index: {}]   ;;  %s9532_s9 = inlined_call_operand.vmem [shape: f32[2,24,128], index: 9, kind: output, shape index: {2}]   ;;  %s9533_s10 = inlined_call_operand.vmem [shape: f32[2,16,128], index: 10, kind: output, shape index: {3}]   ;;  %s9534_s6 = inlined_call_operand.vmem [shape: f32[6,128,128], index: 6, kind: input, shape index: {}]   ;;  %s9535_s11 = inlined_call_operand.vmem [shape: f32[2,24,128], index: 11, kind: output, shape index: {4}]   ;;  %s9536_s12 = inlined_call_operand.vmem [shape: f32[2,16,128], index: 12, kind: output, shape index: {5}]   ;;  %s9537_s7 = inlined_call_operand.vmem [shape: f32[24,128], index: 7, kind: output, shape index: {0}]   ;;  %s9538_s8 = inlined_call_operand.vmem [shape: f32[16,128], index: 8, kind: output, shape index: {1}]  }
   0x1   :  { %6682 = vmatprep.subr.bf16.mxu0 %v9541_v0  ;;  %v40_v1 = vld [vmem:[%s9526_s3] sm:$0xff]  ;;  %v41_v2 = vld [vmem:[%s9526_s3 + $0x8] sm:$0xff]  ;;  %v42_v3 = vld [vmem:[%s9526_s3 + $0x10] sm:$0xff]  ;;  %5654 = vmatprep.mubr.msk.f32.mxu0 %vm7291_vm0, %v9539_v4  ;;  %vm355_vm2 = vcmask 195584  }
   0x2   :  { %v6683_v5 = vpack.c.bf16 %v41_v2, %v40_v1  ;;  %v43_v6 = vld [vmem:[%s9526_s3 + $0x18] sm:$0xff]  ;;  %v44_v8 = vld [vmem:[%s9526_s3 + $0x20] sm:$0xff]  ;;  %v45_v9 = vld [vmem:[%s9526_s3 + $0x28] sm:$0xff] }
   0x3   :  { %v6686_v7 = vpack.c.bf16 %v43_v6, %v42_v3  ;;  %v7383_v10 = vld [vmem:[%s9527_s0] sm:$0xff]  ;;  %v6689_v11 = vpack.c.bf16 %v45_v9, %v44_v8  ;;  %v46_v12 = vld [vmem:[%s9526_s3 + $0x30] sm:$0xff]  ;;  %v47_v13 = vld [vmem:[%s9526_s3 + $0x38] sm:$0xff] }
   0x4   :  { %6684 = vmatpush3.bf16.msra.mxu0 %v6683_v5  ;;  %323 = vxpose.xlu0.b32.start [1/3] (short) (narrow) %v7383_v10, 16  ;;  %v6692_v14 = vpack.c.bf16 %v47_v13, %v46_v12  ;;  %v48_v15 = vld [vmem:[%s9526_s3 + $0x40] sm:$0xff]  ;;  %v49_v16 = vld [vmem:[%s9526_s3 + $0x48] sm:$0xff]  ;;  %v50_v18 = vld [vmem:[%s9526_s3 + $0x50] sm:$0xff] }
   0x5   :  { %6685 = vmatprep.subr.bf16.mxu0 %v9541_v0  ;;  %v6695_v17 = vpack.c.bf16 %v49_v16, %v48_v15  ;;  %v51_v19 = vld [vmem:[%s9526_s3 + $0x58] sm:$0xff]  ;;  %v52_v21 = vld [vmem:[%s9526_s3 + $0x60] sm:$0xff]  ;;  %v53_v22 = vld [vmem:[%s9526_s3 + $0x68] sm:$0xff] }
   0x6   :  { %v6698_v20 = vpack.c.bf16 %v51_v19, %v50_v18  ;;  %v6701_v23 = vpack.c.bf16 %v53_v22, %v52_v21  ;;  %v54_v24 = vld [vmem:[%s9526_s3 + $0x70] sm:$0xff]  ;;  %v55_v25 = vld [vmem:[%s9526_s3 + $0x78] sm:$0xff]  ;;  %v35_v27 = vld [vmem:[%s9528_s1] sm:$0xff] }
   0x7   :  { %v6704_v26 = vpack.c.bf16 %v55_v25, %v54_v24  ;;  %v36_v28 = vld [vmem:[%s9528_s1 + $0x8] sm:$0xff]  ;;  %v7433_v29 = vld [vmem:[%s9528_s1 + $0x10] sm:$0xff]  ;;  %v136_v32 = vld [vmem:[%s9529_s4] sm:$0xff] }
   0x8   :  { %6687 = vmatpush3.bf16.msra.mxu0 %v6686_v7  ;;  %v33_v30 = vld [vmem:[%s9527_s0 + $0x8] sm:$0xff]  ;;  %v7444_v31 = vld [vmem:[%s9527_s0 + $0x10] sm:$0xff]  ;;  %v139_v36 = vld [vmem:[%s9529_s4 + $0x18] sm:$0xff]  ;;  %v6741_v59 = vpack.c.bf16 %v36_v28, %v35_v27 }
   0x9   :  { %6688 = vmatprep.subr.bf16.mxu0 %v9541_v0  ;;  %324 = vxpose.xlu0.b32.cont [2/3] (short) (narrow) %v33_v30, 16  ;;  %v137_v33 = vld [vmem:[%s9529_s4 + $0x8] sm:$0xff]  ;;  %v138_v34 = vld [vmem:[%s9529_s4 + $0x10] sm:$0xff]  ;;  %v140_v38 = vld [vmem:[%s9529_s4 + $0x20] sm:$0xff] }
   0xa   :  { %v6706_v35 = vpack.c.bf16 %v137_v33, %v136_v32  ;;  %v6710_v37 = vpack.c.bf16 %v139_v36, %v138_v34  ;;  %v141_v39 = vld [vmem:[%s9529_s4 + $0x28] sm:$0xff]  ;;  %v38_v41 = vld [vmem:[%s9530_s2] sm:$0xff]  ;;  %v142_v42 = vld [vmem:[%s9529_s4 + $0x30] sm:$0xff] }
   0xb   :  { %v6714_v40 = vpack.c.bf16 %v141_v39, %v140_v38  ;;  %v143_v43 = vld [vmem:[%s9529_s4 + $0x38] sm:$0xff]  ;;  %5695 = vmatprep.mubr.f32.mxu1 %v38_v41  ;;  %v144_v45 = vld [vmem:[%s9529_s4 + $0x40] sm:$0xff]  ;;  %v145_v46 = vld [vmem:[%s9529_s4 + $0x48] sm:$0xff] }
   0xc   :  { %6690 = vmatpush3.bf16.msra.mxu0 %v6689_v11  ;;  %6707 = vmatprep.subr.bf16.mxu1 %v6706_v35  ;;  %v6718_v44 = vpack.c.bf16 %v143_v43, %v142_v42  ;;  %v6722_v47 = vpack.c.bf16 %v145_v46, %v144_v45  ;;  %v146_v48 = vld [vmem:[%s9529_s4 + $0x50] sm:$0xff]  ;;  %v147_v49 = vld [vmem:[%s9529_s4 + $0x58] sm:$0xff]  ;;  %v148_v51 = vld [vmem:[%s9529_s4 + $0x60] sm:$0xff] }
   0xd   :  { %6691 = vmatprep.subr.bf16.mxu0 %v9541_v0  ;;  %325 = vxpose.xlu0.b32.end [3/3] (short) (narrow) %v7444_v31, 16  ;;  %v6726_v50 = vpack.c.bf16 %v147_v49, %v146_v48  ;;  %v149_v52 = vld [vmem:[%s9529_s4 + $0x68] sm:$0xff]  ;;  %v150_v54 = vld [vmem:[%s9529_s4 + $0x70] sm:$0xff]  ;;  %v151_v55 = vld [vmem:[%s9529_s4 + $0x78] sm:$0xff] }
   0xe   :  { %6709 = vmatpush3.bf16.msra.mxu1 %v6706_v35  ;;  %v6730_v53 = vpack.c.bf16 %v149_v52, %v148_v51  ;;  %v6734_v56 = vpack.c.bf16 %v151_v55, %v150_v54  ;;  %v39_v57 = vld [vmem:[%s9530_s2 + $0x8] sm:$0xff]  ;;  %v698_v6 = vld [vmem:[%s9531_s5] sm:$0xff]  ;;  %v4812_v11 = vld [vmem:[%s9531_s5 + $0x90] sm:$0xff] }
   0xf   :  { %6711 = vmatprep.subr.bf16.mxu1 %v6710_v37  ;;  %v7501_v58 = vpack.c.bf16 %v39_v57, %v38_v41  ;;  %v699_v7 = vld [vmem:[%s9531_s5 + $0x8] sm:$0xff]  ;;  %v4810_v8 = vld [vmem:[%s9531_s5 + $0x80] sm:$0xff]  ;;  %v701_v12 = vld [vmem:[%s9531_s5 + $0x18] sm:$0xff] }
  0x10   :  { %6693 = vmatpush3.bf16.msra.mxu0 %v6692_v14  ;;  %v4811_v9 = vld [vmem:[%s9531_s5 + $0x88] sm:$0xff]  ;;  %v4813_v13 = vld [vmem:[%s9531_s5 + $0x98] sm:$0xff]  ;;  %v702_v14 = vld [vmem:[%s9531_s5 + $0x20] sm:$0xff] }
  0x11   :  { %6694 = vmatprep.subr.bf16.mxu0 %v9541_v0  ;;  %714 = vxpose.xlu0.b32.start [1/16] %v698_v6, 128  ;;  %v4814_v15 = vld [vmem:[%s9531_s5 + $0xa0] sm:$0xff]  ;;  %v703_v16 = vld [vmem:[%s9531_s5 + $0x28] sm:$0xff]  ;;  %v704_v18 = vld [vmem:[%s9531_s5 + $0x30] sm:$0xff] }
  0x12   :  { %6713 = vmatpush3.bf16.msra.mxu1 %v6710_v37  ;;  %v4816_v19 = vld [vmem:[%s9531_s5 + $0xb0] sm:$0xff]  ;;  %v4817_v21 = vld [vmem:[%s9531_s5 + $0xb8] sm:$0xff]  ;;  %v706_v22 = vld [vmem:[%s9531_s5 + $0x40] sm:$0xff] }
  0x13   :  { %6715 = vmatprep.subr.bf16.mxu1 %v6714_v40  ;;  %v707_v24 = vld [vmem:[%s9531_s5 + $0x48] sm:$0xff]  ;;  %v712_v34 = vld [vmem:[%s9531_s5 + $0x70] sm:$0xff]  ;;  %v713_v36 = vld [vmem:[%s9531_s5 + $0x78] sm:$0xff] }
  0x14   :  { %6696 = vmatpush3.bf16.msra.mxu0 %v6695_v17  ;;  %v4815_v17 = vld [vmem:[%s9531_s5 + $0xa8] sm:$0xff]  ;;  %v4824_v35 = vld [vmem:[%s9531_s5 + $0xf0] sm:$0xff]  ;;  %v4825_v37 = vld [vmem:[%s9531_s5 + $0xf8] sm:$0xff] }
  0x15   :  { %6697 = vmatprep.subr.bf16.mxu0 %v9541_v0  ;;  %715 = vxpose.xlu0.b32.cont [2/16] %v699_v7, 128  ;;  %v4819_v25 = vld [vmem:[%s9531_s5 + $0xc8] sm:$0xff] }
  0x16   :  { %6717 = vmatpush3.bf16.msra.mxu1 %v6714_v40  ;;  %v711_v32 = vld [vmem:[%s9531_s5 + $0x68] sm:$0xff] }
  0x17   :  { %6719 = vmatprep.subr.bf16.mxu1 %v6718_v44  ;;  %v4823_v33 = vld [vmem:[%s9531_s5 + $0xe8] sm:$0xff] }
  0x18   :  { %6699 = vmatpush3.bf16.msra.mxu0 %v6698_v20  ;;  %v705_v20 = vld [vmem:[%s9531_s5 + $0x38] sm:$0xff] }
  0x19   :  { %6700 = vmatprep.subr.bf16.mxu0 %v9541_v0 }
  0x1a   :  { %6721 = vmatpush3.bf16.msra.mxu1 %v6718_v44 }
  0x1b   :  { %6723 = vmatprep.subr.bf16.mxu1 %v6722_v47 }
  0x1c   :  { %6702 = vmatpush3.bf16.msra.mxu0 %v6701_v23  ;;  %v4818_v23 = vld [vmem:[%s9531_s5 + $0xc0] sm:$0xff] }
  0x1d   :  { %6703 = vmatprep.subr.bf16.mxu0 %v9541_v0 }
  0x1e   :  { %6725 = vmatpush3.bf16.msra.mxu1 %v6722_v47 }
  0x1f   :  { %6727 = vmatprep.subr.bf16.mxu1 %v6726_v50 }
  0x20   :  { %6705 = vmatpush3.bf16.msra.mxu0 %v6704_v26  ;;  %v708_v26 = vld [vmem:[%s9531_s5 + $0x50] sm:$0xff] }
  0x22   :  { %6729 = vmatpush3.bf16.msra.mxu1 %v6726_v50 }
  0x23   :  { %5655 = vmatmul.mubr.f32.vlgmr.msra.gmra.mrb[0].mxu0 %v35_v27  ;;  %6731 = vmatprep.subr.bf16.mxu1 %v6730_v53  ;;  %v4820_v27 = vld [vmem:[%s9531_s5 + $0xd0] sm:$0xff] }
  0x24   :  { %5657 = vmatprep.mubr.msk.f32.mxu0 %vm7291_vm0, %v9539_v4 }
  0x26   :  { %6733 = vmatpush3.bf16.msra.mxu1 %v6730_v53 }
  0x27   :  { %5658 = vmatmul.mubr.f32.gmra.mrb[2].mxu0 %v36_v28  ;;  %6735 = vmatprep.subr.bf16.mxu1 %v6734_v56  ;;  %v709_v28 = vld [vmem:[%s9531_s5 + $0x58] sm:$0xff] }
  0x28   :  { %5660 = vmatprep.mubr.msk.f32.mxu0 %vm7291_vm0, %v9539_v4 }
  0x2a   :  { %6737 = vmatpush3.bf16.msra.mxu1 %v6734_v56 }
  0x2b   :  { %5661 = vmatmul.mubr.f32.gmra.mrb[4].mxu0 %v7433_v29  ;;  %6738 = vmatprep.subr.bf16.mxu1 %v9541_v0 }
  0x2d   :  { %5696 = vmatmul.mubr.f32.vlgmr.msra.gmra.mrb[0].mxu1 %v39_v57 }
  0x2e   :  { %6740 = vmatpush3.bf16.msra.mxu1 %v7501_v58  ;;  %5702 = vmatprep.mubr.msk.f32.mxu1 %vm7291_vm0, %v9539_v4 }
  0x2f   :  { %6742 = vmatprep.subr.bf16.mxu1 %v6741_v59 }
  0x31   :  { %5703 = vmatmul.mubr.msk.f32.vlgmr.msra.gmra.mrb[2].mxu1 %vm227_vm1, %v7383_v10  ;;  %v700_v10 = vld [vmem:[%s9531_s5 + $0x10] sm:$0xff] }
  0x32   :  { %5705 = vmatprep.mubr.msk.f32.mxu1 %vm7291_vm0, %v9539_v4  ;;  %6744 = vmatpush3.bf16.msra.mxu1 %v6741_v59 }
  0x33   :  { %5715 = vmatprep.subr.mxu1 %v7433_v29  ;;  %716 = vxpose.xlu0.b32.cont [3/16] %v700_v10, 128 }
  0x35   :  { %5706 = vmatmul.mubr.msk.f32.gmra.mrb[4].mxu1 %vm227_vm1, %v33_v30  ;;  %v710_v30 = vld [vmem:[%s9531_s5 + $0x60] sm:$0xff] }
  0x36   :  { %5708 = vmatprep.mubr.msk.f32.mxu1 %vm7291_vm0, %v9539_v4  ;;  %5716 = vmatpush3.msra.mxu1 %v7433_v29 }
  0x37   :  { %6746 = vmatprep.subr.bf16.mxu1 %v6741_v59  ;;  %717 = vxpose.xlu0.b32.cont [4/16] %v701_v12, 128 }
  0x39   :  { %5709 = vmatmul.mubr.msk.f32.gmra.mrb[6].mxu1 %vm227_vm1, %v7444_v31  ;;  %v4822_v31 = vld [vmem:[%s9531_s5 + $0xe0] sm:$0xff] }
  0x3b   :  { %718 = vxpose.xlu0.b32.cont [5/16] %v702_v14, 128 }
  0x3f   :  { %719 = vxpose.xlu0.b32.cont [6/16] %v703_v16, 128 }
  0x43   :  { %720 = vxpose.xlu0.b32.cont [7/16] %v704_v18, 128 }
  0x47   :  { %721 = vxpose.xlu0.b32.cont [8/16] %v705_v20, 128 }
  0x4b   :  { %722 = vxpose.xlu0.b32.cont [9/16] %v706_v22, 128 }
  0x4f   :  { %723 = vxpose.xlu0.b32.cont [10/16] %v707_v24, 128 }
  0x53   :  { %724 = vxpose.xlu0.b32.cont [11/16] %v708_v26, 128 }
  0x57   :  { %725 = vxpose.xlu0.b32.cont [12/16] %v709_v28, 128 }
  0x5b   :  { %726 = vxpose.xlu0.b32.cont [13/16] %v710_v30, 128 }
  0x5f   :  { %727 = vxpose.xlu0.b32.cont [14/16] %v711_v32, 128 }
  0x63   :  { %728 = vxpose.xlu0.b32.cont [15/16] %v712_v34, 128 }
  0x67   :  { %729 = vxpose.xlu0.b32.end [16/16] %v713_v36, 128 }
  0x85   :  { %v7518_v60 = vpop.trf.xlu0 }
  0x86   :  { %5717 = vmatprep.mubr.msk.f32.mxu1 %vm355_vm2, %v7518_v60 }
  0x89   :  { %v7524_v62 = vpop.trf.xlu0 }
  0x8a   :  { %5718 = vmatmul.mubr.msk.f32.vlgmr.msra.gmra.mrb[8].mxu1 %vm355_vm2, %v7524_v62 }
  0x8b   :  { %6748 = vmatpush3.bf16.msra.mxu1 %v6741_v59 }
  0x8c   :  { %5724 = vmatprep.subr.mxu1 %v7433_v29 }
  0x8f   :  { %5725 = vmatpush3.msra.mxu1 %v7433_v29  ;;  %v4821_v29 = vld [vmem:[%s9531_s5 + $0xd8] sm:$0xff] }
  0xab   :  { %v730_v18 = vpop.trf.xlu0 }
  0xac   :  { %5782 = vmatprep.mubr.f32.mxu0 %v730_v18 }
  0xf6   :  { %v7522_v61 = vpop.f32.mrb[0].mxu0 }
  0xf7   :  { %441 = vxpose.xlu1.b32.start [1/3] (short) %v7522_v61, 128  ;;  %v5656_v63 = vpop.f32.mrb[1].mxu0 }
  0xfa   :  { %v7530_v1 = vpop.f32.mrb[2].mxu0 }
  0xfb   :  { %9563 = vst [vmem:[#allocation2_spill] sm:$0xff] %v7530_v1  ;;  %442 = vxpose.xlu1.b32.cont [2/3] (short) %v7530_v1, 128  ;;  %v5659_v2 = vpop.f32.mrb[3].mxu0 }
  0xfe   :  { %v7534_v3 = vpop.f32.mrb[4].mxu0 }
  0xff   :  { %9564 = vst [vmem:[#allocation3_spill] sm:$0xff] %v7534_v3  ;;  %443 = vxpose.xlu1.b32.end [3/3] (short) %v7534_v3, 128  ;;  %v5662_v5 = vpop.f32.mrb[5].mxu0 }
 0x100   :  { %v7633_v38 = vpop.f32.mrb[0].mxu1 }
 0x101   :  { %v7637_v40 = vpop.f32.mrb[1].mxu1 }
 0x104   :  { %v303_v41 = vpop.f32.mrb[2].mxu1 }
 0x105   :  { %v317_v43 = vmul.f32 0.5, %v303_v41  ;;  %v5704_v44 = vpop.f32.mrb[3].mxu1 }
 0x107   :  { %v320_v45 = vmax.f32 %v317_v43, %v303_v41 }
 0x108   :  { %v308_v46 = vpop.f32.mrb[4].mxu1 }
 0x109   :  { %2570 = vst [vmem:[%s9532_s9] sm:$0xff] %v320_v45  ;;  %v318_v48 = vmul.f32 0.5, %v308_v46  ;;  %v5707_v49 = vpop.f32.mrb[5].mxu1 }
 0x10b   :  { %v321_v50 = vmax.f32 %v318_v48, %v308_v46 }
 0x10c   :  { %v313_v51 = vpop.f32.mrb[6].mxu1 }
 0x10d   :  { %2571 = vst [vmem:[%s9532_s9 + $0x8] sm:$0xff] %v321_v50  ;;  %v319_v53 = vmul.f32 0.5, %v313_v51  ;;  %v5710_v54 = vpop.f32.mrb[7].mxu1 }
 0x10f   :  { %v322_v55 = vmax.f32 %v319_v53, %v313_v51 }
 0x111   :  { %2572 = vst [vmem:[%s9532_s9 + $0x10] sm:$0xff] %v322_v55 }
 0x134   :  { %956 = vxpose.xlu1.b32.start [1/16] %v4810_v8, 128 }
 0x138   :  { %957 = vxpose.xlu1.b32.cont [2/16] %v4811_v9, 128 }
 0x13c   :  { %958 = vxpose.xlu1.b32.cont [3/16] %v4812_v11, 128 }
 0x140   :  { %959 = vxpose.xlu1.b32.cont [4/16] %v4813_v13, 128 }
 0x144   :  { %960 = vxpose.xlu1.b32.cont [5/16] %v4814_v15, 128 }
 0x148   :  { %961 = vxpose.xlu1.b32.cont [6/16] %v4815_v17, 128 }
 0x14c   :  { %962 = vxpose.xlu1.b32.cont [7/16] %v4816_v19, 128 }
 0x150   :  { %963 = vxpose.xlu1.b32.cont [8/16] %v4817_v21, 128 }
 0x154   :  { %964 = vxpose.xlu1.b32.cont [9/16] %v4818_v23, 128 }
 0x158   :  { %965 = vxpose.xlu1.b32.cont [10/16] %v4819_v25, 128 }
 0x15c   :  { %966 = vxpose.xlu1.b32.cont [11/16] %v4820_v27, 128 }
 0x15d   :  { %v5719_v12 = vpop.f32.mrb[8].mxu1 }
 0x15e   :  { %v438_v13 = vmul.f32 0.5, %v5719_v12  ;;  %v428_v14 = vpop.f32.mrb[9].mxu1 }
 0x15f   :  { %v437_v15 = vmul.f32 0.5, %v428_v14 }
 0x160   :  { %967 = vxpose.xlu1.b32.cont [12/16] %v4821_v29, 128  ;;  %v440_v16 = vmax.f32 %v438_v13, %v5719_v12  ;;  %v7724_v29 = vpop.trf.xlu0 }
 0x161   :  { %v439_v17 = vmax.f32 %v437_v15, %v428_v14 }
 0x162   :  { %2574 = vst [vmem:[%s9533_s10 + $0x8] sm:$0xff] %v440_v16 }
 0x163   :  { %2573 = vst [vmem:[%s9533_s10] sm:$0xff] %v439_v17 }
 0x164   :  { %968 = vxpose.xlu1.b32.cont [13/16] %v4822_v31, 128  ;;  %v7732_v34 = vpop.trf.xlu0 }
 0x168   :  { %969 = vxpose.xlu1.b32.cont [14/16] %v4823_v33, 128  ;;  %v733_v45 = vpop.trf.xlu0 }
 0x16c   :  { %970 = vxpose.xlu1.b32.cont [15/16] %v4824_v35, 128  ;;  %v734_v54 = vpop.trf.xlu0 }
 0x170   :  { %971 = vxpose.xlu1.b32.end [16/16] %v4825_v37, 128  ;;  %v735_v16 = vpop.trf.xlu0 }
 0x174   :  { %1509 = vxpose.xlu1.b32.start [1/2] (short) %v7637_v40, 128 }
 0x177   :  { %v7635_v39 = vpop.trf.xlu1 }
 0x178   :  { %5726 = vmatprep.mubr.msk.f32.mxu1 %vm355_vm2, %v7635_v39  ;;  %1510 = vxpose.xlu1.b32.end [2/2] (short) %v7633_v38, 128 }
 0x17b   :  { %v7642_v42 = vpop.trf.xlu1 }
 0x17c   :  { %5727 = vmatmul.mubr.msk.f32.vlgmr.msra.gmra.mrb[10].mxu1 %vm355_vm2, %v7642_v42 }
 0x17f   :  { %v7647_v47 = vpop.trf.xlu1 }
 0x180   :  { %5729 = vmatprep.mubr.msk.f32.mxu1 %vm355_vm2, %v7647_v47 }
 0x183   :  { %v7654_v52 = vpop.trf.xlu1 }
 0x184   :  { %5730 = vmatmul.mubr.msk.f32.gmra.mrb[12].mxu1 %vm355_vm2, %v7654_v52 }
 0x187   :  { %v7661_v56 = vpop.trf.xlu1 }
 0x188   :  { %5732 = vmatprep.mubr.msk.f32.mxu1 %vm355_vm2, %v7661_v56 }
 0x18b   :  { %v7668_v57 = vpop.trf.xlu1 }
 0x18c   :  { %5733 = vmatmul.mubr.msk.f32.gmra.mrb[14].mxu1 %vm355_vm2, %v7668_v57 }
 0x18f   :  { %v7672_v59 = vpop.trf.xlu1 }
 0x190   :  { %5735 = vmatprep.mubr.msk.f32.mxu1 %vm355_vm2, %v7672_v59 }
 0x193   :  { %v7676_v63 = vpop.trf.xlu1 }
 0x194   :  { %5736 = vmatmul.mubr.msk.f32.gmra.mrb[16].mxu1 %vm355_vm2, %v7676_v63 }
 0x197   :  { %v7680_v2 = vpop.trf.xlu1 }
 0x198   :  { %5738 = vmatprep.mubr.msk.f32.mxu1 %vm355_vm2, %v7680_v2 }
 0x19b   :  { %v7684_v5 = vpop.trf.xlu1 }
 0x19c   :  { %5739 = vmatmul.mubr.msk.f32.gmra.mrb[18].mxu1 %vm355_vm2, %v7684_v5 }
 0x19f   :  { %v7688_v6 = vpop.trf.xlu1 }
 0x1a0   :  { %5741 = vmatprep.mubr.msk.f32.mxu1 %vm355_vm2, %v7688_v6 }
 0x1a3   :  { %v7692_v7 = vpop.trf.xlu1 }
 0x1a4   :  { %5742 = vmatmul.mubr.msk.f32.gmra.mrb[20].mxu1 %vm355_vm2, %v7692_v7 }
 0x1a7   :  { %v7696_v8 = vpop.trf.xlu1 }
 0x1a8   :  { %5744 = vmatprep.mubr.msk.f32.mxu1 %vm355_vm2, %v7696_v8 }
 0x1ab   :  { %v7700_v9 = vpop.trf.xlu1 }
 0x1ac   :  { %5745 = vmatmul.mubr.msk.f32.gmra.mrb[22].mxu1 %vm355_vm2, %v7700_v9 }
 0x1af   :  { %v7704_v10 = vpop.trf.xlu1 }
 0x1b0   :  { %9565 = vst [vmem:[#allocation4_spill] sm:$0xff] %v7704_v10  ;;  %5747 = vmatprep.mubr.msk.f32.mxu1 %vm355_vm2, %v7704_v10 }
 0x1b3   :  { %v7708_v11 = vpop.trf.xlu1 }
 0x1b4   :  { %9566 = vst [vmem:[#allocation5_spill] sm:$0xff] %v7708_v11  ;;  %5748 = vmatmul.mubr.msk.f32.gmra.mrb[24].mxu1 %vm355_vm2, %v7708_v11 }
 0x24f   :  { %v5728_v19 = vpop.f32.mrb[10].mxu1 }
 0x250   :  { %v667_v20 = vmul.f32 0.5, %v5728_v19  ;;  %v587_v21 = vpop.f32.mrb[11].mxu1 }
 0x251   :  { %v666_v22 = vmul.f32 0.5, %v587_v21 }
 0x252   :  { %v7718_v23 = vmax.f32 %v667_v20, %v5728_v19 }
 0x253   :  { %v7720_v24 = vmax.f32 %v666_v22, %v587_v21  ;;  %v736_v21 = vpop.trf.xlu0 }
 0x255   :  { %v6749_v25 = vpack.c.bf16 %v7718_v23, %v7720_v24 }
 0x257   :  { %v5731_v26 = vpop.f32.mrb[12].mxu1  ;;  %6750 = vmatprep.subr.bf16.mxu0 %v6749_v25 }
 0x258   :  { %v669_v27 = vmul.f32 0.5, %v5731_v26  ;;  %v597_v28 = vpop.f32.mrb[13].mxu1  ;;  %6752 = vmatpush3.bf16.msra.mxu0 %v6749_v25 }
 0x259   :  { %v668_v30 = vmul.f32 0.5, %v597_v28 }
 0x25a   :  { %v7726_v31 = vmax.f32 %v669_v27, %v5731_v26 }
 0x25b   :  { %v7728_v32 = vmax.f32 %v668_v30, %v597_v28 }
 0x25d   :  { %v6753_v33 = vpack.c.bf16 %v7726_v31, %v7728_v32 }
 0x25f   :  { %v5734_v35 = vpop.f32.mrb[14].mxu1  ;;  %6754 = vmatprep.subr.bf16.mxu0 %v6753_v33 }
 0x260   :  { %v671_v36 = vmul.f32 0.5, %v5734_v35  ;;  %v607_v37 = vpop.f32.mrb[15].mxu1  ;;  %6756 = vmatpush3.bf16.msra.mxu0 %v6753_v33  ;;  %v737_v33 = vpop.trf.xlu0 }
 0x261   :  { %v670_v41 = vmul.f32 0.5, %v607_v37 }
 0x262   :  { %v7734_v43 = vmax.f32 %v671_v36, %v5734_v35 }
 0x263   :  { %v7736_v44 = vmax.f32 %v670_v41, %v607_v37 }
 0x265   :  { %v6757_v46 = vpack.c.bf16 %v7734_v43, %v7736_v44 }
 0x267   :  { %v5737_v48 = vpop.f32.mrb[16].mxu1  ;;  %6758 = vmatprep.subr.bf16.mxu0 %v6757_v46 }
 0x268   :  { %v673_v49 = vmul.f32 0.5, %v5737_v48  ;;  %v617_v50 = vpop.f32.mrb[17].mxu1  ;;  %6760 = vmatpush3.bf16.msra.mxu0 %v6757_v46 }
 0x269   :  { %v672_v51 = vmul.f32 0.5, %v617_v50 }
 0x26a   :  { %v7740_v53 = vmax.f32 %v673_v49, %v5737_v48  ;;  %v738_v49 = vpop.trf.xlu0 }
 0x26b   :  { %v7742_v55 = vmax.f32 %v672_v51, %v617_v50 }
 0x26d   :  { %v6761_v12 = vpack.c.bf16 %v7740_v53, %v7742_v55 }
 0x26f   :  { %v5740_v13 = vpop.f32.mrb[18].mxu1  ;;  %6762 = vmatprep.subr.bf16.mxu0 %v6761_v12 }
 0x270   :  { %v675_v14 = vmul.f32 0.5, %v5740_v13  ;;  %v627_v15 = vpop.f32.mrb[19].mxu1  ;;  %6764 = vmatpush3.bf16.msra.mxu0 %v6761_v12 }
 0x271   :  { %v674_v17 = vmul.f32 0.5, %v627_v15 }
 0x272   :  { %v7746_v18 = vmax.f32 %v675_v14, %v5740_v13 }
 0x273   :  { %v7748_v19 = vmax.f32 %v674_v17, %v627_v15  ;;  %v739_v15 = vpop.trf.xlu0 }
 0x275   :  { %v6765_v20 = vpack.c.bf16 %v7746_v18, %v7748_v19 }
 0x277   :  { %v5743_v22 = vpop.f32.mrb[20].mxu1  ;;  %6766 = vmatprep.subr.bf16.mxu0 %v6765_v20 }
 0x278   :  { %v677_v25 = vmul.f32 0.5, %v5743_v22  ;;  %v637_v26 = vpop.f32.mrb[21].mxu1  ;;  %6768 = vmatpush3.bf16.msra.mxu0 %v6765_v20 }
 0x279   :  { %v676_v27 = vmul.f32 0.5, %v637_v26 }
 0x27a   :  { %v7752_v28 = vmax.f32 %v677_v25, %v5743_v22 }
 0x27b   :  { %v7754_v30 = vmax.f32 %v676_v27, %v637_v26  ;;  %v740_v26 = vpop.trf.xlu0 }
 0x27d   :  { %v6769_v35 = vpack.c.bf16 %v7752_v28, %v7754_v30 }
 0x27f   :  { %v5746_v36 = vpop.f32.mrb[22].mxu1  ;;  %6770 = vmatprep.subr.bf16.mxu0 %v6769_v35  ;;  %v741_v27 = vpop.trf.xlu0 }
 0x280   :  { %v679_v37 = vmul.f32 0.5, %v5746_v36  ;;  %v647_v41 = vpop.f32.mrb[23].mxu1  ;;  %6772 = vmatpush3.bf16.msra.mxu0 %v6769_v35 }
 0x281   :  { %v678_v46 = vmul.f32 0.5, %v647_v41 }
 0x282   :  { %v7758_v48 = vmax.f32 %v679_v37, %v5746_v36 }
 0x283   :  { %v7760_v50 = vmax.f32 %v678_v46, %v647_v41  ;;  %v742_v35 = vpop.trf.xlu0  ;;  %v4832_v46 = vld [vmem:[%s9531_s5 + $0x130] sm:$0xff] }
 0x285   :  { %v6773_v51 = vpack.c.bf16 %v7758_v48, %v7760_v50 }
 0x287   :  { %v5749_v12 = vpop.f32.mrb[24].mxu1  ;;  %6774 = vmatprep.subr.bf16.mxu0 %v6773_v51  ;;  %v743_v36 = vpop.trf.xlu0 }
 0x288   :  { %v681_v13 = vmul.f32 0.5, %v5749_v12  ;;  %v657_v14 = vpop.f32.mrb[25].mxu1  ;;  %6776 = vmatpush3.bf16.msra.mxu0 %v6773_v51  ;;  %v4834_v51 = vld [vmem:[%s9531_s5 + $0x140] sm:$0xff] }
 0x289   :  { %v680_v17 = vmul.f32 0.5, %v657_v14 }
 0x28a   :  { %v7764_v20 = vmax.f32 %v681_v13, %v5749_v12  ;;  %v4835_v12 = vld [vmem:[%s9531_s5 + $0x148] sm:$0xff]  ;;  %v4836_v13 = vld [vmem:[%s9531_s5 + $0x150] sm:$0xff] }
 0x28b   :  { %v7766_v22 = vmax.f32 %v680_v17, %v657_v14  ;;  %v744_v37 = vpop.trf.xlu0  ;;  %v4838_v17 = vld [vmem:[%s9531_s5 + $0x160] sm:$0xff] }
 0x28d   :  { %v6777_v25 = vpack.c.bf16 %v7764_v20, %v7766_v22 }
 0x28f   :  { %6778 = vmatprep.subr.bf16.mxu0 %v6777_v25  ;;  %v745_v41 = vpop.trf.xlu0 }
 0x290   :  { %6780 = vmatpush3.bf16.msra.mxu0 %v6777_v25 }
 0x293   :  { %5783 = vmatmul.mubr.f32.vlgmr.msra.gmra.mrb[6].mxu0 %v7724_v29  ;;  %v972_v29 = vpop.trf.xlu1 }
 0x294   :  { %5785 = vmatprep.mubr.f32.mxu0 %v7732_v34  ;;  %5838 = vmatprep.mubr.f32.mxu1 %v972_v29  ;;  %v4826_v34 = vld [vmem:[%s9531_s5 + $0x100] sm:$0xff] }
 0x295   :  { %1198 = vxpose.xlu0.b32.start [1/16] %v4826_v34, 128 }
 0x297   :  { %5786 = vmatmul.mubr.f32.gmra.mrb[8].mxu0 %v733_v45  ;;  %v4827_v45 = vld [vmem:[%s9531_s5 + $0x108] sm:$0xff]  ;;  %v7805_v14 = vpop.trf.xlu1 }
 0x298   :  { %5788 = vmatprep.mubr.f32.mxu0 %v734_v54  ;;  %v4828_v54 = vld [vmem:[%s9531_s5 + $0x110] sm:$0xff] }
 0x299   :  { %1199 = vxpose.xlu0.b32.cont [2/16] %v4827_v45, 128 }
 0x29b   :  { %5789 = vmatmul.mubr.f32.gmra.mrb[10].mxu0 %v735_v16  ;;  %v4829_v16 = vld [vmem:[%s9531_s5 + $0x118] sm:$0xff]  ;;  %v7813_v25 = vpop.trf.xlu1 }
 0x29c   :  { %5791 = vmatprep.mubr.f32.mxu0 %v736_v21  ;;  %v4830_v21 = vld [vmem:[%s9531_s5 + $0x120] sm:$0xff] }
 0x29d   :  { %1200 = vxpose.xlu0.b32.cont [3/16] %v4828_v54, 128 }
 0x29f   :  { %5792 = vmatmul.mubr.f32.gmra.mrb[12].mxu0 %v737_v33  ;;  %v4831_v33 = vld [vmem:[%s9531_s5 + $0x128] sm:$0xff] }
 0x2a0   :  { %5794 = vmatprep.mubr.f32.mxu0 %v738_v49  ;;  %v4833_v49 = vld [vmem:[%s9531_s5 + $0x138] sm:$0xff] }
 0x2a1   :  { %1201 = vxpose.xlu0.b32.cont [4/16] %v4829_v16, 128 }
 0x2a3   :  { %5795 = vmatmul.mubr.f32.gmra.mrb[14].mxu0 %v739_v15  ;;  %v4837_v15 = vld [vmem:[%s9531_s5 + $0x158] sm:$0xff] }
 0x2a4   :  { %5797 = vmatprep.mubr.f32.mxu0 %v740_v26  ;;  %v4839_v26 = vld [vmem:[%s9531_s5 + $0x168] sm:$0xff] }
 0x2a5   :  { %1202 = vxpose.xlu0.b32.cont [5/16] %v4830_v21, 128 }
 0x2a7   :  { %5798 = vmatmul.mubr.f32.gmra.mrb[16].mxu0 %v741_v27  ;;  %v7818_v27 = vpop.trf.xlu1 }
 0x2a8   :  { %5800 = vmatprep.mubr.f32.mxu0 %v742_v35  ;;  %v4840_v35 = vld [vmem:[%s9531_s5 + $0x170] sm:$0xff] }
 0x2a9   :  { %1203 = vxpose.xlu0.b32.cont [6/16] %v4831_v33, 128 }
 0x2ab   :  { %5801 = vmatmul.mubr.f32.gmra.mrb[18].mxu0 %v743_v36  ;;  %v7826_v34 = vpop.trf.xlu1 }
 0x2ac   :  { %5803 = vmatprep.mubr.f32.mxu0 %v744_v37  ;;  %v4841_v37 = vld [vmem:[%s9531_s5 + $0x178] sm:$0xff] }
 0x2ad   :  { %1204 = vxpose.xlu0.b32.cont [7/16] %v4832_v46, 128 }
 0x2af   :  { %5804 = vmatmul.mubr.f32.gmra.mrb[20].mxu0 %v745_v41 }
 0x2b1   :  { %1205 = vxpose.xlu0.b32.cont [8/16] %v4833_v49, 128 }
 0x2b5   :  { %1206 = vxpose.xlu0.b32.cont [9/16] %v4834_v51, 128 }
 0x2b9   :  { %1207 = vxpose.xlu0.b32.cont [10/16] %v4835_v12, 128 }
 0x2bd   :  { %1208 = vxpose.xlu0.b32.cont [11/16] %v4836_v13, 128 }
 0x2c1   :  { %1209 = vxpose.xlu0.b32.cont [12/16] %v4837_v15, 128  ;;  %v7834_v15 = vpop.trf.xlu1 }
 0x2c5   :  { %1210 = vxpose.xlu0.b32.cont [13/16] %v4838_v17, 128 }
 0x2c9   :  { %1211 = vxpose.xlu0.b32.cont [14/16] %v4839_v26, 128 }
 0x2cd   :  { %1212 = vxpose.xlu0.b32.cont [15/16] %v4840_v35, 128 }
 0x2d1   :  { %1213 = vxpose.xlu0.b32.end [16/16] %v4841_v37, 128 }
 0x366   :  { %v5784_v36 = vpop.f32.mrb[6].mxu0 }
 0x367   :  { %v892_v41 = vmul.f32 0.5, %v5784_v36  ;;  %v812_v29 = vpop.f32.mrb[7].mxu0 }
 0x368   :  { %v891_v45 = vmul.f32 0.5, %v812_v29 }
 0x369   :  { %v908_v54 = vmax.f32 %v892_v41, %v5784_v36 }
 0x36a   :  { %v907_v16 = vmax.f32 %v891_v45, %v812_v29  ;;  %v5787_v21 = vpop.f32.mrb[8].mxu0 }
 0x36b   :  { %v7829_v33 = vadd.f32 %v908_v54, %v7718_v23  ;;  %v894_v46 = vmul.f32 0.5, %v5787_v21  ;;  %v822_v49 = vpop.f32.mrb[9].mxu0 }
 0x36c   :  { %v7832_v51 = vadd.f32 %v907_v16, %v7720_v24  ;;  %v893_v12 = vmul.f32 0.5, %v822_v49 }
 0x36d   :  { %v910_v13 = vmax.f32 %v894_v46, %v5787_v21 }
 0x36e   :  { %v909_v17 = vmax.f32 %v893_v12, %v822_v49  ;;  %v5790_v26 = vpop.f32.mrb[10].mxu0  ;;  %v6781_v35 = vpack.c.bf16 %v7829_v33, %v7832_v51  ;;  %v7849_v49 = vpop.trf.xlu1 }
 0x36f   :  { %v7839_v36 = vadd.f32 %v910_v13, %v7726_v31  ;;  %v896_v37 = vmul.f32 0.5, %v5790_v26  ;;  %v832_v23 = vpop.f32.mrb[11].mxu0 }
 0x370   :  { %v7842_v41 = vadd.f32 %v909_v17, %v7728_v32  ;;  %v895_v29 = vmul.f32 0.5, %v832_v23  ;;  %6782 = vmatprep.subr.bf16.mxu1 %v6781_v35 }
 0x371   :  { %v912_v24 = vmax.f32 %v896_v37, %v5790_v26  ;;  %6784 = vmatpush3.bf16.msra.mxu1 %v6781_v35 }
 0x372   :  { %v911_v45 = vmax.f32 %v895_v29, %v832_v23  ;;  %v5793_v54 = vpop.f32.mrb[12].mxu0  ;;  %v6785_v16 = vpack.c.bf16 %v7839_v36, %v7842_v41 }
 0x373   :  { %v7847_v21 = vadd.f32 %v912_v24, %v7734_v43  ;;  %v898_v46 = vmul.f32 0.5, %v5793_v54  ;;  %v842_v31 = vpop.f32.mrb[13].mxu0 }
 0x374   :  { %v7852_v12 = vadd.f32 %v911_v45, %v7736_v44  ;;  %v897_v32 = vmul.f32 0.5, %v842_v31  ;;  %6786 = vmatprep.subr.bf16.mxu1 %v6785_v16  ;;  %v979_v45 = vpop.trf.xlu1 }
 0x375   :  { %v914_v13 = vmax.f32 %v898_v46, %v5793_v54  ;;  %6788 = vmatpush3.bf16.msra.mxu1 %v6785_v16 }
 0x376   :  { %v913_v17 = vmax.f32 %v897_v32, %v842_v31  ;;  %v5796_v26 = vpop.f32.mrb[14].mxu0  ;;  %v6789_v35 = vpack.c.bf16 %v7847_v21, %v7852_v12 }
 0x377   :  { %v7857_v37 = vadd.f32 %v914_v13, %v7740_v53  ;;  %v900_v43 = vmul.f32 0.5, %v5796_v26  ;;  %v852_v23 = vpop.f32.mrb[15].mxu0 }
 0x378   :  { %v7860_v29 = vadd.f32 %v913_v17, %v7742_v55  ;;  %v899_v24 = vmul.f32 0.5, %v852_v23  ;;  %6790 = vmatprep.subr.bf16.mxu1 %v6789_v35 }
 0x379   :  { %v916_v44 = vmax.f32 %v900_v43, %v5796_v26  ;;  %6792 = vmatpush3.bf16.msra.mxu1 %v6789_v35 }
 0x37a   :  { %v915_v54 = vmax.f32 %v899_v24, %v852_v23  ;;  %v5799_v16 = vpop.f32.mrb[16].mxu0  ;;  %v6793_v46 = vpack.c.bf16 %v7857_v37, %v7860_v29 }
 0x37b   :  { %v7865_v31 = vadd.f32 %v916_v44, %v7746_v18  ;;  %v902_v53 = vmul.f32 0.5, %v5799_v16  ;;  %v862_v32 = vpop.f32.mrb[17].mxu0  ;;  %v980_v44 = vpop.trf.xlu1 }
 0x37c   :  { %v7868_v13 = vadd.f32 %v915_v54, %v7748_v19  ;;  %v901_v55 = vmul.f32 0.5, %v862_v32  ;;  %6794 = vmatprep.subr.bf16.mxu1 %v6793_v46 }
 0x37d   :  { %v918_v17 = vmax.f32 %v902_v53, %v5799_v16  ;;  %6796 = vmatpush3.bf16.msra.mxu1 %v6793_v46 }
 0x37e   :  { %v917_v26 = vmax.f32 %v901_v55, %v862_v32  ;;  %v5802_v35 = vpop.f32.mrb[18].mxu0  ;;  %v6797_v43 = vpack.c.bf16 %v7865_v31, %v7868_v13 }
 0x37f   :  { %v7873_v23 = vadd.f32 %v918_v17, %v7752_v28  ;;  %v904_v24 = vmul.f32 0.5, %v5802_v35  ;;  %v872_v18 = vpop.f32.mrb[19].mxu0 }
 0x380   :  { %v7876_v4 = vadd.f32 %v917_v26, %v7754_v30  ;;  %v903_v19 = vmul.f32 0.5, %v872_v18  ;;  %6798 = vmatprep.subr.bf16.mxu1 %v6797_v43  ;;  %v981_v26 = vpop.trf.xlu1 }
 0x381   :  { %v920_v54 = vmax.f32 %v904_v24, %v5802_v35  ;;  %6800 = vmatpush3.bf16.msra.mxu1 %v6797_v43 }
 0x382   :  { %v919_v16 = vmax.f32 %v903_v19, %v872_v18  ;;  %v5805_v46 = vpop.f32.mrb[20].mxu0  ;;  %v6801_v53 = vpack.c.bf16 %v7873_v23, %v7876_v4  ;;  %v9567_v19 = vmov 0.0|0.0  }
 0x383   :  { %v7881_v32 = vadd.f32 %v920_v54, %v7758_v48  ;;  %v906_v28 = vmul.f32 0.5, %v5805_v46  ;;  %v882_v55 = vpop.f32.mrb[21].mxu0 }
 0x384   :  { %v7884_v17 = vadd.f32 %v919_v16, %v7760_v50  ;;  %v905_v0 = vmul.f32 0.5, %v882_v55  ;;  %6802 = vmatprep.subr.bf16.mxu1 %v6801_v53  ;;  %v982_v18 = vpop.trf.xlu1 }
 0x385   :  { %v922_v30 = vmax.f32 %v906_v28, %v5805_v46  ;;  %6804 = vmatpush3.bf16.msra.mxu1 %v6801_v53 }
 0x386   :  { %v921_v35 = vmax.f32 %v905_v0, %v882_v55  ;;  %v6805_v43 = vpack.c.bf16 %v7881_v32, %v7884_v17 }
 0x387   :  { %v7889_v24 = vadd.f32 %v922_v30, %v7764_v20 }
 0x388   :  { %v7892_v48 = vadd.f32 %v921_v35, %v7766_v22  ;;  %6806 = vmatprep.subr.bf16.mxu1 %v6805_v43  ;;  %v983_v0 = vpop.trf.xlu1 }
 0x389   :  { %6808 = vmatpush3.bf16.msra.mxu1 %v6805_v43 }
 0x38a   :  { %v6809_v50 = vpack.c.bf16 %v7889_v24, %v7892_v48 }
 0x38c   :  { %6810 = vmatprep.subr.bf16.mxu1 %v6809_v50  ;;  %v984_v20 = vpop.trf.xlu1 }
 0x38d   :  { %6812 = vmatpush3.bf16.msra.mxu1 %v6809_v50 }
 0x38e   :  { %6845 = vmatprep.subr.bf16.mxu1 %v9567_v19 }
 0x390   :  { %5839 = vmatmul.mubr.f32.vlgmr.msra.gmra.mrb[26].mxu1 %v7805_v14  ;;  %v985_v22 = vpop.trf.xlu1 }
 0x391   :  { %5841 = vmatprep.mubr.f32.mxu1 %v7813_v25  ;;  %v9568_v25 = vmov 0.0  }
 0x394   :  { %5842 = vmatmul.mubr.f32.gmra.mrb[28].mxu1 %v7818_v27  ;;  %v986_v54 = vpop.trf.xlu1  ;;  %v1214_v27 = vpop.trf.xlu0 }
 0x395   :  { %5844 = vmatprep.mubr.f32.mxu1 %v7826_v34  ;;  %5894 = vmatprep.mubr.f32.mxu0 %v1214_v27 }
 0x398   :  { %5845 = vmatmul.mubr.f32.gmra.mrb[30].mxu1 %v7834_v15  ;;  %v987_v14 = vpop.trf.xlu1  ;;  %v7905_v34 = vpop.trf.xlu0 }
 0x399   :  { %5847 = vmatprep.mubr.f32.mxu1 %v7849_v49 }
 0x39c   :  { %5848 = vmatmul.mubr.f32.gmra.mrb[32].mxu1 %v979_v45  ;;  %v7907_v15 = vpop.trf.xlu0 }
 0x39d   :  { %5850 = vmatprep.mubr.f32.mxu1 %v980_v44 }
 0x3a0   :  { %5851 = vmatmul.mubr.f32.gmra.mrb[34].mxu1 %v981_v26  ;;  %v7909_v49 = vpop.trf.xlu0 }
 0x3a1   :  { %5853 = vmatprep.mubr.f32.mxu1 %v982_v18 }
 0x3a4   :  { %5854 = vmatmul.mubr.f32.gmra.mrb[36].mxu1 %v983_v0  ;;  %v7911_v46 = vpop.trf.xlu0 }
 0x3a5   :  { %5856 = vmatprep.mubr.f32.mxu1 %v984_v20 }
 0x3a8   :  { %5857 = vmatmul.mubr.f32.gmra.mrb[38].mxu1 %v985_v22  ;;  %v7919_v20 = vpop.trf.xlu0 }
 0x3a9   :  { %5859 = vmatprep.mubr.f32.mxu1 %v986_v54 }
 0x3ac   :  { %5860 = vmatmul.mubr.f32.gmra.mrb[40].mxu1 %v987_v14 }
 0x3ad   :  { %5950 = vmatprep.mubr.msk.f32.mxu1 %vm7291_vm0, %v9568_v25 }
 0x463   :  { %v5840_v45 = vpop.f32.mrb[26].mxu1 }
 0x464   :  { %v1134_v44 = vmul.f32 0.5, %v5840_v45  ;;  %v1054_v16 = vpop.f32.mrb[27].mxu1 }
 0x465   :  { %v1133_v53 = vmul.f32 0.5, %v1054_v16 }
 0x466   :  { %v1150_v28 = vmax.f32 %v1134_v44, %v5840_v45 }
 0x467   :  { %v1149_v55 = vmax.f32 %v1133_v53, %v1054_v16  ;;  %v5843_v30 = vpop.f32.mrb[28].mxu1 }
 0x468   :  { %v7914_v26 = vadd.f32 %v1150_v28, %v7829_v33  ;;  %v1136_v35 = vmul.f32 0.5, %v5843_v30  ;;  %v1064_v43 = vpop.f32.mrb[29].mxu1 }
 0x469   :  { %v7917_v50 = vadd.f32 %v1149_v55, %v7832_v51  ;;  %v1135_v18 = vmul.f32 0.5, %v1064_v43 }
 0x46a   :  { %v1152_v0 = vmax.f32 %v1136_v35, %v5843_v30 }
 0x46b   :  { %v1151_v22 = vmax.f32 %v1135_v18, %v1064_v43  ;;  %v5846_v54 = vpop.f32.mrb[30].mxu1  ;;  %v6813_v14 = vpack.c.bf16 %v7914_v26, %v7917_v50  ;;  %v7934_v43 = vpop.trf.xlu0 }
 0x46c   :  { %v7924_v27 = vadd.f32 %v1152_v0, %v7839_v36  ;;  %v1138_v45 = vmul.f32 0.5, %v5846_v54  ;;  %v1074_v33 = vpop.f32.mrb[31].mxu1 }
 0x46d   :  { %v7927_v44 = vadd.f32 %v1151_v22, %v7842_v41  ;;  %v1137_v16 = vmul.f32 0.5, %v1074_v33  ;;  %6814 = vmatprep.subr.bf16.mxu0 %v6813_v14 }
 0x46e   :  { %v1154_v51 = vmax.f32 %v1138_v45, %v5846_v54  ;;  %6816 = vmatpush3.bf16.msra.mxu0 %v6813_v14 }
 0x46f   :  { %v1153_v53 = vmax.f32 %v1137_v16, %v1074_v33  ;;  %v5849_v28 = vpop.f32.mrb[32].mxu1  ;;  %v6817_v55 = vpack.c.bf16 %v7924_v27, %v7927_v44 }
 0x470   :  { %v7932_v30 = vadd.f32 %v1154_v51, %v7847_v21  ;;  %v1140_v35 = vmul.f32 0.5, %v5849_v28  ;;  %v1084_v36 = vpop.f32.mrb[33].mxu1 }
 0x471   :  { %v7937_v18 = vadd.f32 %v1153_v53, %v7852_v12  ;;  %v1139_v41 = vmul.f32 0.5, %v1084_v36  ;;  %6818 = vmatprep.subr.bf16.mxu0 %v6817_v55  ;;  %v1221_v53 = vpop.trf.xlu0 }
 0x472   :  { %v1156_v0 = vmax.f32 %v1140_v35, %v5849_v28  ;;  %6820 = vmatpush3.bf16.msra.mxu0 %v6817_v55 }
 0x473   :  { %v1155_v22 = vmax.f32 %v1139_v41, %v1084_v36  ;;  %v5852_v54 = vpop.f32.mrb[34].mxu1  ;;  %v6821_v14 = vpack.c.bf16 %v7932_v30, %v7937_v18 }
 0x474   :  { %v7942_v45 = vadd.f32 %v1156_v0, %v7857_v37  ;;  %v1142_v21 = vmul.f32 0.5, %v5852_v54  ;;  %v1094_v33 = vpop.f32.mrb[35].mxu1 }
 0x475   :  { %v7945_v16 = vadd.f32 %v1155_v22, %v7860_v29  ;;  %v1141_v51 = vmul.f32 0.5, %v1094_v33  ;;  %6822 = vmatprep.subr.bf16.mxu0 %v6821_v14 }
 0x476   :  { %v1158_v12 = vmax.f32 %v1142_v21, %v5852_v54  ;;  %6824 = vmatpush3.bf16.msra.mxu0 %v6821_v14 }
 0x477   :  { %v1157_v28 = vmax.f32 %v1141_v51, %v1094_v33  ;;  %v5855_v55 = vpop.f32.mrb[36].mxu1  ;;  %v6825_v35 = vpack.c.bf16 %v7942_v45, %v7945_v16 }
 0x478   :  { %v7950_v36 = vadd.f32 %v1158_v12, %v7865_v31  ;;  %v1144_v37 = vmul.f32 0.5, %v5855_v55  ;;  %v1104_v41 = vpop.f32.mrb[37].mxu1  ;;  %v1222_v12 = vpop.trf.xlu0 }
 0x479   :  { %v7953_v0 = vadd.f32 %v1157_v28, %v7868_v13  ;;  %v1143_v29 = vmul.f32 0.5, %v1104_v41  ;;  %6826 = vmatprep.subr.bf16.mxu0 %v6825_v35 }
 0x47a   :  { %v1160_v22 = vmax.f32 %v1144_v37, %v5855_v55  ;;  %6828 = vmatpush3.bf16.msra.mxu0 %v6825_v35 }
 0x47b   :  { %v1159_v54 = vmax.f32 %v1143_v29, %v1104_v41  ;;  %v5858_v14 = vpop.f32.mrb[38].mxu1  ;;  %v6829_v21 = vpack.c.bf16 %v7950_v36, %v7953_v0 }
 0x47c   :  { %v7958_v33 = vadd.f32 %v1160_v22, %v7873_v23  ;;  %v1146_v51 = vmul.f32 0.5, %v5858_v14  ;;  %v1114_v31 = vpop.f32.mrb[39].mxu1 }
 0x47d   :  { %v7961_v11 = vadd.f32 %v1159_v54, %v7876_v4  ;;  %v1145_v13 = vmul.f32 0.5, %v1114_v31  ;;  %6830 = vmatprep.subr.bf16.mxu0 %v6829_v21  ;;  %v1223_v54 = vpop.trf.xlu0 }
 0x47e   :  { %v1162_v28 = vmax.f32 %v1146_v51, %v5858_v14  ;;  %6832 = vmatpush3.bf16.msra.mxu0 %v6829_v21 }
 0x47f   :  { %v1161_v55 = vmax.f32 %v1145_v13, %v1114_v31  ;;  %v5861_v35 = vpop.f32.mrb[40].mxu1  ;;  %v6833_v37 = vpack.c.bf16 %v7958_v33, %v7961_v11 }
 0x480   :  { %v7966_v41 = vadd.f32 %v1162_v28, %v7881_v32  ;;  %v1148_v23 = vmul.f32 0.5, %v5861_v35  ;;  %v1124_v29 = vpop.f32.mrb[41].mxu1  ;;  %v1773_v28 = vld [vmem:[%s9534_s6 + $0x38] sm:$0xff] }
 0x481   :  { %v7969_v22 = vadd.f32 %v1161_v55, %v7884_v17  ;;  %v1147_v10 = vmul.f32 0.5, %v1124_v29  ;;  %6834 = vmatprep.subr.bf16.mxu0 %v6833_v37  ;;  %v1224_v31 = vpop.trf.xlu0  ;;  %v1774_v55 = vld [vmem:[%s9534_s6 + $0x40] sm:$0xff] }
 0x482   :  { %v1164_v4 = vmax.f32 %v1148_v23, %v5861_v35  ;;  %6836 = vmatpush3.bf16.msra.mxu0 %v6833_v37  ;;  %v8014_v35 = vpop.trf.xlu1  ;;  %v1775_v37 = vld [vmem:[%s9534_s6 + $0x48] sm:$0xff]  ;;  %v1776_v23 = vld [vmem:[%s9534_s6 + $0x50] sm:$0xff] }
 0x483   :  { %v1163_v14 = vmax.f32 %v1147_v10, %v1124_v29  ;;  %v6837_v21 = vpack.c.bf16 %v7966_v41, %v7969_v22  ;;  %9569 = vst [vmem:[#allocation6_spill] sm:$0xff] %v8014_v35 }
 0x484   :  { %v7974_v51 = vadd.f32 %v1164_v4, %v7889_v24  ;;  %v1777_v4 = vld [vmem:[%s9534_s6 + $0x58] sm:$0xff] }
 0x485   :  { %v7977_v32 = vadd.f32 %v1163_v14, %v7892_v48  ;;  %6838 = vmatprep.subr.bf16.mxu0 %v6837_v21  ;;  %v1225_v10 = vpop.trf.xlu0 }
 0x486   :  { %6840 = vmatpush3.bf16.msra.mxu0 %v6837_v21  ;;  %v8022_v29 = vpop.trf.xlu1  ;;  %v1778_v21 = vld [vmem:[%s9534_s6 + $0x60] sm:$0xff] }
 0x487   :  { %v6841_v17 = vpack.c.bf16 %v7974_v51, %v7977_v32  ;;  %9570 = vst [vmem:[#allocation7_spill] sm:$0xff] %v8022_v29 }
 0x489   :  { %6842 = vmatprep.subr.bf16.mxu0 %v6841_v17  ;;  %v1226_v24 = vpop.trf.xlu0 }
 0x48a   :  { %6844 = vmatpush3.bf16.msra.mxu0 %v6841_v17  ;;  %v8027_v14 = vpop.trf.xlu1 }
 0x48b   :  { %9571 = vst [vmem:[#allocation8_spill] sm:$0xff] %v8027_v14 }
 0x48d   :  { %5895 = vmatmul.mubr.f32.vlgmr.msra.gmra.mrb[22].mxu0 %v7905_v34  ;;  %v1227_v48 = vpop.trf.xlu0 }
 0x48e   :  { %5897 = vmatprep.mubr.f32.mxu0 %v7907_v15  ;;  %v1766_v15 = vld [vmem:[%s9534_s6] sm:$0xff] }
 0x48f   :  { %1782 = vxpose.xlu1.b32.start [1/16] %v1766_v15, 128 }
 0x491   :  { %5898 = vmatmul.mubr.f32.gmra.mrb[24].mxu0 %v7909_v49  ;;  %v1228_v13 = vpop.trf.xlu0  ;;  %v1767_v49 = vld [vmem:[%s9534_s6 + $0x8] sm:$0xff] }
 0x492   :  { %5900 = vmatprep.mubr.f32.mxu0 %v7911_v46  ;;  %v1768_v46 = vld [vmem:[%s9534_s6 + $0x10] sm:$0xff] }
 0x493   :  { %1783 = vxpose.xlu1.b32.cont [2/16] %v1767_v49, 128 }
 0x495   :  { %5901 = vmatmul.mubr.f32.gmra.mrb[26].mxu0 %v7919_v20  ;;  %v1229_v34 = vpop.trf.xlu0  ;;  %v1769_v20 = vld [vmem:[%s9534_s6 + $0x18] sm:$0xff] }
 0x496   :  { %5903 = vmatprep.mubr.f32.mxu0 %v7934_v43  ;;  %v1770_v43 = vld [vmem:[%s9534_s6 + $0x20] sm:$0xff] }
 0x497   :  { %1784 = vxpose.xlu1.b32.cont [3/16] %v1768_v46, 128 }
 0x499   :  { %5904 = vmatmul.mubr.f32.gmra.mrb[28].mxu0 %v1221_v53  ;;  %v1771_v53 = vld [vmem:[%s9534_s6 + $0x28] sm:$0xff] }
 0x49a   :  { %5906 = vmatprep.mubr.f32.mxu0 %v1222_v12  ;;  %v1772_v12 = vld [vmem:[%s9534_s6 + $0x30] sm:$0xff] }
 0x49b   :  { %1785 = vxpose.xlu1.b32.cont [4/16] %v1769_v20, 128 }
 0x49d   :  { %5907 = vmatmul.mubr.f32.gmra.mrb[30].mxu0 %v1223_v54 }
 0x49e   :  { %5909 = vmatprep.mubr.f32.mxu0 %v1224_v31 }
 0x49f   :  { %1786 = vxpose.xlu1.b32.cont [5/16] %v1770_v43, 128 }
 0x4a1   :  { %5910 = vmatmul.mubr.f32.gmra.mrb[32].mxu0 %v1225_v10 }
 0x4a2   :  { %5912 = vmatprep.mubr.f32.mxu0 %v1226_v24 }
 0x4a3   :  { %1787 = vxpose.xlu1.b32.cont [6/16] %v1771_v53, 128  ;;  %v8037_v53 = vpop.trf.xlu1 }
 0x4a4   :  { %9572 = vst [vmem:[#allocation9_spill] sm:$0xff] %v8037_v53 }
 0x4a5   :  { %5913 = vmatmul.mubr.f32.gmra.mrb[34].mxu0 %v1227_v48 }
 0x4a6   :  { %5915 = vmatprep.mubr.f32.mxu0 %v1228_v13 }
 0x4a7   :  { %1788 = vxpose.xlu1.b32.cont [7/16] %v1772_v12, 128 }
 0x4a9   :  { %5916 = vmatmul.mubr.f32.gmra.mrb[36].mxu0 %v1229_v34  ;;  %v1779_v34 = vld [vmem:[%s9534_s6 + $0x68] sm:$0xff] }
 0x4ab   :  { %1789 = vxpose.xlu1.b32.cont [8/16] %v1773_v28, 128 }
 0x4af   :  { %1790 = vxpose.xlu1.b32.cont [9/16] %v1774_v55, 128 }
 0x4b3   :  { %1791 = vxpose.xlu1.b32.cont [10/16] %v1775_v37, 128 }
 0x4b7   :  { %1792 = vxpose.xlu1.b32.cont [11/16] %v1776_v23, 128  ;;  %v1780_v23 = vld [vmem:[%s9534_s6 + $0x70] sm:$0xff] }
 0x4bb   :  { %1793 = vxpose.xlu1.b32.cont [12/16] %v1777_v4, 128 }
 0x4bf   :  { %1794 = vxpose.xlu1.b32.cont [13/16] %v1778_v21, 128 }
 0x4c3   :  { %1795 = vxpose.xlu1.b32.cont [14/16] %v1779_v34, 128 }
 0x4c7   :  { %1796 = vxpose.xlu1.b32.cont [15/16] %v1780_v23, 128 }
 0x560   :  { %v5896_v54 = vpop.f32.mrb[22].mxu0 }
 0x561   :  { %v1376_v17 = vmul.f32 0.5, %v5896_v54  ;;  %v1296_v31 = vpop.f32.mrb[23].mxu0 }
 0x562   :  { %v1375_v10 = vmul.f32 0.5, %v1296_v31 }
 0x563   :  { %v1392_v24 = vmax.f32 %v1376_v17, %v5896_v54 }
 0x564   :  { %v1391_v48 = vmax.f32 %v1375_v10, %v1296_v31  ;;  %v5899_v13 = vpop.f32.mrb[24].mxu0 }
 0x565   :  { %v1408_v15 = vadd.f32 %v1392_v24, %v7914_v26  ;;  %v1378_v49 = vmul.f32 0.5, %v5899_v13  ;;  %v1306_v46 = vpop.f32.mrb[25].mxu0 }
 0x566   :  { %v1407_v20 = vadd.f32 %v1391_v48, %v7917_v50  ;;  %v1377_v43 = vmul.f32 0.5, %v1306_v46  ;;  %v8045_v48 = vpop.trf.xlu1 }
 0x567   :  { %v1394_v12 = vmax.f32 %v1378_v49, %v5899_v13  ;;  %9573 = vst [vmem:[#allocation10_spill] sm:$0xff] %v8045_v48  ;;  %v1781_v13 = vld [vmem:[%s9534_s6 + $0x78] sm:$0xff] }
 0x568   :  { %v6846_v28 = vpack.c.bf16 %v1408_v15, %v1407_v20  ;;  %v1393_v55 = vmax.f32 %v1377_v43, %v1306_v46  ;;  %v5902_v37 = vpop.f32.mrb[26].mxu0  ;;  %1797 = vxpose.xlu1.b32.end [16/16] %v1781_v13, 128 }
 0x569   :  { %v1410_v4 = vadd.f32 %v1394_v12, %v7924_v27  ;;  %v1380_v54 = vmul.f32 0.5, %v5902_v37  ;;  %v1316_v26 = vpop.f32.mrb[27].mxu0 }
 0x56a   :  { %v1409_v21 = vadd.f32 %v1393_v55, %v7927_v44  ;;  %v1379_v17 = vmul.f32 0.5, %v1316_v26  ;;  %6847 = vmatpush3.bf16.msra.mxu1 %v6846_v28 }
 0x56b   :  { %v1396_v50 = vmax.f32 %v1380_v54, %v5902_v37  ;;  %6848 = vmatprep.subr.bf16.mxu1 %v9567_v19 }
 0x56c   :  { %v6849_v31 = vpack.c.bf16 %v1410_v4, %v1409_v21  ;;  %v1395_v10 = vmax.f32 %v1379_v17, %v1316_v26  ;;  %v5905_v24 = vpop.f32.mrb[28].mxu0  ;;  %v8055_v4 = vpop.trf.xlu1 }
 0x56d   :  { %v1412_v27 = vadd.f32 %v1396_v50, %v7932_v30  ;;  %v1382_v34 = vmul.f32 0.5, %v5905_v24  ;;  %v1326_v15 = vpop.f32.mrb[29].mxu0  ;;  %9574 = vst [vmem:[#allocation11_spill] sm:$0xff] %v8055_v4 }
 0x56e   :  { %v1411_v44 = vadd.f32 %v1395_v10, %v7937_v18  ;;  %v1381_v49 = vmul.f32 0.5, %v1326_v15  ;;  %6850 = vmatpush3.bf16.msra.mxu1 %v6849_v31 }
 0x56f   :  { %v1398_v46 = vmax.f32 %v1382_v34, %v5905_v24  ;;  %6851 = vmatprep.subr.bf16.mxu1 %v9567_v19 }
 0x570   :  { %v6852_v20 = vpack.c.bf16 %v1412_v27, %v1411_v44  ;;  %v1397_v43 = vmax.f32 %v1381_v49, %v1326_v15  ;;  %v5908_v12 = vpop.f32.mrb[30].mxu0  ;;  %v8061_v34 = vpop.trf.xlu1 }
 0x571   :  { %v1414_v28 = vadd.f32 %v1398_v46, %v7942_v45  ;;  %v1384_v55 = vmul.f32 0.5, %v5908_v12  ;;  %v1336_v37 = vpop.f32.mrb[31].mxu0  ;;  %9575 = vst [vmem:[#allocation12_spill] sm:$0xff] %v8061_v34 }
 0x572   :  { %v1413_v23 = vadd.f32 %v1397_v43, %v7945_v16  ;;  %v1383_v30 = vmul.f32 0.5, %v1336_v37  ;;  %6853 = vmatpush3.bf16.msra.mxu1 %v6852_v20 }
 0x573   :  { %v1400_v18 = vmax.f32 %v1384_v55, %v5908_v12  ;;  %6854 = vmatprep.subr.bf16.mxu1 %v9567_v19 }
 0x574   :  { %v6855_v54 = vpack.c.bf16 %v1414_v28, %v1413_v23  ;;  %v1399_v26 = vmax.f32 %v1383_v30, %v1336_v37  ;;  %v5911_v21 = vpop.f32.mrb[32].mxu0 }
 0x575   :  { %v1416_v17 = vadd.f32 %v1400_v18, %v7950_v36  ;;  %v1386_v50 = vmul.f32 0.5, %v5911_v21  ;;  %v1346_v31 = vpop.f32.mrb[33].mxu0 }
 0x576   :  { %v1415_v45 = vadd.f32 %v1399_v26, %v7953_v0  ;;  %v1385_v10 = vmul.f32 0.5, %v1346_v31  ;;  %6856 = vmatpush3.bf16.msra.mxu1 %v6855_v54 }
 0x577   :  { %v1402_v24 = vmax.f32 %v1386_v50, %v5911_v21  ;;  %6857 = vmatprep.subr.bf16.mxu1 %v9567_v19 }
 0x578   :  { %v6858_v16 = vpack.c.bf16 %v1416_v17, %v1415_v45  ;;  %v1401_v13 = vmax.f32 %v1385_v10, %v1346_v31  ;;  %v5914_v27 = vpop.f32.mrb[34].mxu0 }
 0x579   :  { %v1418_v15 = vadd.f32 %v1402_v24, %v7958_v33  ;;  %v1388_v44 = vmul.f32 0.5, %v5914_v27  ;;  %v1356_v49 = vpop.f32.mrb[35].mxu0  ;;  %v8068_v33 = vpop.trf.xlu1  ;;  %v4858_v24 = vld [vmem:[%s9534_s6 + $0x80] sm:$0xff] }
 0x57a   :  { %v1417_v36 = vadd.f32 %v1401_v13, %v7961_v11  ;;  %v1387_v46 = vmul.f32 0.5, %v1356_v49  ;;  %6859 = vmatpush3.bf16.msra.mxu1 %v6858_v16  ;;  %9576 = vst [vmem:[#allocation13_spill] sm:$0xff] %v8068_v33  ;;  %2024 = vxpose.xlu0.b32.start [1/16] %v4858_v24, 128  ;;  %v4859_v16 = vld [vmem:[%s9534_s6 + $0x88] sm:$0xff]  ;;  %v4860_v13 = vld [vmem:[%s9534_s6 + $0x90] sm:$0xff] }
 0x57b   :  { %v1404_v20 = vmax.f32 %v1388_v44, %v5914_v27  ;;  %6860 = vmatprep.subr.bf16.mxu1 %v9567_v19  ;;  %v4861_v27 = vld [vmem:[%s9534_s6 + $0x98] sm:$0xff]  ;;  %v4863_v44 = vld [vmem:[%s9534_s6 + $0xa8] sm:$0xff] }
 0x57c   :  { %v6861_v0 = vpack.c.bf16 %v1418_v15, %v1417_v36  ;;  %v1403_v43 = vmax.f32 %v1387_v46, %v1356_v49  ;;  %v5917_v12 = vpop.f32.mrb[36].mxu0  ;;  %v4862_v15 = vld [vmem:[%s9534_s6 + $0xa0] sm:$0xff]  ;;  %v4864_v49 = vld [vmem:[%s9534_s6 + $0xb0] sm:$0xff]  ;;  %v4865_v36 = vld [vmem:[%s9534_s6 + $0xb8] sm:$0xff] }
 0x57d   :  { %v1420_v28 = vadd.f32 %v1404_v20, %v7966_v41  ;;  %v1390_v55 = vmul.f32 0.5, %v5917_v12  ;;  %v1366_v37 = vpop.f32.mrb[37].mxu0  ;;  %v8074_v17 = vpop.trf.xlu1  ;;  %v4866_v46 = vld [vmem:[%s9534_s6 + $0xc0] sm:$0xff]  ;;  %v4867_v20 = vld [vmem:[%s9534_s6 + $0xc8] sm:$0xff] }
 0x57e   :  { %v1419_v23 = vadd.f32 %v1403_v43, %v7969_v22  ;;  %v1389_v30 = vmul.f32 0.5, %v1366_v37  ;;  %6862 = vmatpush3.bf16.msra.mxu1 %v6861_v0  ;;  %9577 = vst [vmem:[#allocation14_spill] sm:$0xff] %v8074_v17  ;;  %2025 = vxpose.xlu0.b32.cont [2/16] %v4859_v16, 128  ;;  %v4868_v0 = vld [vmem:[%s9534_s6 + $0xd0] sm:$0xff] }
 0x57f   :  { %v1406_v18 = vmax.f32 %v1390_v55, %v5917_v12  ;;  %6863 = vmatprep.subr.bf16.mxu1 %v9567_v19  ;;  %v4869_v12 = vld [vmem:[%s9534_s6 + $0xd8] sm:$0xff] }
 0x580   :  { %v6864_v11 = vpack.c.bf16 %v1420_v28, %v1419_v23  ;;  %v1405_v54 = vmax.f32 %v1389_v30, %v1366_v37  ;;  %v4870_v28 = vld [vmem:[%s9534_s6 + $0xe0] sm:$0xff] }
 0x581   :  { %v1422_v26 = vadd.f32 %v1406_v18, %v7974_v51  ;;  %v8081_v22 = vpop.trf.xlu1  ;;  %v4871_v18 = vld [vmem:[%s9534_s6 + $0xe8] sm:$0xff] }
 0x582   :  { %v1421_v21 = vadd.f32 %v1405_v54, %v7977_v32  ;;  %6865 = vmatpush3.bf16.msra.mxu1 %v6864_v11  ;;  %9578 = vst [vmem:[#allocation15_spill] sm:$0xff] %v8081_v22  ;;  %2026 = vxpose.xlu0.b32.cont [3/16] %v4860_v13, 128 }
 0x583   :  { %6866 = vmatprep.subr.bf16.mxu1 %v9567_v19 }
 0x584   :  { %v6867_v41 = vpack.c.bf16 %v1422_v26, %v1421_v21 }
 0x585   :  { %v8086_v51 = vpop.trf.xlu1 }
 0x586   :  { %6868 = vmatpush3.bf16.msra.mxu1 %v6867_v41  ;;  %9579 = vst [vmem:[#allocation16_spill] sm:$0xff] %v8086_v51  ;;  %2027 = vxpose.xlu0.b32.cont [4/16] %v4861_v27, 128 }
 0x587   :  { %6870 = vmatprep.subr.bf16.mxu1 %v7501_v58 }
 0x589   :  { %5951 = vmatmul.mubr.f32.vlgmr.msra.gmra.mrb[42].mxu1 %v7522_v61 }
 0x58a   :  { %6872 = vmatpush3.bf16.msra.mxu1 %v7501_v58  ;;  %5953 = vmatprep.mubr.msk.f32.mxu1 %vm7291_vm0, %v9568_v25  ;;  %v8095_v58 = vpop.trf.xlu1 }
 0x58b   :  { %9580 = vst [vmem:[#allocation17_spill] sm:$0xff] %v8095_v58  ;;  %2028 = vxpose.xlu0.b32.cont [5/16] %v4862_v15, 128  ;;  %v4873_v15 = vld [vmem:[%s9534_s6 + $0xf8] sm:$0xff] }
 0x58d   :  { %5954 = vmatmul.mubr.f32.gmra.mrb[44].mxu1 %v7530_v1 }
 0x58e   :  { %5956 = vmatprep.mubr.msk.f32.mxu1 %vm7291_vm0, %v9568_v25  ;;  %v8101_v32 = vpop.trf.xlu1 }
 0x58f   :  { %9581 = vst [vmem:[#allocation18_spill] sm:$0xff] %v8101_v32  ;;  %2029 = vxpose.xlu0.b32.cont [6/16] %v4863_v44, 128 }
 0x591   :  { %5957 = vmatmul.mubr.f32.gmra.mrb[46].mxu1 %v7534_v3 }
 0x592   :  { %5963 = vmatprep.mubr.msk.f32.mxu1 %vm227_vm1, %v8014_v35  ;;  %v8111_v50 = vpop.trf.xlu1 }
 0x593   :  { %9582 = vst [vmem:[#allocation19_spill] sm:$0xff] %v8111_v50  ;;  %2030 = vxpose.xlu0.b32.cont [7/16] %v4864_v49, 128 }
 0x595   :  { %5964 = vmatmul.mubr.msk.f32.vlgmr.msra.gmra.mrb[48].mxu1 %vm227_vm1, %v8022_v29 }
 0x596   :  { %5966 = vmatprep.mubr.msk.f32.mxu1 %vm227_vm1, %v8027_v14  ;;  %v8117_v31 = vpop.trf.xlu1 }
 0x597   :  { %9583 = vst [vmem:[#allocation20_spill] sm:$0xff] %v8117_v31  ;;  %2031 = vxpose.xlu0.b32.cont [8/16] %v4865_v36, 128 }
 0x599   :  { %5967 = vmatmul.mubr.msk.f32.gmra.mrb[50].mxu1 %vm227_vm1, %v8037_v53 }
 0x59a   :  { %5969 = vmatprep.mubr.msk.f32.mxu1 %vm227_vm1, %v8045_v48  ;;  %v8127_v45 = vpop.trf.xlu1 }
 0x59b   :  { %9584 = vst [vmem:[#allocation21_spill] sm:$0xff] %v8127_v45  ;;  %2032 = vxpose.xlu0.b32.cont [9/16] %v4866_v46, 128 }
 0x59d   :  { %5970 = vmatmul.mubr.msk.f32.gmra.mrb[52].mxu1 %vm227_vm1, %v8055_v4 }
 0x59e   :  { %5972 = vmatprep.mubr.msk.f32.mxu1 %vm227_vm1, %v8061_v34 }
 0x59f   :  { %2033 = vxpose.xlu0.b32.cont [10/16] %v4867_v20, 128 }
 0x5a1   :  { %5973 = vmatmul.mubr.msk.f32.gmra.mrb[54].mxu1 %vm227_vm1, %v8068_v33 }
 0x5a2   :  { %5975 = vmatprep.mubr.msk.f32.mxu1 %vm227_vm1, %v8074_v17 }
 0x5a3   :  { %2034 = vxpose.xlu0.b32.cont [11/16] %v4868_v0, 128 }
 0x5a5   :  { %5976 = vmatmul.mubr.msk.f32.gmra.mrb[56].mxu1 %vm227_vm1, %v8081_v22 }
 0x5a6   :  { %5978 = vmatprep.mubr.msk.f32.mxu1 %vm227_vm1, %v8086_v51 }
 0x5a7   :  { %2035 = vxpose.xlu0.b32.cont [12/16] %v4869_v12, 128 }
 0x5a9   :  { %5979 = vmatmul.mubr.msk.f32.gmra.mrb[58].mxu1 %vm227_vm1, %v8095_v58 }
 0x5aa   :  { %5981 = vmatprep.mubr.msk.f32.mxu1 %vm227_vm1, %v8101_v32 }
 0x5ab   :  { %2036 = vxpose.xlu0.b32.cont [13/16] %v4870_v28, 128 }
 0x5ac   :  { %v1798_v10 = vpop.trf.xlu1 }
 0x5ad   :  { %5982 = vmatmul.mubr.msk.f32.gmra.mrb[60].mxu1 %vm227_vm1, %v8111_v50  ;;  %6019 = vmatprep.mubr.f32.mxu0 %v1798_v10  ;;  %v4872_v10 = vld [vmem:[%s9534_s6 + $0xf0] sm:$0xff] }
 0x5ae   :  { %5984 = vmatprep.mubr.msk.f32.mxu1 %vm227_vm1, %v8117_v31 }
 0x5af   :  { %2037 = vxpose.xlu0.b32.cont [14/16] %v4871_v18, 128 }
 0x5b0   :  { %v8164_v43 = vpop.trf.xlu1 }
 0x5b1   :  { %5985 = vmatmul.mubr.msk.f32.gmra.mrb[62].mxu1 %vm227_vm1, %v8127_v45 }
 0x5b3   :  { %2038 = vxpose.xlu0.b32.cont [15/16] %v4872_v10, 128 }
 0x5b4   :  { %v8172_v55 = vpop.trf.xlu1 }
 0x5b7   :  { %2039 = vxpose.xlu0.b32.end [16/16] %v4873_v15, 128 }
 0x5b8   :  { %v8183_v41 = vpop.trf.xlu1 }
 0x5bc   :  { %v8199_v49 = vpop.trf.xlu1 }
 0x5c0   :  { %v8209_v18 = vpop.trf.xlu1 }
 0x65c   :  { %v1489_v37 = vpop.f32.mrb[42].mxu1 }
 0x65d   :  { %v1503_v23 = vmul.f32 0.5, %v1489_v37  ;;  %v5952_v30 = vpop.f32.mrb[43].mxu1 }
 0x65f   :  { %v8177_v11 = vmax.f32 %v1503_v23, %v1489_v37 }
 0x660   :  { %v1494_v54 = vpop.f32.mrb[44].mxu1 }
 0x661   :  { %2575 = vst [vmem:[%s9535_s11] sm:$0xff] %v8177_v11  ;;  %v1504_v26 = vmul.f32 0.5, %v1494_v54  ;;  %v5955_v21 = vpop.f32.mrb[45].mxu1 }
 0x663   :  { %v8188_v24 = vmax.f32 %v1504_v26, %v1494_v54 }
 0x664   :  { %v1499_v16 = vpop.f32.mrb[46].mxu1 }
 0x665   :  { %2576 = vst [vmem:[%s9535_s11 + $0x8] sm:$0xff] %v8188_v24  ;;  %v1505_v13 = vmul.f32 0.5, %v1499_v16  ;;  %v5958_v27 = vpop.f32.mrb[47].mxu1 }
 0x667   :  { %v8197_v44 = vmax.f32 %v1505_v13, %v1499_v16 }
 0x668   :  { %v5965_v36 = vpop.f32.mrb[48].mxu1 }
 0x669   :  { %2577 = vst [vmem:[%s9535_s11 + $0x10] sm:$0xff] %v8197_v44  ;;  %v1735_v46 = vmul.f32 0.5, %v5965_v36  ;;  %v1655_v20 = vpop.f32.mrb[49].mxu1 }
 0x66a   :  { %v1734_v0 = vmul.f32 0.5, %v1655_v20 }
 0x66b   :  { %v8205_v12 = vmax.f32 %v1735_v46, %v5965_v36 }
 0x66c   :  { %v8207_v28 = vmax.f32 %v1734_v0, %v1655_v20  ;;  %v5968_v37 = vpop.f32.mrb[50].mxu1  ;;  %v1804_v20 = vpop.trf.xlu1 }
 0x66d   :  { %v1737_v23 = vmul.f32 0.5, %v5968_v37  ;;  %v1665_v30 = vpop.f32.mrb[51].mxu1 }
 0x66e   :  { %v6873_v54 = vpack.c.bf16 %v8205_v12, %v8207_v28  ;;  %v1736_v26 = vmul.f32 0.5, %v1665_v30 }
 0x66f   :  { %v8213_v21 = vmax.f32 %v1737_v23, %v5968_v37 }
 0x670   :  { %v8215_v10 = vmax.f32 %v1736_v26, %v1665_v30  ;;  %v5971_v16 = vpop.f32.mrb[52].mxu1  ;;  %6874 = vmatprep.subr.bf16.mxu0 %v6873_v54 }
 0x671   :  { %v1739_v13 = vmul.f32 0.5, %v5971_v16  ;;  %v1675_v27 = vpop.f32.mrb[53].mxu1  ;;  %6876 = vmatpush3.bf16.msra.mxu0 %v6873_v54 }
 0x672   :  { %v6877_v15 = vpack.c.bf16 %v8213_v21, %v8215_v10  ;;  %v1738_v36 = vmul.f32 0.5, %v1675_v27 }
 0x673   :  { %v8219_v46 = vmax.f32 %v1739_v13, %v5971_v16 }
 0x674   :  { %v8221_v0 = vmax.f32 %v1738_v36, %v1675_v27  ;;  %v5974_v45 = vpop.f32.mrb[54].mxu1  ;;  %6878 = vmatprep.subr.bf16.mxu0 %v6877_v15  ;;  %v1805_v27 = vpop.trf.xlu1 }
 0x675   :  { %v1741_v37 = vmul.f32 0.5, %v5974_v45  ;;  %v1685_v23 = vpop.f32.mrb[55].mxu1  ;;  %6880 = vmatpush3.bf16.msra.mxu0 %v6877_v15 }
 0x676   :  { %v6881_v30 = vpack.c.bf16 %v8219_v46, %v8221_v0  ;;  %v1740_v26 = vmul.f32 0.5, %v1685_v23 }
 0x677   :  { %v8225_v31 = vmax.f32 %v1741_v37, %v5974_v45 }
 0x678   :  { %v8227_v54 = vmax.f32 %v1740_v26, %v1685_v23  ;;  %v5977_v50 = vpop.f32.mrb[56].mxu1  ;;  %6882 = vmatprep.subr.bf16.mxu0 %v6881_v30 }
 0x679   :  { %v1743_v16 = vmul.f32 0.5, %v5977_v50  ;;  %v1695_v13 = vpop.f32.mrb[57].mxu1  ;;  %6884 = vmatpush3.bf16.msra.mxu0 %v6881_v30  ;;  %v1806_v30 = vpop.trf.xlu1 }
 0x67a   :  { %v6885_v36 = vpack.c.bf16 %v8225_v31, %v8227_v54  ;;  %v1742_v32 = vmul.f32 0.5, %v1695_v13 }
 0x67b   :  { %v8231_v58 = vmax.f32 %v1743_v16, %v5977_v50 }
 0x67c   :  { %v8233_v15 = vmax.f32 %v1742_v32, %v1695_v13  ;;  %v5980_v51 = vpop.f32.mrb[58].mxu1  ;;  %6886 = vmatprep.subr.bf16.mxu0 %v6885_v36 }
 0x67d   :  { %v1745_v45 = vmul.f32 0.5, %v5980_v51  ;;  %v1705_v37 = vpop.f32.mrb[59].mxu1  ;;  %6888 = vmatpush3.bf16.msra.mxu0 %v6885_v36 }
 0x67e   :  { %v6889_v23 = vpack.c.bf16 %v8231_v58, %v8233_v15  ;;  %v1744_v26 = vmul.f32 0.5, %v1705_v37 }
 0x67f   :  { %v8237_v22 = vmax.f32 %v1745_v45, %v5980_v51 }
 0x680   :  { %v8239_v17 = vmax.f32 %v1744_v26, %v1705_v37  ;;  %v5983_v33 = vpop.f32.mrb[60].mxu1  ;;  %6890 = vmatprep.subr.bf16.mxu0 %v6889_v23  ;;  %v1807_v37 = vpop.trf.xlu1 }
 0x681   :  { %v1747_v50 = vmul.f32 0.5, %v5983_v33  ;;  %v1715_v16 = vpop.f32.mrb[61].mxu1  ;;  %6892 = vmatpush3.bf16.msra.mxu0 %v6889_v23 }
 0x682   :  { %v6893_v32 = vpack.c.bf16 %v8237_v22, %v8239_v17  ;;  %v1746_v13 = vmul.f32 0.5, %v1715_v16 }
 0x683   :  { %v8243_v34 = vmax.f32 %v1747_v50, %v5983_v33 }
 0x684   :  { %v8245_v36 = vmax.f32 %v1746_v13, %v1715_v16  ;;  %v5986_v4 = vpop.f32.mrb[62].mxu1  ;;  %6894 = vmatprep.subr.bf16.mxu0 %v6893_v32  ;;  %v1808_v50 = vpop.trf.xlu1  ;;  %v4880_v13 = vld [vmem:[%s9534_s6 + $0x130] sm:$0xff] }
 0x685   :  { %v1749_v51 = vmul.f32 0.5, %v5986_v4  ;;  %v1725_v45 = vpop.f32.mrb[63].mxu1  ;;  %6896 = vmatpush3.bf16.msra.mxu0 %v6893_v32 }
 0x686   :  { %v6897_v26 = vpack.c.bf16 %v8243_v34, %v8245_v36  ;;  %v1748_v48 = vmul.f32 0.5, %v1725_v45 }
 0x687   :  { %v8249_v53 = vmax.f32 %v1749_v51, %v5986_v4  ;;  %v4881_v51 = vld [vmem:[%s9534_s6 + $0x138] sm:$0xff] }
 0x688   :  { %v8251_v23 = vmax.f32 %v1748_v48, %v1725_v45  ;;  %6898 = vmatprep.subr.bf16.mxu0 %v6897_v26  ;;  %v1809_v16 = vpop.trf.xlu1  ;;  %v4882_v45 = vld [vmem:[%s9534_s6 + $0x140] sm:$0xff] }
 0x689   :  { %6900 = vmatpush3.bf16.msra.mxu0 %v6897_v26  ;;  %v4884_v26 = vld [vmem:[%s9534_s6 + $0x150] sm:$0xff] }
 0x68a   :  { %v6901_v33 = vpack.c.bf16 %v8249_v53, %v8251_v23 }
 0x68c   :  { %6902 = vmatprep.subr.bf16.mxu0 %v6901_v33  ;;  %v1810_v4 = vpop.trf.xlu1 }
 0x68d   :  { %6904 = vmatpush3.bf16.msra.mxu0 %v6901_v33 }
 0x690   :  { %6020 = vmatmul.mubr.f32.vlgmr.msra.gmra.mrb[38].mxu0 %v8164_v43  ;;  %v1811_v48 = vpop.trf.xlu1 }
 0x691   :  { %6022 = vmatprep.mubr.f32.mxu0 %v8172_v55  ;;  %v2040_v55 = vpop.trf.xlu0 }
 0x692   :  { %6075 = vmatprep.mubr.f32.mxu1 %v2040_v55 }
 0x694   :  { %6023 = vmatmul.mubr.f32.gmra.mrb[40].mxu0 %v8183_v41  ;;  %v1812_v32 = vpop.trf.xlu1  ;;  %v4874_v41 = vld [vmem:[%s9534_s6 + $0x100] sm:$0xff] }
 0x695   :  { %6025 = vmatprep.mubr.f32.mxu0 %v8199_v49  ;;  %2266 = vxpose.xlu0.b32.start [1/16] %v4874_v41, 128  ;;  %v4875_v49 = vld [vmem:[%s9534_s6 + $0x108] sm:$0xff]  ;;  %v8293_v33 = vpop.trf.xlu0 }
 0x698   :  { %6026 = vmatmul.mubr.f32.gmra.mrb[42].mxu0 %v8209_v18  ;;  %v1813_v43 = vpop.trf.xlu1  ;;  %v4876_v18 = vld [vmem:[%s9534_s6 + $0x110] sm:$0xff] }
 0x699   :  { %6028 = vmatprep.mubr.f32.mxu0 %v1804_v20  ;;  %2267 = vxpose.xlu0.b32.cont [2/16] %v4875_v49, 128  ;;  %v4877_v20 = vld [vmem:[%s9534_s6 + $0x118] sm:$0xff] }
 0x69c   :  { %6029 = vmatmul.mubr.f32.gmra.mrb[44].mxu0 %v1805_v27  ;;  %v4878_v27 = vld [vmem:[%s9534_s6 + $0x120] sm:$0xff] }
 0x69d   :  { %6031 = vmatprep.mubr.f32.mxu0 %v1806_v30  ;;  %2268 = vxpose.xlu0.b32.cont [3/16] %v4876_v18, 128  ;;  %v4879_v30 = vld [vmem:[%s9534_s6 + $0x128] sm:$0xff] }
 0x6a0   :  { %6032 = vmatmul.mubr.f32.gmra.mrb[46].mxu0 %v1807_v37  ;;  %v4883_v37 = vld [vmem:[%s9534_s6 + $0x148] sm:$0xff] }
 0x6a1   :  { %6034 = vmatprep.mubr.f32.mxu0 %v1808_v50  ;;  %2269 = vxpose.xlu0.b32.cont [4/16] %v4877_v20, 128  ;;  %v4885_v50 = vld [vmem:[%s9534_s6 + $0x158] sm:$0xff] }
 0x6a2   :  { %v4889_v20 = vld [vmem:[%s9534_s6 + $0x178] sm:$0xff] }
 0x6a4   :  { %6035 = vmatmul.mubr.f32.gmra.mrb[48].mxu0 %v1809_v16  ;;  %v8298_v16 = vpop.trf.xlu0 }
 0x6a5   :  { %6037 = vmatprep.mubr.f32.mxu0 %v1810_v4  ;;  %2270 = vxpose.xlu0.b32.cont [5/16] %v4878_v27, 128  ;;  %v4886_v4 = vld [vmem:[%s9534_s6 + $0x160] sm:$0xff] }
 0x6a8   :  { %6038 = vmatmul.mubr.f32.gmra.mrb[50].mxu0 %v1811_v48  ;;  %v4887_v48 = vld [vmem:[%s9534_s6 + $0x168] sm:$0xff] }
 0x6a9   :  { %6040 = vmatprep.mubr.f32.mxu0 %v1812_v32  ;;  %2271 = vxpose.xlu0.b32.cont [6/16] %v4879_v30, 128  ;;  %v8306_v32 = vpop.trf.xlu0 }
 0x6ac   :  { %6041 = vmatmul.mubr.f32.gmra.mrb[52].mxu0 %v1813_v43  ;;  %v4888_v43 = vld [vmem:[%s9534_s6 + $0x170] sm:$0xff] }
 0x6ad   :  { %2272 = vxpose.xlu0.b32.cont [7/16] %v4880_v13, 128  ;;  %v8311_v18 = vpop.trf.xlu0 }
 0x6b1   :  { %2273 = vxpose.xlu0.b32.cont [8/16] %v4881_v51, 128 }
 0x6b5   :  { %2274 = vxpose.xlu0.b32.cont [9/16] %v4882_v45, 128 }
 0x6b9   :  { %2275 = vxpose.xlu0.b32.cont [10/16] %v4883_v37, 128 }
 0x6bd   :  { %2276 = vxpose.xlu0.b32.cont [11/16] %v4884_v26, 128 }
 0x6c1   :  { %2277 = vxpose.xlu0.b32.cont [12/16] %v4885_v50, 128 }
 0x6c5   :  { %2278 = vxpose.xlu0.b32.cont [13/16] %v4886_v4, 128 }
 0x6c9   :  { %2279 = vxpose.xlu0.b32.cont [14/16] %v4887_v48, 128 }
 0x6cd   :  { %2280 = vxpose.xlu0.b32.cont [15/16] %v4888_v43, 128  ;;  %v8322_v43 = vpop.trf.xlu0 }
 0x6d1   :  { %2281 = vxpose.xlu0.b32.end [16/16] %v4889_v20, 128 }
 0x763   :  { %v6021_v55 = vpop.f32.mrb[38].mxu0 }
 0x764   :  { %v1960_v41 = vmul.f32 0.5, %v6021_v55  ;;  %v1880_v49 = vpop.f32.mrb[39].mxu0 }
 0x765   :  { %v1959_v27 = vmul.f32 0.5, %v1880_v49 }
 0x766   :  { %v1976_v30 = vmax.f32 %v1960_v41, %v6021_v55 }
 0x767   :  { %v1975_v13 = vmax.f32 %v1959_v27, %v1880_v49  ;;  %v6024_v51 = vpop.f32.mrb[40].mxu0 }
 0x768   :  { %v8317_v45 = vadd.f32 %v1976_v30, %v8205_v12  ;;  %v1962_v37 = vmul.f32 0.5, %v6024_v51  ;;  %v1890_v26 = vpop.f32.mrb[41].mxu0 }
 0x769   :  { %v8320_v50 = vadd.f32 %v1975_v13, %v8207_v28  ;;  %v1961_v4 = vmul.f32 0.5, %v1890_v26 }
 0x76a   :  { %v1978_v48 = vmax.f32 %v1962_v37, %v6024_v51 }
 0x76b   :  { %v1977_v14 = vmax.f32 %v1961_v4, %v1890_v26  ;;  %v6027_v29 = vpop.f32.mrb[42].mxu0  ;;  %v6905_v55 = vpack.c.bf16 %v8317_v45, %v8320_v50  ;;  %v8337_v4 = vpop.trf.xlu0 }
 0x76c   :  { %v8327_v41 = vadd.f32 %v1978_v48, %v8213_v21  ;;  %v1964_v49 = vmul.f32 0.5, %v6027_v29  ;;  %v1900_v12 = vpop.f32.mrb[43].mxu0 }
 0x76d   :  { %v8330_v20 = vadd.f32 %v1977_v14, %v8215_v10  ;;  %v1963_v27 = vmul.f32 0.5, %v1900_v12  ;;  %6906 = vmatprep.subr.bf16.mxu1 %v6905_v55 }
 0x76e   :  { %v1980_v28 = vmax.f32 %v1964_v49, %v6027_v29  ;;  %6908 = vmatpush3.bf16.msra.mxu1 %v6905_v55 }
 0x76f   :  { %v1979_v30 = vmax.f32 %v1963_v27, %v1900_v12  ;;  %v6030_v13 = vpop.f32.mrb[44].mxu0  ;;  %v6909_v51 = vpack.c.bf16 %v8327_v41, %v8330_v20 }
 0x770   :  { %v8335_v37 = vadd.f32 %v1980_v28, %v8219_v46  ;;  %v1966_v26 = vmul.f32 0.5, %v6030_v13  ;;  %v1910_v21 = vpop.f32.mrb[45].mxu0 }
 0x771   :  { %v8340_v48 = vadd.f32 %v1979_v30, %v8221_v0  ;;  %v1965_v14 = vmul.f32 0.5, %v1910_v21  ;;  %6910 = vmatprep.subr.bf16.mxu1 %v6909_v51  ;;  %v2047_v30 = vpop.trf.xlu0 }
 0x772   :  { %v1982_v10 = vmax.f32 %v1966_v26, %v6030_v13  ;;  %6912 = vmatpush3.bf16.msra.mxu1 %v6909_v51 }
 0x773   :  { %v1981_v29 = vmax.f32 %v1965_v14, %v1910_v21  ;;  %v6033_v55 = vpop.f32.mrb[46].mxu0  ;;  %v6913_v49 = vpack.c.bf16 %v8335_v37, %v8340_v48 }
 0x774   :  { %v8345_v12 = vadd.f32 %v1982_v10, %v8225_v31  ;;  %v1968_v46 = vmul.f32 0.5, %v6033_v55  ;;  %v1920_v27 = vpop.f32.mrb[47].mxu0 }
 0x775   :  { %v8348_v28 = vadd.f32 %v1981_v29, %v8227_v54  ;;  %v1967_v35 = vmul.f32 0.5, %v1920_v27  ;;  %6914 = vmatprep.subr.bf16.mxu1 %v6913_v49 }
 0x776   :  { %v1984_v0 = vmax.f32 %v1968_v46, %v6033_v55  ;;  %6916 = vmatpush3.bf16.msra.mxu1 %v6913_v49 }
 0x777   :  { %v1983_v13 = vmax.f32 %v1967_v35, %v1920_v27  ;;  %v6036_v51 = vpop.f32.mrb[48].mxu0  ;;  %v6917_v26 = vpack.c.bf16 %v8345_v12, %v8348_v28 }
 0x778   :  { %v8353_v21 = vadd.f32 %v1984_v0, %v8231_v58  ;;  %v1970_v31 = vmul.f32 0.5, %v6036_v51  ;;  %v1930_v14 = vpop.f32.mrb[49].mxu0  ;;  %v2048_v0 = vpop.trf.xlu0 }
 0x779   :  { %v8356_v10 = vadd.f32 %v1983_v13, %v8233_v15  ;;  %v1969_v54 = vmul.f32 0.5, %v1930_v14  ;;  %6918 = vmatprep.subr.bf16.mxu1 %v6917_v26 }
 0x77a   :  { %v1986_v29 = vmax.f32 %v1970_v31, %v6036_v51  ;;  %6920 = vmatpush3.bf16.msra.mxu1 %v6917_v26 }
 0x77b   :  { %v1985_v55 = vmax.f32 %v1969_v54, %v1930_v14  ;;  %v6039_v49 = vpop.f32.mrb[50].mxu0  ;;  %v6921_v35 = vpack.c.bf16 %v8353_v21, %v8356_v10 }
 0x77c   :  { %v8361_v46 = vadd.f32 %v1986_v29, %v8237_v22  ;;  %v1972_v27 = vmul.f32 0.5, %v6039_v49  ;;  %v1940_v58 = vpop.f32.mrb[51].mxu0 }
 0x77d   :  { %v8364_v3 = vadd.f32 %v1985_v55, %v8239_v17  ;;  %v1971_v15 = vmul.f32 0.5, %v1940_v58  ;;  %6922 = vmatprep.subr.bf16.mxu1 %v6921_v35  ;;  %v2049_v55 = vpop.trf.xlu0 }
 0x77e   :  { %v1988_v13 = vmax.f32 %v1972_v27, %v6039_v49  ;;  %6924 = vmatpush3.bf16.msra.mxu1 %v6921_v35 }
 0x77f   :  { %v1987_v51 = vmax.f32 %v1971_v15, %v1940_v58  ;;  %v6042_v26 = vpop.f32.mrb[52].mxu0  ;;  %v6925_v31 = vpack.c.bf16 %v8361_v46, %v8364_v3 }
 0x780   :  { %v8369_v14 = vadd.f32 %v1988_v13, %v8243_v34  ;;  %v1974_v22 = vmul.f32 0.5, %v6042_v26  ;;  %v1950_v54 = vpop.f32.mrb[53].mxu0 }
 0x781   :  { %v8372_v29 = vadd.f32 %v1987_v51, %v8245_v36  ;;  %v1973_v1 = vmul.f32 0.5, %v1950_v54  ;;  %6926 = vmatprep.subr.bf16.mxu1 %v6925_v31  ;;  %v2050_v58 = vpop.trf.xlu0 }
 0x782   :  { %v1990_v17 = vmax.f32 %v1974_v22, %v6042_v26  ;;  %6928 = vmatpush3.bf16.msra.mxu1 %v6925_v31 }
 0x783   :  { %v1989_v49 = vmax.f32 %v1973_v1, %v1950_v54  ;;  %v6929_v35 = vpack.c.bf16 %v8369_v14, %v8372_v29 }
 0x784   :  { %v8377_v27 = vadd.f32 %v1990_v17, %v8249_v53 }
 0x785   :  { %v8380_v34 = vadd.f32 %v1989_v49, %v8251_v23  ;;  %6930 = vmatprep.subr.bf16.mxu1 %v6929_v35  ;;  %v2051_v1 = vpop.trf.xlu0 }
 0x786   :  { %6932 = vmatpush3.bf16.msra.mxu1 %v6929_v35 }
 0x787   :  { %v6933_v36 = vpack.c.bf16 %v8377_v27, %v8380_v34 }
 0x789   :  { %6934 = vmatprep.subr.bf16.mxu1 %v6933_v36  ;;  %v2052_v53 = vpop.trf.xlu0 }
 0x78a   :  { %6936 = vmatpush3.bf16.msra.mxu1 %v6933_v36 }
 0x78d   :  { %6076 = vmatmul.mubr.f32.vlgmr.msra.gmra.mrb[64].mxu1 %v8293_v33  ;;  %v2053_v23 = vpop.trf.xlu0 }
 0x78e   :  { %6078 = vmatprep.mubr.f32.mxu1 %v8298_v16 }
 0x791   :  { %6079 = vmatmul.mubr.f32.gmra.mrb[66].mxu1 %v8306_v32  ;;  %v2054_v15 = vpop.trf.xlu0 }
 0x792   :  { %6081 = vmatprep.mubr.f32.mxu1 %v8311_v18 }
 0x795   :  { %6082 = vmatmul.mubr.f32.gmra.mrb[68].mxu1 %v8322_v43  ;;  %v2055_v33 = vpop.trf.xlu0 }
 0x796   :  { %6084 = vmatprep.mubr.f32.mxu1 %v8337_v4 }
 0x799   :  { %6085 = vmatmul.mubr.f32.gmra.mrb[70].mxu1 %v2047_v30  ;;  %v2282_v16 = vpop.trf.xlu0 }
 0x79a   :  { %6087 = vmatprep.mubr.f32.mxu1 %v2048_v0  ;;  %6131 = vmatprep.mubr.f32.mxu0 %v2282_v16 }
 0x79d   :  { %6088 = vmatmul.mubr.f32.gmra.mrb[72].mxu1 %v2049_v55  ;;  %v8391_v32 = vpop.trf.xlu0 }
 0x79e   :  { %6090 = vmatprep.mubr.f32.mxu1 %v2050_v58 }
 0x7a1   :  { %6091 = vmatmul.mubr.f32.gmra.mrb[74].mxu1 %v2051_v1  ;;  %v8393_v18 = vpop.trf.xlu0 }
 0x7a2   :  { %6093 = vmatprep.mubr.f32.mxu1 %v2052_v53 }
 0x7a5   :  { %6094 = vmatmul.mubr.f32.gmra.mrb[76].mxu1 %v2053_v23  ;;  %v8395_v43 = vpop.trf.xlu0 }
 0x7a6   :  { %6096 = vmatprep.mubr.f32.mxu1 %v2054_v15 }
 0x7a9   :  { %6097 = vmatmul.mubr.f32.gmra.mrb[78].mxu1 %v2055_v33  ;;  %v8397_v13 = vpop.trf.xlu0 }
 0x7aa   :  { %6187 = vmatprep.mubr.f32.mxu1 %v7637_v40 }
 0x7ad   :  { %v8405_v58 = vpop.trf.xlu0 }
 0x860   :  { %v6077_v4 = vpop.f32.mrb[64].mxu1 }
 0x861   :  { %v2202_v30 = vmul.f32 0.5, %v6077_v4  ;;  %v2122_v0 = vpop.f32.mrb[65].mxu1 }
 0x862   :  { %v2201_v51 = vmul.f32 0.5, %v2122_v0 }
 0x863   :  { %v2218_v26 = vmax.f32 %v2202_v30, %v6077_v4 }
 0x864   :  { %v2217_v31 = vmax.f32 %v2201_v51, %v2122_v0  ;;  %v6080_v22 = vpop.f32.mrb[66].mxu1 }
 0x865   :  { %v8400_v54 = vadd.f32 %v2218_v26, %v8317_v45  ;;  %v2204_v17 = vmul.f32 0.5, %v6080_v22  ;;  %v2132_v55 = vpop.f32.mrb[67].mxu1 }
 0x866   :  { %v8403_v49 = vadd.f32 %v2217_v31, %v8320_v50  ;;  %v2203_v35 = vmul.f32 0.5, %v2132_v55 }
 0x867   :  { %v2220_v36 = vmax.f32 %v2204_v17, %v6080_v22  ;;  %v8420_v22 = vpop.trf.xlu0 }
 0x868   :  { %v2219_v1 = vmax.f32 %v2203_v35, %v2132_v55  ;;  %v6083_v53 = vpop.f32.mrb[68].mxu1  ;;  %v6937_v23 = vpack.c.bf16 %v8400_v54, %v8403_v49 }
 0x869   :  { %v8410_v15 = vadd.f32 %v2220_v36, %v8327_v41  ;;  %v2206_v33 = vmul.f32 0.5, %v6083_v53  ;;  %v2142_v45 = vpop.f32.mrb[69].mxu1 }
 0x86a   :  { %v8413_v16 = vadd.f32 %v2219_v1, %v8330_v20  ;;  %v2205_v4 = vmul.f32 0.5, %v2142_v45  ;;  %6938 = vmatprep.subr.bf16.mxu0 %v6937_v23 }
 0x86b   :  { %v2222_v50 = vmax.f32 %v2206_v33, %v6083_v53  ;;  %6940 = vmatpush3.bf16.msra.mxu0 %v6937_v23 }
 0x86c   :  { %v2221_v30 = vmax.f32 %v2205_v4, %v2142_v45  ;;  %v6086_v0 = vpop.f32.mrb[70].mxu1  ;;  %v6941_v51 = vpack.c.bf16 %v8410_v15, %v8413_v16  ;;  %v8433_v4 = vpop.trf.xlu0 }
 0x86d   :  { %v8418_v26 = vadd.f32 %v2222_v50, %v8335_v37  ;;  %v2208_v31 = vmul.f32 0.5, %v6086_v0  ;;  %v2152_v41 = vpop.f32.mrb[71].mxu1 }
 0x86e   :  { %v8423_v17 = vadd.f32 %v2221_v30, %v8340_v48  ;;  %v2207_v20 = vmul.f32 0.5, %v2152_v41  ;;  %6942 = vmatprep.subr.bf16.mxu0 %v6941_v51 }
 0x86f   :  { %v2224_v55 = vmax.f32 %v2208_v31, %v6086_v0  ;;  %6944 = vmatpush3.bf16.msra.mxu0 %v6941_v51 }
 0x870   :  { %v2223_v35 = vmax.f32 %v2207_v20, %v2152_v41  ;;  %v6089_v36 = vpop.f32.mrb[72].mxu1  ;;  %v6945_v1 = vpack.c.bf16 %v8418_v26, %v8423_v17 }
 0x871   :  { %v8428_v53 = vadd.f32 %v2224_v55, %v8345_v12  ;;  %v2210_v37 = vmul.f32 0.5, %v6089_v36  ;;  %v2162_v23 = vpop.f32.mrb[73].mxu1 }
 0x872   :  { %v8431_v33 = vadd.f32 %v2223_v35, %v8348_v28  ;;  %v2209_v45 = vmul.f32 0.5, %v2162_v23  ;;  %6946 = vmatprep.subr.bf16.mxu0 %v6945_v1 }
 0x873   :  { %v2226_v48 = vmax.f32 %v2210_v37, %v6089_v36  ;;  %6948 = vmatpush3.bf16.msra.mxu0 %v6945_v1 }
 0x874   :  { %v2225_v50 = vmax.f32 %v2209_v45, %v2162_v23  ;;  %v6092_v30 = vpop.f32.mrb[74].mxu1  ;;  %v6949_v0 = vpack.c.bf16 %v8428_v53, %v8431_v33  ;;  %v2290_v23 = vpop.trf.xlu0 }
 0x875   :  { %v8438_v51 = vadd.f32 %v2226_v48, %v8353_v21  ;;  %v2212_v12 = vmul.f32 0.5, %v6092_v30  ;;  %v2172_v31 = vpop.f32.mrb[75].mxu1 }
 0x876   :  { %v8441_v41 = vadd.f32 %v2225_v50, %v8356_v10  ;;  %v2211_v28 = vmul.f32 0.5, %v2172_v31  ;;  %6950 = vmatprep.subr.bf16.mxu0 %v6949_v0 }
 0x877   :  { %v2228_v20 = vmax.f32 %v2212_v12, %v6092_v30  ;;  %6952 = vmatpush3.bf16.msra.mxu0 %v6949_v0 }
 0x878   :  { %v2227_v55 = vmax.f32 %v2211_v28, %v2172_v31  ;;  %v6095_v35 = vpop.f32.mrb[76].mxu1  ;;  %v6953_v36 = vpack.c.bf16 %v8438_v51, %v8441_v41  ;;  %v7267_v28 = vld [vmem:[%s9532_s9 + $0x8] sm:$0xff] }
 0x879   :  { %v8446_v1 = vadd.f32 %v2228_v20, %v8361_v46  ;;  %v2214_v37 = vmul.f32 0.5, %v6095_v35  ;;  %v2182_v21 = vpop.f32.mrb[77].mxu1 }
 0x87a   :  { %v8449_v45 = vadd.f32 %v2227_v55, %v8364_v3  ;;  %v2213_v10 = vmul.f32 0.5, %v2182_v21  ;;  %6954 = vmatprep.subr.bf16.mxu0 %v6953_v36  ;;  %v2581_v3 = vadd.f32 %v7267_v28, %v8188_v24  ;;  %v7272_v28 = vld [vmem:[%s9528_s1 + $0x10] sm:$0xff] }
 0x87b   :  { %v2230_v48 = vmax.f32 %v2214_v37, %v6095_v35  ;;  %6956 = vmatpush3.bf16.msra.mxu0 %v6953_v36  ;;  %v2291_v36 = vpop.trf.xlu0 }
 0x87c   :  { %v2229_v50 = vmax.f32 %v2213_v10, %v2182_v21  ;;  %v6098_v30 = vpop.f32.mrb[78].mxu1  ;;  %v6957_v0 = vpack.c.bf16 %v8446_v1, %v8449_v45 }
 0x87d   :  { %v8454_v12 = vadd.f32 %v2230_v48, %v8369_v14  ;;  %v2216_v46 = vmul.f32 0.5, %v6098_v30  ;;  %v2192_v31 = vpop.f32.mrb[79].mxu1  ;;  %v7268_v14 = vld [vmem:[%s9532_s9] sm:$0xff] }
 0x87e   :  { %v8461_v20 = vadd.f32 %v2229_v50, %v8372_v29  ;;  %v2215_v55 = vmul.f32 0.5, %v2192_v31  ;;  %6958 = vmatprep.subr.bf16.mxu0 %v6957_v0  ;;  %v2580_v37 = vadd.f32 %v7268_v14, %v8177_v11  ;;  %v7269_v29 = vld [vmem:[%s9528_s1 + $0x8] sm:$0xff]  ;;  %v7270_v11 = vld [vmem:[%s9528_s1] sm:$0xff] }
 0x87f   :  { %v2232_v35 = vmax.f32 %v2216_v46, %v6098_v30  ;;  %6960 = vmatpush3.bf16.msra.mxu0 %v6957_v0  ;;  %v8475_v48 = vadd.f32 %v7269_v29, %v2581_v3  ;;  %v2292_v0 = vpop.trf.xlu0  ;;  %v7271_v46 = vld [vmem:[%s9532_s9 + $0x10] sm:$0xff] }
 0x880   :  { %v2231_v21 = vmax.f32 %v2215_v55, %v2192_v31  ;;  %v6961_v10 = vpack.c.bf16 %v8454_v12, %v8461_v20  ;;  %v8483_v30 = vadd.f32 %v7270_v11, %v2580_v37  ;;  %v2582_v31 = vadd.f32 %v7271_v46, %v8197_v44 }
 0x881   :  { %v8470_v24 = vadd.f32 %v2232_v35, %v8377_v27 }
 0x882   :  { %v8478_v50 = vadd.f32 %v2231_v21, %v8380_v34  ;;  %6962 = vmatprep.subr.bf16.mxu0 %v6961_v10  ;;  %v8493_v34 = vpack.c.bf16 %v8475_v48, %v8483_v30  ;;  %v8499_v3 = vadd.f32 %v7272_v28, %v2582_v31 }
 0x883   :  { %6964 = vmatpush3.bf16.msra.mxu0 %v6961_v10  ;;  %v2293_v44 = vpop.trf.xlu0 }
 0x884   :  { %v6965_v27 = vpack.c.bf16 %v8470_v24, %v8478_v50 }
 0x886   :  { %6966 = vmatprep.subr.bf16.mxu0 %v6965_v27 }
 0x887   :  { %6968 = vmatpush3.bf16.msra.mxu0 %v6965_v27  ;;  %v2294_v55 = vpop.trf.xlu0 }
 0x888   :  { %7005 = vmatprep.subr.bf16.mxu0 %v8493_v34 }
 0x88a   :  { %6132 = vmatmul.mubr.f32.vlgmr.msra.gmra.mrb[54].mxu0 %v8391_v32 }
 0x88b   :  { %6134 = vmatprep.mubr.f32.mxu0 %v8393_v18  ;;  %7007 = vmatpush3.bf16.msra.mxu0 %v8493_v34  ;;  %v2295_v32 = vpop.trf.xlu0 }
 0x88c   :  { %6207 = vmatprep.subr.mxu0 %v8499_v3 }
 0x88e   :  { %6135 = vmatmul.mubr.f32.gmra.mrb[56].mxu0 %v8395_v43 }
 0x88f   :  { %6137 = vmatprep.mubr.f32.mxu0 %v8397_v13  ;;  %6208 = vmatpush3.msra.mxu0 %v8499_v3  ;;  %v2296_v18 = vpop.trf.xlu0 }
 0x892   :  { %6138 = vmatmul.mubr.f32.gmra.mrb[58].mxu0 %v8405_v58 }
 0x893   :  { %6140 = vmatprep.mubr.f32.mxu0 %v8420_v22  ;;  %v2297_v43 = vpop.trf.xlu0 }
 0x896   :  { %6141 = vmatmul.mubr.f32.gmra.mrb[60].mxu0 %v8433_v4 }
 0x897   :  { %6143 = vmatprep.mubr.f32.mxu0 %v2290_v23 }
 0x89a   :  { %6144 = vmatmul.mubr.f32.gmra.mrb[62].mxu0 %v2291_v36 }
 0x89b   :  { %6146 = vmatprep.mubr.f32.mxu0 %v2292_v0 }
 0x89e   :  { %6147 = vmatmul.mubr.f32.gmra.mrb[64].mxu0 %v2293_v44 }
 0x89f   :  { %6149 = vmatprep.mubr.f32.mxu0 %v2294_v55 }
 0x8a2   :  { %6150 = vmatmul.mubr.f32.gmra.mrb[66].mxu0 %v2295_v32 }
 0x8a3   :  { %6152 = vmatprep.mubr.f32.mxu0 %v2296_v18 }
 0x8a6   :  { %6153 = vmatmul.mubr.f32.gmra.mrb[68].mxu0 %v2297_v43 }
 0x8a7   :  { %6209 = vmatprep.mubr.msk.f32.mxu0 %vm355_vm2, %v7518_v60 }
 0x8aa   :  { %6210 = vmatmul.mubr.msk.f32.vlgmr.msra.gmra.mrb[70].mxu0 %vm355_vm2, %v7524_v62 }
 0x95d   :  { %v6133_v13 = vpop.f32.mrb[54].mxu0 }
 0x95e   :  { %v2444_v58 = vmul.f32 0.5, %v6133_v13  ;;  %v2364_v22 = vpop.f32.mrb[55].mxu0 }
 0x95f   :  { %v2443_v4 = vmul.f32 0.5, %v2364_v22 }
 0x960   :  { %v2460_v23 = vmax.f32 %v2444_v58, %v6133_v13 }
 0x961   :  { %v2459_v35 = vmax.f32 %v2443_v4, %v2364_v22  ;;  %v6136_v36 = vpop.f32.mrb[56].mxu0 }
 0x962   :  { %v2476_v14 = vadd.f32 %v2460_v23, %v8400_v54  ;;  %v2446_v37 = vmul.f32 0.5, %v6136_v36  ;;  %v2374_v21 = vpop.f32.mrb[57].mxu0 }
 0x963   :  { %v2475_v10 = vadd.f32 %v2459_v35, %v8403_v49  ;;  %v2445_v29 = vmul.f32 0.5, %v2374_v21 }
 0x964   :  { %v2462_v11 = vmax.f32 %v2446_v37, %v6136_v36 }
 0x965   :  { %v2461_v27 = vmax.f32 %v2445_v29, %v2374_v21  ;;  %v6139_v60 = vpop.f32.mrb[58].mxu0  ;;  %v6969_v0 = vpack.c.bf16 %v2476_v14, %v2475_v10 }
 0x966   :  { %v2478_v62 = vadd.f32 %v2462_v11, %v8410_v15  ;;  %v2448_v46 = vmul.f32 0.5, %v6139_v60  ;;  %v2384_v31 = vpop.f32.mrb[59].mxu0 }
 0x967   :  { %v2477_v28 = vadd.f32 %v2461_v27, %v8413_v16  ;;  %v2447_v44 = vmul.f32 0.5, %v2384_v31  ;;  %6970 = vmatprep.subr.bf16.mxu1 %v6969_v0 }
 0x968   :  { %v2464_v55 = vmax.f32 %v2448_v46, %v6139_v60  ;;  %6972 = vmatpush3.bf16.msra.mxu1 %v6969_v0 }
 0x969   :  { %v2463_v54 = vmax.f32 %v2447_v44, %v2384_v31  ;;  %v6142_v32 = vpop.f32.mrb[60].mxu0  ;;  %v6973_v18 = vpack.c.bf16 %v2478_v62, %v2477_v28 }
 0x96a   :  { %v2480_v49 = vadd.f32 %v2464_v55, %v8418_v26  ;;  %v2450_v43 = vmul.f32 0.5, %v6142_v32  ;;  %v2394_v13 = vpop.f32.mrb[61].mxu0 }
 0x96b   :  { %v2479_v58 = vadd.f32 %v2463_v54, %v8423_v17  ;;  %v2449_v22 = vmul.f32 0.5, %v2394_v13  ;;  %6974 = vmatprep.subr.bf16.mxu1 %v6973_v18 }
 0x96c   :  { %v2466_v15 = vmax.f32 %v2450_v43, %v6142_v32  ;;  %6976 = vmatpush3.bf16.msra.mxu1 %v6973_v18 }
 0x96d   :  { %v2465_v4 = vmax.f32 %v2449_v22, %v2394_v13  ;;  %v6145_v23 = vpop.f32.mrb[62].mxu0  ;;  %v6977_v16 = vpack.c.bf16 %v2480_v49, %v2479_v58 }
 0x96e   :  { %v2482_v35 = vadd.f32 %v2466_v15, %v8428_v53  ;;  %v2452_v36 = vmul.f32 0.5, %v6145_v23  ;;  %v2404_v14 = vpop.f32.mrb[63].mxu0 }
 0x96f   :  { %v2481_v37 = vadd.f32 %v2465_v4, %v8431_v33  ;;  %v2451_v21 = vmul.f32 0.5, %v2404_v14  ;;  %6978 = vmatprep.subr.bf16.mxu1 %v6977_v16 }
 0x970   :  { %v2468_v26 = vmax.f32 %v2452_v36, %v6145_v23  ;;  %6980 = vmatpush3.bf16.msra.mxu1 %v6977_v16 }
 0x971   :  { %v2467_v10 = vmax.f32 %v2451_v21, %v2404_v14  ;;  %v6148_v29 = vpop.f32.mrb[64].mxu0  ;;  %v6981_v17 = vpack.c.bf16 %v2482_v35, %v2481_v37 }
 0x972   :  { %v2484_v11 = vadd.f32 %v2468_v26, %v8438_v51  ;;  %v2454_v27 = vmul.f32 0.5, %v6148_v29  ;;  %v2414_v60 = vpop.f32.mrb[65].mxu0 }
 0x973   :  { %v2483_v0 = vadd.f32 %v2467_v10, %v8441_v41  ;;  %v2453_v62 = vmul.f32 0.5, %v2414_v60  ;;  %6982 = vmatprep.subr.bf16.mxu1 %v6981_v17  ;;  %v4914_v10 = vld [vmem:[%s9531_s5 + $0x198] sm:$0xff] }
 0x974   :  { %v2470_v53 = vmax.f32 %v2454_v27, %v6148_v29  ;;  %6984 = vmatpush3.bf16.msra.mxu1 %v6981_v17  ;;  %v4915_v29 = vld [vmem:[%s9531_s5 + $0x1a0] sm:$0xff]  ;;  %v4916_v17 = vld [vmem:[%s9531_s5 + $0x1a8] sm:$0xff]  ;;  %v4918_v27 = vld [vmem:[%s9531_s5 + $0x1b8] sm:$0xff] }
 0x975   :  { %v2469_v46 = vmax.f32 %v2453_v62, %v2414_v60  ;;  %v6151_v31 = vpop.f32.mrb[66].mxu0  ;;  %v6985_v33 = vpack.c.bf16 %v2484_v11, %v2483_v0  ;;  %v4917_v11 = vld [vmem:[%s9531_s5 + $0x1b0] sm:$0xff]  ;;  %v4919_v60 = vld [vmem:[%s9531_s5 + $0x1c0] sm:$0xff]  ;;  %v4920_v0 = vld [vmem:[%s9531_s5 + $0x1c8] sm:$0xff] }
 0x976   :  { %v2486_v28 = vadd.f32 %v2470_v53, %v8446_v1  ;;  %v2456_v44 = vmul.f32 0.5, %v6151_v31  ;;  %v2424_v55 = vpop.f32.mrb[67].mxu0  ;;  %v4921_v62 = vld [vmem:[%s9531_s5 + $0x1d0] sm:$0xff]  ;;  %v4922_v53 = vld [vmem:[%s9531_s5 + $0x1d8] sm:$0xff] }
 0x977   :  { %v2485_v54 = vadd.f32 %v2469_v46, %v8449_v45  ;;  %v2455_v32 = vmul.f32 0.5, %v2424_v55  ;;  %6986 = vmatprep.subr.bf16.mxu1 %v6985_v33  ;;  %v4923_v46 = vld [vmem:[%s9531_s5 + $0x1e0] sm:$0xff] }
 0x978   :  { %v2472_v51 = vmax.f32 %v2456_v44, %v6151_v31  ;;  %6988 = vmatpush3.bf16.msra.mxu1 %v6985_v33  ;;  %v4924_v31 = vld [vmem:[%s9531_s5 + $0x1e8] sm:$0xff]  ;;  %v4925_v33 = vld [vmem:[%s9531_s5 + $0x1f0] sm:$0xff] }
 0x979   :  { %v2471_v18 = vmax.f32 %v2455_v32, %v2424_v55  ;;  %v6154_v49 = vpop.f32.mrb[68].mxu0  ;;  %v6989_v41 = vpack.c.bf16 %v2486_v28, %v2485_v54  ;;  %v4926_v28 = vld [vmem:[%s9531_s5 + $0x1f8] sm:$0xff] }
 0x97a   :  { %v2488_v43 = vadd.f32 %v2472_v51, %v8454_v12  ;;  %v2458_v13 = vmul.f32 0.5, %v6154_v49  ;;  %v2434_v58 = vpop.f32.mrb[69].mxu0 }
 0x97b   :  { %v2487_v22 = vadd.f32 %v2471_v18, %v8461_v20  ;;  %v2457_v15 = vmul.f32 0.5, %v2434_v58  ;;  %6990 = vmatprep.subr.bf16.mxu1 %v6989_v41  ;;  %v4911_v20 = vld [vmem:[%s9531_s5 + $0x180] sm:$0xff] }
 0x97c   :  { %v2474_v1 = vmax.f32 %v2458_v13, %v6154_v49  ;;  %6992 = vmatpush3.bf16.msra.mxu1 %v6989_v41  ;;  %2954 = vxpose.xlu1.b32.start [1/16] %v4911_v20, 128  ;;  %v7273_v49 = vld [vmem:[%s9533_s10 + $0x8] sm:$0xff] }
 0x97d   :  { %v2473_v4 = vmax.f32 %v2457_v15, %v2434_v58  ;;  %v6211_v23 = vpop.f32.mrb[70].mxu0  ;;  %v6993_v45 = vpack.c.bf16 %v2488_v43, %v2487_v22  ;;  %v7274_v43 = vld [vmem:[%s9533_s10] sm:$0xff]  ;;  %v7275_v58 = vld [vmem:[%s9530_s2 + $0x8] sm:$0xff] }
 0x97e   :  { %v2490_v16 = vadd.f32 %v2474_v1, %v8470_v24  ;;  %v2757_v35 = vmul.f32 0.5, %v6211_v23  ;;  %v2747_v36 = vpop.f32.mrb[71].mxu0  ;;  %v4912_v24 = vld [vmem:[%s9531_s5 + $0x188] sm:$0xff]  ;;  %v7276_v15 = vld [vmem:[%s9530_s2] sm:$0xff] }
 0x97f   :  { %v2489_v14 = vadd.f32 %v2473_v4, %v8478_v50  ;;  %v2756_v37 = vmul.f32 0.5, %v2747_v36  ;;  %6994 = vmatprep.subr.bf16.mxu1 %v6993_v45  ;;  %v4913_v50 = vld [vmem:[%s9531_s5 + $0x190] sm:$0xff] }
 0x980   :  { %v2759_v12 = vmax.f32 %v2757_v35, %v6211_v23  ;;  %6996 = vmatpush3.bf16.msra.mxu1 %v6993_v45  ;;  %2955 = vxpose.xlu1.b32.cont [2/16] %v4912_v24, 128  ;;  %v7277_v23 = vld [vmem:[%s9527_s0] sm:$0xff]  ;;  %v7278_v45 = vld [vmem:[%s9527_s0 + $0x8] sm:$0xff]  ;;  %v4938_v35 = vld [vmem:[%s9531_s5 + $0x258] sm:$0xff] }
 0x981   :  { %v2758_v21 = vmax.f32 %v2756_v37, %v2747_v36  ;;  %v6997_v26 = vpack.c.bf16 %v2490_v16, %v2489_v14  ;;  %v4939_v36 = vld [vmem:[%s9531_s5 + $0x260] sm:$0xff] }
 0x982   :  { %5027 = vst [vmem:[%s9533_s10 + $0x18] sm:$0xff] %v2759_v12 }
 0x983   :  { %5026 = vst [vmem:[%s9533_s10 + $0x10] sm:$0xff] %v2758_v21  ;;  %6998 = vmatprep.subr.bf16.mxu1 %v6997_v26 }
 0x984   :  { %7000 = vmatpush3.bf16.msra.mxu1 %v6997_v26  ;;  %2956 = vxpose.xlu1.b32.cont [3/16] %v4913_v50, 128  ;;  %v4940_v26 = vld [vmem:[%s9531_s5 + $0x268] sm:$0xff] }
 0x985   :  { %7001 = vmatprep.subr.bf16.mxu1 %v9567_v19 }
 0x987   :  { %6188 = vmatmul.mubr.f32.vlgmr.msra.gmra.mrb[80].mxu1 %v7633_v38 }
 0x988   :  { %6194 = vmatprep.mubr.msk.f32.mxu1 %vm7291_vm0, %v9568_v25  ;;  %2957 = vxpose.xlu1.b32.cont [4/16] %v4914_v10, 128 }
 0x98c   :  { %2958 = vxpose.xlu1.b32.cont [5/16] %v4915_v29, 128 }
 0x990   :  { %2959 = vxpose.xlu1.b32.cont [6/16] %v4916_v17, 128  ;;  %v4941_v17 = vld [vmem:[%s9531_s5 + $0x270] sm:$0xff] }
 0x994   :  { %2960 = vxpose.xlu1.b32.cont [7/16] %v4917_v11, 128 }
 0x998   :  { %2961 = vxpose.xlu1.b32.cont [8/16] %v4918_v27, 128 }
 0x99c   :  { %2962 = vxpose.xlu1.b32.cont [9/16] %v4919_v60, 128 }
 0x9a0   :  { %2963 = vxpose.xlu1.b32.cont [10/16] %v4920_v0, 128 }
 0x9a4   :  { %2964 = vxpose.xlu1.b32.cont [11/16] %v4921_v62, 128  ;;  %v4942_v62 = vld [vmem:[%s9531_s5 + $0x278] sm:$0xff] }
 0x9a8   :  { %2965 = vxpose.xlu1.b32.cont [12/16] %v4922_v53, 128 }
 0x9ac   :  { %2966 = vxpose.xlu1.b32.cont [13/16] %v4923_v46, 128 }
 0x9b0   :  { %2967 = vxpose.xlu1.b32.cont [14/16] %v4924_v31, 128 }
 0x9b4   :  { %2968 = vxpose.xlu1.b32.cont [15/16] %v4925_v33, 128 }
 0x9b8   :  { %2969 = vxpose.xlu1.b32.end [16/16] %v4926_v28, 128 }
 0xa5a   :  { %v6189_v44 = vpop.f32.mrb[80].mxu1 }
 0xa5b   :  { %v2567_v55 = vmul.f32 0.5, %v6189_v44  ;;  %v2557_v54 = vpop.f32.mrb[81].mxu1 }
 0xa5c   :  { %v2566_v32 = vmul.f32 0.5, %v2557_v54 }
 0xa5d   :  { %v2569_v51 = vmax.f32 %v2567_v55, %v6189_v44 }
 0xa5e   :  { %v2568_v18 = vmax.f32 %v2566_v32, %v2557_v54 }
 0xa5f   :  { %2579 = vst [vmem:[%s9536_s12 + $0x8] sm:$0xff] %v2569_v51  ;;  %v2587_v41 = vadd.f32 %v7273_v49, %v2569_v51 }
 0xa60   :  { %2578 = vst [vmem:[%s9536_s12] sm:$0xff] %v2568_v18  ;;  %v2586_v13 = vadd.f32 %v7274_v43, %v2568_v18 }
 0xa61   :  { %v8604_v22 = vadd.f32 %v7275_v58, %v2587_v41 }
 0xa62   :  { %v8609_v1 = vadd.f32 %v7276_v15, %v2586_v13 }
 0xa64   :  { %v8613_v4 = vpack.c.bf16 %v8604_v22, %v8609_v1 }
 0xa66   :  { %7003 = vmatpush3.bf16.msra.mxu1 %v8613_v4 }
 0xa67   :  { %7009 = vmatprep.subr.bf16.mxu1 %v8493_v34 }
 0xa69   :  { %6195 = vmatmul.mubr.msk.f32.vlgmr.msra.gmra.mrb[82].mxu1 %vm227_vm1, %v7277_v23 }
 0xa6a   :  { %7011 = vmatpush3.bf16.msra.mxu1 %v8493_v34  ;;  %6197 = vmatprep.mubr.msk.f32.mxu1 %vm7291_vm0, %v9568_v25  ;;  %v7279_v34 = vld [vmem:[%s9527_s0 + $0x10] sm:$0xff] }
 0xa6b   :  { %6216 = vmatprep.subr.mxu1 %v8499_v3 }
 0xa6d   :  { %6198 = vmatmul.mubr.msk.f32.gmra.mrb[84].mxu1 %vm227_vm1, %v7278_v45 }
 0xa6e   :  { %6217 = vmatpush3.msra.mxu1 %v8499_v3  ;;  %6200 = vmatprep.mubr.msk.f32.mxu1 %vm7291_vm0, %v9568_v25 }
 0xa71   :  { %6201 = vmatmul.mubr.msk.f32.gmra.mrb[86].mxu1 %vm227_vm1, %v7279_v34 }
 0xa72   :  { %6218 = vmatprep.mubr.msk.f32.mxu1 %vm355_vm2, %v7635_v39  ;;  %v9585_v39 = vld [vmem:[#allocation4_spill] sm:$0xff] }
 0xa75   :  { %6219 = vmatmul.mubr.msk.f32.vlgmr.msra.gmra.mrb[88].mxu1 %vm355_vm2, %v7642_v42  ;;  %v9586_v42 = vld [vmem:[#allocation5_spill] sm:$0xff] }
 0xa76   :  { %6221 = vmatprep.mubr.msk.f32.mxu1 %vm355_vm2, %v7647_v47  ;;  %v2970_v47 = vpop.trf.xlu1 }
 0xa77   :  { %6274 = vmatprep.mubr.f32.mxu0 %v2970_v47 }
 0xa79   :  { %6222 = vmatmul.mubr.msk.f32.gmra.mrb[90].mxu1 %vm355_vm2, %v7654_v52  ;;  %v4927_v52 = vld [vmem:[%s9531_s5 + $0x200] sm:$0xff] }
 0xa7a   :  { %6224 = vmatprep.mubr.msk.f32.mxu1 %vm355_vm2, %v7661_v56  ;;  %3196 = vxpose.xlu0.b32.start [1/16] %v4927_v52, 128  ;;  %v4928_v56 = vld [vmem:[%s9531_s5 + $0x208] sm:$0xff]  ;;  %v8701_v16 = vpop.trf.xlu1 }
 0xa7d   :  { %6225 = vmatmul.mubr.msk.f32.gmra.mrb[92].mxu1 %vm355_vm2, %v7668_v57  ;;  %v4929_v57 = vld [vmem:[%s9531_s5 + $0x210] sm:$0xff] }
 0xa7e   :  { %6227 = vmatprep.mubr.msk.f32.mxu1 %vm355_vm2, %v7672_v59  ;;  %3197 = vxpose.xlu0.b32.cont [2/16] %v4928_v56, 128  ;;  %v4930_v59 = vld [vmem:[%s9531_s5 + $0x218] sm:$0xff]  ;;  %v8709_v14 = vpop.trf.xlu1 }
 0xa81   :  { %6228 = vmatmul.mubr.msk.f32.gmra.mrb[94].mxu1 %vm355_vm2, %v7676_v63  ;;  %v4931_v63 = vld [vmem:[%s9531_s5 + $0x220] sm:$0xff] }
 0xa82   :  { %6230 = vmatprep.mubr.msk.f32.mxu1 %vm355_vm2, %v7680_v2  ;;  %3198 = vxpose.xlu0.b32.cont [3/16] %v4929_v57, 128  ;;  %v4932_v2 = vld [vmem:[%s9531_s5 + $0x228] sm:$0xff]  ;;  %v8717_v29 = vpop.trf.xlu1 }
 0xa85   :  { %6231 = vmatmul.mubr.msk.f32.gmra.mrb[96].mxu1 %vm355_vm2, %v7684_v5  ;;  %v4933_v5 = vld [vmem:[%s9531_s5 + $0x230] sm:$0xff] }
 0xa86   :  { %6233 = vmatprep.mubr.msk.f32.mxu1 %vm355_vm2, %v7688_v6  ;;  %3199 = vxpose.xlu0.b32.cont [4/16] %v4930_v59, 128  ;;  %v4934_v6 = vld [vmem:[%s9531_s5 + $0x238] sm:$0xff]  ;;  %v8728_v46 = vpop.trf.xlu1 }
 0xa89   :  { %6234 = vmatmul.mubr.msk.f32.gmra.mrb[98].mxu1 %vm355_vm2, %v7692_v7  ;;  %v4935_v7 = vld [vmem:[%s9531_s5 + $0x240] sm:$0xff] }
 0xa8a   :  { %6236 = vmatprep.mubr.msk.f32.mxu1 %vm355_vm2, %v7696_v8  ;;  %3200 = vxpose.xlu0.b32.cont [5/16] %v4931_v63, 128  ;;  %v4936_v8 = vld [vmem:[%s9531_s5 + $0x248] sm:$0xff]  ;;  %v8737_v49 = vpop.trf.xlu1 }
 0xa8d   :  { %6237 = vmatmul.mubr.msk.f32.gmra.mrb[100].mxu1 %vm355_vm2, %v7700_v9  ;;  %v4937_v9 = vld [vmem:[%s9531_s5 + $0x250] sm:$0xff] }
 0xa8e   :  { %6239 = vmatprep.mubr.msk.f32.mxu1 %vm355_vm2, %v9585_v39  ;;  %3201 = vxpose.xlu0.b32.cont [6/16] %v4932_v2, 128  ;;  %v2976_v47 = vpop.trf.xlu1 }
 0xa91   :  { %6240 = vmatmul.mubr.msk.f32.gmra.mrb[102].mxu1 %vm355_vm2, %v9586_v42 }
 0xa92   :  { %3202 = vxpose.xlu0.b32.cont [7/16] %v4933_v5, 128 }
 0xa96   :  { %3203 = vxpose.xlu0.b32.cont [8/16] %v4934_v6, 128 }
 0xa9a   :  { %3204 = vxpose.xlu0.b32.cont [9/16] %v4935_v7, 128 }
 0xa9e   :  { %3205 = vxpose.xlu0.b32.cont [10/16] %v4936_v8, 128 }
 0xaa2   :  { %3206 = vxpose.xlu0.b32.cont [11/16] %v4937_v9, 128 }
 0xaa6   :  { %3207 = vxpose.xlu0.b32.cont [12/16] %v4938_v35, 128  ;;  %v2977_v35 = vpop.trf.xlu1 }
 0xaaa   :  { %3208 = vxpose.xlu0.b32.cont [13/16] %v4939_v36, 128 }
 0xaae   :  { %3209 = vxpose.xlu0.b32.cont [14/16] %v4940_v26, 128 }
 0xab2   :  { %3210 = vxpose.xlu0.b32.cont [15/16] %v4941_v17, 128 }
 0xab6   :  { %3211 = vxpose.xlu0.b32.end [16/16] %v4942_v62, 128 }
 0xb3c   :  { %v2661_v37 = vpop.f32.mrb[82].mxu1 }
 0xb3d   :  { %v2675_v12 = vmul.f32 0.5, %v2661_v37  ;;  %v6196_v21 = vpop.f32.mrb[83].mxu1 }
 0xb3f   :  { %v2678_v20 = vmax.f32 %v2675_v12, %v2661_v37 }
 0xb40   :  { %v2666_v24 = vpop.f32.mrb[84].mxu1 }
 0xb41   :  { %5023 = vst [vmem:[%s9532_s9 + $0x18] sm:$0xff] %v2678_v20  ;;  %v2676_v50 = vmul.f32 0.5, %v2666_v24  ;;  %v6199_v10 = vpop.f32.mrb[85].mxu1 }
 0xb43   :  { %v2679_v11 = vmax.f32 %v2676_v50, %v2666_v24 }
 0xb44   :  { %v2671_v27 = vpop.f32.mrb[86].mxu1 }
 0xb45   :  { %5024 = vst [vmem:[%s9532_s9 + $0x20] sm:$0xff] %v2679_v11  ;;  %v2677_v60 = vmul.f32 0.5, %v2671_v27  ;;  %v6202_v0 = vpop.f32.mrb[87].mxu1  ;;  %v2978_v11 = vpop.trf.xlu1 }
 0xb47   :  { %v2680_v53 = vmax.f32 %v2677_v60, %v2671_v27 }
 0xb48   :  { %v6220_v31 = vpop.f32.mrb[88].mxu1 }
 0xb49   :  { %5025 = vst [vmem:[%s9532_s9 + $0x28] sm:$0xff] %v2680_v53  ;;  %v2906_v33 = vmul.f32 0.5, %v6220_v31  ;;  %v2826_v28 = vpop.f32.mrb[89].mxu1 }
 0xb4a   :  { %v2905_v44 = vmul.f32 0.5, %v2826_v28 }
 0xb4b   :  { %v8733_v55 = vmax.f32 %v2906_v33, %v6220_v31 }
 0xb4c   :  { %v8735_v54 = vmax.f32 %v2905_v44, %v2826_v28  ;;  %v6223_v32 = vpop.f32.mrb[90].mxu1 }
 0xb4d   :  { %v2908_v51 = vmul.f32 0.5, %v6223_v32  ;;  %v2836_v18 = vpop.f32.mrb[91].mxu1 }
 0xb4e   :  { %v7012_v41 = vpack.c.bf16 %v8733_v55, %v8735_v54  ;;  %v2907_v43 = vmul.f32 0.5, %v2836_v18 }
 0xb4f   :  { %v8741_v13 = vmax.f32 %v2908_v51, %v6223_v32 }
 0xb50   :  { %v8743_v58 = vmax.f32 %v2907_v43, %v2836_v18  ;;  %v6226_v15 = vpop.f32.mrb[92].mxu1  ;;  %7013 = vmatprep.subr.bf16.mxu0 %v7012_v41  ;;  %v2979_v18 = vpop.trf.xlu1 }
 0xb51   :  { %v2910_v23 = vmul.f32 0.5, %v6226_v15  ;;  %v2846_v45 = vpop.f32.mrb[93].mxu1  ;;  %7015 = vmatpush3.bf16.msra.mxu0 %v7012_v41 }
 0xb52   :  { %v7016_v34 = vpack.c.bf16 %v8741_v13, %v8743_v58  ;;  %v2909_v39 = vmul.f32 0.5, %v2846_v45 }
 0xb53   :  { %v8747_v42 = vmax.f32 %v2910_v23, %v6226_v15 }
 0xb54   :  { %v8749_v52 = vmax.f32 %v2909_v39, %v2846_v45  ;;  %v6229_v56 = vpop.f32.mrb[94].mxu1  ;;  %7017 = vmatprep.subr.bf16.mxu0 %v7016_v34 }
 0xb55   :  { %v2912_v57 = vmul.f32 0.5, %v6229_v56  ;;  %v2856_v59 = vpop.f32.mrb[95].mxu1  ;;  %7019 = vmatpush3.bf16.msra.mxu0 %v7016_v34  ;;  %v2980_v34 = vpop.trf.xlu1 }
 0xb56   :  { %v7020_v63 = vpack.c.bf16 %v8747_v42, %v8749_v52  ;;  %v2911_v2 = vmul.f32 0.5, %v2856_v59 }
 0xb57   :  { %v8753_v5 = vmax.f32 %v2912_v57, %v6229_v56 }
 0xb58   :  { %v8755_v6 = vmax.f32 %v2911_v2, %v2856_v59  ;;  %v6232_v7 = vpop.f32.mrb[96].mxu1  ;;  %7021 = vmatprep.subr.bf16.mxu0 %v7020_v63  ;;  %v4948_v2 = vld [vmem:[%s9531_s5 + $0x2a8] sm:$0xff] }
 0xb59   :  { %v2914_v8 = vmul.f32 0.5, %v6232_v7  ;;  %v2866_v9 = vpop.f32.mrb[97].mxu1  ;;  %7023 = vmatpush3.bf16.msra.mxu0 %v7020_v63  ;;  %v2981_v39 = vpop.trf.xlu1  ;;  %v4947_v63 = vld [vmem:[%s9531_s5 + $0x2a0] sm:$0xff] }
 0xb5a   :  { %v7024_v36 = vpack.c.bf16 %v8753_v5, %v8755_v6  ;;  %v2913_v37 = vmul.f32 0.5, %v2866_v9 }
 0xb5b   :  { %v8759_v12 = vmax.f32 %v2914_v8, %v6232_v7  ;;  %v4949_v7 = vld [vmem:[%s9531_s5 + $0x2b0] sm:$0xff]  ;;  %v4950_v8 = vld [vmem:[%s9531_s5 + $0x2b8] sm:$0xff] }
 0xb5c   :  { %v8761_v21 = vmax.f32 %v2913_v37, %v2866_v9  ;;  %v6235_v26 = vpop.f32.mrb[98].mxu1  ;;  %7025 = vmatprep.subr.bf16.mxu0 %v7024_v36  ;;  %v4951_v9 = vld [vmem:[%s9531_s5 + $0x2c0] sm:$0xff] }
 0xb5d   :  { %v2916_v20 = vmul.f32 0.5, %v6235_v26  ;;  %v2876_v24 = vpop.f32.mrb[99].mxu1  ;;  %7027 = vmatpush3.bf16.msra.mxu0 %v7024_v36  ;;  %v2982_v56 = vpop.trf.xlu1  ;;  %v4953_v36 = vld [vmem:[%s9531_s5 + $0x2d0] sm:$0xff] }
 0xb5e   :  { %v7028_v50 = vpack.c.bf16 %v8759_v12, %v8761_v21  ;;  %v2915_v10 = vmul.f32 0.5, %v2876_v24 }
 0xb5f   :  { %v8765_v17 = vmax.f32 %v2916_v20, %v6235_v26  ;;  %v4954_v26 = vld [vmem:[%s9531_s5 + $0x2d8] sm:$0xff]  ;;  %v4955_v20 = vld [vmem:[%s9531_s5 + $0x2e0] sm:$0xff] }
 0xb60   :  { %v8767_v27 = vmax.f32 %v2915_v10, %v2876_v24  ;;  %v6238_v60 = vpop.f32.mrb[100].mxu1  ;;  %7029 = vmatprep.subr.bf16.mxu0 %v7028_v50 }
 0xb61   :  { %v2918_v0 = vmul.f32 0.5, %v6238_v60  ;;  %v2886_v62 = vpop.f32.mrb[101].mxu1  ;;  %7031 = vmatpush3.bf16.msra.mxu0 %v7028_v50  ;;  %v2983_v57 = vpop.trf.xlu1  ;;  %v4956_v50 = vld [vmem:[%s9531_s5 + $0x2e8] sm:$0xff] }
 0xb62   :  { %v7032_v53 = vpack.c.bf16 %v8765_v17, %v8767_v27  ;;  %v2917_v31 = vmul.f32 0.5, %v2886_v62 }
 0xb63   :  { %v8771_v33 = vmax.f32 %v2918_v0, %v6238_v60  ;;  %v4958_v0 = vld [vmem:[%s9531_s5 + $0x2f8] sm:$0xff] }
 0xb64   :  { %v8773_v28 = vmax.f32 %v2917_v31, %v2886_v62  ;;  %v6241_v44 = vpop.f32.mrb[102].mxu1  ;;  %7033 = vmatprep.subr.bf16.mxu0 %v7032_v53 }
 0xb65   :  { %v2920_v32 = vmul.f32 0.5, %v6241_v44  ;;  %v2896_v51 = vpop.f32.mrb[103].mxu1  ;;  %7035 = vmatpush3.bf16.msra.mxu0 %v7032_v53  ;;  %v2984_v59 = vpop.trf.xlu1 }
 0xb66   :  { %v7036_v41 = vpack.c.bf16 %v8771_v33, %v8773_v28  ;;  %v2919_v43 = vmul.f32 0.5, %v2896_v51 }
 0xb67   :  { %v8777_v15 = vmax.f32 %v2920_v32, %v6241_v44 }
 0xb68   :  { %v8779_v23 = vmax.f32 %v2919_v43, %v2896_v51  ;;  %7037 = vmatprep.subr.bf16.mxu0 %v7036_v41 }
 0xb69   :  { %7039 = vmatpush3.bf16.msra.mxu0 %v7036_v41 }
 0xb6a   :  { %v7040_v45 = vpack.c.bf16 %v8777_v15, %v8779_v23 }
 0xb6c   :  { %7041 = vmatprep.subr.bf16.mxu0 %v7040_v45 }
 0xb6d   :  { %7043 = vmatpush3.bf16.msra.mxu0 %v7040_v45 }
 0xb70   :  { %6275 = vmatmul.mubr.f32.vlgmr.msra.gmra.mrb[72].mxu0 %v8701_v16  ;;  %v2985_v16 = vpop.trf.xlu1 }
 0xb71   :  { %6277 = vmatprep.mubr.f32.mxu0 %v8709_v14  ;;  %v3212_v14 = vpop.trf.xlu0 }
 0xb72   :  { %6330 = vmatprep.mubr.f32.mxu1 %v3212_v14 }
 0xb74   :  { %6278 = vmatmul.mubr.f32.gmra.mrb[74].mxu0 %v8717_v29  ;;  %v4943_v29 = vld [vmem:[%s9531_s5 + $0x280] sm:$0xff] }
 0xb75   :  { %6280 = vmatprep.mubr.f32.mxu0 %v8728_v46  ;;  %3438 = vxpose.xlu1.b32.start [1/16] %v4943_v29, 128  ;;  %v4944_v46 = vld [vmem:[%s9531_s5 + $0x288] sm:$0xff]  ;;  %v8821_v37 = vpop.trf.xlu0 }
 0xb78   :  { %6281 = vmatmul.mubr.f32.gmra.mrb[76].mxu0 %v8737_v49  ;;  %v4945_v49 = vld [vmem:[%s9531_s5 + $0x290] sm:$0xff] }
 0xb79   :  { %6283 = vmatprep.mubr.f32.mxu0 %v2976_v47  ;;  %3439 = vxpose.xlu1.b32.cont [2/16] %v4944_v46, 128  ;;  %v4946_v47 = vld [vmem:[%s9531_s5 + $0x298] sm:$0xff]  ;;  %v8829_v24 = vpop.trf.xlu0 }
 0xb7c   :  { %6284 = vmatmul.mubr.f32.gmra.mrb[78].mxu0 %v2977_v35  ;;  %v4952_v35 = vld [vmem:[%s9531_s5 + $0x2c8] sm:$0xff] }
 0xb7d   :  { %6286 = vmatprep.mubr.f32.mxu0 %v2978_v11  ;;  %3440 = vxpose.xlu1.b32.cont [3/16] %v4945_v49, 128  ;;  %v8834_v10 = vpop.trf.xlu0  ;;  %v4957_v11 = vld [vmem:[%s9531_s5 + $0x2f0] sm:$0xff] }
 0xb80   :  { %6287 = vmatmul.mubr.f32.gmra.mrb[80].mxu0 %v2979_v18 }
 0xb81   :  { %6289 = vmatprep.mubr.f32.mxu0 %v2980_v34  ;;  %3441 = vxpose.xlu1.b32.cont [4/16] %v4946_v47, 128  ;;  %v8842_v31 = vpop.trf.xlu0 }
 0xb84   :  { %6290 = vmatmul.mubr.f32.gmra.mrb[82].mxu0 %v2981_v39 }
 0xb85   :  { %6292 = vmatprep.mubr.f32.mxu0 %v2982_v56  ;;  %3442 = vxpose.xlu1.b32.cont [5/16] %v4947_v63, 128 }
 0xb88   :  { %6293 = vmatmul.mubr.f32.gmra.mrb[84].mxu0 %v2983_v57  ;;  %v8850_v57 = vpop.trf.xlu0 }
 0xb89   :  { %6295 = vmatprep.mubr.f32.mxu0 %v2984_v59  ;;  %3443 = vxpose.xlu1.b32.cont [6/16] %v4948_v2, 128 }
 0xb8c   :  { %6296 = vmatmul.mubr.f32.gmra.mrb[86].mxu0 %v2985_v16 }
 0xb8d   :  { %3444 = vxpose.xlu1.b32.cont [7/16] %v4949_v7, 128 }
 0xb91   :  { %3445 = vxpose.xlu1.b32.cont [8/16] %v4950_v8, 128 }
 0xb95   :  { %3446 = vxpose.xlu1.b32.cont [9/16] %v4951_v9, 128 }
 0xb99   :  { %3447 = vxpose.xlu1.b32.cont [10/16] %v4952_v35, 128  ;;  %v8865_v35 = vpop.trf.xlu0 }
 0xb9d   :  { %3448 = vxpose.xlu1.b32.cont [11/16] %v4953_v36, 128 }
 0xba1   :  { %3449 = vxpose.xlu1.b32.cont [12/16] %v4954_v26, 128 }
 0xba5   :  { %3450 = vxpose.xlu1.b32.cont [13/16] %v4955_v20, 128 }
 0xba9   :  { %3451 = vxpose.xlu1.b32.cont [14/16] %v4956_v50, 128 }
 0xbad   :  { %3452 = vxpose.xlu1.b32.cont [15/16] %v4957_v11, 128 }
 0xbb1   :  { %3453 = vxpose.xlu1.b32.end [16/16] %v4958_v0, 128 }
 0xc43   :  { %v6276_v60 = vpop.f32.mrb[72].mxu0 }
 0xc44   :  { %v3132_v62 = vmul.f32 0.5, %v6276_v60  ;;  %v3052_v53 = vpop.f32.mrb[73].mxu0 }
 0xc45   :  { %v3131_v44 = vmul.f32 0.5, %v3052_v53 }
 0xc46   :  { %v3148_v32 = vmax.f32 %v3132_v62, %v6276_v60 }
 0xc47   :  { %v3147_v51 = vmax.f32 %v3131_v44, %v3052_v53  ;;  %v6279_v18 = vpop.f32.mrb[74].mxu0  ;;  %v3219_v44 = vpop.trf.xlu0 }
 0xc48   :  { %v8845_v41 = vadd.f32 %v3148_v32, %v8733_v55  ;;  %v3134_v43 = vmul.f32 0.5, %v6279_v18  ;;  %v3062_v45 = vpop.f32.mrb[75].mxu0 }
 0xc49   :  { %v8848_v34 = vadd.f32 %v3147_v51, %v8735_v54  ;;  %v3133_v39 = vmul.f32 0.5, %v3062_v45 }
 0xc4a   :  { %v3150_v56 = vmax.f32 %v3134_v43, %v6279_v18 }
 0xc4b   :  { %v3149_v59 = vmax.f32 %v3133_v39, %v3062_v45  ;;  %v6282_v16 = vpop.f32.mrb[76].mxu0  ;;  %v7044_v14 = vpack.c.bf16 %v8845_v41, %v8848_v34 }
 0xc4c   :  { %v8855_v29 = vadd.f32 %v3150_v56, %v8741_v13  ;;  %v3136_v46 = vmul.f32 0.5, %v6282_v16  ;;  %v3072_v55 = vpop.f32.mrb[77].mxu0 }
 0xc4d   :  { %v8858_v49 = vadd.f32 %v3149_v59, %v8743_v58  ;;  %v3135_v47 = vmul.f32 0.5, %v3072_v55  ;;  %7045 = vmatprep.subr.bf16.mxu1 %v7044_v14 }
 0xc4e   :  { %v3152_v54 = vmax.f32 %v3136_v46, %v6282_v16  ;;  %7047 = vmatpush3.bf16.msra.mxu1 %v7044_v14 }
 0xc4f   :  { %v3151_v63 = vmax.f32 %v3135_v47, %v3072_v55  ;;  %v6285_v2 = vpop.f32.mrb[78].mxu0  ;;  %v7048_v7 = vpack.c.bf16 %v8855_v29, %v8858_v49  ;;  %v3220_v47 = vpop.trf.xlu0 }
 0xc50   :  { %v8863_v8 = vadd.f32 %v3152_v54, %v8747_v42  ;;  %v3138_v9 = vmul.f32 0.5, %v6285_v2  ;;  %v3082_v13 = vpop.f32.mrb[79].mxu0 }
 0xc51   :  { %v8868_v36 = vadd.f32 %v3151_v63, %v8749_v52  ;;  %v3137_v58 = vmul.f32 0.5, %v3082_v13  ;;  %7049 = vmatprep.subr.bf16.mxu1 %v7048_v7 }
 0xc52   :  { %v3154_v26 = vmax.f32 %v3138_v9, %v6285_v2  ;;  %7051 = vmatpush3.bf16.msra.mxu1 %v7048_v7 }
 0xc53   :  { %v3153_v20 = vmax.f32 %v3137_v58, %v3082_v13  ;;  %v6288_v50 = vpop.f32.mrb[80].mxu0  ;;  %v7052_v11 = vpack.c.bf16 %v8863_v8, %v8868_v36 }
 0xc54   :  { %v8873_v60 = vadd.f32 %v3154_v26, %v8753_v5  ;;  %v3140_v42 = vmul.f32 0.5, %v6288_v50  ;;  %v3092_v0 = vpop.f32.mrb[81].mxu0 }
 0xc55   :  { %v8876_v62 = vadd.f32 %v3153_v20, %v8755_v6  ;;  %v3139_v53 = vmul.f32 0.5, %v3092_v0  ;;  %7053 = vmatprep.subr.bf16.mxu1 %v7052_v11 }
 0xc56   :  { %v3156_v52 = vmax.f32 %v3140_v42, %v6288_v50  ;;  %7055 = vmatpush3.bf16.msra.mxu1 %v7052_v11  ;;  %v3221_v50 = vpop.trf.xlu0 }
 0xc57   :  { %v3155_v32 = vmax.f32 %v3139_v53, %v3092_v0  ;;  %v6291_v51 = vpop.f32.mrb[82].mxu0  ;;  %v7056_v18 = vpack.c.bf16 %v8873_v60, %v8876_v62 }
 0xc58   :  { %v8881_v43 = vadd.f32 %v3156_v52, %v8759_v12  ;;  %v3142_v5 = vmul.f32 0.5, %v6291_v51  ;;  %v3102_v45 = vpop.f32.mrb[83].mxu0 }
 0xc59   :  { %v8884_v39 = vadd.f32 %v3155_v32, %v8761_v21  ;;  %v3141_v6 = vmul.f32 0.5, %v3102_v45  ;;  %7057 = vmatprep.subr.bf16.mxu1 %v7056_v18 }
 0xc5a   :  { %v3158_v56 = vmax.f32 %v3142_v5, %v6291_v51  ;;  %7059 = vmatpush3.bf16.msra.mxu1 %v7056_v18  ;;  %v3222_v53 = vpop.trf.xlu0 }
 0xc5b   :  { %v3157_v59 = vmax.f32 %v3141_v6, %v3102_v45  ;;  %v6294_v16 = vpop.f32.mrb[84].mxu0  ;;  %v7060_v14 = vpack.c.bf16 %v8881_v43, %v8884_v39 }
 0xc5c   :  { %v8889_v46 = vadd.f32 %v3158_v56, %v8765_v17  ;;  %v3144_v55 = vmul.f32 0.5, %v6294_v16  ;;  %v3112_v12 = vpop.f32.mrb[85].mxu0 }
 0xc5d   :  { %v8892_v54 = vadd.f32 %v3157_v59, %v8767_v27  ;;  %v3143_v21 = vmul.f32 0.5, %v3112_v12  ;;  %7061 = vmatprep.subr.bf16.mxu1 %v7060_v14 }
 0xc5e   :  { %v3160_v63 = vmax.f32 %v3144_v55, %v6294_v16  ;;  %7063 = vmatpush3.bf16.msra.mxu1 %v7060_v14  ;;  %v3223_v52 = vpop.trf.xlu0 }
 0xc5f   :  { %v3159_v2 = vmax.f32 %v3143_v21, %v3112_v12  ;;  %v6297_v7 = vpop.f32.mrb[86].mxu0  ;;  %v7064_v9 = vpack.c.bf16 %v8889_v46, %v8892_v54 }
 0xc60   :  { %v8897_v13 = vadd.f32 %v3160_v63, %v8771_v33  ;;  %v3146_v17 = vmul.f32 0.5, %v6297_v7  ;;  %v3122_v58 = vpop.f32.mrb[87].mxu0 }
 0xc61   :  { %v8900_v26 = vadd.f32 %v3159_v2, %v8773_v28  ;;  %v3145_v20 = vmul.f32 0.5, %v3122_v58  ;;  %7065 = vmatprep.subr.bf16.mxu1 %v7064_v9 }
 0xc62   :  { %v3162_v27 = vmax.f32 %v3146_v17, %v6297_v7  ;;  %7067 = vmatpush3.bf16.msra.mxu1 %v7064_v9 }
 0xc63   :  { %v3161_v11 = vmax.f32 %v3145_v20, %v3122_v58  ;;  %v7068_v42 = vpack.c.bf16 %v8897_v13, %v8900_v26 }
 0xc64   :  { %v8905_v0 = vadd.f32 %v3162_v27, %v8777_v15  ;;  %v3224_v15 = vpop.trf.xlu0 }
 0xc65   :  { %v8908_v33 = vadd.f32 %v3161_v11, %v8779_v23  ;;  %7069 = vmatprep.subr.bf16.mxu1 %v7068_v42 }
 0xc66   :  { %7071 = vmatpush3.bf16.msra.mxu1 %v7068_v42 }
 0xc67   :  { %v7072_v28 = vpack.c.bf16 %v8905_v0, %v8908_v33 }
 0xc68   :  { %v3225_v23 = vpop.trf.xlu0 }
 0xc69   :  { %7073 = vmatprep.subr.bf16.mxu1 %v7072_v28 }
 0xc6a   :  { %7075 = vmatpush3.bf16.msra.mxu1 %v7072_v28 }
 0xc6b   :  { %7108 = vmatprep.subr.bf16.mxu1 %v9567_v19 }
 0xc6c   :  { %v3226_v32 = vpop.trf.xlu0 }
 0xc6d   :  { %6331 = vmatmul.mubr.f32.vlgmr.msra.gmra.mrb[104].mxu1 %v8821_v37 }
 0xc6e   :  { %6333 = vmatprep.mubr.f32.mxu1 %v8829_v24  ;;  %v3454_v24 = vpop.trf.xlu1 }
 0xc6f   :  { %6386 = vmatprep.mubr.f32.mxu0 %v3454_v24 }
 0xc70   :  { %v3227_v37 = vpop.trf.xlu0 }
 0xc71   :  { %6334 = vmatmul.mubr.f32.gmra.mrb[106].mxu1 %v8834_v10 }
 0xc72   :  { %6336 = vmatprep.mubr.f32.mxu1 %v8842_v31  ;;  %v8921_v10 = vpop.trf.xlu1 }
 0xc75   :  { %6337 = vmatmul.mubr.f32.gmra.mrb[108].mxu1 %v8850_v57 }
 0xc76   :  { %6339 = vmatprep.mubr.f32.mxu1 %v8865_v35  ;;  %v8923_v31 = vpop.trf.xlu1 }
 0xc79   :  { %6340 = vmatmul.mubr.f32.gmra.mrb[110].mxu1 %v3219_v44 }
 0xc7a   :  { %6342 = vmatprep.mubr.f32.mxu1 %v3220_v47  ;;  %v8925_v57 = vpop.trf.xlu1 }
 0xc7d   :  { %6343 = vmatmul.mubr.f32.gmra.mrb[112].mxu1 %v3221_v50 }
 0xc7e   :  { %6345 = vmatprep.mubr.f32.mxu1 %v3222_v53  ;;  %v8927_v18 = vpop.trf.xlu1 }
 0xc81   :  { %6346 = vmatmul.mubr.f32.gmra.mrb[114].mxu1 %v3223_v52 }
 0xc82   :  { %6348 = vmatprep.mubr.f32.mxu1 %v3224_v15  ;;  %v8935_v21 = vpop.trf.xlu1 }
 0xc85   :  { %6349 = vmatmul.mubr.f32.gmra.mrb[116].mxu1 %v3225_v23 }
 0xc86   :  { %6351 = vmatprep.mubr.f32.mxu1 %v3226_v32  ;;  %v8950_v53 = vpop.trf.xlu1 }
 0xc89   :  { %6352 = vmatmul.mubr.f32.gmra.mrb[118].mxu1 %v3227_v37 }
 0xc8a   :  { %6442 = vmatprep.mubr.msk.f32.mxu1 %vm7291_vm0, %v9568_v25 }
 0xd40   :  { %v6332_v35 = vpop.f32.mrb[104].mxu1 }
 0xd41   :  { %v3374_v44 = vmul.f32 0.5, %v6332_v35  ;;  %v3294_v51 = vpop.f32.mrb[105].mxu1 }
 0xd42   :  { %v3373_v5 = vmul.f32 0.5, %v3294_v51 }
 0xd43   :  { %v3390_v45 = vmax.f32 %v3374_v44, %v6332_v35 }
 0xd44   :  { %v3389_v6 = vmax.f32 %v3373_v5, %v3294_v51  ;;  %v6335_v56 = vpop.f32.mrb[106].mxu1  ;;  %v3461_v5 = vpop.trf.xlu1 }
 0xd45   :  { %v8930_v59 = vadd.f32 %v3390_v45, %v8845_v41  ;;  %v3376_v16 = vmul.f32 0.5, %v6335_v56  ;;  %v3304_v14 = vpop.f32.mrb[107].mxu1 }
 0xd46   :  { %v8933_v55 = vadd.f32 %v3389_v6, %v8848_v34  ;;  %v3375_v12 = vmul.f32 0.5, %v3304_v14 }
 0xd47   :  { %v3392_v47 = vmax.f32 %v3376_v16, %v6335_v56 }
 0xd48   :  { %v3391_v63 = vmax.f32 %v3375_v12, %v3304_v14  ;;  %v6338_v2 = vpop.f32.mrb[108].mxu1  ;;  %v7076_v7 = vpack.c.bf16 %v8930_v59, %v8933_v55 }
 0xd49   :  { %v8940_v9 = vadd.f32 %v3392_v47, %v8855_v29  ;;  %v3378_v17 = vmul.f32 0.5, %v6338_v2  ;;  %v3314_v41 = vpop.f32.mrb[109].mxu1 }
 0xd4a   :  { %v8943_v58 = vadd.f32 %v3391_v63, %v8858_v49  ;;  %v3377_v20 = vmul.f32 0.5, %v3314_v41  ;;  %7077 = vmatprep.subr.bf16.mxu0 %v7076_v7 }
 0xd4b   :  { %v3394_v34 = vmax.f32 %v3378_v17, %v6338_v2  ;;  %7079 = vmatpush3.bf16.msra.mxu0 %v7076_v7 }
 0xd4c   :  { %v3393_v27 = vmax.f32 %v3377_v20, %v3314_v41  ;;  %v6341_v50 = vpop.f32.mrb[110].mxu1  ;;  %v7080_v11 = vpack.c.bf16 %v8940_v9, %v8943_v58  ;;  %v3462_v20 = vpop.trf.xlu1 }
 0xd4d   :  { %v8948_v42 = vadd.f32 %v3394_v34, %v8863_v8  ;;  %v3380_v28 = vmul.f32 0.5, %v6341_v50  ;;  %v3324_v29 = vpop.f32.mrb[111].mxu1 }
 0xd4e   :  { %v8953_v52 = vadd.f32 %v3393_v27, %v8868_v36  ;;  %v3379_v49 = vmul.f32 0.5, %v3324_v29  ;;  %7081 = vmatprep.subr.bf16.mxu0 %v7080_v11 }
 0xd4f   :  { %v3396_v15 = vmax.f32 %v3380_v28, %v6341_v50  ;;  %7083 = vmatpush3.bf16.msra.mxu0 %v7080_v11 }
 0xd50   :  { %v3395_v23 = vmax.f32 %v3379_v49, %v3324_v29  ;;  %v6344_v32 = vpop.f32.mrb[112].mxu1  ;;  %v7084_v37 = vpack.c.bf16 %v8948_v42, %v8953_v52 }
 0xd51   :  { %v8958_v24 = vadd.f32 %v3396_v15, %v8873_v60  ;;  %v3382_v8 = vmul.f32 0.5, %v6344_v32  ;;  %v3334_v35 = vpop.f32.mrb[113].mxu1 }
 0xd52   :  { %v8961_v44 = vadd.f32 %v3395_v23, %v8876_v62  ;;  %v3381_v51 = vmul.f32 0.5, %v3334_v35  ;;  %7085 = vmatprep.subr.bf16.mxu0 %v7084_v37 }
 0xd53   :  { %v3398_v36 = vmax.f32 %v3382_v8, %v6344_v32  ;;  %7087 = vmatpush3.bf16.msra.mxu0 %v7084_v37  ;;  %v3463_v32 = vpop.trf.xlu1 }
 0xd54   :  { %v3397_v45 = vmax.f32 %v3381_v51, %v3334_v35  ;;  %v6347_v6 = vpop.f32.mrb[114].mxu1  ;;  %v7088_v56 = vpack.c.bf16 %v8958_v24, %v8961_v44 }
 0xd55   :  { %v8966_v16 = vadd.f32 %v3398_v36, %v8881_v43  ;;  %v3384_v60 = vmul.f32 0.5, %v6347_v6  ;;  %v3344_v14 = vpop.f32.mrb[115].mxu1 }
 0xd56   :  { %v8969_v12 = vadd.f32 %v3397_v45, %v8884_v39  ;;  %v3383_v62 = vmul.f32 0.5, %v3344_v14  ;;  %7089 = vmatprep.subr.bf16.mxu0 %v7088_v56 }
 0xd57   :  { %v3400_v47 = vmax.f32 %v3384_v60, %v6347_v6  ;;  %7091 = vmatpush3.bf16.msra.mxu0 %v7088_v56  ;;  %v3464_v51 = vpop.trf.xlu1  ;;  %v4981_v6 = vld [vmem:[%s9534_s6 + $0x1b0] sm:$0xff]  ;;  %v4982_v56 = vld [vmem:[%s9534_s6 + $0x1b8] sm:$0xff]  ;;  %v4983_v60 = vld [vmem:[%s9534_s6 + $0x1c0] sm:$0xff] }
 0xd58   :  { %v3399_v63 = vmax.f32 %v3383_v62, %v3344_v14  ;;  %v6350_v2 = vpop.f32.mrb[116].mxu1  ;;  %v7092_v7 = vpack.c.bf16 %v8966_v16, %v8969_v12  ;;  %v4984_v14 = vld [vmem:[%s9534_s6 + $0x1c8] sm:$0xff]  ;;  %v4985_v62 = vld [vmem:[%s9534_s6 + $0x1d0] sm:$0xff] }
 0xd59   :  { %v8974_v17 = vadd.f32 %v3400_v47, %v8889_v46  ;;  %v3386_v41 = vmul.f32 0.5, %v6350_v2  ;;  %v3354_v43 = vpop.f32.mrb[117].mxu1  ;;  %v4986_v47 = vld [vmem:[%s9534_s6 + $0x1d8] sm:$0xff] }
 0xd5a   :  { %v8977_v34 = vadd.f32 %v3399_v63, %v8892_v54  ;;  %v3385_v39 = vmul.f32 0.5, %v3354_v43  ;;  %7093 = vmatprep.subr.bf16.mxu0 %v7092_v7  ;;  %v4987_v63 = vld [vmem:[%s9534_s6 + $0x1e0] sm:$0xff] }
 0xd5b   :  { %v3402_v27 = vmax.f32 %v3386_v41, %v6350_v2  ;;  %7095 = vmatpush3.bf16.msra.mxu0 %v7092_v7  ;;  %v3465_v36 = vpop.trf.xlu1 }
 0xd5c   :  { %v3401_v50 = vmax.f32 %v3385_v39, %v3354_v43  ;;  %v6353_v11 = vpop.f32.mrb[118].mxu1  ;;  %v7096_v28 = vpack.c.bf16 %v8974_v17, %v8977_v34  ;;  %v4988_v39 = vld [vmem:[%s9534_s6 + $0x1e8] sm:$0xff] }
 0xd5d   :  { %v8982_v29 = vadd.f32 %v3402_v27, %v8897_v13  ;;  %v3388_v46 = vmul.f32 0.5, %v6353_v11  ;;  %v3364_v49 = vpop.f32.mrb[119].mxu1 }
 0xd5e   :  { %v8985_v15 = vadd.f32 %v3401_v50, %v8900_v26  ;;  %v3387_v23 = vmul.f32 0.5, %v3364_v49  ;;  %7097 = vmatprep.subr.bf16.mxu0 %v7096_v28 }
 0xd5f   :  { %v3404_v54 = vmax.f32 %v3388_v46, %v6353_v11  ;;  %7099 = vmatpush3.bf16.msra.mxu0 %v7096_v28 }
 0xd60   :  { %v3403_v37 = vmax.f32 %v3387_v23, %v3364_v49  ;;  %v7100_v8 = vpack.c.bf16 %v8982_v29, %v8985_v15 }
 0xd61   :  { %v8990_v35 = vadd.f32 %v3404_v54, %v8905_v0  ;;  %v3466_v0 = vpop.trf.xlu1 }
 0xd62   :  { %v8993_v13 = vadd.f32 %v3403_v37, %v8908_v33  ;;  %7101 = vmatprep.subr.bf16.mxu0 %v7100_v8 }
 0xd63   :  { %7103 = vmatpush3.bf16.msra.mxu0 %v7100_v8 }
 0xd64   :  { %v7104_v26 = vpack.c.bf16 %v8990_v35, %v8993_v13 }
 0xd65   :  { %v3467_v33 = vpop.trf.xlu1 }
 0xd66   :  { %7105 = vmatprep.subr.bf16.mxu0 %v7104_v26 }
 0xd67   :  { %7107 = vmatpush3.bf16.msra.mxu0 %v7104_v26 }
 0xd69   :  { %v3468_v45 = vpop.trf.xlu1 }
 0xd6a   :  { %6387 = vmatmul.mubr.f32.vlgmr.msra.gmra.mrb[88].mxu0 %v8921_v10 }
 0xd6b   :  { %6389 = vmatprep.mubr.f32.mxu0 %v8923_v31  ;;  %v4975_v31 = vld [vmem:[%s9534_s6 + $0x180] sm:$0xff] }
 0xd6c   :  { %3943 = vxpose.xlu0.b32.start [1/16] %v4975_v31, 128 }
 0xd6d   :  { %v3469_v10 = vpop.trf.xlu1 }
 0xd6e   :  { %6390 = vmatmul.mubr.f32.gmra.mrb[90].mxu0 %v8925_v57  ;;  %v4976_v57 = vld [vmem:[%s9534_s6 + $0x188] sm:$0xff] }
 0xd6f   :  { %6392 = vmatprep.mubr.f32.mxu0 %v8927_v18  ;;  %v4977_v18 = vld [vmem:[%s9534_s6 + $0x190] sm:$0xff] }
 0xd70   :  { %3944 = vxpose.xlu0.b32.cont [2/16] %v4976_v57, 128 }
 0xd72   :  { %6393 = vmatmul.mubr.f32.gmra.mrb[92].mxu0 %v8935_v21  ;;  %v4978_v21 = vld [vmem:[%s9534_s6 + $0x198] sm:$0xff] }
 0xd73   :  { %6395 = vmatprep.mubr.f32.mxu0 %v8950_v53  ;;  %v4979_v53 = vld [vmem:[%s9534_s6 + $0x1a0] sm:$0xff] }
 0xd74   :  { %3945 = vxpose.xlu0.b32.cont [3/16] %v4977_v18, 128 }
 0xd76   :  { %6396 = vmatmul.mubr.f32.gmra.mrb[94].mxu0 %v3461_v5  ;;  %v4980_v5 = vld [vmem:[%s9534_s6 + $0x1a8] sm:$0xff] }
 0xd77   :  { %6398 = vmatprep.mubr.f32.mxu0 %v3462_v20 }
 0xd78   :  { %3946 = vxpose.xlu0.b32.cont [4/16] %v4978_v21, 128 }
 0xd7a   :  { %6399 = vmatmul.mubr.f32.gmra.mrb[96].mxu0 %v3463_v32  ;;  %v4989_v32 = vld [vmem:[%s9534_s6 + $0x1f0] sm:$0xff] }
 0xd7b   :  { %6401 = vmatprep.mubr.f32.mxu0 %v3464_v51 }
 0xd7c   :  { %3947 = vxpose.xlu0.b32.cont [5/16] %v4979_v53, 128 }
 0xd7e   :  { %6402 = vmatmul.mubr.f32.gmra.mrb[98].mxu0 %v3465_v36 }
 0xd7f   :  { %6404 = vmatprep.mubr.f32.mxu0 %v3466_v0 }
 0xd80   :  { %3948 = vxpose.xlu0.b32.cont [6/16] %v4980_v5, 128 }
 0xd82   :  { %6405 = vmatmul.mubr.f32.gmra.mrb[100].mxu0 %v3467_v33 }
 0xd83   :  { %6407 = vmatprep.mubr.f32.mxu0 %v3468_v45  ;;  %v4990_v45 = vld [vmem:[%s9534_s6 + $0x1f8] sm:$0xff] }
 0xd84   :  { %3949 = vxpose.xlu0.b32.cont [7/16] %v4981_v6, 128 }
 0xd86   :  { %6408 = vmatmul.mubr.f32.gmra.mrb[102].mxu0 %v3469_v10 }
 0xd88   :  { %3950 = vxpose.xlu0.b32.cont [8/16] %v4982_v56, 128 }
 0xd8c   :  { %3951 = vxpose.xlu0.b32.cont [9/16] %v4983_v60, 128 }
 0xd90   :  { %3952 = vxpose.xlu0.b32.cont [10/16] %v4984_v14, 128 }
 0xd94   :  { %3953 = vxpose.xlu0.b32.cont [11/16] %v4985_v62, 128 }
 0xd98   :  { %3954 = vxpose.xlu0.b32.cont [12/16] %v4986_v47, 128 }
 0xd9c   :  { %3955 = vxpose.xlu0.b32.cont [13/16] %v4987_v63, 128 }
 0xda0   :  { %3956 = vxpose.xlu0.b32.cont [14/16] %v4988_v39, 128 }
 0xda4   :  { %3957 = vxpose.xlu0.b32.cont [15/16] %v4989_v32, 128 }
 0xda8   :  { %3958 = vxpose.xlu0.b32.end [16/16] %v4990_v45, 128 }
 0xe3d   :  { %v6388_v2 = vpop.f32.mrb[88].mxu0 }
 0xe3e   :  { %v3616_v7 = vmul.f32 0.5, %v6388_v2  ;;  %v3536_v41 = vpop.f32.mrb[89].mxu0 }
 0xe3f   :  { %v3615_v43 = vmul.f32 0.5, %v3536_v41 }
 0xe40   :  { %v3632_v20 = vmax.f32 %v3616_v7, %v6388_v2 }
 0xe41   :  { %v3631_v27 = vmax.f32 %v3615_v43, %v3536_v41  ;;  %v6391_v50 = vpop.f32.mrb[90].mxu0 }
 0xe42   :  { %v3648_v11 = vadd.f32 %v3632_v20, %v8930_v59  ;;  %v3618_v28 = vmul.f32 0.5, %v6391_v50  ;;  %v3546_v46 = vpop.f32.mrb[91].mxu0 }
 0xe43   :  { %v3647_v49 = vadd.f32 %v3631_v27, %v8933_v55  ;;  %v3617_v23 = vmul.f32 0.5, %v3546_v46 }
 0xe44   :  { %v3634_v54 = vmax.f32 %v3618_v28, %v6391_v50 }
 0xe45   :  { %v7109_v37 = vpack.c.bf16 %v3648_v11, %v3647_v49  ;;  %v3633_v8 = vmax.f32 %v3617_v23, %v3546_v46  ;;  %v6394_v26 = vpop.f32.mrb[92].mxu0 }
 0xe46   :  { %v3650_v51 = vadd.f32 %v3634_v54, %v8940_v9  ;;  %v3620_v36 = vmul.f32 0.5, %v6394_v26  ;;  %v3556_v0 = vpop.f32.mrb[93].mxu0 }
 0xe47   :  { %v3649_v59 = vadd.f32 %v3633_v8, %v8943_v58  ;;  %v3619_v33 = vmul.f32 0.5, %v3556_v0  ;;  %7110 = vmatpush3.bf16.msra.mxu1 %v7109_v37 }
 0xe48   :  { %v3636_v55 = vmax.f32 %v3620_v36, %v6394_v26  ;;  %7111 = vmatprep.subr.bf16.mxu1 %v9567_v19 }
 0xe49   :  { %v7112_v10 = vpack.c.bf16 %v3650_v51, %v3649_v59  ;;  %v3635_v31 = vmax.f32 %v3619_v33, %v3556_v0  ;;  %v6397_v57 = vpop.f32.mrb[94].mxu0 }
 0xe4a   :  { %v3652_v18 = vadd.f32 %v3636_v55, %v8948_v42  ;;  %v3622_v9 = vmul.f32 0.5, %v6397_v57  ;;  %v3566_v21 = vpop.f32.mrb[95].mxu0 }
 0xe4b   :  { %v3651_v53 = vadd.f32 %v3635_v31, %v8953_v52  ;;  %v3621_v58 = vmul.f32 0.5, %v3566_v21  ;;  %7113 = vmatpush3.bf16.msra.mxu1 %v7112_v10  ;;  %v9594_v31 = vld [vmem:[#allocation11_spill] sm:$0xff] }
 0xe4c   :  { %v3638_v5 = vmax.f32 %v3622_v9, %v6397_v57  ;;  %7114 = vmatprep.subr.bf16.mxu1 %v9567_v19  ;;  %v9596_v57 = vld [vmem:[#allocation13_spill] sm:$0xff]  ;;  %v9598_v9 = vld [vmem:[#allocation15_spill] sm:$0xff] }
 0xe4d   :  { %v7115_v6 = vpack.c.bf16 %v3652_v18, %v3651_v53  ;;  %v3637_v56 = vmax.f32 %v3621_v58, %v3566_v21  ;;  %v6400_v60 = vpop.f32.mrb[96].mxu0  ;;  %v9597_v18 = vld [vmem:[#allocation14_spill] sm:$0xff]  ;;  %v9599_v21 = vld [vmem:[#allocation16_spill] sm:$0xff]  ;;  %v9600_v53 = vld [vmem:[#allocation17_spill] sm:$0xff] }
 0xe4e   :  { %v3654_v14 = vadd.f32 %v3638_v5, %v8958_v24  ;;  %v3624_v62 = vmul.f32 0.5, %v6400_v60  ;;  %v3576_v47 = vpop.f32.mrb[97].mxu0  ;;  %v9601_v58 = vld [vmem:[#allocation18_spill] sm:$0xff]  ;;  %v9602_v5 = vld [vmem:[#allocation19_spill] sm:$0xff] }
 0xe4f   :  { %v3653_v63 = vadd.f32 %v3637_v56, %v8961_v44  ;;  %v3623_v42 = vmul.f32 0.5, %v3576_v47  ;;  %7116 = vmatpush3.bf16.msra.mxu1 %v7115_v6  ;;  %v9603_v6 = vld [vmem:[#allocation20_spill] sm:$0xff]  ;;  %v9604_v56 = vld [vmem:[#allocation21_spill] sm:$0xff] }
 0xe50   :  { %v3640_v2 = vmax.f32 %v3624_v62, %v6400_v60  ;;  %7117 = vmatprep.subr.bf16.mxu1 %v9567_v19  ;;  %v3959_v60 = vpop.trf.xlu0  ;;  %v4992_v62 = vld [vmem:[%s9534_s6 + $0x208] sm:$0xff] }
 0xe51   :  { %v7118_v52 = vpack.c.bf16 %v3654_v14, %v3653_v63  ;;  %v3639_v7 = vmax.f32 %v3623_v42, %v3576_v47  ;;  %v6403_v41 = vpop.f32.mrb[98].mxu0  ;;  %6511 = vmatprep.mubr.f32.mxu0 %v3959_v60  ;;  %v4991_v14 = vld [vmem:[%s9534_s6 + $0x200] sm:$0xff]  ;;  %v4993_v47 = vld [vmem:[%s9534_s6 + $0x210] sm:$0xff]  ;;  %v4994_v63 = vld [vmem:[%s9534_s6 + $0x218] sm:$0xff] }
 0xe52   :  { %v3656_v43 = vadd.f32 %v3640_v2, %v8966_v16  ;;  %v3626_v20 = vmul.f32 0.5, %v6403_v41  ;;  %v3586_v39 = vpop.f32.mrb[99].mxu0  ;;  %4185 = vxpose.xlu1.b32.start [1/16] %v4991_v14, 128  ;;  %v4995_v42 = vld [vmem:[%s9534_s6 + $0x220] sm:$0xff]  ;;  %v4996_v2 = vld [vmem:[%s9534_s6 + $0x228] sm:$0xff] }
 0xe53   :  { %v3655_v27 = vadd.f32 %v3639_v7, %v8969_v12  ;;  %v3625_v50 = vmul.f32 0.5, %v3586_v39  ;;  %7119 = vmatpush3.bf16.msra.mxu1 %v7118_v52  ;;  %v4997_v52 = vld [vmem:[%s9534_s6 + $0x230] sm:$0xff]  ;;  %v4998_v7 = vld [vmem:[%s9534_s6 + $0x238] sm:$0xff] }
 0xe54   :  { %v3642_v24 = vmax.f32 %v3626_v20, %v6403_v41  ;;  %7120 = vmatprep.subr.bf16.mxu1 %v9567_v19  ;;  %v4999_v41 = vld [vmem:[%s9534_s6 + $0x240] sm:$0xff]  ;;  %v5001_v20 = vld [vmem:[%s9534_s6 + $0x250] sm:$0xff] }
 0xe55   :  { %v7121_v44 = vpack.c.bf16 %v3656_v43, %v3655_v27  ;;  %v3641_v11 = vmax.f32 %v3625_v50, %v3586_v39  ;;  %v6406_v28 = vpop.f32.mrb[100].mxu0  ;;  %v5000_v43 = vld [vmem:[%s9534_s6 + $0x248] sm:$0xff]  ;;  %v9148_v39 = vpop.trf.xlu0  ;;  %v5002_v27 = vld [vmem:[%s9534_s6 + $0x258] sm:$0xff]  ;;  %v5003_v50 = vld [vmem:[%s9534_s6 + $0x260] sm:$0xff] }
 0xe56   :  { %v3658_v46 = vadd.f32 %v3642_v24, %v8974_v17  ;;  %v3628_v49 = vmul.f32 0.5, %v6406_v28  ;;  %v3596_v23 = vpop.f32.mrb[101].mxu0  ;;  %4186 = vxpose.xlu1.b32.cont [2/16] %v4992_v62, 128 }
 0xe57   :  { %v3657_v54 = vadd.f32 %v3641_v11, %v8977_v34  ;;  %v3627_v32 = vmul.f32 0.5, %v3596_v23  ;;  %7122 = vmatpush3.bf16.msra.mxu1 %v7121_v44 }
 0xe58   :  { %v3644_v16 = vmax.f32 %v3628_v49, %v6406_v28  ;;  %7123 = vmatprep.subr.bf16.mxu1 %v9567_v19 }
 0xe59   :  { %v7124_v12 = vpack.c.bf16 %v3658_v46, %v3657_v54  ;;  %v3643_v37 = vmax.f32 %v3627_v32, %v3596_v23  ;;  %v6409_v8 = vpop.f32.mrb[102].mxu0  ;;  %v9156_v24 = vpop.trf.xlu0  ;;  %v5004_v46 = vld [vmem:[%s9534_s6 + $0x268] sm:$0xff]  ;;  %v7280_v54 = vld [vmem:[%s9532_s9 + $0x18] sm:$0xff] }
 0xe5a   :  { %v3660_v26 = vadd.f32 %v3644_v16, %v8982_v29  ;;  %v3630_v51 = vmul.f32 0.5, %v6409_v8  ;;  %v3606_v36 = vpop.f32.mrb[103].mxu0  ;;  %v9587_v29 = vld [vmem:[#allocation2_spill] sm:$0xff]  ;;  %4187 = vxpose.xlu1.b32.cont [3/16] %v4993_v47, 128 }
 0xe5b   :  { %v3659_v0 = vadd.f32 %v3643_v37, %v8985_v15  ;;  %v3629_v59 = vmul.f32 0.5, %v3606_v36  ;;  %7125 = vmatpush3.bf16.msra.mxu1 %v7124_v12  ;;  %v9588_v15 = vld [vmem:[#allocation3_spill] sm:$0xff] }
 0xe5c   :  { %v3646_v17 = vmax.f32 %v3630_v51, %v6409_v8  ;;  %7126 = vmatprep.subr.bf16.mxu1 %v9567_v19  ;;  %v5005_v8 = vld [vmem:[%s9534_s6 + $0x270] sm:$0xff] }
 0xe5d   :  { %v7127_v34 = vpack.c.bf16 %v3660_v26, %v3659_v0  ;;  %v3645_v33 = vmax.f32 %v3629_v59, %v3606_v36  ;;  %v9167_v37 = vpop.trf.xlu0  ;;  %v7281_v26 = vld [vmem:[%s9528_s1] sm:$0xff] }
 0xe5e   :  { %v3662_v55 = vadd.f32 %v3646_v17, %v8990_v35  ;;  %v9589_v35 = vld [vmem:[#allocation6_spill] sm:$0xff]  ;;  %4188 = vxpose.xlu1.b32.cont [4/16] %v4994_v63, 128  ;;  %v2590_v51 = vadd.f32 %v7281_v26, %v8483_v30 }
 0xe5f   :  { %v3661_v45 = vadd.f32 %v3645_v33, %v8993_v13  ;;  %7128 = vmatpush3.bf16.msra.mxu1 %v7127_v34  ;;  %v9591_v13 = vld [vmem:[#allocation8_spill] sm:$0xff]  ;;  %v7282_v34 = vld [vmem:[%s9532_s9 + $0x20] sm:$0xff] }
 0xe60   :  { %7129 = vmatprep.subr.bf16.mxu1 %v9567_v19  ;;  %v9590_v19 = vld [vmem:[#allocation7_spill] sm:$0xff] }
 0xe61   :  { %v7130_v10 = vpack.c.bf16 %v3662_v55, %v3661_v45 }
 0xe62   :  { %4189 = vxpose.xlu1.b32.cont [5/16] %v4995_v42, 128 }
 0xe63   :  { %7131 = vmatpush3.bf16.msra.mxu1 %v7130_v10  ;;  %v5006_v10 = vld [vmem:[%s9534_s6 + $0x278] sm:$0xff] }
 0xe64   :  { %7133 = vmatprep.subr.bf16.mxu1 %v8613_v4 }
 0xe66   :  { %6443 = vmatmul.mubr.f32.vlgmr.msra.gmra.mrb[120].mxu1 %v7522_v61  ;;  %v9592_v61 = vld [vmem:[#allocation9_spill] sm:$0xff]  ;;  %4190 = vxpose.xlu1.b32.cont [6/16] %v4996_v2, 128 }
 0xe67   :  { %7135 = vmatpush3.bf16.msra.mxu1 %v8613_v4  ;;  %6445 = vmatprep.mubr.msk.f32.mxu1 %vm7291_vm0, %v9568_v25  ;;  %v9593_v4 = vld [vmem:[#allocation10_spill] sm:$0xff] }
 0xe6a   :  { %6446 = vmatmul.mubr.f32.gmra.mrb[122].mxu1 %v9587_v29  ;;  %4191 = vxpose.xlu1.b32.cont [7/16] %v4997_v52, 128 }
 0xe6b   :  { %6448 = vmatprep.mubr.msk.f32.mxu1 %vm7291_vm0, %v9568_v25  ;;  %v9595_v25 = vld [vmem:[#allocation12_spill] sm:$0xff] }
 0xe6e   :  { %6449 = vmatmul.mubr.f32.gmra.mrb[124].mxu1 %v9588_v15  ;;  %4192 = vxpose.xlu1.b32.cont [8/16] %v4998_v7, 128 }
 0xe6f   :  { %6455 = vmatprep.mubr.msk.f32.mxu1 %vm227_vm1, %v9589_v35 }
 0xe72   :  { %6456 = vmatmul.mubr.msk.f32.vlgmr.msra.gmra.mrb[126].mxu1 %vm227_vm1, %v9590_v19  ;;  %4193 = vxpose.xlu1.b32.cont [9/16] %v4999_v41, 128  ;;  %v9194_v19 = vpop.trf.xlu0 }
 0xe73   :  { %6458 = vmatprep.mubr.msk.f32.mxu1 %vm227_vm1, %v9591_v13 }
 0xe76   :  { %6459 = vmatmul.mubr.msk.f32.gmra.mrb[128].mxu1 %vm227_vm1, %v9592_v61  ;;  %4194 = vxpose.xlu1.b32.cont [10/16] %v5000_v43, 128  ;;  %v9214_v14 = vpop.trf.xlu0 }
 0xe77   :  { %6461 = vmatprep.mubr.msk.f32.mxu1 %vm227_vm1, %v9593_v4  ;;  %v7284_v4 = vld [vmem:[%s9532_s9 + $0x28] sm:$0xff] }
 0xe7a   :  { %6462 = vmatmul.mubr.msk.f32.gmra.mrb[130].mxu1 %vm227_vm1, %v9594_v31  ;;  %4195 = vxpose.xlu1.b32.cont [11/16] %v5001_v20, 128  ;;  %v3965_v20 = vpop.trf.xlu0 }
 0xe7b   :  { %6464 = vmatprep.mubr.msk.f32.mxu1 %vm227_vm1, %v9595_v25 }
 0xe7e   :  { %6465 = vmatmul.mubr.msk.f32.gmra.mrb[132].mxu1 %vm227_vm1, %v9596_v57  ;;  %4196 = vxpose.xlu1.b32.cont [12/16] %v5002_v27, 128 }
 0xe7f   :  { %6467 = vmatprep.mubr.msk.f32.mxu1 %vm227_vm1, %v9597_v18 }
 0xe82   :  { %6468 = vmatmul.mubr.msk.f32.gmra.mrb[134].mxu1 %vm227_vm1, %v9598_v9  ;;  %4197 = vxpose.xlu1.b32.cont [13/16] %v5003_v50, 128 }
 0xe83   :  { %6470 = vmatprep.mubr.msk.f32.mxu1 %vm227_vm1, %v9599_v21 }
 0xe86   :  { %6471 = vmatmul.mubr.msk.f32.gmra.mrb[136].mxu1 %vm227_vm1, %v9600_v53  ;;  %4198 = vxpose.xlu1.b32.cont [14/16] %v5004_v46, 128 }
 0xe87   :  { %6473 = vmatprep.mubr.msk.f32.mxu1 %vm227_vm1, %v9601_v58 }
 0xe8a   :  { %6474 = vmatmul.mubr.msk.f32.gmra.mrb[138].mxu1 %vm227_vm1, %v9602_v5  ;;  %4199 = vxpose.xlu1.b32.cont [15/16] %v5005_v8, 128 }
 0xe8b   :  { %6476 = vmatprep.mubr.msk.f32.mxu1 %vm227_vm1, %v9603_v6 }
 0xe8e   :  { %6477 = vmatmul.mubr.msk.f32.gmra.mrb[140].mxu1 %vm227_vm1, %v9604_v56  ;;  %4200 = vxpose.xlu1.b32.end [16/16] %v5006_v10, 128 }
 0xf39   :  { %v3729_v44 = vpop.f32.mrb[120].mxu1 }
 0xf3a   :  { %v3743_v11 = vmul.f32 0.5, %v3729_v44  ;;  %v6444_v28 = vpop.f32.mrb[121].mxu1 }
 0xf3c   :  { %v3746_v49 = vmax.f32 %v3743_v11, %v3729_v44 }
 0xf3d   :  { %v3734_v23 = vpop.f32.mrb[122].mxu1 }
 0xf3e   :  { %5028 = vst [vmem:[%s9535_s11 + $0x18] sm:$0xff] %v3746_v49  ;;  %v4745_v32 = vadd.f32 %v7280_v54, %v3746_v49  ;;  %v3744_v16 = vmul.f32 0.5, %v3734_v23  ;;  %v6447_v12 = vpop.f32.mrb[123].mxu1 }
 0xf3f   :  { %v3966_v12 = vpop.trf.xlu0 }
 0xf40   :  { %v4748_v36 = vadd.f32 %v4745_v32, %v8483_v30  ;;  %v3747_v0 = vmax.f32 %v3744_v16, %v3734_v23  ;;  %v7283_v30 = vld [vmem:[%s9528_s1 + $0x8] sm:$0xff] }
 0xf41   :  { %v3739_v59 = vpop.f32.mrb[124].mxu1  ;;  %v2591_v29 = vadd.f32 %v7283_v30, %v8475_v48 }
 0xf42   :  { %v4755_v17 = vadd.f32 %v4748_v36, %v2590_v51  ;;  %5029 = vst [vmem:[%s9535_s11 + $0x20] sm:$0xff] %v3747_v0  ;;  %v4746_v33 = vadd.f32 %v7282_v34, %v3747_v0  ;;  %v3745_v55 = vmul.f32 0.5, %v3739_v59  ;;  %v6450_v45 = vpop.f32.mrb[125].mxu1 }
 0xf43   :  { %v3967_v45 = vpop.trf.xlu0 }
 0xf44   :  { %4760 = vst [vmem:[%s9537_s7] sm:$0xff] %v4755_v17  ;;  %v4749_v15 = vadd.f32 %v4746_v33, %v8475_v48  ;;  %v3748_v35 = vmax.f32 %v3745_v55, %v3739_v59  ;;  %v7285_v48 = vld [vmem:[%s9528_s1 + $0x10] sm:$0xff] }
 0xf45   :  { %v6457_v13 = vpop.f32.mrb[126].mxu1  ;;  %v2592_v9 = vadd.f32 %v7285_v48, %v8499_v3 }
 0xf46   :  { %v4756_v61 = vadd.f32 %v4749_v15, %v2591_v29  ;;  %5030 = vst [vmem:[%s9535_s11 + $0x28] sm:$0xff] %v3748_v35  ;;  %v4747_v31 = vadd.f32 %v7284_v4, %v3748_v35  ;;  %v3895_v25 = vmul.f32 0.5, %v6457_v13  ;;  %v3815_v57 = vpop.f32.mrb[127].mxu1 }
 0xf47   :  { %v3894_v18 = vmul.f32 0.5, %v3815_v57 }
 0xf48   :  { %4761 = vst [vmem:[%s9537_s7 + $0x8] sm:$0xff] %v4756_v61  ;;  %v4750_v21 = vadd.f32 %v4747_v31, %v8499_v3  ;;  %v9210_v53 = vmax.f32 %v3895_v25, %v6457_v13 }
 0xf49   :  { %v9212_v58 = vmax.f32 %v3894_v18, %v3815_v57  ;;  %v6460_v5 = vpop.f32.mrb[128].mxu1  ;;  %v3968_v18 = vpop.trf.xlu0 }
 0xf4a   :  { %v4757_v6 = vadd.f32 %v4750_v21, %v2592_v9  ;;  %v3897_v56 = vmul.f32 0.5, %v6460_v5  ;;  %v3825_v60 = vpop.f32.mrb[129].mxu1 }
 0xf4b   :  { %v7136_v62 = vpack.c.bf16 %v9210_v53, %v9212_v58  ;;  %v3896_v47 = vmul.f32 0.5, %v3825_v60 }
 0xf4c   :  { %4762 = vst [vmem:[%s9537_s7 + $0x10] sm:$0xff] %v4757_v6  ;;  %v9221_v63 = vmax.f32 %v3897_v56, %v6460_v5 }
 0xf4d   :  { %v9223_v3 = vmax.f32 %v3896_v47, %v3825_v60  ;;  %v6463_v42 = vpop.f32.mrb[130].mxu1  ;;  %7137 = vmatprep.subr.bf16.mxu0 %v7136_v62  ;;  %v3969_v56 = vpop.trf.xlu0 }
 0xf4e   :  { %v3899_v2 = vmul.f32 0.5, %v6463_v42  ;;  %v3835_v52 = vpop.f32.mrb[131].mxu1  ;;  %7139 = vmatpush3.bf16.msra.mxu0 %v7136_v62 }
 0xf4f   :  { %v7140_v7 = vpack.c.bf16 %v9221_v63, %v9223_v3  ;;  %v3898_v41 = vmul.f32 0.5, %v3835_v52 }
 0xf50   :  { %v9227_v43 = vmax.f32 %v3899_v2, %v6463_v42  ;;  %v5010_v2 = vld [vmem:[%s9534_s6 + $0x298] sm:$0xff] }
 0xf51   :  { %v9229_v27 = vmax.f32 %v3898_v41, %v3835_v52  ;;  %v6466_v50 = vpop.f32.mrb[132].mxu1  ;;  %7141 = vmatprep.subr.bf16.mxu0 %v7140_v7  ;;  %v3970_v60 = vpop.trf.xlu0  ;;  %v5011_v52 = vld [vmem:[%s9534_s6 + $0x2a0] sm:$0xff]  ;;  %v5013_v41 = vld [vmem:[%s9534_s6 + $0x2b0] sm:$0xff] }
 0xf52   :  { %v3901_v44 = vmul.f32 0.5, %v6466_v50  ;;  %v3845_v11 = vpop.f32.mrb[133].mxu1  ;;  %7143 = vmatpush3.bf16.msra.mxu0 %v7140_v7  ;;  %v5012_v7 = vld [vmem:[%s9534_s6 + $0x2a8] sm:$0xff] }
 0xf53   :  { %v7144_v28 = vpack.c.bf16 %v9227_v43, %v9229_v27  ;;  %v3900_v46 = vmul.f32 0.5, %v3845_v11 }
 0xf54   :  { %v9233_v49 = vmax.f32 %v3901_v44, %v6466_v50  ;;  %v5015_v50 = vld [vmem:[%s9534_s6 + $0x2c0] sm:$0xff]  ;;  %v5016_v44 = vld [vmem:[%s9534_s6 + $0x2c8] sm:$0xff] }
 0xf55   :  { %v9235_v23 = vmax.f32 %v3900_v46, %v3845_v11  ;;  %v6469_v54 = vpop.f32.mrb[134].mxu1  ;;  %7145 = vmatprep.subr.bf16.mxu0 %v7144_v28  ;;  %v3971_v62 = vpop.trf.xlu0  ;;  %v5017_v11 = vld [vmem:[%s9534_s6 + $0x2d0] sm:$0xff]  ;;  %v5018_v46 = vld [vmem:[%s9534_s6 + $0x2d8] sm:$0xff] }
 0xf56   :  { %v3903_v32 = vmul.f32 0.5, %v6469_v54  ;;  %v3855_v16 = vpop.f32.mrb[135].mxu1  ;;  %7147 = vmatpush3.bf16.msra.mxu0 %v7144_v28 }
 0xf57   :  { %v7148_v8 = vpack.c.bf16 %v9233_v49, %v9235_v23  ;;  %v3902_v26 = vmul.f32 0.5, %v3855_v16 }
 0xf58   :  { %v9239_v51 = vmax.f32 %v3903_v32, %v6469_v54  ;;  %v5019_v32 = vld [vmem:[%s9534_s6 + $0x2e0] sm:$0xff] }
 0xf59   :  { %v9241_v36 = vmax.f32 %v3902_v26, %v3855_v16  ;;  %v6472_v0 = vpop.f32.mrb[136].mxu1  ;;  %7149 = vmatprep.subr.bf16.mxu0 %v7148_v8  ;;  %v3972_v47 = vpop.trf.xlu0  ;;  %v5020_v16 = vld [vmem:[%s9534_s6 + $0x2e8] sm:$0xff] }
 0xf5a   :  { %v3905_v59 = vmul.f32 0.5, %v6472_v0  ;;  %v3865_v17 = vpop.f32.mrb[137].mxu1  ;;  %7151 = vmatpush3.bf16.msra.mxu0 %v7148_v8  ;;  %v5021_v8 = vld [vmem:[%s9534_s6 + $0x2f0] sm:$0xff] }
 0xf5b   :  { %v7152_v34 = vpack.c.bf16 %v9239_v51, %v9241_v36  ;;  %v3904_v33 = vmul.f32 0.5, %v3865_v17 }
 0xf5c   :  { %v9245_v55 = vmax.f32 %v3905_v59, %v6472_v0 }
 0xf5d   :  { %v9247_v10 = vmax.f32 %v3904_v33, %v3865_v17  ;;  %v6475_v30 = vpop.f32.mrb[138].mxu1  ;;  %7153 = vmatprep.subr.bf16.mxu0 %v7152_v34  ;;  %v3973_v42 = vpop.trf.xlu0 }
 0xf5e   :  { %v3907_v29 = vmul.f32 0.5, %v6475_v30  ;;  %v3875_v15 = vpop.f32.mrb[139].mxu1  ;;  %7155 = vmatpush3.bf16.msra.mxu0 %v7152_v34  ;;  %v5022_v34 = vld [vmem:[%s9534_s6 + $0x2f8] sm:$0xff] }
 0xf5f   :  { %v7156_v35 = vpack.c.bf16 %v9245_v55, %v9247_v10  ;;  %v3906_v13 = vmul.f32 0.5, %v3875_v15 }
 0xf60   :  { %v9251_v61 = vmax.f32 %v3907_v29, %v6475_v30 }
 0xf61   :  { %v9253_v4 = vmax.f32 %v3906_v13, %v3875_v15  ;;  %v6478_v31 = vpop.f32.mrb[140].mxu1  ;;  %7157 = vmatprep.subr.bf16.mxu0 %v7156_v35 }
 0xf62   :  { %v3909_v25 = vmul.f32 0.5, %v6478_v31  ;;  %v3885_v57 = vpop.f32.mrb[141].mxu1  ;;  %7159 = vmatpush3.bf16.msra.mxu0 %v7156_v35 }
 0xf63   :  { %v7160_v48 = vpack.c.bf16 %v9251_v61, %v9253_v4  ;;  %v3908_v9 = vmul.f32 0.5, %v3885_v57 }
 0xf64   :  { %v9257_v21 = vmax.f32 %v3909_v25, %v6478_v31 }
 0xf65   :  { %v9259_v5 = vmax.f32 %v3908_v9, %v3885_v57  ;;  %7161 = vmatprep.subr.bf16.mxu0 %v7160_v48 }
 0xf66   :  { %7163 = vmatpush3.bf16.msra.mxu0 %v7160_v48 }
 0xf67   :  { %v7164_v6 = vpack.c.bf16 %v9257_v21, %v9259_v5 }
 0xf69   :  { %7165 = vmatprep.subr.bf16.mxu0 %v7164_v6 }
 0xf6a   :  { %7167 = vmatpush3.bf16.msra.mxu0 %v7164_v6 }
 0xf6d   :  { %6512 = vmatmul.mubr.f32.vlgmr.msra.gmra.mrb[104].mxu0 %v9148_v39  ;;  %v3974_v39 = vpop.trf.xlu0 }
 0xf6e   :  { %6514 = vmatprep.mubr.f32.mxu0 %v9156_v24  ;;  %v4201_v24 = vpop.trf.xlu1 }
 0xf6f   :  { %6567 = vmatprep.mubr.f32.mxu1 %v4201_v24 }
 0xf71   :  { %6515 = vmatmul.mubr.f32.gmra.mrb[106].mxu0 %v9167_v37  ;;  %v5007_v37 = vld [vmem:[%s9534_s6 + $0x280] sm:$0xff] }
 0xf72   :  { %6517 = vmatprep.mubr.f32.mxu0 %v9194_v19  ;;  %4427 = vxpose.xlu0.b32.start [1/16] %v5007_v37, 128  ;;  %v5008_v19 = vld [vmem:[%s9534_s6 + $0x288] sm:$0xff]  ;;  %v9301_v28 = vpop.trf.xlu1 }
 0xf75   :  { %6518 = vmatmul.mubr.f32.gmra.mrb[108].mxu0 %v9214_v14  ;;  %v5009_v14 = vld [vmem:[%s9534_s6 + $0x290] sm:$0xff] }
 0xf76   :  { %6520 = vmatprep.mubr.f32.mxu0 %v3965_v20  ;;  %4428 = vxpose.xlu0.b32.cont [2/16] %v5008_v19, 128  ;;  %v5014_v20 = vld [vmem:[%s9534_s6 + $0x2b8] sm:$0xff]  ;;  %v9306_v54 = vpop.trf.xlu1 }
 0xf79   :  { %6521 = vmatmul.mubr.f32.gmra.mrb[110].mxu0 %v3966_v12 }
 0xf7a   :  { %6523 = vmatprep.mubr.f32.mxu0 %v3967_v45  ;;  %4429 = vxpose.xlu0.b32.cont [3/16] %v5009_v14, 128  ;;  %v9314_v12 = vpop.trf.xlu1 }
 0xf7d   :  { %6524 = vmatmul.mubr.f32.gmra.mrb[112].mxu0 %v3968_v18 }
 0xf7e   :  { %6526 = vmatprep.mubr.f32.mxu0 %v3969_v56  ;;  %4430 = vxpose.xlu0.b32.cont [4/16] %v5010_v2, 128  ;;  %v9319_v17 = vpop.trf.xlu1 }
 0xf81   :  { %6527 = vmatmul.mubr.f32.gmra.mrb[114].mxu0 %v3970_v60 }
 0xf82   :  { %6529 = vmatprep.mubr.f32.mxu0 %v3971_v62  ;;  %4431 = vxpose.xlu0.b32.cont [5/16] %v5011_v52, 128  ;;  %v9330_v18 = vpop.trf.xlu1 }
 0xf85   :  { %6530 = vmatmul.mubr.f32.gmra.mrb[116].mxu0 %v3972_v47 }
 0xf86   :  { %6532 = vmatprep.mubr.f32.mxu0 %v3973_v42  ;;  %4432 = vxpose.xlu0.b32.cont [6/16] %v5012_v7, 128  ;;  %v9345_v14 = vpop.trf.xlu1 }
 0xf89   :  { %6533 = vmatmul.mubr.f32.gmra.mrb[118].mxu0 %v3974_v39 }
 0xf8a   :  { %4433 = vxpose.xlu0.b32.cont [7/16] %v5013_v41, 128 }
 0xf8e   :  { %4434 = vxpose.xlu0.b32.cont [8/16] %v5014_v20, 128 }
 0xf92   :  { %4435 = vxpose.xlu0.b32.cont [9/16] %v5015_v50, 128 }
 0xf96   :  { %4436 = vxpose.xlu0.b32.cont [10/16] %v5016_v44, 128 }
 0xf9a   :  { %4437 = vxpose.xlu0.b32.cont [11/16] %v5017_v11, 128 }
 0xf9e   :  { %4438 = vxpose.xlu0.b32.cont [12/16] %v5018_v46, 128 }
 0xfa2   :  { %4439 = vxpose.xlu0.b32.cont [13/16] %v5019_v32, 128  ;;  %v4208_v32 = vpop.trf.xlu1 }
 0xfa6   :  { %4440 = vxpose.xlu0.b32.cont [14/16] %v5020_v16, 128 }
 0xfaa   :  { %4441 = vxpose.xlu0.b32.cont [15/16] %v5021_v8, 128 }
 0xfae   :  { %4442 = vxpose.xlu0.b32.end [16/16] %v5022_v34, 128 }
0x1040   :  { %v6513_v26 = vpop.f32.mrb[104].mxu0 }
0x1041   :  { %v4121_v0 = vmul.f32 0.5, %v6513_v26  ;;  %v4041_v59 = vpop.f32.mrb[105].mxu0 }
0x1042   :  { %v4120_v33 = vmul.f32 0.5, %v4041_v59 }
0x1043   :  { %v4137_v45 = vmax.f32 %v4121_v0, %v6513_v26 }
0x1044   :  { %v4136_v30 = vmax.f32 %v4120_v33, %v4041_v59  ;;  %v6516_v29 = vpop.f32.mrb[106].mxu0 }
0x1045   :  { %v9325_v15 = vadd.f32 %v4137_v45, %v9210_v53  ;;  %v4123_v35 = vmul.f32 0.5, %v6516_v29  ;;  %v4051_v13 = vpop.f32.mrb[107].mxu0 }
0x1046   :  { %v9328_v31 = vadd.f32 %v4136_v30, %v9212_v58  ;;  %v4122_v25 = vmul.f32 0.5, %v4051_v13 }
0x1047   :  { %v4139_v57 = vmax.f32 %v4123_v35, %v6516_v29 }
0x1048   :  { %v4138_v48 = vmax.f32 %v4122_v25, %v4051_v13  ;;  %v6519_v9 = vpop.f32.mrb[108].mxu0  ;;  %v7168_v6 = vpack.c.bf16 %v9325_v15, %v9328_v31  ;;  %v4209_v25 = vpop.trf.xlu1 }
0x1049   :  { %v9335_v56 = vadd.f32 %v4139_v57, %v9221_v63  ;;  %v4125_v60 = vmul.f32 0.5, %v6519_v9  ;;  %v4061_v53 = vpop.f32.mrb[109].mxu0 }
0x104a   :  { %v9338_v62 = vadd.f32 %v4138_v48, %v9223_v3  ;;  %v4124_v47 = vmul.f32 0.5, %v4061_v53  ;;  %7169 = vmatprep.subr.bf16.mxu1 %v7168_v6 }
0x104b   :  { %v4141_v58 = vmax.f32 %v4125_v60, %v6519_v9  ;;  %7171 = vmatpush3.bf16.msra.mxu1 %v7168_v6 }
0x104c   :  { %v4140_v42 = vmax.f32 %v4124_v47, %v4061_v53  ;;  %v6522_v39 = vpop.f32.mrb[110].mxu0  ;;  %v7172_v24 = vpack.c.bf16 %v9335_v56, %v9338_v62 }
0x104d   :  { %v9343_v37 = vadd.f32 %v4141_v58, %v9227_v43  ;;  %v4127_v19 = vmul.f32 0.5, %v6522_v39  ;;  %v4071_v63 = vpop.f32.mrb[111].mxu0 }
0x104e   :  { %v9348_v2 = vadd.f32 %v4140_v42, %v9229_v27  ;;  %v4126_v3 = vmul.f32 0.5, %v4071_v63  ;;  %7173 = vmatprep.subr.bf16.mxu1 %v7172_v24 }
0x104f   :  { %v4143_v52 = vmax.f32 %v4127_v19, %v6522_v39  ;;  %7175 = vmatpush3.bf16.msra.mxu1 %v7172_v24  ;;  %v4210_v39 = vpop.trf.xlu1 }
0x1050   :  { %v4142_v7 = vmax.f32 %v4126_v3, %v4071_v63  ;;  %v6525_v41 = vpop.f32.mrb[112].mxu0  ;;  %v7176_v20 = vpack.c.bf16 %v9343_v37, %v9348_v2 }
0x1051   :  { %v9353_v50 = vadd.f32 %v4143_v52, %v9233_v49  ;;  %v4129_v43 = vmul.f32 0.5, %v6525_v41  ;;  %v4081_v44 = vpop.f32.mrb[113].mxu0 }
0x1052   :  { %v9356_v11 = vadd.f32 %v4142_v7, %v9235_v23  ;;  %v4128_v46 = vmul.f32 0.5, %v4081_v44  ;;  %7177 = vmatprep.subr.bf16.mxu1 %v7176_v20 }
0x1053   :  { %v4145_v27 = vmax.f32 %v4129_v43, %v6525_v41  ;;  %7179 = vmatpush3.bf16.msra.mxu1 %v7176_v20  ;;  %v4211_v3 = vpop.trf.xlu1 }
0x1054   :  { %v4144_v16 = vmax.f32 %v4128_v46, %v4081_v44  ;;  %v6528_v8 = vpop.f32.mrb[114].mxu0  ;;  %v7180_v26 = vpack.c.bf16 %v9353_v50, %v9356_v11 }
0x1055   :  { %v9361_v0 = vadd.f32 %v4145_v27, %v9239_v51  ;;  %v4131_v49 = vmul.f32 0.5, %v6528_v8  ;;  %v4091_v59 = vpop.f32.mrb[115].mxu0 }
0x1056   :  { %v9364_v34 = vadd.f32 %v4144_v16, %v9241_v36  ;;  %v4130_v23 = vmul.f32 0.5, %v4091_v59  ;;  %7181 = vmatprep.subr.bf16.mxu1 %v7180_v26 }
0x1057   :  { %v4147_v33 = vmax.f32 %v4131_v49, %v6528_v8  ;;  %7183 = vmatpush3.bf16.msra.mxu1 %v7180_v26  ;;  %v4212_v52 = vpop.trf.xlu1 }
0x1058   :  { %v4146_v45 = vmax.f32 %v4130_v23, %v4091_v59  ;;  %v6531_v30 = vpop.f32.mrb[116].mxu0  ;;  %v7184_v29 = vpack.c.bf16 %v9361_v0, %v9364_v34 }
0x1059   :  { %v9369_v35 = vadd.f32 %v4147_v33, %v9245_v55  ;;  %v4133_v13 = vmul.f32 0.5, %v6531_v30  ;;  %v4101_v51 = vpop.f32.mrb[117].mxu0 }
0x105a   :  { %v9372_v57 = vadd.f32 %v4146_v45, %v9247_v10  ;;  %v4132_v36 = vmul.f32 0.5, %v4101_v51  ;;  %7185 = vmatprep.subr.bf16.mxu1 %v7184_v29 }
0x105b   :  { %v4149_v48 = vmax.f32 %v4133_v13, %v6531_v30  ;;  %7187 = vmatpush3.bf16.msra.mxu1 %v7184_v29 }
0x105c   :  { %v4148_v9 = vmax.f32 %v4132_v36, %v4101_v51  ;;  %v6534_v6 = vpop.f32.mrb[118].mxu0  ;;  %v7188_v60 = vpack.c.bf16 %v9369_v35, %v9372_v57 }
0x105d   :  { %v9377_v53 = vadd.f32 %v4149_v48, %v9251_v61  ;;  %v4135_v55 = vmul.f32 0.5, %v6534_v6  ;;  %v4111_v47 = vpop.f32.mrb[119].mxu0 }
0x105e   :  { %v9380_v58 = vadd.f32 %v4148_v9, %v9253_v4  ;;  %v4134_v42 = vmul.f32 0.5, %v4111_v47  ;;  %7189 = vmatprep.subr.bf16.mxu1 %v7188_v60 }
0x105f   :  { %v4151_v10 = vmax.f32 %v4135_v55, %v6534_v6  ;;  %7191 = vmatpush3.bf16.msra.mxu1 %v7188_v60 }
0x1060   :  { %v4150_v24 = vmax.f32 %v4134_v42, %v4111_v47  ;;  %v7192_v19 = vpack.c.bf16 %v9377_v53, %v9380_v58 }
0x1061   :  { %v9385_v63 = vadd.f32 %v4151_v10, %v9257_v21  ;;  %v4213_v21 = vpop.trf.xlu1 }
0x1062   :  { %v9388_v61 = vadd.f32 %v4150_v24, %v9259_v5  ;;  %7193 = vmatprep.subr.bf16.mxu1 %v7192_v19 }
0x1063   :  { %7195 = vmatpush3.bf16.msra.mxu1 %v7192_v19 }
0x1064   :  { %v7196_v4 = vpack.c.bf16 %v9385_v63, %v9388_v61 }
0x1065   :  { %v4214_v5 = vpop.trf.xlu1 }
0x1066   :  { %7197 = vmatprep.subr.bf16.mxu1 %v7196_v4 }
0x1067   :  { %7199 = vmatpush3.bf16.msra.mxu1 %v7196_v4 }
0x1069   :  { %v4215_v7 = vpop.trf.xlu1 }
0x106a   :  { %6568 = vmatmul.mubr.f32.vlgmr.msra.gmra.mrb[142].mxu1 %v9301_v28 }
0x106b   :  { %6570 = vmatprep.mubr.f32.mxu1 %v9306_v54  ;;  %v4443_v54 = vpop.trf.xlu0 }
0x106c   :  { %6623 = vmatprep.mubr.f32.mxu0 %v4443_v54 }
0x106d   :  { %v4216_v28 = vpop.trf.xlu1 }
0x106e   :  { %6571 = vmatmul.mubr.f32.gmra.mrb[144].mxu1 %v9314_v12 }
0x106f   :  { %6573 = vmatprep.mubr.f32.mxu1 %v9319_v17  ;;  %v9399_v12 = vpop.trf.xlu0 }
0x1072   :  { %6574 = vmatmul.mubr.f32.gmra.mrb[146].mxu1 %v9330_v18 }
0x1073   :  { %6576 = vmatprep.mubr.f32.mxu1 %v9345_v14  ;;  %v9401_v17 = vpop.trf.xlu0 }
0x1076   :  { %6577 = vmatmul.mubr.f32.gmra.mrb[148].mxu1 %v4208_v32 }
0x1077   :  { %6579 = vmatprep.mubr.f32.mxu1 %v4209_v25  ;;  %v9403_v18 = vpop.trf.xlu0 }
0x107a   :  { %6580 = vmatmul.mubr.f32.gmra.mrb[150].mxu1 %v4210_v39 }
0x107b   :  { %6582 = vmatprep.mubr.f32.mxu1 %v4211_v3  ;;  %v9405_v43 = vpop.trf.xlu0 }
0x107e   :  { %6583 = vmatmul.mubr.f32.gmra.mrb[152].mxu1 %v4212_v52 }
0x107f   :  { %6585 = vmatprep.mubr.f32.mxu1 %v4213_v21  ;;  %v9413_v23 = vpop.trf.xlu0 }
0x1082   :  { %6586 = vmatmul.mubr.f32.gmra.mrb[154].mxu1 %v4214_v5 }
0x1083   :  { %6588 = vmatprep.mubr.f32.mxu1 %v4215_v7  ;;  %v9428_v55 = vpop.trf.xlu0 }
0x1086   :  { %6589 = vmatmul.mubr.f32.gmra.mrb[156].mxu1 %v4216_v28 }
0x1087   :  { %6679 = vmatprep.mubr.f32.mxu1 %v7637_v40  ;;  %v4450_v21 = vpop.trf.xlu0 }
0x113d   :  { %v6569_v14 = vpop.f32.mrb[142].mxu1 }
0x113e   :  { %v4363_v41 = vmul.f32 0.5, %v6569_v14  ;;  %v4283_v20 = vpop.f32.mrb[143].mxu1 }
0x113f   :  { %v4362_v44 = vmul.f32 0.5, %v4283_v20 }
0x1140   :  { %v4379_v46 = vmax.f32 %v4363_v41, %v6569_v14 }
0x1141   :  { %v4378_v27 = vmax.f32 %v4362_v44, %v4283_v20  ;;  %v6572_v32 = vpop.f32.mrb[144].mxu1 }
0x1142   :  { %v9408_v16 = vadd.f32 %v4379_v46, %v9325_v15  ;;  %v4365_v40 = vmul.f32 0.5, %v6572_v32  ;;  %v4293_v8 = vpop.f32.mrb[145].mxu1 }
0x1143   :  { %v9411_v26 = vadd.f32 %v4378_v27, %v9328_v31  ;;  %v4364_v49 = vmul.f32 0.5, %v4293_v8 }
0x1144   :  { %v4381_v59 = vmax.f32 %v4365_v40, %v6572_v32 }
0x1145   :  { %v4380_v33 = vmax.f32 %v4364_v49, %v4293_v8  ;;  %v6575_v45 = vpop.f32.mrb[146].mxu1  ;;  %v7200_v30 = vpack.c.bf16 %v9408_v16, %v9411_v26  ;;  %v4451_v8 = vpop.trf.xlu0 }
0x1146   :  { %v9418_v29 = vadd.f32 %v4381_v59, %v9335_v56  ;;  %v4367_v13 = vmul.f32 0.5, %v6575_v45  ;;  %v4303_v15 = vpop.f32.mrb[147].mxu1 }
0x1147   :  { %v9421_v51 = vadd.f32 %v4380_v33, %v9338_v62  ;;  %v4366_v25 = vmul.f32 0.5, %v4303_v15  ;;  %7201 = vmatprep.subr.bf16.mxu0 %v7200_v30 }
0x1148   :  { %v4383_v31 = vmax.f32 %v4367_v13, %v6575_v45  ;;  %7203 = vmatpush3.bf16.msra.mxu0 %v7200_v30 }
0x1149   :  { %v4382_v36 = vmax.f32 %v4366_v25, %v4303_v15  ;;  %v6578_v48 = vpop.f32.mrb[148].mxu1  ;;  %v7204_v9 = vpack.c.bf16 %v9418_v29, %v9421_v51 }
0x114a   :  { %v9426_v6 = vadd.f32 %v4383_v31, %v9343_v37  ;;  %v4369_v60 = vmul.f32 0.5, %v6578_v48  ;;  %v4313_v56 = vpop.f32.mrb[149].mxu1 }
0x114b   :  { %v9431_v47 = vadd.f32 %v4382_v36, %v9348_v2  ;;  %v4368_v62 = vmul.f32 0.5, %v4313_v56  ;;  %7205 = vmatprep.subr.bf16.mxu0 %v7204_v9  ;;  %v4452_v36 = vpop.trf.xlu0 }
0x114c   :  { %v4385_v42 = vmax.f32 %v4369_v60, %v6578_v48  ;;  %7207 = vmatpush3.bf16.msra.mxu0 %v7204_v9 }
0x114d   :  { %v4384_v10 = vmax.f32 %v4368_v62, %v4313_v56  ;;  %v6581_v39 = vpop.f32.mrb[150].mxu1  ;;  %v7208_v24 = vpack.c.bf16 %v9426_v6, %v9431_v47 }
0x114e   :  { %v9436_v19 = vadd.f32 %v4385_v42, %v9353_v50  ;;  %v4371_v37 = vmul.f32 0.5, %v6581_v39  ;;  %v4323_v4 = vpop.f32.mrb[151].mxu1 }
0x114f   :  { %v9439_v3 = vadd.f32 %v4384_v10, %v9356_v11  ;;  %v4370_v52 = vmul.f32 0.5, %v4323_v4  ;;  %7209 = vmatprep.subr.bf16.mxu0 %v7208_v24  ;;  %v4453_v56 = vpop.trf.xlu0 }
0x1150   :  { %v4387_v2 = vmax.f32 %v4371_v37, %v6581_v39  ;;  %7211 = vmatpush3.bf16.msra.mxu0 %v7208_v24 }
0x1151   :  { %v4386_v5 = vmax.f32 %v4370_v52, %v4323_v4  ;;  %v6584_v7 = vpop.f32.mrb[152].mxu1  ;;  %v7212_v28 = vpack.c.bf16 %v9436_v19, %v9439_v3 }
0x1152   :  { %v9444_v54 = vadd.f32 %v4387_v2, %v9361_v0  ;;  %v4373_v50 = vmul.f32 0.5, %v6584_v7  ;;  %v4333_v14 = vpop.f32.mrb[153].mxu1 }
0x1153   :  { %v9447_v41 = vadd.f32 %v4386_v5, %v9364_v34  ;;  %v4372_v11 = vmul.f32 0.5, %v4333_v14  ;;  %7213 = vmatprep.subr.bf16.mxu0 %v7212_v28  ;;  %v4454_v62 = vpop.trf.xlu0 }
0x1154   :  { %v4389_v20 = vmax.f32 %v4373_v50, %v6584_v7  ;;  %7215 = vmatpush3.bf16.msra.mxu0 %v7212_v28 }
0x1155   :  { %v4388_v44 = vmax.f32 %v4372_v11, %v4333_v14  ;;  %v6587_v46 = vpop.f32.mrb[154].mxu1  ;;  %v7216_v27 = vpack.c.bf16 %v9444_v54, %v9447_v41 }
0x1156   :  { %v9452_v32 = vadd.f32 %v4389_v20, %v9369_v35  ;;  %v4375_v40 = vmul.f32 0.5, %v6587_v46  ;;  %v4343_v0 = vpop.f32.mrb[155].mxu1 }
0x1157   :  { %v9455_v49 = vadd.f32 %v4388_v44, %v9372_v57  ;;  %v4374_v34 = vmul.f32 0.5, %v4343_v0  ;;  %7217 = vmatprep.subr.bf16.mxu0 %v7216_v27 }
0x1158   :  { %v4391_v59 = vmax.f32 %v4375_v40, %v6587_v46  ;;  %7219 = vmatpush3.bf16.msra.mxu0 %v7216_v27 }
0x1159   :  { %v4390_v33 = vmax.f32 %v4374_v34, %v4343_v0  ;;  %v6590_v45 = vpop.f32.mrb[156].mxu1  ;;  %v7220_v30 = vpack.c.bf16 %v9452_v32, %v9455_v49 }
0x115a   :  { %v9460_v13 = vadd.f32 %v4391_v59, %v9377_v53  ;;  %v4377_v35 = vmul.f32 0.5, %v6590_v45  ;;  %v4353_v15 = vpop.f32.mrb[157].mxu1 }
0x115b   :  { %v9463_v25 = vadd.f32 %v4390_v33, %v9380_v58  ;;  %v4376_v31 = vmul.f32 0.5, %v4353_v15  ;;  %7221 = vmatprep.subr.bf16.mxu0 %v7220_v30 }
0x115c   :  { %v4393_v57 = vmax.f32 %v4377_v35, %v6590_v45  ;;  %7223 = vmatpush3.bf16.msra.mxu0 %v7220_v30 }
0x115d   :  { %v4392_v48 = vmax.f32 %v4376_v31, %v4353_v15  ;;  %v7224_v9 = vpack.c.bf16 %v9460_v13, %v9463_v25 }
0x115e   :  { %v9468_v60 = vadd.f32 %v4393_v57, %v9385_v63  ;;  %v4455_v63 = vpop.trf.xlu0 }
0x115f   :  { %v9471_v53 = vadd.f32 %v4392_v48, %v9388_v61  ;;  %7225 = vmatprep.subr.bf16.mxu0 %v7224_v9 }
0x1160   :  { %7227 = vmatpush3.bf16.msra.mxu0 %v7224_v9 }
0x1161   :  { %v7228_v58 = vpack.c.bf16 %v9468_v60, %v9471_v53 }
0x1162   :  { %v4456_v61 = vpop.trf.xlu0 }
0x1163   :  { %7229 = vmatprep.subr.bf16.mxu0 %v7228_v58 }
0x1164   :  { %7231 = vmatpush3.bf16.msra.mxu0 %v7228_v58 }
0x1166   :  { %v4457_v42 = vpop.trf.xlu0 }
0x1167   :  { %6624 = vmatmul.mubr.f32.vlgmr.msra.gmra.mrb[120].mxu0 %v9399_v12 }
0x1168   :  { %6626 = vmatprep.mubr.f32.mxu0 %v9401_v17 }
0x116a   :  { %v4458_v12 = vpop.trf.xlu0 }
0x116b   :  { %6627 = vmatmul.mubr.f32.gmra.mrb[122].mxu0 %v9403_v18 }
0x116c   :  { %6629 = vmatprep.mubr.f32.mxu0 %v9405_v43 }
0x116f   :  { %6630 = vmatmul.mubr.f32.gmra.mrb[124].mxu0 %v9413_v23 }
0x1170   :  { %6632 = vmatprep.mubr.f32.mxu0 %v9428_v55 }
0x1173   :  { %6633 = vmatmul.mubr.f32.gmra.mrb[126].mxu0 %v4450_v21 }
0x1174   :  { %6635 = vmatprep.mubr.f32.mxu0 %v4451_v8 }
0x1177   :  { %6636 = vmatmul.mubr.f32.gmra.mrb[128].mxu0 %v4452_v36 }
0x1178   :  { %6638 = vmatprep.mubr.f32.mxu0 %v4453_v56 }
0x117b   :  { %6639 = vmatmul.mubr.f32.gmra.mrb[130].mxu0 %v4454_v62 }
0x117c   :  { %6641 = vmatprep.mubr.f32.mxu0 %v4455_v63 }
0x117f   :  { %6642 = vmatmul.mubr.f32.gmra.mrb[132].mxu0 %v4456_v61 }
0x1180   :  { %6644 = vmatprep.mubr.f32.mxu0 %v4457_v42 }
0x1183   :  { %6645 = vmatmul.mubr.f32.gmra.mrb[134].mxu0 %v4458_v12 }
0x123a   :  { %v6625_v17 = vpop.f32.mrb[120].mxu0 }
0x123b   :  { %v4605_v18 = vmul.f32 0.5, %v6625_v17  ;;  %v4525_v43 = vpop.f32.mrb[121].mxu0 }
0x123c   :  { %v4604_v10 = vmul.f32 0.5, %v4525_v43 }
0x123d   :  { %v4621_v39 = vmax.f32 %v4605_v18, %v6625_v17 }
0x123e   :  { %v4620_v23 = vmax.f32 %v4604_v10, %v4525_v43  ;;  %v6628_v24 = vpop.f32.mrb[122].mxu0 }
0x123f   :  { %v4637_v55 = vadd.f32 %v4621_v39, %v9408_v16  ;;  %v4607_v37 = vmul.f32 0.5, %v6628_v24  ;;  %v4535_v4 = vpop.f32.mrb[123].mxu0 }
0x1240   :  { %v4636_v52 = vadd.f32 %v4620_v23, %v9411_v26  ;;  %v4606_v2 = vmul.f32 0.5, %v4535_v4 }
0x1241   :  { %v4623_v21 = vmax.f32 %v4607_v37, %v6628_v24 }
0x1242   :  { %v4622_v5 = vmax.f32 %v4606_v2, %v4535_v4  ;;  %v6631_v7 = vpop.f32.mrb[124].mxu0  ;;  %v7232_v28 = vpack.c.bf16 %v4637_v55, %v4636_v52 }
0x1243   :  { %v4639_v50 = vadd.f32 %v4623_v21, %v9418_v29  ;;  %v4609_v14 = vmul.f32 0.5, %v6631_v7  ;;  %v4545_v11 = vpop.f32.mrb[125].mxu0 }
0x1244   :  { %v4638_v20 = vadd.f32 %v4622_v5, %v9421_v51  ;;  %v4608_v44 = vmul.f32 0.5, %v4545_v11  ;;  %7233 = vmatprep.subr.bf16.mxu1 %v7232_v28 }
0x1245   :  { %v4625_v46 = vmax.f32 %v4609_v14, %v6631_v7  ;;  %7235 = vmatpush3.bf16.msra.mxu1 %v7232_v28 }
0x1246   :  { %v4624_v16 = vmax.f32 %v4608_v44, %v4545_v11  ;;  %v6634_v27 = vpop.f32.mrb[126].mxu0  ;;  %v7236_v40 = vpack.c.bf16 %v4639_v50, %v4638_v20  ;;  %v7288_v44 = vld [vmem:[%s9530_s2 + $0x8] sm:$0xff] }
0x1247   :  { %v4641_v26 = vadd.f32 %v4625_v46, %v9426_v6  ;;  %v4611_v0 = vmul.f32 0.5, %v6634_v27  ;;  %v4555_v8 = vpop.f32.mrb[127].mxu0  ;;  %v2594_v46 = vadd.f32 %v7288_v44, %v8604_v22 }
0x1248   :  { %v4640_v34 = vadd.f32 %v4624_v16, %v9431_v47  ;;  %v4610_v59 = vmul.f32 0.5, %v4555_v8  ;;  %7237 = vmatprep.subr.bf16.mxu1 %v7236_v40 }
0x1249   :  { %v4627_v29 = vmax.f32 %v4611_v0, %v6634_v27  ;;  %7239 = vmatpush3.bf16.msra.mxu1 %v7236_v40  ;;  %v7289_v27 = vld [vmem:[%s9530_s2] sm:$0xff] }
0x124a   :  { %v4626_v33 = vmax.f32 %v4610_v59, %v4555_v8  ;;  %v6637_v45 = vpop.f32.mrb[128].mxu0  ;;  %v7240_v51 = vpack.c.bf16 %v4641_v26, %v4640_v34  ;;  %v2593_v40 = vadd.f32 %v7289_v27, %v8609_v1 }
0x124b   :  { %v4643_v30 = vadd.f32 %v4627_v29, %v9436_v19  ;;  %v4613_v35 = vmul.f32 0.5, %v6637_v45  ;;  %v4565_v15 = vpop.f32.mrb[129].mxu0 }
0x124c   :  { %v4642_v31 = vadd.f32 %v4626_v33, %v9439_v3  ;;  %v4612_v57 = vmul.f32 0.5, %v4565_v15  ;;  %7241 = vmatprep.subr.bf16.mxu1 %v7240_v51 }
0x124d   :  { %v4629_v6 = vmax.f32 %v4613_v35, %v6637_v45  ;;  %7243 = vmatpush3.bf16.msra.mxu1 %v7240_v51 }
0x124e   :  { %v4628_v36 = vmax.f32 %v4612_v57, %v4565_v15  ;;  %v6640_v48 = vpop.f32.mrb[130].mxu0  ;;  %v7244_v47 = vpack.c.bf16 %v4643_v30, %v4642_v31 }
0x124f   :  { %v4645_v9 = vadd.f32 %v4629_v6, %v9444_v54  ;;  %v4615_v58 = vmul.f32 0.5, %v6640_v48  ;;  %v4575_v56 = vpop.f32.mrb[131].mxu0 }
0x1250   :  { %v4644_v62 = vadd.f32 %v4628_v36, %v9447_v41  ;;  %v4614_v63 = vmul.f32 0.5, %v4575_v56  ;;  %7245 = vmatprep.subr.bf16.mxu1 %v7244_v47 }
0x1251   :  { %v4631_v19 = vmax.f32 %v4615_v58, %v6640_v48  ;;  %7247 = vmatpush3.bf16.msra.mxu1 %v7244_v47 }
0x1252   :  { %v4630_v61 = vmax.f32 %v4614_v63, %v4575_v56  ;;  %v6643_v42 = vpop.f32.mrb[132].mxu0  ;;  %v7248_v3 = vpack.c.bf16 %v4645_v9, %v4644_v62 }
0x1253   :  { %v4647_v12 = vadd.f32 %v4631_v19, %v9452_v32  ;;  %v4617_v17 = vmul.f32 0.5, %v6643_v42  ;;  %v4585_v18 = vpop.f32.mrb[133].mxu0 }
0x1254   :  { %v4646_v43 = vadd.f32 %v4630_v61, %v9455_v49  ;;  %v4616_v10 = vmul.f32 0.5, %v4585_v18  ;;  %7249 = vmatprep.subr.bf16.mxu1 %v7248_v3 }
0x1255   :  { %v4633_v54 = vmax.f32 %v4617_v17, %v6643_v42  ;;  %7251 = vmatpush3.bf16.msra.mxu1 %v7248_v3 }
0x1256   :  { %v4632_v39 = vmax.f32 %v4616_v10, %v4585_v18  ;;  %v6646_v23 = vpop.f32.mrb[134].mxu0  ;;  %v7252_v41 = vpack.c.bf16 %v4647_v12, %v4646_v43 }
0x1257   :  { %v4649_v24 = vadd.f32 %v4633_v54, %v9460_v13  ;;  %v4619_v55 = vmul.f32 0.5, %v6646_v23  ;;  %v4595_v37 = vpop.f32.mrb[135].mxu0 }
0x1258   :  { %v4648_v4 = vadd.f32 %v4632_v39, %v9463_v25  ;;  %v4618_v52 = vmul.f32 0.5, %v4595_v37  ;;  %7253 = vmatprep.subr.bf16.mxu1 %v7252_v41 }
0x1259   :  { %v4635_v32 = vmax.f32 %v4619_v55, %v6646_v23  ;;  %7255 = vmatpush3.bf16.msra.mxu1 %v7252_v41 }
0x125a   :  { %v4634_v2 = vmax.f32 %v4618_v52, %v4595_v37  ;;  %v7256_v21 = vpack.c.bf16 %v4649_v24, %v4648_v4 }
0x125b   :  { %v4651_v49 = vadd.f32 %v4635_v32, %v9468_v60  ;;  %v7286_v60 = vld [vmem:[%s9533_s10 + $0x18] sm:$0xff] }
0x125c   :  { %v4650_v5 = vadd.f32 %v4634_v2, %v9471_v53  ;;  %7257 = vmatprep.subr.bf16.mxu1 %v7256_v21 }
0x125d   :  { %7259 = vmatpush3.bf16.msra.mxu1 %v7256_v21 }
0x125e   :  { %v7260_v7 = vpack.c.bf16 %v4651_v49, %v4650_v5 }
0x1260   :  { %7261 = vmatprep.subr.bf16.mxu1 %v7260_v7 }
0x1261   :  { %7263 = vmatpush3.bf16.msra.mxu1 %v7260_v7 }
0x1264   :  { %6680 = vmatmul.mubr.f32.vlgmr.msra.gmra.mrb[158].mxu1 %v7633_v38  ;;  %v7287_v38 = vld [vmem:[%s9533_s10 + $0x10] sm:$0xff] }
0x1337   :  { %v6681_v13 = vpop.f32.mrb[158].mxu1 }
0x1338   :  { %v4728_v28 = vmul.f32 0.5, %v6681_v13  ;;  %v4718_v25 = vpop.f32.mrb[159].mxu1 }
0x1339   :  { %v4727_v50 = vmul.f32 0.5, %v4718_v25 }
0x133a   :  { %v4730_v14 = vmax.f32 %v4728_v28, %v6681_v13 }
0x133b   :  { %v4729_v11 = vmax.f32 %v4727_v50, %v4718_v25 }
0x133c   :  { %5032 = vst [vmem:[%s9536_s12 + $0x18] sm:$0xff] %v4730_v14  ;;  %v4752_v53 = vadd.f32 %v7286_v60, %v4730_v14 }
0x133d   :  { %5031 = vst [vmem:[%s9536_s12 + $0x10] sm:$0xff] %v4729_v11  ;;  %v4751_v20 = vadd.f32 %v7287_v38, %v4729_v11 }
0x133e   :  { %v4754_v16 = vadd.f32 %v4752_v53, %v8604_v22 }
0x133f   :  { %v4753_v26 = vadd.f32 %v4751_v20, %v8609_v1 }
0x1340   :  { %v4759_v0 = vadd.f32 %v4754_v16, %v2594_v46 }
0x1341   :  { %v4758_v8 = vadd.f32 %v4753_v26, %v2593_v40 }
0x1342   :  { %4764 = vst [vmem:[%s9538_s8 + $0x8] sm:$0xff] %v4759_v0 }
0x1343   :  { %4763 = vst [vmem:[%s9538_s8] sm:$0xff] %v4758_v8 }

</bundles_post_ra>
